<compile_context>
chip_gen: v6e
topology: v6e:2x2x1
jax: 0.10.0
libtpu: 0.0.40
codegen_flags: <defaults>
</compile_context>

<pallas_src>
import numpy as np

import jax
import jax.numpy as jnp
from jax.experimental import pallas as pl
from jax.experimental.pallas import tpu as pltpu


# ----------------------------- Pallas kernel --------------------------------

def _lenet_fused_kernel(x_ref, c1w_ref, c1b_ref, sel1_ref, c2w_ref, c2b_ref,
                        f1w_ref, f1b_ref, f2w_ref, f2b_ref, f3w_ref, f3b_ref,
                        out_ref):
    """Whole forward pass for one batch tile; all activations stay in VMEM.

    Layouts (channels-last, lane-dense):
      conv1 out: rows=(b,i), cols = w*6  + c   (144 wide)
      conv2 out: rows=(b,i), cols = w*12 + c   ( 96 wide)
    Each 5x5 conv = ONE matmul against a K-stacked banded weight matrix.
    2x2 max-pool: row pairs via reshape+max; column pairs via lane-shifted max,
    then a single 0/1 selection matmul (pool1) / fc1-folded compaction (pool2).
    """
    f32, bf16 = jnp.float32, jnp.bfloat16
    tb = x_ref.shape[0]

    # -------- conv1: 1 -> 6, 5x5 VALID, bias + relu  (one matmul, K=140) --------
    x3 = x_ref[...]                                                   # (tb, 28, 28) f32
    lhs1 = jnp.concatenate([x3[:, di:di + 24, :] for di in range(5)], axis=-1)
    lhs1 = lhs1.reshape(tb * 24, 140).astype(bf16)
    h1 = jnp.dot(lhs1, c1w_ref[...], preferred_element_type=f32)      # (tb*24, 144)
    h1 = jnp.maximum(h1 + c1b_ref[...], 0.0)

    # -------- max-pool 2x2 #1 --------
    h1 = jnp.max(h1.reshape(tb * 12, 2, 144), axis=1)                 # pool H -> (tb*12, 144)
    p1 = jnp.maximum(h1[:, :138], h1[:, 6:])                          # pool W; pooled at cols 12*w+c
    p1 = jnp.dot(p1.astype(bf16), sel1_ref[...],
                 preferred_element_type=f32)                          # compact -> (tb*12, 72)

    # -------- conv2: 6 -> 12, 5x5 VALID, bias + relu  (one matmul, K=360) --------
    p1 = p1.reshape(tb, 12, 72)
    lhs2 = jnp.concatenate([p1[:, di:di + 8, :] for di in range(5)], axis=-1)
    lhs2 = lhs2.reshape(tb * 8, 360).astype(bf16)
    h2 = jnp.dot(lhs2, c2w_ref[...], preferred_element_type=f32)      # (tb*8, 96)
    h2 = jnp.maximum(h2 + c2b_ref[...], 0.0)

    # -------- max-pool 2x2 #2 (column compaction folded into fc1 weights) --------
    h2 = jnp.max(h2.reshape(tb * 4, 2, 96), axis=1)                   # (tb*4, 96)
    p2 = jnp.maximum(h2[:, :84], h2[:, 12:])                          # (tb*4, 84); pooled at 24*w+c

    # -------- fc1 + relu (pool2 compaction + torch feature permutation pre-folded) --------
    p2 = p2.reshape(tb, 4, 84)
    lhs3 = jnp.concatenate([p2[:, h, :] for h in range(4)], axis=-1).astype(bf16)  # (tb, 336)
    t = jnp.maximum(jnp.dot(lhs3, f1w_ref[...], preferred_element_type=f32)
                    + f1b_ref[...], 0.0)                              # (tb, 120)

    # -------- fc2 + relu, fc3 (output padded to 128 lanes) --------
    t = jnp.maximum(jnp.dot(t.astype(bf16), f2w_ref[...], preferred_element_type=f32)
                    + f2b_ref[...], 0.0)                              # (tb, 60)
    t = jnp.dot(t.astype(bf16), f3w_ref[...], preferred_element_type=f32) + f3b_ref[...]
    out_ref[...] = t.astype(out_ref.dtype)                            # (tb, 128)


# --------------------- hoisted weight preprocessing -------------------------

def _build_conv1_stacked(w1):
    """(6,1,5,5) -> (140,144): W[28*di + j + dj, 6*j + o] = w1[o,0,di,dj]."""
    jj, di, dj, oc = np.meshgrid(np.arange(24), np.arange(5), np.arange(5),
                                 np.arange(6), indexing="ij")
    rows = (28 * di + jj + dj).reshape(-1)
    cols = (6 * jj + oc).reshape(-1)
    vals = w1[oc.reshape(-1), 0, di.reshape(-1), dj.reshape(-1)]
    return jnp.zeros((140, 144), jnp.float32).at[rows, cols].set(vals)


def _build_conv2_stacked(w2):
    """(12,6,5,5) -> (360,96): W[72*di + 6*(j+dj) + c, 12*j + o] = w2[o,c,di,dj]."""
    jj, di, dj, ci, oc = np.meshgrid(np.arange(8), np.arange(5), np.arange(5),
                                     np.arange(6), np.arange(12), indexing="ij")
    rows = (72 * di + 6 * (jj + dj) + ci).reshape(-1)
    cols = (12 * jj + oc).reshape(-1)
    vals = w2[oc.reshape(-1), ci.reshape(-1), di.reshape(-1), dj.reshape(-1)]
    return jnp.zeros((360, 96), jnp.float32).at[rows, cols].set(vals)


def _build_pool1_select():
    """(138,72) 0/1 matrix: output col jp*6 + o reads input col 12*jp + o."""
    r = np.arange(138)[:, None]
    c = np.arange(72)[None, :]
    base = 12 * (c // 6) + (c % 6)
    return jnp.asarray((r == base).astype(np.float32))


def _build_fc1_stacked(fc1_w):
    """(120,192) torch fc1 -> (336,120) operating on the post-pool2 (4,84) slab.

    Row h*84 + 24*w + c carries torch input feature c*16 + h*4 + w; other rows 0.
    """
    hh, ww, cc = np.meshgrid(np.arange(4), np.arange(4), np.arange(12), indexing="ij")
    rows = (84 * hh + 24 * ww + cc).reshape(-1)
    src = (16 * cc + 4 * hh + ww).reshape(-1)
    return jnp.zeros((336, 120), jnp.float32).at[rows].set(fc1_w[:, src].T)


def prepare_params(params):
    """One-time weight prep: K-stacked conv mats, fused fc1, bf16 casts, padded fc3."""
    bf16, f32 = jnp.bfloat16, jnp.float32
    f3w = jnp.zeros((60, 128), f32).at[:, :10].set(params["fc3_w"].T)
    f3b = jnp.zeros((1, 128), f32).at[0, :10].set(params["fc3_b"])
    return {
        "c1w": _build_conv1_stacked(params["conv1_w"]).astype(bf16),
        "c1b": jnp.tile(params["conv1_b"], 24).reshape(1, 144).astype(f32),
        "sel1": _build_pool1_select().astype(bf16),
        "c2w": _build_conv2_stacked(params["conv2_w"]).astype(bf16),
        "c2b": jnp.tile(params["conv2_b"], 8).reshape(1, 96).astype(f32),
        "f1w": _build_fc1_stacked(params["fc1_w"]).astype(bf16),
        "f1b": params["fc1_b"].reshape(1, 120).astype(f32),
        "f2w": params["fc2_w"].T.astype(bf16),
        "f2b": params["fc2_b"].reshape(1, 60).astype(f32),
        "f3w": f3w.astype(bf16),
        "f3b": f3b,
    }


# ------------------------------- forward ------------------------------------

def network_forward(prepped, x):
    """x: (B, 1, 28, 28) float32 NCHW (PyTorch layout). Returns (B, 10) logits."""
    B = x.shape[0]
    assert x.shape[1:] == (1, 28, 28), x.shape
    x3 = x.reshape(B, 28, 28)

    # Batch-tile selection: big tiles for MXU utilization, grid >= 2 whenever B >= 9
    # (second v7x TensorCore), padding handles any batch size.
    if B >= 256:
        tb = 128
    elif B >= 16:
        tb = ((B + 15) // 16) * 8            # ~B/2, rounded up to a multiple of 8
    else:
        tb = 8
    Bp = ((B + tb - 1) // tb) * tb
    if Bp != B:
        x3 = jnp.pad(x3, ((0, Bp - B), (0, 0), (0, 0)))

    def full(shape):
        return pl.BlockSpec(shape, lambda i: (0,) * len(shape))

    w = prepped
    weight_keys = ("c1w", "c1b", "sel1", "c2w", "c2b",
                   "f1w", "f1b", "f2w", "f2b", "f3w", "f3b")
    in_specs = [pl.BlockSpec((tb, 28, 28), lambda i: (i, 0, 0))]
    in_specs += [full(w[k].shape) for k in weight_keys]
    out_spec = pl.BlockSpec((tb, 128), lambda i: (i, 0))

    per_img_flops = 2 * (24 * 140 * 144 + 12 * 138 * 72 + 8 * 360 * 96
                         + 336 * 120 + 120 * 60 + 60 * 128)
    weight_bytes = (2 * (140 * 144 + 138 * 72 + 360 * 96 + 336 * 120 + 120 * 60 + 60 * 128)
                    + 4 * (144 + 96 + 120 + 60 + 128))
    flops = int(per_img_flops * Bp)
    bytes_accessed = int(4 * Bp * (28 * 28 + 128) + weight_bytes)

    out = pl.pallas_call(
        _lenet_fused_kernel,
        out_shape=jax.ShapeDtypeStruct((Bp, 128), jnp.float32),
        grid=(Bp // tb,),
        in_specs=in_specs,
        out_specs=out_spec,
        compiler_params=pltpu.CompilerParams(
            dimension_semantics=("parallel",),
            vmem_limit_bytes=32 * 1024 * 1024),
        cost_estimate=pl.CostEstimate(flops=flops, transcendentals=0,
                                      bytes_accessed=bytes_accessed),
    )(x3, *[w[k] for k in weight_keys])
    return out[:B, :10]


# ------------------------- init + pure-JAX reference -------------------------

def init_params(key):
    """Deterministic PyTorch-default-style uniform init (bound = 1/sqrt(fan_in))."""
    def uni(k, shape, fan_in):
        bound = 1.0 / jnp.sqrt(jnp.float32(fan_in))
        return jax.random.uniform(k, shape, jnp.float32, -bound, bound)

    ks = jax.random.split(key, 10)
    p = {}
    p["conv1_w"] = uni(ks[0], (6, 1, 5, 5), 1 * 5 * 5)
    p["conv1_b"] = uni(ks[1], (6,), 1 * 5 * 5)
    p["conv2_w"] = uni(ks[2], (12, 6, 5, 5), 6 * 5 * 5)
    p["conv2_b"] = uni(ks[3], (12,), 6 * 5 * 5)
    p["fc1_w"] = uni(ks[4], (120, 192), 192)
    p["fc1_b"] = uni(ks[5], (120,), 192)
    p["fc2_w"] = uni(ks[6], (60, 120), 120)
    p["fc2_b"] = uni(ks[7], (60,), 120)
    p["fc3_w"] = uni(ks[8], (10, 60), 60)
    p["fc3_b"] = uni(ks[9], (10,), 60)
    return p


def _pool_ref(y):
    B, C, H, W = y.shape
    return y.reshape(B, C, H // 2, 2, W // 2, 2).max(axis=(3, 5))


def reference_forward(params, x):
    """Plain-JAX mirror of the PyTorch module (for correctness checking only)."""
    dn = ("NCHW", "OIHW", "NCHW")
    y = jax.lax.conv_general_dilated(x, params["conv1_w"], (1, 1), "VALID",
                                     dimension_numbers=dn)
    y = jnp.maximum(y + params["conv1_b"][None, :, None, None], 0.0)
    y = _pool_ref(y)
    y = jax.lax.conv_general_dilated(y, params["conv2_w"], (1, 1), "VALID",
                                     dimension_numbers=dn)
    y = jnp.maximum(y + params["conv2_b"][None, :, None, None], 0.0)
    y = _pool_ref(y)
    t = y.reshape(y.shape[0], 12 * 4 * 4)
    t = jnp.maximum(t @ params["fc1_w"].T + params["fc1_b"], 0.0)
    t = jnp.maximum(t @ params["fc2_w"].T + params["fc2_b"], 0.0)
    return t @ params["fc3_w"].T + params["fc3_b"]


if __name__ == "__main__":
    key = jax.random.PRNGKey(0)
    k_param, k_input = jax.random.split(key)
    params = init_params(k_param)
    prepped = prepare_params(params)
    fwd = jax.jit(network_forward)

    # Small test (batch=2): grid=1 path.
    x = jax.random.normal(k_input, (2, 1, 28, 28), dtype=jnp.float32)
    out = fwd(prepped, x)
    jax.block_until_ready(out)
    assert out.shape == (2, 10), out.shape
    ref = reference_forward(params, x)
    np.testing.assert_allclose(np.asarray(out), np.asarray(ref), atol=1e-2, rtol=1e-2)

    # Larger test (batch=24): exercises padding + multi-step "parallel" grid.
    x2 = jax.random.normal(jax.random.PRNGKey(1), (24, 1, 28, 28), dtype=jnp.float32)
    out2 = fwd(prepped, x2)
    jax.block_until_ready(out2)
    assert out2.shape == (24, 10), out2.shape
    ref2 = reference_forward(params, x2)
    np.testing.assert_allclose(np.asarray(out2), np.asarray(ref2), atol=1e-2, rtol=1e-2)

    print("KERNEL_OK")
</pallas_src>

<mosaic_0001>
module attributes {stable_mosaic.version = 11 : i64} {
  func.func @_lenet_fused_kernel(%arg0: i32, %arg1: memref<8x28x28xf32, #tpu.memory_space<vmem>>, %arg2: memref<140x144xbf16, #tpu.memory_space<vmem>>, %arg3: memref<1x144xf32, #tpu.memory_space<vmem>>, %arg4: memref<138x72xbf16, #tpu.memory_space<vmem>>, %arg5: memref<360x96xbf16, #tpu.memory_space<vmem>>, %arg6: memref<1x96xf32, #tpu.memory_space<vmem>>, %arg7: memref<336x120xbf16, #tpu.memory_space<vmem>>, %arg8: memref<1x120xf32, #tpu.memory_space<vmem>>, %arg9: memref<120x60xbf16, #tpu.memory_space<vmem>>, %arg10: memref<1x60xf32, #tpu.memory_space<vmem>>, %arg11: memref<60x128xbf16, #tpu.memory_space<vmem>>, %arg12: memref<1x128xf32, #tpu.memory_space<vmem>>, %arg13: memref<8x128xf32, #tpu.memory_space<vmem>>) attributes {dimension_semantics = [#tpu.dimension_semantics<parallel>], iteration_bounds = array<i64: 1>, scalar_prefetch = 0 : i64, scratch_operands = 0 : i64, tpu.core_type = #tpu.core_type<tc>, window_params = [{transform_indices = @transform_0, window_bounds = array<i64: 8, 28, 28>}, {pipeline_mode = #tpu.pipeline_mode<synchronous>, transform_indices = @transform_1, window_bounds = array<i64: 140, 144>}, {pipeline_mode = #tpu.pipeline_mode<synchronous>, transform_indices = @transform_2, window_bounds = array<i64: 1, 144>}, {pipeline_mode = #tpu.pipeline_mode<synchronous>, transform_indices = @transform_3, window_bounds = array<i64: 138, 72>}, {pipeline_mode = #tpu.pipeline_mode<synchronous>, transform_indices = @transform_4, window_bounds = array<i64: 360, 96>}, {pipeline_mode = #tpu.pipeline_mode<synchronous>, transform_indices = @transform_5, window_bounds = array<i64: 1, 96>}, {pipeline_mode = #tpu.pipeline_mode<synchronous>, transform_indices = @transform_6, window_bounds = array<i64: 336, 120>}, {pipeline_mode = #tpu.pipeline_mode<synchronous>, transform_indices = @transform_7, window_bounds = array<i64: 1, 120>}, {pipeline_mode = #tpu.pipeline_mode<synchronous>, transform_indices = @transform_8, window_bounds = array<i64: 120, 60>}, {pipeline_mode = #tpu.pipeline_mode<synchronous>, transform_indices = @transform_9, window_bounds = array<i64: 1, 60>}, {pipeline_mode = #tpu.pipeline_mode<synchronous>, transform_indices = @transform_10, window_bounds = array<i64: 60, 128>}, {pipeline_mode = #tpu.pipeline_mode<synchronous>, transform_indices = @transform_11, window_bounds = array<i64: 1, 128>}, {transform_indices = @transform_12, window_bounds = array<i64: 8, 128>}]} {
    %c0 = arith.constant 0 : index
    %c0_0 = arith.constant 0 : index
    %c0_1 = arith.constant 0 : index
    %0 = vector.load %arg1[%c0, %c0_0, %c0_1] : memref<8x28x28xf32, #tpu.memory_space<vmem>>, vector<8x28x28xf32>
    %1 = vector.extract_strided_slice %0 {offsets = [0, 0, 0], sizes = [8, 24, 28], strides = [1, 1, 1]} : vector<8x28x28xf32> to vector<8x24x28xf32>
    %2 = vector.extract_strided_slice %0 {offsets = [0, 1, 0], sizes = [8, 24, 28], strides = [1, 1, 1]} : vector<8x28x28xf32> to vector<8x24x28xf32>
    %3 = vector.extract_strided_slice %0 {offsets = [0, 2, 0], sizes = [8, 24, 28], strides = [1, 1, 1]} : vector<8x28x28xf32> to vector<8x24x28xf32>
    %4 = vector.extract_strided_slice %0 {offsets = [0, 3, 0], sizes = [8, 24, 28], strides = [1, 1, 1]} : vector<8x28x28xf32> to vector<8x24x28xf32>
    %5 = vector.extract_strided_slice %0 {offsets = [0, 4, 0], sizes = [8, 24, 28], strides = [1, 1, 1]} : vector<8x28x28xf32> to vector<8x24x28xf32>
    %6 = tpu.concatenate %1, %2, %3, %4, %5 in 2 : vector<8x24x28xf32>, vector<8x24x28xf32>, vector<8x24x28xf32>, vector<8x24x28xf32>, vector<8x24x28xf32> -> vector<8x24x140xf32>
    %7 = vector.shape_cast %6 : vector<8x24x140xf32> to vector<192x140xf32>
    %8 = arith.truncf %7 : vector<192x140xf32> to vector<192x140xbf16>
    %c0_2 = arith.constant 0 : index
    %c0_3 = arith.constant 0 : index
    %9 = vector.load %arg2[%c0_2, %c0_3] : memref<140x144xbf16, #tpu.memory_space<vmem>>, vector<140x144xbf16>
    %cst = arith.constant dense<0.000000e+00> : vector<192x144xf32>
    %10 = tpu.matmul %8, %9, %cst {dimension_numbers = #tpu.dot_dimension_numbers<[1], [0], [0], [1], [0, 0, 1, 1], [], []>} : vector<192x140xbf16>, vector<140x144xbf16>, vector<192x144xf32> -> vector<192x144xf32>
    %c0_4 = arith.constant 0 : index
    %c0_5 = arith.constant 0 : index
    %11 = vector.load %arg3[%c0_4, %c0_5] : memref<1x144xf32, #tpu.memory_space<vmem>>, vector<1x144xf32>
    %12 = vector.broadcast %11 : vector<1x144xf32> to vector<192x144xf32>
    %13 = arith.addf %10, %12 : vector<192x144xf32>
    %cst_6 = arith.constant 0.000000e+00 : f32
    %14 = vector.broadcast %cst_6 : f32 to vector<192x144xf32>
    %15 = arith.maximumf %13, %14 : vector<192x144xf32>
    %16 = vector.shape_cast %15 : vector<192x144xf32> to vector<96x2x144xf32>
    %cst_7 = arith.constant dense<0xFF800000> : vector<96x144xf32>
    %17 = vector.multi_reduction <maximumf>, %16, %cst_7 [1] : vector<96x2x144xf32> to vector<96x144xf32>
    %18 = vector.extract_strided_slice %17 {offsets = [0, 0], sizes = [96, 138], strides = [1, 1]} : vector<96x144xf32> to vector<96x138xf32>
    %19 = vector.extract_strided_slice %17 {offsets = [0, 6], sizes = [96, 138], strides = [1, 1]} : vector<96x144xf32> to vector<96x138xf32>
    %20 = arith.maximumf %18, %19 : vector<96x138xf32>
    %21 = arith.truncf %20 : vector<96x138xf32> to vector<96x138xbf16>
    %c0_8 = arith.constant 0 : index
    %c0_9 = arith.constant 0 : index
    %22 = vector.load %arg4[%c0_8, %c0_9] : memref<138x72xbf16, #tpu.memory_space<vmem>>, vector<138x72xbf16>
    %cst_10 = arith.constant dense<0.000000e+00> : vector<96x72xf32>
    %23 = tpu.matmul %21, %22, %cst_10 {dimension_numbers = #tpu.dot_dimension_numbers<[1], [0], [0], [1], [0, 0, 1, 1], [], []>} : vector<96x138xbf16>, vector<138x72xbf16>, vector<96x72xf32> -> vector<96x72xf32>
    %24 = vector.shape_cast %23 : vector<96x72xf32> to vector<8x12x72xf32>
    %25 = vector.extract_strided_slice %24 {offsets = [0, 0, 0], sizes = [8, 8, 72], strides = [1, 1, 1]} : vector<8x12x72xf32> to vector<8x8x72xf32>
    %26 = vector.extract_strided_slice %24 {offsets = [0, 1, 0], sizes = [8, 8, 72], strides = [1, 1, 1]} : vector<8x12x72xf32> to vector<8x8x72xf32>
    %27 = vector.extract_strided_slice %24 {offsets = [0, 2, 0], sizes = [8, 8, 72], strides = [1, 1, 1]} : vector<8x12x72xf32> to vector<8x8x72xf32>
    %28 = vector.extract_strided_slice %24 {offsets = [0, 3, 0], sizes = [8, 8, 72], strides = [1, 1, 1]} : vector<8x12x72xf32> to vector<8x8x72xf32>
    %29 = vector.extract_strided_slice %24 {offsets = [0, 4, 0], sizes = [8, 8, 72], strides = [1, 1, 1]} : vector<8x12x72xf32> to vector<8x8x72xf32>
    %30 = tpu.concatenate %25, %26, %27, %28, %29 in 2 : vector<8x8x72xf32>, vector<8x8x72xf32>, vector<8x8x72xf32>, vector<8x8x72xf32>, vector<8x8x72xf32> -> vector<8x8x360xf32>
    %31 = vector.shape_cast %30 : vector<8x8x360xf32> to vector<64x360xf32>
    %32 = arith.truncf %31 : vector<64x360xf32> to vector<64x360xbf16>
    %c0_11 = arith.constant 0 : index
    %c0_12 = arith.constant 0 : index
    %33 = vector.load %arg5[%c0_11, %c0_12] : memref<360x96xbf16, #tpu.memory_space<vmem>>, vector<360x96xbf16>
    %cst_13 = arith.constant dense<0.000000e+00> : vector<64x96xf32>
    %34 = tpu.matmul %32, %33, %cst_13 {dimension_numbers = #tpu.dot_dimension_numbers<[1], [0], [0], [1], [0, 0, 1, 1], [], []>} : vector<64x360xbf16>, vector<360x96xbf16>, vector<64x96xf32> -> vector<64x96xf32>
    %c0_14 = arith.constant 0 : index
    %c0_15 = arith.constant 0 : index
    %35 = vector.load %arg6[%c0_14, %c0_15] : memref<1x96xf32, #tpu.memory_space<vmem>>, vector<1x96xf32>
    %36 = vector.broadcast %35 : vector<1x96xf32> to vector<64x96xf32>
    %37 = arith.addf %34, %36 : vector<64x96xf32>
    %cst_16 = arith.constant 0.000000e+00 : f32
    %38 = vector.broadcast %cst_16 : f32 to vector<64x96xf32>
    %39 = arith.maximumf %37, %38 : vector<64x96xf32>
    %40 = vector.shape_cast %39 : vector<64x96xf32> to vector<32x2x96xf32>
    %cst_17 = arith.constant dense<0xFF800000> : vector<32x96xf32>
    %41 = vector.multi_reduction <maximumf>, %40, %cst_17 [1] : vector<32x2x96xf32> to vector<32x96xf32>
    %42 = vector.extract_strided_slice %41 {offsets = [0, 0], sizes = [32, 84], strides = [1, 1]} : vector<32x96xf32> to vector<32x84xf32>
    %43 = vector.extract_strided_slice %41 {offsets = [0, 12], sizes = [32, 84], strides = [1, 1]} : vector<32x96xf32> to vector<32x84xf32>
    %44 = arith.maximumf %42, %43 : vector<32x84xf32>
    %45 = vector.shape_cast %44 : vector<32x84xf32> to vector<8x4x84xf32>
    %46 = vector.extract_strided_slice %45 {offsets = [0, 0, 0], sizes = [8, 1, 84], strides = [1, 1, 1]} : vector<8x4x84xf32> to vector<8x1x84xf32>
    %47 = vector.shape_cast %46 : vector<8x1x84xf32> to vector<8x84xf32>
    %48 = vector.extract_strided_slice %45 {offsets = [0, 1, 0], sizes = [8, 1, 84], strides = [1, 1, 1]} : vector<8x4x84xf32> to vector<8x1x84xf32>
    %49 = vector.shape_cast %48 : vector<8x1x84xf32> to vector<8x84xf32>
    %50 = vector.extract_strided_slice %45 {offsets = [0, 2, 0], sizes = [8, 1, 84], strides = [1, 1, 1]} : vector<8x4x84xf32> to vector<8x1x84xf32>
    %51 = vector.shape_cast %50 : vector<8x1x84xf32> to vector<8x84xf32>
    %52 = vector.extract_strided_slice %45 {offsets = [0, 3, 0], sizes = [8, 1, 84], strides = [1, 1, 1]} : vector<8x4x84xf32> to vector<8x1x84xf32>
    %53 = vector.shape_cast %52 : vector<8x1x84xf32> to vector<8x84xf32>
    %54 = tpu.concatenate %47, %49, %51, %53 in 1 : vector<8x84xf32>, vector<8x84xf32>, vector<8x84xf32>, vector<8x84xf32> -> vector<8x336xf32>
    %55 = arith.truncf %54 : vector<8x336xf32> to vector<8x336xbf16>
    %c0_18 = arith.constant 0 : index
    %c0_19 = arith.constant 0 : index
    %56 = vector.load %arg7[%c0_18, %c0_19] : memref<336x120xbf16, #tpu.memory_space<vmem>>, vector<336x120xbf16>
    %cst_20 = arith.constant dense<0.000000e+00> : vector<8x120xf32>
    %57 = tpu.matmul %55, %56, %cst_20 {dimension_numbers = #tpu.dot_dimension_numbers<[1], [0], [0], [1], [0, 0, 1, 1], [], []>} : vector<8x336xbf16>, vector<336x120xbf16>, vector<8x120xf32> -> vector<8x120xf32>
    %c0_21 = arith.constant 0 : index
    %c0_22 = arith.constant 0 : index
    %58 = vector.load %arg8[%c0_21, %c0_22] : memref<1x120xf32, #tpu.memory_space<vmem>>, vector<1x120xf32>
    %59 = vector.broadcast %58 : vector<1x120xf32> to vector<8x120xf32>
    %60 = arith.addf %57, %59 : vector<8x120xf32>
    %cst_23 = arith.constant 0.000000e+00 : f32
    %61 = vector.broadcast %cst_23 : f32 to vector<8x120xf32>
    %62 = arith.maximumf %60, %61 : vector<8x120xf32>
    %63 = arith.truncf %62 : vector<8x120xf32> to vector<8x120xbf16>
    %c0_24 = arith.constant 0 : index
    %c0_25 = arith.constant 0 : index
    %64 = vector.load %arg9[%c0_24, %c0_25] : memref<120x60xbf16, #tpu.memory_space<vmem>>, vector<120x60xbf16>
    %cst_26 = arith.constant dense<0.000000e+00> : vector<8x60xf32>
    %65 = tpu.matmul %63, %64, %cst_26 {dimension_numbers = #tpu.dot_dimension_numbers<[1], [0], [0], [1], [0, 0, 1, 1], [], []>} : vector<8x120xbf16>, vector<120x60xbf16>, vector<8x60xf32> -> vector<8x60xf32>
    %c0_27 = arith.constant 0 : index
    %c0_28 = arith.constant 0 : index
    %66 = vector.load %arg10[%c0_27, %c0_28] : memref<1x60xf32, #tpu.memory_space<vmem>>, vector<1x60xf32>
    %67 = vector.broadcast %66 : vector<1x60xf32> to vector<8x60xf32>
    %68 = arith.addf %65, %67 : vector<8x60xf32>
    %cst_29 = arith.constant 0.000000e+00 : f32
    %69 = vector.broadcast %cst_29 : f32 to vector<8x60xf32>
    %70 = arith.maximumf %68, %69 : vector<8x60xf32>
    %71 = arith.truncf %70 : vector<8x60xf32> to vector<8x60xbf16>
    %c0_30 = arith.constant 0 : index
    %c0_31 = arith.constant 0 : index
    %72 = vector.load %arg11[%c0_30, %c0_31] : memref<60x128xbf16, #tpu.memory_space<vmem>>, vector<60x128xbf16>
    %cst_32 = arith.constant dense<0.000000e+00> : vector<8x128xf32>
    %73 = tpu.matmul %71, %72, %cst_32 {dimension_numbers = #tpu.dot_dimension_numbers<[1], [0], [0], [1], [0, 0, 1, 1], [], []>} : vector<8x60xbf16>, vector<60x128xbf16>, vector<8x128xf32> -> vector<8x128xf32>
    %c0_33 = arith.constant 0 : index
    %c0_34 = arith.constant 0 : index
    %74 = vector.load %arg12[%c0_33, %c0_34] : memref<1x128xf32, #tpu.memory_space<vmem>>, vector<1x128xf32>
    %75 = vector.broadcast %74 : vector<1x128xf32> to vector<8x128xf32>
    %76 = arith.addf %73, %75 : vector<8x128xf32>
    %c0_35 = arith.constant 0 : index
    %c0_36 = arith.constant 0 : index
    %77 = vector.load %arg13[%c0_35, %c0_36] : memref<8x128xf32, #tpu.memory_space<vmem>>, vector<8x128xf32>
    tpu.vector_store %arg13[%c0_35, %c0_36], %76 {strides = array<i32>} : memref<8x128xf32, #tpu.memory_space<vmem>>, vector<8x128xf32>,
    return
  }
  func.func @transform_0(%arg0: i32) -> (i32, i32, i32) {
    %c0_i32 = arith.constant 0 : i32
    %c0_i32_0 = arith.constant 0 : i32
    %c0_i32_1 = arith.constant 0 : i32
    return %arg0, %c0_i32, %c0_i32_0 : i32, i32, i32
  }
  func.func @transform_1(%arg0: i32) -> (i32, i32) {
    %c0_i32 = arith.constant 0 : i32
    %c0_i32_0 = arith.constant 0 : i32
    %c0_i32_1 = arith.constant 0 : i32
    return %c0_i32, %c0_i32_0 : i32, i32
  }
  func.func @transform_2(%arg0: i32) -> (i32, i32) {
    %c0_i32 = arith.constant 0 : i32
    %c0_i32_0 = arith.constant 0 : i32
    %c0_i32_1 = arith.constant 0 : i32
    return %c0_i32, %c0_i32_0 : i32, i32
  }
  func.func @transform_3(%arg0: i32) -> (i32, i32) {
    %c0_i32 = arith.constant 0 : i32
    %c0_i32_0 = arith.constant 0 : i32
    %c0_i32_1 = arith.constant 0 : i32
    return %c0_i32, %c0_i32_0 : i32, i32
  }
  func.func @transform_4(%arg0: i32) -> (i32, i32) {
    %c0_i32 = arith.constant 0 : i32
    %c0_i32_0 = arith.constant 0 : i32
    %c0_i32_1 = arith.constant 0 : i32
    return %c0_i32, %c0_i32_0 : i32, i32
  }
  func.func @transform_5(%arg0: i32) -> (i32, i32) {
    %c0_i32 = arith.constant 0 : i32
    %c0_i32_0 = arith.constant 0 : i32
    %c0_i32_1 = arith.constant 0 : i32
    return %c0_i32, %c0_i32_0 : i32, i32
  }
  func.func @transform_6(%arg0: i32) -> (i32, i32) {
    %c0_i32 = arith.constant 0 : i32
    %c0_i32_0 = arith.constant 0 : i32
    %c0_i32_1 = arith.constant 0 : i32
    return %c0_i32, %c0_i32_0 : i32, i32
  }
  func.func @transform_7(%arg0: i32) -> (i32, i32) {
    %c0_i32 = arith.constant 0 : i32
    %c0_i32_0 = arith.constant 0 : i32
    %c0_i32_1 = arith.constant 0 : i32
    return %c0_i32, %c0_i32_0 : i32, i32
  }
  func.func @transform_8(%arg0: i32) -> (i32, i32) {
    %c0_i32 = arith.constant 0 : i32
    %c0_i32_0 = arith.constant 0 : i32
    %c0_i32_1 = arith.constant 0 : i32
    return %c0_i32, %c0_i32_0 : i32, i32
  }
  func.func @transform_9(%arg0: i32) -> (i32, i32) {
    %c0_i32 = arith.constant 0 : i32
    %c0_i32_0 = arith.constant 0 : i32
    %c0_i32_1 = arith.constant 0 : i32
    return %c0_i32, %c0_i32_0 : i32, i32
  }
  func.func @transform_10(%arg0: i32) -> (i32, i32) {
    %c0_i32 = arith.constant 0 : i32
    %c0_i32_0 = arith.constant 0 : i32
    %c0_i32_1 = arith.constant 0 : i32
    return %c0_i32, %c0_i32_0 : i32, i32
  }
  func.func @transform_11(%arg0: i32) -> (i32, i32) {
    %c0_i32 = arith.constant 0 : i32
    %c0_i32_0 = arith.constant 0 : i32
    %c0_i32_1 = arith.constant 0 : i32
    return %c0_i32, %c0_i32_0 : i32, i32
  }
  func.func @transform_12(%arg0: i32) -> (i32, i32) {
    %c0_i32 = arith.constant 0 : i32
    %c0_i32_0 = arith.constant 0 : i32
    return %arg0, %c0_i32 : i32, i32
  }
}

</mosaic_0001>

<bundles_post_ra>
// kernel: network_forward.1
= control target key start
LH: loop header
LB: loop body
LE: loop exit
PB: predicated region body
PF: predicated region fallthrough
CT: control target
= control target key end

     0   :  { %vm106_vm0 = vcmask 1046528   ;;  %vm364_vm1 = vcmask 1044480   ;;  %vm235_vm2 = vcmask 1045504   ;;  %vm493_vm3 = vcmask 1043456   ;;  %s9064_s15 = smov 28   ;;  %s9065_s16 = smov 84   ;;  %s13983_s0 = inlined_call_operand.vmem [shape: f32[8,28,28], index: 0, kind: input, shape index: {}]   ;;  %s13984_s1 = inlined_call_operand.vmem [shape: bf16[140,144], index: 1, kind: input, shape index: {}]   ;;  %s13985_s2 = inlined_call_operand.vmem [shape: f32[1,144], index: 2, kind: input, shape index: {}]   ;;  %s13986_s3 = inlined_call_operand.vmem [shape: bf16[138,72], index: 3, kind: input, shape index: {}]   ;;  %s13987_s4 = inlined_call_operand.vmem [shape: bf16[360,96], index: 4, kind: input, shape index: {}]   ;;  %s13988_s5 = inlined_call_operand.vmem [shape: f32[1,96], index: 5, kind: input, shape index: {}]   ;;  %s13989_s6 = inlined_call_operand.vmem [shape: bf16[336,120], index: 6, kind: input, shape index: {}]   ;;  %s13990_s8 = inlined_call_operand.vmem [shape: bf16[120,60], index: 8, kind: input, shape index: {}]   ;;  %s13991_s10 = inlined_call_operand.vmem [shape: bf16[60,128], index: 10, kind: input, shape index: {}]   ;;  %s13992_s7 = inlined_call_operand.vmem [shape: f32[1,120], index: 7, kind: input, shape index: {}]   ;;  %s13993_s9 = inlined_call_operand.vmem [shape: f32[1,60], index: 9, kind: input, shape index: {}]   ;;  %s13994_s11 = inlined_call_operand.vmem [shape: f32[1,128], index: 11, kind: input, shape index: {}]   ;;  %s13995_s12 = inlined_call_operand.vmem [shape: f32[8,128], index: 12, kind: output, shape index: {}]  }
   0x1   :  { %v9148_v0 = vld [vmem:[%s13983_s0] sm:$0xff]  ;;  %v9153_v1 = vld [vmem:[%s13983_s0 + $0x8] sm:$0xff]  ;;  %v9158_v2 = vld [vmem:[%s13983_s0 + $0x10] sm:$0xff]  ;;  %s9066_s23 = smov 56   ;;  %s9067_s26 = smov 112   ;;  %vm622_vm4 = vcmask 228352  }
   0x2   :  { %v107_v3 = vrot.slane %v9148_v0, 1  ;;  %v108_v4 = vrot.slane %v9153_v1, 1  ;;  %v110_v5 = vrot.slane %v9158_v2, 1  ;;  %v365_v6 = vrot.slane %v9148_v0, 3  ;;  %v45_v15 = vld [vmem:[%s13983_s0 + $0x18] sm:$0xf] }
   0x3   :  { %v366_v7 = vrot.slane %v9153_v1, 3  ;;  %v368_v8 = vrot.slane %v9158_v2, 3  ;;  %v236_v9 = vrot.slane %v9148_v0, 2  ;;  %v237_v10 = vrot.slane %v9153_v1, 2  ;;  %v9178_v16 = vld [vmem:[%s13983_s0 + $0x20] sm:$0xff]  ;;  %v9183_v17 = vld [vmem:[%s13983_s0 + $0x28] sm:$0xff] }
   0x4   :  { %v109_v11 = vsel %vm106_vm0, %v107_v3, %v108_v4  ;;  %v111_v12 = vsel %vm106_vm0, %v108_v4, %v110_v5  ;;  %v239_v13 = vrot.slane %v9158_v2, 2  ;;  %v494_v14 = vrot.slane %v9148_v0, 4  ;;  %v9204_v38 = vld [vmem:[%s13983_s0 + $0x30] sm:$0xff]  ;;  %v49_v39 = vld [vmem:[%s13983_s0 + $0x38] sm:$0xf]  ;;  %v9228_v54 = vld [vmem:[%s13983_s0 + $0x40] sm:$0xff] }
   0x5   :  { %v8092_v18 = vpack.i.bf16 %v111_v12, %v109_v11  ;;  %v367_v19 = vsel %vm364_vm1, %v365_v6, %v366_v7  ;;  %v369_v20 = vsel %vm364_vm1, %v366_v7, %v368_v8  ;;  %v238_v21 = vsel %vm235_vm2, %v236_v9, %v237_v10  ;;  %v8972_v44 = vld [vmem:[%s13984_s1 + $0x74] ss:$8 sps:$4 sm:$0xff]   ;;  %v8974_v49 = vld [vmem:[%s13984_s1 + $0x70] ss:$8 sps:$4 sm:$0xff]   ;;  %v8975_v55 = vld [vmem:[%s13984_s1 + $0x64] ss:$8 sps:$4 sm:$0xff]  }
   0x6   :  { %v8102_v22 = vpack.i.bf16 %v369_v20, %v367_v19  ;;  %v240_v23 = vsel %vm235_vm2, %v237_v10, %v239_v13  ;;  %v495_v24 = vrot.slane %v9153_v1, 4  ;;  %v497_v25 = vrot.slane %v9158_v2, 4  ;;  %907 = vmatprep.subr.bf16.mxu0 %v8972_v44  ;;  %v8977_v60 = vld [vmem:[%s13984_s1 + $0x60] ss:$8 sps:$4 sm:$0xff]   ;;  %v8978_v3 = vld [vmem:[%s13984_s1 + $0x54] ss:$8 sps:$4 sm:$0xff]  }
   0x7   :  { %8093 = vrot.lane.b32.xlu0 %v8092_v18, %s9064_s15  ;;  %v8097_v26 = vpack.i.bf16 %v240_v23, %v238_v21  ;;  %v112_v27 = vrot.slane %v45_v15, 1  ;;  %v114_v28 = vrot.slane %v9178_v16, 1  ;;  %v115_v29 = vrot.slane %v9183_v17, 1  ;;  %908 = vmatpush1.bf16.msra.mxu0 %v8974_v49  ;;  %v9255_v9 = vld [vmem:[%s13983_s0 + $0x50] sm:$0xff]  ;;  %v8981_v21 = vld [vmem:[%s13984_s1 + $0x44] ss:$8 sps:$4 sm:$0xff]  }
   0x8   :  { %8103 = vrot.lane.b32.xlu1 %v8102_v22, %s9065_s16  ;;  %v496_v30 = vsel %vm493_vm3, %v494_v14, %v495_v24  ;;  %v498_v31 = vsel %vm493_vm3, %v495_v24, %v497_v25  ;;  %v241_v32 = vrot.slane %v45_v15, 2  ;;  %v243_v33 = vrot.slane %v9178_v16, 2  ;;  %909 = vmatprep.subr.bf16.mxu0 %v8975_v55  ;;  %v8980_v18 = vld [vmem:[%s13984_s1 + $0x50] ss:$8 sps:$4 sm:$0xff]   ;;  %s9074_s29 = smov 32  }
   0x9   :  { %v8107_v34 = vpack.i.bf16 %v498_v31, %v496_v30  ;;  %v113_v35 = vsel %vm106_vm0, %v110_v5, %v112_v27  ;;  %v116_v36 = vsel %vm106_vm0, %v114_v28, %v115_v29  ;;  %v244_v37 = vrot.slane %v9183_v17, 2 }
   0xa   :  { %v8112_v40 = vpack.i.bf16 %v116_v36, %v113_v35  ;;  %v242_v41 = vsel %vm235_vm2, %v239_v13, %v241_v32  ;;  %v370_v42 = vrot.slane %v45_v15, 3  ;;  %v372_v43 = vrot.slane %v9178_v16, 3  ;;  %v9283_v32 = vld [vmem:[%s13983_s0 + $0x58] sm:$0xf] }
   0xb   :  { %8098 = vrot.lane.b32.xlu0 %v8097_v26, %s9066_s23  ;;  %v245_v45 = vsel %vm235_vm2, %v243_v33, %v244_v37  ;;  %v373_v46 = vrot.slane %v9183_v17, 3  ;;  %v499_v47 = vrot.slane %v45_v15, 4  ;;  %v501_v48 = vrot.slane %v9178_v16, 4  ;;  %910 = vmatpush1.bf16.msra.mxu0 %v8977_v60  ;;  %v9288_v33 = vld [vmem:[%s13983_s0 + $0x60] sm:$0xff] }
   0xc   :  { %8108 = vrot.lane.b32.xlu1 %v8107_v34, %s9067_s26  ;;  %v8117_v50 = vpack.i.bf16 %v245_v45, %v242_v41  ;;  %v371_v51 = vsel %vm364_vm1, %v368_v8, %v370_v42  ;;  %v502_v52 = vrot.slane %v9183_v17, 4  ;;  %v117_v53 = vrot.slane %v9204_v38, 1  ;;  %v9250_v8 = vld [vmem:[%s13983_s0 + $0x48] sm:$0xff]  ;;  %911 = vmatprep.subr.bf16.mxu0 %v8978_v3  ;;  %v8984_v41 = vld [vmem:[%s13984_s1 + $0x34] ss:$8 sps:$4 sm:$0xff]  }
   0xd   :  { %v374_v56 = vsel %vm364_vm1, %v372_v43, %v373_v46  ;;  %v500_v57 = vsel %vm493_vm3, %v497_v25, %v499_v47  ;;  %v119_v58 = vrot.slane %v49_v39, 1  ;;  %v246_v59 = vrot.slane %v9204_v38, 2  ;;  %v8983_v34 = vld [vmem:[%s13984_s1 + $0x40] ss:$8 sps:$4 sm:$0xff]  }
   0xe   :  { %v8122_v61 = vpack.i.bf16 %v374_v56, %v371_v51  ;;  %v503_v62 = vsel %vm493_vm3, %v501_v48, %v502_v52  ;;  %v248_v63 = vrot.slane %v49_v39, 2  ;;  %v118_v5 = vsel %vm106_vm0, %v115_v29, %v117_v53  ;;  %v8987_v56 = vld [vmem:[%s13984_s1 + $0x24] ss:$8 sps:$4 sm:$0xff]   ;;  %v8989_v3 = vld [vmem:[%s13984_s1 + $0x20] ss:$8 sps:$4 sm:$0xff]  }
   0xf   :  { %8113 = vrot.lane.b32.xlu0 %v8112_v40, %s9064_s15  ;;  %v8127_v4 = vpack.i.bf16 %v503_v62, %v500_v57  ;;  %v120_v6 = vsel %vm106_vm0, %v117_v53, %v119_v58  ;;  %v247_v7 = vsel %vm235_vm2, %v244_v37, %v246_v59  ;;  %v375_v11 = vrot.slane %v9204_v38, 3  ;;  %912 = vmatpush1.bf16.msra.mxu0 %v8980_v18  ;;  %v9300_v40 = vld [vmem:[%s13983_s0 + $0x68] sm:$0xff] }
  0x10   :  { %8118 = vrot.lane.b32.xlu1 %v8117_v50, %s9066_s23  ;;  %v249_v10 = vsel %vm235_vm2, %v246_v59, %v248_v63  ;;  %v377_v12 = vrot.slane %v49_v39, 3  ;;  %v504_v13 = vrot.slane %v9204_v38, 4  ;;  %v506_v14 = vrot.slane %v49_v39, 4  ;;  %913 = vmatprep.subr.bf16.mxu0 %v8981_v21  ;;  %v8986_v50 = vld [vmem:[%s13984_s1 + $0x30] ss:$8 sps:$4 sm:$0xff]  }
  0x11   :  { %v121_v15 = vrot.slane %v9228_v54, 1  ;;  %v122_v19 = vrot.slane %v9250_v8, 1  ;;  %v124_v20 = vrot.slane %v9255_v9, 1  ;;  %v8132_v22 = vpack.i.bf16 %v120_v6, %v118_v5 }
  0x12   :  { %v8137_v23 = vpack.i.bf16 %v249_v10, %v247_v7  ;;  %v376_v24 = vsel %vm364_vm1, %v373_v46, %v375_v11  ;;  %v378_v25 = vsel %vm364_vm1, %v375_v11, %v377_v12  ;;  %v505_v26 = vsel %vm493_vm3, %v502_v52, %v504_v13  ;;  %v8990_v10 = vld [vmem:[%s13984_s1 + $0x14] ss:$8 sps:$4 sm:$0xff]  }
  0x13   :  { %8123 = vrot.lane.b32.xlu0 %v8122_v61, %s9065_s16  ;;  %v507_v27 = vsel %vm493_vm3, %v504_v13, %v506_v14  ;;  %v123_v28 = vsel %vm106_vm0, %v121_v15, %v122_v19  ;;  %v250_v29 = vrot.slane %v9228_v54, 2  ;;  %v251_v30 = vrot.slane %v9250_v8, 2  ;;  %914 = vmatpush1.bf16.msra.mxu0 %v8983_v34  ;;  %v9346_v15 = vld [vmem:[%s13983_s0 + $0x70] sm:$0xff] }
  0x14   :  { %8128 = vrot.lane.b32.xlu1 %v8127_v4, %s9067_s26  ;;  %v253_v31 = vrot.slane %v9255_v9, 2  ;;  %v125_v35 = vsel %vm106_vm0, %v122_v19, %v124_v20  ;;  %v379_v36 = vrot.slane %v9228_v54, 3  ;;  %v380_v37 = vrot.slane %v9250_v8, 3  ;;  %915 = vmatprep.subr.bf16.mxu0 %v8984_v41 }
  0x15   :  { %v382_v39 = vrot.slane %v9255_v9, 3  ;;  %v8142_v42 = vpack.i.bf16 %v378_v25, %v376_v24  ;;  %v508_v43 = vrot.slane %v9228_v54, 4  ;;  %v509_v44 = vrot.slane %v9250_v8, 4 }
  0x16   :  { %v511_v45 = vrot.slane %v9255_v9, 4  ;;  %v8147_v46 = vpack.i.bf16 %v507_v27, %v505_v26  ;;  %v8152_v47 = vpack.i.bf16 %v125_v35, %v123_v28  ;;  %v252_v48 = vsel %vm235_vm2, %v250_v29, %v251_v30  ;;  %v8993_v26 = vld [vmem:[%s13984_s1 + $0x4] ss:$8 sps:$4 sm:$0xff]  }
  0x17   :  { %8133 = vrot.lane.b32.xlu0 %v8132_v22, %s9064_s15  ;;  %v254_v49 = vsel %vm235_vm2, %v251_v30, %v253_v31  ;;  %v381_v51 = vsel %vm364_vm1, %v379_v36, %v380_v37  ;;  %v126_v52 = vrot.slane %v9283_v32, 1  ;;  %v128_v53 = vrot.slane %v9288_v33, 1  ;;  %916 = vmatpush1.bf16.msra.mxu0 %v8986_v50  ;;  %v57_v22 = vld [vmem:[%s13983_s0 + $0x78] sm:$0xf]  ;;  %v9373_v36 = vld [vmem:[%s13983_s0 + $0x80] sm:$0xff] }
  0x18   :  { %8138 = vrot.lane.b32.xlu1 %v8137_v23, %s9066_s23  ;;  %v129_v55 = vrot.slane %v9300_v40, 1  ;;  %v383_v57 = vsel %vm364_vm1, %v380_v37, %v382_v39  ;;  %v510_v58 = vsel %vm493_vm3, %v508_v43, %v509_v44  ;;  %v512_v59 = vsel %vm493_vm3, %v509_v44, %v511_v45  ;;  %917 = vmatprep.subr.bf16.mxu0 %v8987_v56  ;;  %v8992_v23 = vld [vmem:[%s13984_s1 + $0x10] ss:$8 sps:$4 sm:$0xff]   ;;  %v8995_v37 = vld [vmem:[%s13984_s1] ss:$8 sps:$4 sm:$0xff]  }
  0x19   :  { %v255_v60 = vrot.slane %v9283_v32, 2  ;;  %v8157_v61 = vpack.i.bf16 %v254_v49, %v252_v48  ;;  %v257_v62 = vrot.slane %v9288_v33, 2  ;;  %v258_v63 = vrot.slane %v9300_v40, 2  ;;  %v9387_v43 = vld [vmem:[%s13983_s0 + $0x90] sm:$0xff] }
  0x1a   :  { %v8162_v4 = vpack.i.bf16 %v383_v57, %v381_v51  ;;  %v8167_v5 = vpack.i.bf16 %v512_v59, %v510_v58  ;;  %v127_v6 = vsel %vm106_vm0, %v124_v20, %v126_v52  ;;  %v130_v7 = vsel %vm106_vm0, %v128_v53, %v129_v55  ;;  %v8996_v44 = vld [vmem:[%s13984_s1 + $0x84] ss:$8 sps:$4 sm:$0x3f]  }
  0x1b   :  { %8143 = vrot.lane.b32.xlu0 %v8142_v42, %s9065_s16  ;;  %v256_v11 = vsel %vm235_vm2, %v253_v31, %v255_v60  ;;  %v384_v12 = vrot.slane %v9283_v32, 3  ;;  %v386_v13 = vrot.slane %v9288_v33, 3  ;;  %v387_v14 = vrot.slane %v9300_v40, 3  ;;  %918 = vmatpush1.bf16.msra.mxu0 %v8989_v3  ;;  %v9382_v42 = vld [vmem:[%s13983_s0 + $0x88] sm:$0xff] }
  0x1c   :  { %8148 = vrot.lane.b32.xlu1 %v8147_v46, %s9067_s26  ;;  %v259_v18 = vsel %vm235_vm2, %v257_v62, %v258_v63  ;;  %v513_v19 = vrot.slane %v9283_v32, 4  ;;  %v515_v20 = vrot.slane %v9288_v33, 4  ;;  %v516_v21 = vrot.slane %v9300_v40, 4  ;;  %919 = vmatprep.subr.bf16.mxu0 %v8990_v10 }
  0x1d   :  { %v8172_v24 = vpack.i.bf16 %v130_v7, %v127_v6  ;;  %v131_v25 = vrot.slane %v9346_v15, 1  ;;  %v8177_v27 = vpack.i.bf16 %v259_v18, %v256_v11  ;;  %v385_v28 = vsel %vm364_vm1, %v382_v39, %v384_v12 }
  0x1e   :  { %v388_v29 = vsel %vm364_vm1, %v386_v13, %v387_v14  ;;  %v133_v30 = vrot.slane %v57_v22, 1  ;;  %v514_v31 = vsel %vm493_vm3, %v511_v45, %v513_v19  ;;  %v517_v32 = vsel %vm493_vm3, %v515_v20, %v516_v21  ;;  %v61_v19 = vld [vmem:[%s13983_s0 + $0x98] sm:$0xf] }
  0x1f   :  { %8153 = vrot.lane.b32.xlu0 %v8152_v47, %s9064_s15  ;;  %v260_v34 = vrot.slane %v9346_v15, 2  ;;  %v262_v35 = vrot.slane %v57_v22, 2  ;;  %920 = vmatpush1.bf16.msra.mxu0 %v8992_v23  ;;  %v8182_v39 = vpack.i.bf16 %v388_v29, %v385_v28  ;;  %v132_v41 = vsel %vm106_vm0, %v129_v55, %v131_v25 }
  0x20   :  { %8158 = vrot.lane.b32.xlu1 %v8157_v61, %s9066_s23  ;;  %921 = vmatprep.subr.bf16.mxu0 %v8993_v26  ;;  %v8187_v45 = vpack.i.bf16 %v517_v32, %v514_v31  ;;  %v134_v46 = vsel %vm106_vm0, %v131_v25, %v133_v30  ;;  %v389_v47 = vrot.slane %v9346_v15, 3  ;;  %v391_v48 = vrot.slane %v57_v22, 3 }
  0x21   :  { %v261_v49 = vsel %vm235_vm2, %v258_v63, %v260_v34  ;;  %v263_v50 = vsel %vm235_vm2, %v260_v34, %v262_v35  ;;  %v518_v51 = vrot.slane %v9346_v15, 4  ;;  %v520_v52 = vrot.slane %v57_v22, 4  ;;  %v9433_v22 = vld [vmem:[%s13983_s0 + $0xa8] sm:$0xff] }
  0x22   :  { %v135_v53 = vrot.slane %v9373_v36, 1  ;;  %v136_v55 = vrot.slane %v9382_v42, 1  ;;  %v138_v56 = vrot.slane %v9387_v43, 1  ;;  %v8192_v57 = vpack.i.bf16 %v134_v46, %v132_v41  ;;  %v8998_v35 = vld [vmem:[%s13984_s1 + $0x80] ss:$8 sps:$4 sm:$0x3f]  }
  0x23   :  { %8163 = vrot.lane.b32.xlu0 %v8162_v4, %s9065_s16  ;;  %922 = vmatpush1.bf16.msra.mxu0 %v8995_v37  ;;  %v8197_v58 = vpack.i.bf16 %v263_v50, %v261_v49  ;;  %v390_v59 = vsel %vm364_vm1, %v387_v14, %v389_v47  ;;  %v392_v60 = vsel %vm364_vm1, %v389_v47, %v391_v48  ;;  %v264_v63 = vrot.slane %v9373_v36, 2 }
  0x24   :  { %8168 = vrot.lane.b32.xlu1 %v8167_v5, %s9067_s26  ;;  %7819 = vmatprep.subr.msk.bf16.mxu0 %vm235_vm2, %v8996_v44  ;;  %v519_v61 = vsel %vm493_vm3, %v516_v21, %v518_v51  ;;  %v521_v62 = vsel %vm493_vm3, %v518_v51, %v520_v52  ;;  %v265_v3 = vrot.slane %v9382_v42, 2  ;;  %v137_v4 = vsel %vm106_vm0, %v135_v53, %v136_v55  ;;  %v9428_v21 = vld [vmem:[%s13983_s0 + $0xa0] sm:$0xff] }
  0x25   :  { %v139_v5 = vsel %vm106_vm0, %v136_v55, %v138_v56  ;;  %v267_v6 = vrot.slane %v9387_v43, 2  ;;  %v393_v7 = vrot.slane %v9373_v36, 3  ;;  %v394_v10 = vrot.slane %v9382_v42, 3 }
  0x26   :  { %v396_v11 = vrot.slane %v9387_v43, 3  ;;  %v522_v12 = vrot.slane %v9373_v36, 4  ;;  %v523_v13 = vrot.slane %v9382_v42, 4  ;;  %v8202_v14 = vpack.i.bf16 %v392_v60, %v390_v59  ;;  %v65_v59 = vld [vmem:[%s13983_s0 + $0xb8] sm:$0xf] }
  0x27   :  { %8173 = vrot.lane.b32.xlu0 %v8172_v24, %s9064_s15  ;;  %v525_v18 = vrot.slane %v9387_v43, 4  ;;  %v8207_v20 = vpack.i.bf16 %v521_v62, %v519_v61  ;;  %v8212_v23 = vpack.i.bf16 %v139_v5, %v137_v4  ;;  %v266_v24 = vsel %vm235_vm2, %v264_v63, %v265_v3 }
  0x28   :  { %8178 = vrot.lane.b32.xlu1 %v8177_v27, %s9066_s23  ;;  %v268_v25 = vsel %vm235_vm2, %v265_v3, %v267_v6  ;;  %v395_v26 = vsel %vm364_vm1, %v393_v7, %v394_v10  ;;  %v397_v27 = vsel %vm364_vm1, %v394_v10, %v396_v11  ;;  %v524_v28 = vsel %vm493_vm3, %v522_v12, %v523_v13 }
  0x29   :  { %v140_v29 = vrot.slane %v61_v19, 1  ;;  %v526_v30 = vsel %vm493_vm3, %v523_v13, %v525_v18  ;;  %v142_v31 = vrot.slane %v9428_v21, 1  ;;  %v143_v32 = vrot.slane %v9433_v22, 1 }
  0x2a   :  { %v269_v34 = vrot.slane %v61_v19, 2  ;;  %v8217_v37 = vpack.i.bf16 %v268_v25, %v266_v24  ;;  %v272_v41 = vrot.slane %v9433_v22, 2  ;;  %v8222_v44 = vpack.i.bf16 %v397_v27, %v395_v26 }
  0x2b   :  { %8183 = vrot.lane.b32.xlu0 %v8182_v39, %s9065_s16  ;;  %v271_v39 = vrot.slane %v9428_v21, 2  ;;  %v141_v46 = vsel %vm106_vm0, %v138_v56, %v140_v29  ;;  %v144_v47 = vsel %vm106_vm0, %v142_v31, %v143_v32  ;;  %v398_v49 = vrot.slane %v61_v19, 3  ;;  %v9462_v56 = vld [vmem:[%s13983_s0 + $0xb0] sm:$0xff] }
  0x2c   :  { %8188 = vrot.lane.b32.xlu1 %v8187_v45, %s9067_s26  ;;  %v8227_v45 = vpack.i.bf16 %v526_v30, %v524_v28  ;;  %v270_v48 = vsel %vm235_vm2, %v267_v6, %v269_v34  ;;  %v902_v50 = vsel %vm235_vm2, %v8998_v35, 0  ;;  %v400_v52 = vrot.slane %v9428_v21, 3 }
  0x2d   :  { %v273_v51 = vsel %vm235_vm2, %v271_v39, %v272_v41  ;;  %v401_v53 = vrot.slane %v9433_v22, 3  ;;  %v527_v55 = vrot.slane %v61_v19, 4  ;;  %938 = vmatpush2.bf16.msra.mxu0 %v902_v50  ;;  %v8232_v60 = vpack.i.bf16 %v144_v47, %v141_v46  ;;  %v9483_v19 = vld [vmem:[%s13983_s0 + $0xc0] sm:$0xff] }
  0x2e   :  { %v8237_v61 = vpack.i.bf16 %v273_v51, %v270_v48  ;;  %v399_v62 = vsel %vm364_vm1, %v396_v11, %v398_v49  ;;  %v145_v63 = vrot.slane %v9462_v56, 1  ;;  %v147_v5 = vrot.slane %v65_v59, 1 }
  0x2f   :  { %8193 = vrot.lane.b32.xlu0 %v8192_v57, %s9064_s15  ;;  %v529_v57 = vrot.slane %v9428_v21, 4  ;;  %v402_v3 = vsel %vm364_vm1, %v400_v52, %v401_v53  ;;  %v528_v4 = vsel %vm493_vm3, %v525_v18, %v527_v55  ;;  %v274_v6 = vrot.slane %v9462_v56, 2  ;;  %v9488_v18 = vld [vmem:[%s13983_s0 + $0xc8] sm:$0xff]  ;;  %v69_v52 = vld [vmem:[%s13983_s0 + $0xd8] sm:$0xf] }
  0x30   :  { %8198 = vrot.lane.b32.xlu1 %v8197_v58, %s9066_s23  ;;  %v530_v58 = vrot.slane %v9433_v22, 4  ;;  %v276_v10 = vrot.slane %v65_v59, 2  ;;  %v403_v12 = vrot.slane %v9462_v56, 3  ;;  %v405_v13 = vrot.slane %v65_v59, 3 }
  0x31   :  { %v8242_v11 = vpack.i.bf16 %v402_v3, %v399_v62  ;;  %v148_v24 = vsel %vm106_vm0, %v145_v63, %v147_v5  ;;  %v275_v25 = vsel %vm235_vm2, %v272_v41, %v274_v6  ;;  %v532_v26 = vrot.slane %v9462_v56, 4 }
  0x32   :  { %v531_v7 = vsel %vm493_vm3, %v529_v57, %v530_v58  ;;  %v277_v27 = vsel %vm235_vm2, %v274_v6, %v276_v10  ;;  %v404_v28 = vsel %vm364_vm1, %v401_v53, %v403_v12  ;;  %v406_v29 = vsel %vm364_vm1, %v403_v12, %v405_v13 }
  0x33   :  { %8203 = vrot.lane.b32.xlu0 %v8202_v14, %s9065_s16  ;;  %v146_v14 = vsel %vm106_vm0, %v143_v32, %v145_v63  ;;  %v534_v30 = vrot.slane %v65_v59, 4  ;;  %v149_v31 = vrot.slane %v9483_v19, 1  ;;  %v150_v32 = vrot.slane %v9488_v18, 1  ;;  %v9527_v59 = vld [vmem:[%s13983_s0 + $0xe0] sm:$0xff] }
  0x34   :  { %8208 = vrot.lane.b32.xlu1 %v8207_v20, %s9067_s26  ;;  %v9493_v20 = vld [vmem:[%s13983_s0 + $0xd0] sm:$0xff]  ;;  %v8252_v35 = vpack.i.bf16 %v148_v24, %v146_v14  ;;  %v8262_v39 = vpack.i.bf16 %v406_v29, %v404_v28  ;;  %v533_v41 = vsel %vm493_vm3, %v530_v58, %v532_v26  ;;  %v279_v46 = vrot.slane %v9488_v18, 2 }
  0x35   :  { %v152_v34 = vrot.slane %v9493_v20, 1  ;;  %v281_v47 = vrot.slane %v9493_v20, 2  ;;  %v151_v48 = vsel %vm106_vm0, %v149_v31, %v150_v32  ;;  %v407_v50 = vrot.slane %v9483_v19, 3 }
  0x36   :  { %v408_v51 = vrot.slane %v9488_v18, 3  ;;  %v410_v53 = vrot.slane %v9493_v20, 3  ;;  %v536_v55 = vrot.slane %v9483_v19, 4  ;;  %v537_v57 = vrot.slane %v9488_v18, 4 }
  0x37   :  { %8213 = vrot.lane.b32.xlu0 %v8212_v23, %s9064_s15  ;;  %v8247_v23 = vpack.i.bf16 %v531_v7, %v528_v4  ;;  %v153_v49 = vsel %vm106_vm0, %v150_v32, %v152_v34  ;;  %v539_v58 = vrot.slane %v9493_v20, 4  ;;  %v282_v3 = vsel %vm235_vm2, %v279_v46, %v281_v47 }
  0x38   :  { %8218 = vrot.lane.b32.xlu1 %v8217_v37, %s9066_s23  ;;  %v8257_v37 = vpack.i.bf16 %v277_v27, %v275_v25  ;;  %v8272_v62 = vpack.i.bf16 %v153_v49, %v151_v48  ;;  %v409_v4 = vsel %vm364_vm1, %v407_v50, %v408_v51  ;;  %v154_v5 = vrot.slane %v69_v52, 1 }
  0x39   :  { %v156_v6 = vrot.slane %v9527_v59, 1  ;;  %v411_v10 = vsel %vm364_vm1, %v408_v51, %v410_v53  ;;  %v538_v12 = vsel %vm493_vm3, %v536_v55, %v537_v57  ;;  %v540_v13 = vsel %vm493_vm3, %v537_v57, %v539_v58 }
  0x3a   :  { %v8282_v25 = vpack.i.bf16 %v411_v10, %v409_v4  ;;  %v155_v27 = vsel %vm106_vm0, %v152_v34, %v154_v5  ;;  %v414_v31 = vrot.slane %v9527_v59, 3  ;;  %vm647_vm5 = vcmask 457728  }
  0x3b   :  { %8223 = vrot.lane.b32.xlu0 %v8222_v44, %s9065_s16  ;;  %v535_v44 = vsel %vm493_vm3, %v532_v26, %v534_v30  ;;  %v8287_v26 = vpack.i.bf16 %v540_v13, %v538_v12  ;;  %v412_v30 = vrot.slane %v69_v52, 3  ;;  %vm672_vm6 = vcmask 687104  }
  0x3c   :  { %8228 = vrot.lane.b32.xlu1 %v8227_v45, %s9067_s26  ;;  %v278_v45 = vrot.slane %v9483_v19, 2  ;;  %vm697_vm7 = vcmask 916480   ;;  %vm864_vm8 = vcmask 97280   ;;  %vm2548_vm9 = vcmask 1041408  }
  0x3d   :  { %vm2556_vm10 = vcmask 123904   ;;  %vm4470_vm11 = vcmask 998400   ;;  %vm5546_vm12 = vcmask 1041409   ;;  %vm5549_vm13 = vcmask 1042434  }
  0x3e   :  { %v280_v63 = vsel %vm235_vm2, %v278_v45, %v279_v46  ;;  %vm5552_vm14 = vcmask 1043459   ;;  %vm5555_vm15 = vcmask 1044484  }
  0x3f   :  { %8233 = vrot.lane.b32.xlu0 %v8232_v60, %s9064_s15  ;;  %v9532_v60 = vld [vmem:[%s13983_s0 + $0xe8] sm:$0xff]  ;;  %v8277_v14 = vpack.i.bf16 %v282_v3, %v280_v63 }
  0x40   :  { %8238 = vrot.lane.b32.xlu1 %v8237_v61, %s9066_s23  ;;  %v8267_v61 = vpack.i.bf16 %v535_v44, %v533_v41  ;;  %v157_v7 = vrot.slane %v9532_v60, 1  ;;  %v286_v24 = vrot.slane %v9532_v60, 2  ;;  %v415_v32 = vrot.slane %v9532_v60, 3  ;;  %v9560_v41 = vld [vmem:[%s13983_s0 + $0xf0] sm:$0xff]  ;;  %v73_v44 = vld [vmem:[%s13983_s0 + $0xf8] sm:$0xf] }
  0x41   :  { %v544_v34 = vrot.slane %v9532_v60, 4  ;;  %v159_v51 = vrot.slane %v9560_v41, 1  ;;  %v288_v55 = vrot.slane %v9560_v41, 2  ;;  %v290_v57 = vrot.slane %v73_v44, 2 }
  0x42   :  { %v158_v28 = vsel %vm106_vm0, %v156_v6, %v157_v7  ;;  %v416_v48 = vsel %vm364_vm1, %v414_v31, %v415_v32  ;;  %v419_v3 = vrot.slane %v73_v44, 3  ;;  %v546_v6 = vrot.slane %v9560_v41, 4 }
  0x43   :  { %8243 = vrot.lane.b32.xlu0 %v8242_v11, %s9065_s16  ;;  %v283_v11 = vrot.slane %v69_v52, 2  ;;  %v8292_v45 = vpack.i.bf16 %v158_v28, %v155_v27  ;;  %v289_v4 = vsel %vm235_vm2, %v286_v24, %v288_v55  ;;  %v291_v5 = vsel %vm235_vm2, %v288_v55, %v290_v57 }
  0x44   :  { %8248 = vrot.lane.b32.xlu1 %v8247_v23, %s9067_s26  ;;  %v285_v23 = vrot.slane %v9527_v59, 2  ;;  %v548_v10 = vrot.slane %v73_v44, 4  ;;  %v8317_v13 = vpack.i.bf16 %v291_v5, %v289_v4 }
  0x45   :  { %v284_v29 = vsel %vm235_vm2, %v281_v47, %v283_v11  ;;  %v413_v47 = vsel %vm364_vm1, %v410_v53, %v412_v30  ;;  %v160_v53 = vsel %vm106_vm0, %v157_v7, %v159_v51 }
  0x47   :  { %8253 = vrot.lane.b32.xlu0 %v8252_v35, %s9064_s15  ;;  %v287_v35 = vsel %vm235_vm2, %v285_v23, %v286_v24  ;;  %v549_v23 = vsel %vm493_vm3, %v546_v6, %v548_v10 }
  0x48   :  { %8258 = vrot.lane.b32.xlu1 %v8257_v37, %s9066_s23  ;;  %v541_v37 = vrot.slane %v69_v52, 4  ;;  %v8297_v46 = vpack.i.bf16 %v287_v35, %v284_v29  ;;  %v161_v52 = vrot.slane %v73_v44, 1 }
  0x4a   :  { %v542_v49 = vsel %vm493_vm3, %v539_v58, %v541_v37  ;;  %v162_v63 = vsel %vm106_vm0, %v159_v51, %v161_v52  ;;  %v417_v58 = vrot.slane %v9560_v41, 3 }
  0x4b   :  { %8263 = vrot.lane.b32.xlu0 %v8262_v39, %s9065_s16  ;;  %v543_v39 = vrot.slane %v9527_v59, 4  ;;  %v8312_v12 = vpack.i.bf16 %v162_v63, %v160_v53 }
  0x4c   :  { %8268 = vrot.lane.b32.xlu1 %v8267_v61, %s9067_s26  ;;  %v8302_v61 = vpack.i.bf16 %v416_v48, %v413_v47  ;;  %v418_v7 = vsel %vm364_vm1, %v415_v32, %v417_v58  ;;  %v420_v11 = vsel %vm364_vm1, %v417_v58, %v419_v3 }
  0x4d   :  { %v545_v50 = vsel %vm493_vm3, %v543_v39, %v544_v34  ;;  %v8322_v24 = vpack.i.bf16 %v420_v11, %v418_v7 }
  0x4f   :  { %8273 = vrot.lane.b32.xlu0 %v8272_v62, %s9064_s15  ;;  %v8307_v62 = vpack.i.bf16 %v545_v50, %v542_v49 }
  0x50   :  { %8278 = vrot.lane.b32.xlu1 %v8277_v14, %s9066_s23  ;;  %v547_v14 = vsel %vm493_vm3, %v544_v34, %v546_v6 }
  0x53   :  { %8283 = vrot.lane.b32.xlu0 %v8282_v25, %s9065_s16  ;;  %v8327_v25 = vpack.i.bf16 %v549_v23, %v547_v14 }
  0x54   :  { %8288 = vrot.lane.b32.xlu1 %v8287_v26, %s9067_s26 }
  0x57   :  { %8293 = vrot.lane.b32.xlu0 %v8292_v45, %s9064_s15 }
  0x58   :  { %8298 = vrot.lane.b32.xlu1 %v8297_v46, %s9066_s23 }
  0x5b   :  { %8303 = vrot.lane.b32.xlu0 %v8302_v61, %s9065_s16 }
  0x5c   :  { %8308 = vrot.lane.b32.xlu1 %v8307_v62, %s9067_s26 }
  0x5f   :  { %8313 = vrot.lane.b32.xlu0 %v8312_v12, %s9064_s15  ;;  %s9072_s15 = smov 72  }
  0x60   :  { %8318 = vrot.lane.b32.xlu1 %v8317_v13, %s9066_s23 }
  0x63   :  { %8323 = vrot.lane.b32.xlu0 %v8322_v24, %s9065_s16 }
  0x64   :  { %8328 = vrot.lane.b32.xlu1 %v8327_v25, %s9067_s26 }
  0x79   :  { %v8094_v26 = vpop.permute.xlu0 %8093 }
  0x7a   :  { %v8104_v27 = vpop.permute.xlu1 %8103  ;;  %v8096_v28 = vunpack.i.h.bf16 %v8094_v26  ;;  %v8095_v29 = vunpack.i.l.bf16 %v8094_v26 }
  0x7b   :  { %v8106_v31 = vunpack.i.h.bf16 %v8104_v27  ;;  %v8105_v32 = vunpack.i.l.bf16 %v8104_v27 }
  0x7c   :  { %v624_v34 = vsel %vm622_vm4, %v9153_v1, %v8096_v28  ;;  %v623_v44 = vsel %vm622_vm4, %v9148_v0, %v8095_v29 }
  0x7d   :  { %v8099_v30 = vpop.permute.xlu0 %8098 }
  0x7e   :  { %v8101_v35 = vunpack.i.h.bf16 %v8099_v30  ;;  %v8100_v37 = vunpack.i.l.bf16 %v8099_v30  ;;  %v8109_v39 = vpop.permute.xlu1 %8108 }
  0x7f   :  { %v8111_v45 = vunpack.i.h.bf16 %v8109_v39  ;;  %v8110_v46 = vunpack.i.l.bf16 %v8109_v39 }
  0x80   :  { %v648_v47 = vsel %vm647_vm5, %v623_v44, %v8100_v37  ;;  %v649_v48 = vsel %vm647_vm5, %v624_v34, %v8101_v35 }
  0x81   :  { %v8114_v49 = vpop.permute.xlu0 %8113  ;;  %v723_v50 = vpack.c.bf16 %v8111_v45, %v8110_v46  ;;  %v673_v51 = vsel %vm672_vm6, %v648_v47, %v8105_v32  ;;  %v674_v52 = vsel %vm672_vm6, %v649_v48, %v8106_v31 }
  0x82   :  { %v8116_v55 = vunpack.i.h.bf16 %v8114_v49  ;;  %v8115_v57 = vunpack.i.l.bf16 %v8114_v49  ;;  %v8119_v61 = vpop.permute.xlu1 %8118  ;;  %v698_v1 = vsel %vm697_vm7, %v673_v51, %v8110_v46  ;;  %v699_v0 = vsel %vm697_vm7, %v674_v52, %v8111_v45 }
  0x83   :  { %v8121_v62 = vunpack.i.h.bf16 %v8119_v61  ;;  %v8120_v53 = vunpack.i.l.bf16 %v8119_v61  ;;  %7820 = vmatprep.mubr.msk.bf16.mxu0 %vm864_vm8, %v723_v50  ;;  %v722_v63 = vpack.c.bf16 %v699_v0, %v698_v1 }
  0x84   :  { %v626_v58 = vsel %vm622_vm4, %v9178_v16, %v8116_v55  ;;  %v625_v3 = vsel %vm622_vm4, %v9158_v2, %v8115_v57 }
  0x85   :  { %v650_v4 = vsel %vm647_vm5, %v625_v3, %v8120_v53  ;;  %v651_v5 = vsel %vm647_vm5, %v626_v58, %v8121_v62  ;;  %v8124_v6 = vpop.permute.xlu0 %8123  ;;  %940 = vmatmul.mubr.bf16.vlgmr.msra.gmra.mxu0 %v722_v63 }
  0x86   :  { %v8126_v10 = vunpack.i.h.bf16 %v8124_v6  ;;  %v8125_v12 = vunpack.i.l.bf16 %v8124_v6  ;;  %v8129_v13 = vpop.permute.xlu1 %8128 }
  0x87   :  { %v8131_v7 = vunpack.i.h.bf16 %v8129_v13  ;;  %v8130_v11 = vunpack.i.l.bf16 %v8129_v13 }
  0x88   :  { %v675_v14 = vsel %vm672_vm6, %v650_v4, %v8125_v12  ;;  %v676_v23 = vsel %vm672_vm6, %v651_v5, %v8126_v10 }
  0x89   :  { %v725_v24 = vpack.c.bf16 %v8131_v7, %v8130_v11  ;;  %v8134_v16 = vpop.permute.xlu0 %8133  ;;  %v700_v25 = vsel %vm697_vm7, %v675_v14, %v8130_v11  ;;  %v701_v2 = vsel %vm697_vm7, %v676_v23, %v8131_v7 }
  0x8a   :  { %v8136_v26 = vunpack.i.h.bf16 %v8134_v16  ;;  %v8135_v27 = vunpack.i.l.bf16 %v8134_v16  ;;  %v8139_v28 = vpop.permute.xlu1 %8138  ;;  %v724_v29 = vpack.c.bf16 %v701_v2, %v700_v25 }
  0x8b   :  { %v8141_v30 = vunpack.i.h.bf16 %v8139_v28  ;;  %v8140_v31 = vunpack.i.l.bf16 %v8139_v28  ;;  %7821 = vmatprep.mubr.msk.bf16.mxu0 %vm864_vm8, %v725_v24 }
  0x8c   :  { %v628_v32 = vsel %vm622_vm4, %v9204_v38, %v8136_v26  ;;  %v627_v35 = vsel %vm622_vm4, %v9183_v17, %v8135_v27 }
  0x8d   :  { %v652_v37 = vsel %vm647_vm5, %v627_v35, %v8140_v31  ;;  %v653_v39 = vsel %vm647_vm5, %v628_v32, %v8141_v30  ;;  %950 = vmatmul.mubr.bf16.gmra.mxu0 %v724_v29  ;;  %v8144_v34 = vpop.permute.xlu0 %8143 }
  0x8e   :  { %v8146_v44 = vunpack.i.h.bf16 %v8144_v34  ;;  %v8145_v45 = vunpack.i.l.bf16 %v8144_v34  ;;  %v8149_v46 = vpop.permute.xlu1 %8148 }
  0x8f   :  { %v8151_v47 = vunpack.i.h.bf16 %v8149_v46  ;;  %v8150_v48 = vunpack.i.l.bf16 %v8149_v46 }
  0x90   :  { %v677_v49 = vsel %vm672_vm6, %v652_v37, %v8145_v45  ;;  %v678_v50 = vsel %vm672_vm6, %v653_v39, %v8146_v44 }
  0x91   :  { %v727_v51 = vpack.c.bf16 %v8151_v47, %v8150_v48  ;;  %v8154_v38 = vpop.permute.xlu0 %8153  ;;  %v702_v52 = vsel %vm697_vm7, %v677_v49, %v8150_v48  ;;  %v703_v17 = vsel %vm697_vm7, %v678_v50, %v8151_v47 }
  0x92   :  { %v8156_v55 = vunpack.i.h.bf16 %v8154_v38  ;;  %v8155_v57 = vunpack.i.l.bf16 %v8154_v38  ;;  %v8159_v61 = vpop.permute.xlu1 %8158  ;;  %v726_v1 = vpack.c.bf16 %v703_v17, %v702_v52 }
  0x93   :  { %v8161_v0 = vunpack.i.h.bf16 %v8159_v61  ;;  %v8160_v62 = vunpack.i.l.bf16 %v8159_v61  ;;  %7822 = vmatprep.mubr.msk.bf16.mxu0 %vm864_vm8, %v727_v51 }
  0x94   :  { %v630_v53 = vsel %vm622_vm4, %v9250_v8, %v8156_v55  ;;  %v629_v63 = vsel %vm622_vm4, %v9228_v54, %v8155_v57 }
  0x95   :  { %v654_v58 = vsel %vm647_vm5, %v629_v63, %v8160_v62  ;;  %v655_v3 = vsel %vm647_vm5, %v630_v53, %v8161_v0  ;;  %960 = vmatmul.mubr.bf16.gmra.mxu0 %v726_v1  ;;  %v8164_v4 = vpop.permute.xlu0 %8163 }
  0x96   :  { %v8166_v5 = vunpack.i.h.bf16 %v8164_v4  ;;  %v8165_v6 = vunpack.i.l.bf16 %v8164_v4  ;;  %v8169_v10 = vpop.permute.xlu1 %8168 }
  0x97   :  { %v8171_v12 = vunpack.i.h.bf16 %v8169_v10  ;;  %v8170_v13 = vunpack.i.l.bf16 %v8169_v10 }
  0x98   :  { %v679_v7 = vsel %vm672_vm6, %v654_v58, %v8165_v6  ;;  %v680_v11 = vsel %vm672_vm6, %v655_v3, %v8166_v5 }
  0x99   :  { %v729_v14 = vpack.c.bf16 %v8171_v12, %v8170_v13  ;;  %v704_v8 = vsel %vm697_vm7, %v679_v7, %v8170_v13  ;;  %v705_v54 = vsel %vm697_vm7, %v680_v11, %v8171_v12  ;;  %v8174_v23 = vpop.permute.xlu0 %8173 }
  0x9a   :  { %v728_v24 = vpack.c.bf16 %v705_v54, %v704_v8  ;;  %v8176_v16 = vunpack.i.h.bf16 %v8174_v23  ;;  %v8175_v25 = vunpack.i.l.bf16 %v8174_v23  ;;  %v8179_v2 = vpop.permute.xlu1 %8178 }
  0x9b   :  { %7823 = vmatprep.mubr.msk.bf16.mxu0 %vm864_vm8, %v729_v14  ;;  %v8181_v26 = vunpack.i.h.bf16 %v8179_v2  ;;  %v8180_v27 = vunpack.i.l.bf16 %v8179_v2 }
  0x9c   :  { %v632_v28 = vsel %vm622_vm4, %v9288_v33, %v8176_v16  ;;  %v631_v29 = vsel %vm622_vm4, %v9255_v9, %v8175_v25 }
  0x9d   :  { %970 = vmatmul.mubr.bf16.gmra.mxu0 %v728_v24  ;;  %v656_v30 = vsel %vm647_vm5, %v631_v29, %v8180_v27  ;;  %v657_v31 = vsel %vm647_vm5, %v632_v28, %v8181_v26  ;;  %v8184_v32 = vpop.permute.xlu0 %8183 }
  0x9e   :  { %v8186_v35 = vunpack.i.h.bf16 %v8184_v32  ;;  %v8185_v37 = vunpack.i.l.bf16 %v8184_v32  ;;  %v8189_v39 = vpop.permute.xlu1 %8188 }
  0x9f   :  { %v8191_v34 = vunpack.i.h.bf16 %v8189_v39  ;;  %v8190_v44 = vunpack.i.l.bf16 %v8189_v39 }
  0xa0   :  { %v681_v45 = vsel %vm672_vm6, %v656_v30, %v8185_v37  ;;  %v682_v46 = vsel %vm672_vm6, %v657_v31, %v8186_v35 }
  0xa1   :  { %v731_v47 = vpack.c.bf16 %v8191_v34, %v8190_v44  ;;  %v8194_v33 = vpop.permute.xlu0 %8193  ;;  %v706_v48 = vsel %vm697_vm7, %v681_v45, %v8190_v44  ;;  %v707_v9 = vsel %vm697_vm7, %v682_v46, %v8191_v34 }
  0xa2   :  { %v8196_v49 = vunpack.i.h.bf16 %v8194_v33  ;;  %v8195_v50 = vunpack.i.l.bf16 %v8194_v33  ;;  %v8199_v51 = vpop.permute.xlu1 %8198  ;;  %v730_v38 = vpack.c.bf16 %v707_v9, %v706_v48 }
  0xa3   :  { %v8201_v52 = vunpack.i.h.bf16 %v8199_v51  ;;  %v8200_v17 = vunpack.i.l.bf16 %v8199_v51  ;;  %7824 = vmatprep.mubr.msk.bf16.mxu0 %vm864_vm8, %v731_v47 }
  0xa4   :  { %v634_v55 = vsel %vm622_vm4, %v9346_v15, %v8196_v49  ;;  %v633_v57 = vsel %vm622_vm4, %v9300_v40, %v8195_v50 }
  0xa5   :  { %v658_v61 = vsel %vm647_vm5, %v633_v57, %v8200_v17  ;;  %v659_v1 = vsel %vm647_vm5, %v634_v55, %v8201_v52  ;;  %980 = vmatmul.mubr.bf16.gmra.mxu0 %v730_v38  ;;  %v8204_v0 = vpop.permute.xlu0 %8203 }
  0xa6   :  { %v8206_v62 = vunpack.i.h.bf16 %v8204_v0  ;;  %v8205_v53 = vunpack.i.l.bf16 %v8204_v0  ;;  %v8209_v63 = vpop.permute.xlu1 %8208 }
  0xa7   :  { %v8211_v58 = vunpack.i.h.bf16 %v8209_v63  ;;  %v8210_v3 = vunpack.i.l.bf16 %v8209_v63 }
  0xa8   :  { %v683_v4 = vsel %vm672_vm6, %v658_v61, %v8205_v53  ;;  %v684_v5 = vsel %vm672_vm6, %v659_v1, %v8206_v62 }
  0xa9   :  { %v733_v6 = vpack.c.bf16 %v8211_v58, %v8210_v3  ;;  %v708_v15 = vsel %vm697_vm7, %v683_v4, %v8210_v3  ;;  %v709_v40 = vsel %vm697_vm7, %v684_v5, %v8211_v58  ;;  %v8214_v10 = vpop.permute.xlu0 %8213 }
  0xaa   :  { %v732_v12 = vpack.c.bf16 %v709_v40, %v708_v15  ;;  %v8216_v13 = vunpack.i.h.bf16 %v8214_v10  ;;  %v8215_v7 = vunpack.i.l.bf16 %v8214_v10  ;;  %v8219_v11 = vpop.permute.xlu1 %8218 }
  0xab   :  { %7825 = vmatprep.mubr.msk.bf16.mxu0 %vm864_vm8, %v733_v6  ;;  %v8221_v14 = vunpack.i.h.bf16 %v8219_v11  ;;  %v8220_v8 = vunpack.i.l.bf16 %v8219_v11 }
  0xac   :  { %v636_v54 = vsel %vm622_vm4, %v9382_v42, %v8216_v13  ;;  %v635_v23 = vsel %vm622_vm4, %v9373_v36, %v8215_v7 }
  0xad   :  { %990 = vmatmul.mubr.bf16.gmra.mxu0 %v732_v12  ;;  %v660_v24 = vsel %vm647_vm5, %v635_v23, %v8220_v8  ;;  %v661_v16 = vsel %vm647_vm5, %v636_v54, %v8221_v14  ;;  %v8224_v25 = vpop.permute.xlu0 %8223 }
  0xae   :  { %v8226_v2 = vunpack.i.h.bf16 %v8224_v25  ;;  %v8225_v26 = vunpack.i.l.bf16 %v8224_v25  ;;  %v8229_v27 = vpop.permute.xlu1 %8228 }
  0xaf   :  { %v8231_v28 = vunpack.i.h.bf16 %v8229_v27  ;;  %v8230_v29 = vunpack.i.l.bf16 %v8229_v27 }
  0xb0   :  { %v685_v30 = vsel %vm672_vm6, %v660_v24, %v8225_v26  ;;  %v686_v31 = vsel %vm672_vm6, %v661_v16, %v8226_v2 }
  0xb1   :  { %v735_v32 = vpack.c.bf16 %v8231_v28, %v8230_v29  ;;  %v8234_v42 = vpop.permute.xlu0 %8233  ;;  %v710_v35 = vsel %vm697_vm7, %v685_v30, %v8230_v29  ;;  %v711_v36 = vsel %vm697_vm7, %v686_v31, %v8231_v28 }
  0xb2   :  { %v8236_v37 = vunpack.i.h.bf16 %v8234_v42  ;;  %v8235_v39 = vunpack.i.l.bf16 %v8234_v42  ;;  %v8239_v34 = vpop.permute.xlu1 %8238  ;;  %v734_v44 = vpack.c.bf16 %v711_v36, %v710_v35 }
  0xb3   :  { %v8241_v45 = vunpack.i.h.bf16 %v8239_v34  ;;  %v8240_v46 = vunpack.i.l.bf16 %v8239_v34  ;;  %7826 = vmatprep.mubr.msk.bf16.mxu0 %vm864_vm8, %v735_v32 }
  0xb4   :  { %v638_v47 = vsel %vm622_vm4, %v9428_v21, %v8236_v37  ;;  %v637_v33 = vsel %vm622_vm4, %v9387_v43, %v8235_v39 }
  0xb5   :  { %v662_v48 = vsel %vm647_vm5, %v637_v33, %v8240_v46  ;;  %v663_v9 = vsel %vm647_vm5, %v638_v47, %v8241_v45  ;;  %1000 = vmatmul.mubr.bf16.gmra.mxu0 %v734_v44  ;;  %v8244_v49 = vpop.permute.xlu0 %8243 }
  0xb6   :  { %v8246_v50 = vunpack.i.h.bf16 %v8244_v49  ;;  %v8245_v51 = vunpack.i.l.bf16 %v8244_v49  ;;  %v8249_v38 = vpop.permute.xlu1 %8248 }
  0xb7   :  { %v8251_v52 = vunpack.i.h.bf16 %v8249_v38  ;;  %v8250_v17 = vunpack.i.l.bf16 %v8249_v38 }
  0xb8   :  { %v687_v55 = vsel %vm672_vm6, %v662_v48, %v8245_v51  ;;  %v688_v57 = vsel %vm672_vm6, %v663_v9, %v8246_v50 }
  0xb9   :  { %v737_v61 = vpack.c.bf16 %v8251_v52, %v8250_v17  ;;  %v712_v21 = vsel %vm697_vm7, %v687_v55, %v8250_v17  ;;  %v713_v43 = vsel %vm697_vm7, %v688_v57, %v8251_v52  ;;  %v8254_v1 = vpop.permute.xlu0 %8253 }
  0xba   :  { %v736_v0 = vpack.c.bf16 %v713_v43, %v712_v21  ;;  %v8256_v62 = vunpack.i.h.bf16 %v8254_v1  ;;  %v8255_v53 = vunpack.i.l.bf16 %v8254_v1  ;;  %v8259_v63 = vpop.permute.xlu1 %8258 }
  0xbb   :  { %7827 = vmatprep.mubr.msk.bf16.mxu0 %vm864_vm8, %v737_v61  ;;  %v8261_v58 = vunpack.i.h.bf16 %v8259_v63  ;;  %v8260_v3 = vunpack.i.l.bf16 %v8259_v63 }
  0xbc   :  { %v640_v4 = vsel %vm622_vm4, %v9462_v56, %v8256_v62  ;;  %v639_v5 = vsel %vm622_vm4, %v9433_v22, %v8255_v53 }
  0xbd   :  { %1010 = vmatmul.mubr.bf16.gmra.mxu0 %v736_v0  ;;  %v664_v6 = vsel %vm647_vm5, %v639_v5, %v8260_v3  ;;  %v665_v15 = vsel %vm647_vm5, %v640_v4, %v8261_v58  ;;  %v8264_v40 = vpop.permute.xlu0 %8263 }
  0xbe   :  { %v8266_v10 = vunpack.i.h.bf16 %v8264_v40  ;;  %v8265_v12 = vunpack.i.l.bf16 %v8264_v40  ;;  %v8269_v13 = vpop.permute.xlu1 %8268 }
  0xbf   :  { %v8271_v7 = vunpack.i.h.bf16 %v8269_v13  ;;  %v8270_v11 = vunpack.i.l.bf16 %v8269_v13 }
  0xc0   :  { %v689_v14 = vsel %vm672_vm6, %v664_v6, %v8265_v12  ;;  %v690_v8 = vsel %vm672_vm6, %v665_v15, %v8266_v10 }
  0xc1   :  { %v739_v54 = vpack.c.bf16 %v8271_v7, %v8270_v11  ;;  %v8274_v56 = vpop.permute.xlu0 %8273  ;;  %v714_v23 = vsel %vm697_vm7, %v689_v14, %v8270_v11  ;;  %v715_v22 = vsel %vm697_vm7, %v690_v8, %v8271_v7 }
  0xc2   :  { %v8276_v24 = vunpack.i.h.bf16 %v8274_v56  ;;  %v8275_v16 = vunpack.i.l.bf16 %v8274_v56  ;;  %v8279_v25 = vpop.permute.xlu1 %8278  ;;  %v738_v2 = vpack.c.bf16 %v715_v22, %v714_v23 }
  0xc3   :  { %v8281_v26 = vunpack.i.h.bf16 %v8279_v25  ;;  %v8280_v27 = vunpack.i.l.bf16 %v8279_v25  ;;  %7828 = vmatprep.mubr.msk.bf16.mxu0 %vm864_vm8, %v739_v54  ;;  %v766_v25 = vlaneseq }
  0xc4   :  { %v642_v28 = vsel %vm622_vm4, %v9488_v18, %v8276_v24  ;;  %v641_v29 = vsel %vm622_vm4, %v9483_v19, %v8275_v16 }
  0xc5   :  { %v666_v30 = vsel %vm647_vm5, %v641_v29, %v8280_v27  ;;  %v667_v31 = vsel %vm647_vm5, %v642_v28, %v8281_v26  ;;  %1020 = vmatmul.mubr.bf16.gmra.mxu0 %v738_v2  ;;  %v8284_v32 = vpop.permute.xlu0 %8283  ;;  %v767_v2 = vshrl.u32 %v766_v25, 7  ;;  %v764_v27 = vld [vmem:[%s13985_s2] sm:$0x3]  ;;  %s9069_s2 = smov 122  }
  0xc6   :  { %v8286_v42 = vunpack.i.h.bf16 %v8284_v32  ;;  %v8285_v35 = vunpack.i.l.bf16 %v8284_v32  ;;  %v8289_v36 = vpop.permute.xlu1 %8288 }
  0xc7   :  { %v8291_v37 = vunpack.i.h.bf16 %v8289_v36  ;;  %v8290_v39 = vunpack.i.l.bf16 %v8289_v36  ;;  %v768_v26 = vsub.s32 0, %v767_v2  ;;  %v772_v28 = vsub.s32 1, %v767_v2 }
  0xc8   :  { %v691_v34 = vsel %vm672_vm6, %v666_v30, %v8285_v35  ;;  %v692_v44 = vsel %vm672_vm6, %v667_v31, %v8286_v42  ;;  %v9068_v30 = vmov 1983009808  }
  0xc9   :  { %v741_v45 = vpack.c.bf16 %v8291_v37, %v8290_v39  ;;  %v716_v18 = vsel %vm697_vm7, %v691_v34, %v8290_v39  ;;  %v717_v19 = vsel %vm697_vm7, %v692_v44, %v8291_v37  ;;  %v8294_v46 = vpop.permute.xlu0 %8293  ;;  %v9726_v29 = vrot.slane %v764_v27, %v768_v26 }
  0xca   :  { %v740_v47 = vpack.c.bf16 %v717_v19, %v716_v18  ;;  %v8296_v33 = vunpack.i.h.bf16 %v8294_v46  ;;  %v8295_v48 = vunpack.i.l.bf16 %v8294_v46  ;;  %v8299_v9 = vpop.permute.xlu1 %8298  ;;  %v1159_v31 = vunpack.c.l.s4 %v9068_v30 }
  0xcb   :  { %7829 = vmatprep.mubr.msk.bf16.mxu0 %vm864_vm8, %v741_v45  ;;  %v8301_v49 = vunpack.i.h.bf16 %v8299_v9  ;;  %v8300_v50 = vunpack.i.l.bf16 %v8299_v9  ;;  %v9728_v32 = vrot.slane %v764_v27, %v772_v28 }
  0xcc   :  { %v644_v51 = vsel %vm622_vm4, %v9527_v59, %v8296_v33  ;;  %v643_v38 = vsel %vm622_vm4, %v9493_v20, %v8295_v48  ;;  %v1160_v36 = vunpack.c.0.s8 %v1159_v31 }
  0xcd   :  { %1030 = vmatmul.mubr.bf16.gmra.mxu0 %v740_v47  ;;  %v668_v52 = vsel %vm647_vm5, %v643_v38, %v8300_v50  ;;  %v669_v17 = vsel %vm647_vm5, %v644_v51, %v8301_v49  ;;  %v8304_v55 = vpop.permute.xlu0 %8303 }
  0xce   :  { %v8306_v57 = vunpack.i.h.bf16 %v8304_v55  ;;  %v8305_v61 = vunpack.i.l.bf16 %v8304_v55  ;;  %v8309_v21 = vpop.permute.xlu1 %8308  ;;  %v9732_v18 = vsub.s32 %v1160_v36, %v767_v2 }
  0xcf   :  { %v8311_v43 = vunpack.i.h.bf16 %v8309_v21  ;;  %v8310_v1 = vunpack.i.l.bf16 %v8309_v21 }
  0xd0   :  { %v693_v0 = vsel %vm672_vm6, %v668_v52, %v8305_v61  ;;  %v694_v62 = vsel %vm672_vm6, %v669_v17, %v8306_v57  ;;  %14277 = vst [vmem:[#allocation2_spill] sm:$0xff] %v9732_v18 }
  0xd1   :  { %v743_v53 = vpack.c.bf16 %v8311_v43, %v8310_v1  ;;  %v8314_v59 = vpop.permute.xlu0 %8313  ;;  %v718_v63 = vsel %vm697_vm7, %v693_v0, %v8310_v1  ;;  %v719_v20 = vsel %vm697_vm7, %v694_v62, %v8311_v43 }
  0xd2   :  { %v8316_v58 = vunpack.i.h.bf16 %v8314_v59  ;;  %v8315_v3 = vunpack.i.l.bf16 %v8314_v59  ;;  %v8319_v4 = vpop.permute.xlu1 %8318  ;;  %v742_v5 = vpack.c.bf16 %v719_v20, %v718_v63 }
  0xd3   :  { %v8321_v6 = vunpack.i.h.bf16 %v8319_v4  ;;  %v8320_v15 = vunpack.i.l.bf16 %v8319_v4  ;;  %7830 = vmatprep.mubr.msk.bf16.mxu0 %vm864_vm8, %v743_v53 }
  0xd4   :  { %v646_v40 = vsel %vm622_vm4, %v9560_v41, %v8316_v58  ;;  %v645_v10 = vsel %vm622_vm4, %v9532_v60, %v8315_v3  ;;  %vm5558_vm4 = vcmask 1045509  }
  0xd5   :  { %v670_v12 = vsel %vm647_vm5, %v645_v10, %v8320_v15  ;;  %v671_v13 = vsel %vm647_vm5, %v646_v40, %v8321_v6  ;;  %1040 = vmatmul.mubr.bf16.gmra.mxu0 %v742_v5  ;;  %v8324_v7 = vpop.permute.xlu0 %8323  ;;  %vm5561_vm5 = vcmask 1046534  }
  0xd6   :  { %v8326_v11 = vunpack.i.h.bf16 %v8324_v7  ;;  %v8325_v14 = vunpack.i.l.bf16 %v8324_v7  ;;  %v8329_v8 = vpop.permute.xlu1 %8328 }
  0xd7   :  { %v8331_v54 = vunpack.i.h.bf16 %v8329_v8  ;;  %v8330_v56 = vunpack.i.l.bf16 %v8329_v8 }
  0xd8   :  { %v695_v23 = vsel %vm672_vm6, %v670_v12, %v8325_v14  ;;  %v696_v22 = vsel %vm672_vm6, %v671_v13, %v8326_v11 }
  0xd9   :  { %v745_v24 = vpack.c.bf16 %v8331_v54, %v8330_v56  ;;  %v720_v41 = vsel %vm697_vm7, %v695_v23, %v8330_v56  ;;  %v721_v60 = vsel %vm697_vm7, %v696_v22, %v8331_v54  ;;  %vm5564_vm7 = vcmask 1047559  }
  0xda   :  { %v744_v16 = vpack.c.bf16 %v721_v60, %v720_v41 }
  0xdb   :  { %7831 = vmatprep.mubr.msk.bf16.mxu0 %vm864_vm8, %v745_v24  ;;  %vm5959_vm8 = vcmask 80896  }
  0xdd   :  { %1050 = vmatmul.mubr.bf16.gmra.mxu0 %v744_v16 }
 0x145   :  { %v941_v42 = vpop.f32.mrf.mxu0 }
 0x146   :  { %v942_v35 = vadd.f32 %v941_v42, %v9726_v29 }
 0x147   :  { %v943_v37 = vpop.f32.mrf.mxu0 }
 0x148   :  { %v944_v39 = vadd.f32 %v943_v37, %v9728_v32  ;;  %v1060_v44 = vmax.f32 %v942_v35, 0.0 }
 0x149   :  { %v945_v34 = vpop.f32.mrf.mxu0 }
 0x14a   :  { %v1061_v45 = vmax.f32 %v944_v39, 0.0  ;;  %v946_v19 = vadd.f32 %v945_v34, %v9726_v29 }
 0x14b   :  { %v947_v46 = vpop.f32.mrf.mxu0 }
 0x14c   :  { %v1156_v47 = vcombine.low %v1060_v44, %v1061_v45  ;;  %v1157_v33 = vcombine.high %v1060_v44, %v1061_v45  ;;  %v948_v48 = vadd.f32 %v947_v46, %v9728_v32  ;;  %v1062_v38 = vmax.f32 %v946_v19, 0.0 }
 0x14d   :  { %v951_v9 = vpop.f32.mrf.mxu0 }
 0x14e   :  { %v1164_v49 = vrot.slane %v1156_v47, %v9732_v18  ;;  %v1171_v50 = vrot.slane %v1157_v33, %v9732_v18  ;;  %v1063_v51 = vmax.f32 %v948_v48, 0.0  ;;  %v952_v17 = vadd.f32 %v951_v9, %v9726_v29 }
 0x14f   :  { %v953_v52 = vpop.f32.mrf.mxu0 }
 0x150   :  { %v1172_v55 = vcombine.high %v1164_v49, %v1164_v49  ;;  %v1173_v57 = vcombine.high %v1171_v50, %v1171_v50  ;;  %v1174_v61 = vcombine.low %v1062_v38, %v1063_v51  ;;  %v1175_v21 = vcombine.high %v1062_v38, %v1063_v51 }
 0x151   :  { %v955_v43 = vpop.f32.mrf.mxu0  ;;  %v9740_v1 = vrot.slane %v1164_v49, %v9732_v18  ;;  %v954_v0 = vadd.f32 %v953_v52, %v9728_v32  ;;  %v9744_v62 = vrot.slane %v1171_v50, %v9732_v18  ;;  %v1064_v3 = vmax.f32 %v952_v17, 0.0 }
 0x152   :  { %v1182_v53 = vrot.slane %v1174_v61, %v9732_v18  ;;  %v1189_v59 = vrot.slane %v1175_v21, %v9732_v18  ;;  %v9749_v20 = vrot.slane %v1172_v55, %v9732_v18  ;;  %v9752_v58 = vrot.slane %v1173_v57, %v9732_v18 }
 0x153   :  { %v957_v63 = vpop.f32.mrf.mxu0  ;;  %v1595_v5 = vcombine.high %v9740_v1, %v9740_v1  ;;  %v9758_v6 = vsel %vm2548_vm9, %v9740_v1, -inf  ;;  %v1065_v15 = vmax.f32 %v954_v0, 0.0  ;;  %v2578_v10 = vsel %vm2548_vm9, %v9744_v62, -inf }
 0x154   :  { %v958_v40 = vadd.f32 %v957_v63, %v9728_v32  ;;  %v1190_v12 = vcombine.high %v1182_v53, %v1182_v53  ;;  %v1191_v13 = vcombine.high %v1189_v59, %v1189_v59  ;;  %v956_v7 = vadd.f32 %v955_v43, %v9726_v29 }
 0x155   :  { %v961_v4 = vpop.f32.mrf.mxu0  ;;  %v9765_v14 = vrot.slane %v1182_v53, %v9732_v18  ;;  %v9768_v8 = vrot.slane %v1189_v59, %v9732_v18  ;;  %v1192_v54 = vcombine.low %v1064_v3, %v1065_v15  ;;  %v1193_v56 = vcombine.high %v1064_v3, %v1065_v15 }
 0x156   :  { %v1611_v22 = vcombine.high %v9744_v62, %v9744_v62  ;;  %v1619_v24 = vcombine.high %v9752_v58, %v9752_v58  ;;  %v2550_v41 = vrot.slane %v9758_v6, 4  ;;  %v1067_v2 = vmax.f32 %v958_v40, 0.0 }
 0x157   :  { %v963_v11 = vpop.f32.mrf.mxu0  ;;  %v1200_v16 = vrot.slane %v1192_v54, %v9732_v18  ;;  %v1207_v25 = vrot.slane %v1193_v56, %v9732_v18  ;;  %v962_v26 = vadd.f32 %v961_v4, %v9726_v29  ;;  %v2579_v27 = vrot.slane %v2578_v10, 4 }
 0x158   :  { %v9781_v28 = vrot.slane %v1190_v12, %v9732_v18  ;;  %v1066_v30 = vmax.f32 %v956_v7, 0.0  ;;  %v964_v31 = vadd.f32 %v963_v11, %v9728_v32  ;;  %v9785_v35 = vrot.slane %v1191_v13, %v9732_v18 }
 0x159   :  { %v965_v60 = vpop.f32.mrf.mxu0  ;;  %v9789_v36 = vsel %vm2548_vm9, %v9765_v14, -inf  ;;  %v9793_v37 = vsel %vm2548_vm9, %v9768_v8, -inf  ;;  %v1208_v39 = vcombine.high %v1200_v16, %v1200_v16  ;;  %v1209_v34 = vcombine.high %v1207_v25, %v1207_v25 }
 0x15a   :  { %v9796_v44 = vrot.slane %v1200_v16, %v9732_v18  ;;  %v1210_v45 = vcombine.low %v1066_v30, %v1067_v2  ;;  %v1211_v19 = vcombine.high %v1066_v30, %v1067_v2  ;;  %v1068_v48 = vmax.f32 %v962_v26, 0.0 }
 0x15b   :  { %v967_v42 = vpop.f32.mrf.mxu0  ;;  %v1069_v9 = vmax.f32 %v964_v31, 0.0  ;;  %v9803_v49 = vrot.slane %v1207_v25, %v9732_v18  ;;  %v966_v38 = vadd.f32 %v965_v60, %v9726_v29  ;;  %v9815_v61 = vrot.slane %v1208_v39, %v9732_v18 }
 0x15c   :  { %v1218_v50 = vrot.slane %v1210_v45, %v9732_v18  ;;  %v1225_v51 = vrot.slane %v1211_v19, %v9732_v18  ;;  %v9818_v21 = vrot.slane %v1209_v34, %v9732_v18  ;;  %v9822_v43 = vsel %vm2548_vm9, %v9796_v44, -inf }
 0x15d   :  { %v971_v46 = vpop.f32.mrf.mxu0  ;;  %v9824_v53 = vmax.f32 %v2578_v10, %v2579_v27  ;;  %v1228_v3 = vcombine.low %v1068_v48, %v1069_v9  ;;  %v1229_v4 = vcombine.high %v1068_v48, %v1069_v9  ;;  %v9828_v15 = vsel %vm2548_vm9, %v9803_v49, -inf }
 0x15e   :  { %v1226_v59 = vcombine.high %v1218_v50, %v1218_v50  ;;  %v1227_v63 = vcombine.high %v1225_v51, %v1225_v51  ;;  %v9831_v40 = vrot.slane %v1218_v50, %v9732_v18  ;;  %v1070_v12 = vmax.f32 %v966_v38, 0.0 }
 0x15f   :  { %v973_v0 = vpop.f32.mrf.mxu0  ;;  %v968_v13 = vadd.f32 %v967_v42, %v9728_v32  ;;  %v9839_v11 = vrot.slane %v1225_v51, %v9732_v18  ;;  %v1236_v54 = vrot.slane %v1228_v3, %v9732_v18  ;;  %v1243_v25 = vrot.slane %v1229_v4, %v9732_v18 }
 0x160   :  { %v2691_v26 = vrot.slane %v9828_v15, 4  ;;  %v9850_v27 = vrot.slane %v1226_v59, %v9732_v18  ;;  %v9853_v30 = vrot.slane %v1227_v63, %v9732_v18  ;;  %v972_v31 = vadd.f32 %v971_v46, %v9726_v29 }
 0x161   :  { %v975_v2 = vpop.f32.mrf.mxu0  ;;  %v1244_v39 = vcombine.high %v1236_v54, %v1236_v54  ;;  %v1071_v34 = vmax.f32 %v968_v13, 0.0  ;;  %v974_v45 = vadd.f32 %v973_v0, %v9728_v32  ;;  %v9863_v48 = vsel %vm2548_vm9, %v9831_v40, -inf }
 0x162   :  { %v9867_v9 = vsel %vm2548_vm9, %v9839_v11, -inf  ;;  %v9870_v46 = vrot.slane %v1236_v54, %v9732_v18  ;;  %v1245_v50 = vcombine.high %v1243_v25, %v1243_v25  ;;  %v9873_v51 = vrot.slane %v1243_v25, %v9732_v18 }
 0x163   :  { %v1246_v38 = vcombine.low %v1070_v12, %v1071_v34  ;;  %v1247_v0 = vcombine.high %v1070_v12, %v1071_v34  ;;  %v977_v59 = vpop.f32.mrf.mxu0  ;;  %v1072_v4 = vmax.f32 %v972_v31, 0.0  ;;  %v976_v13 = vadd.f32 %v975_v2, %v9726_v29 }
 0x164   :  { %v9881_v7 = vrot.slane %v1244_v39, %v9732_v18  ;;  %v1073_v16 = vmax.f32 %v974_v45, 0.0  ;;  %v978_v3 = vadd.f32 %v977_v59, %v9728_v32  ;;  %v9893_v31 = vrot.slane %v1245_v50, %v9732_v18 }
 0x165   :  { %v1254_v54 = vrot.slane %v1246_v38, %v9732_v18  ;;  %v1261_v25 = vrot.slane %v1247_v0, %v9732_v18  ;;  %v9897_v39 = vsel %vm2548_vm9, %v9870_v46, -inf  ;;  %v9901_v45 = vsel %vm2548_vm9, %v9873_v51, -inf }
 0x166   :  { %v1264_v17 = vcombine.low %v1072_v4, %v1073_v16  ;;  %v1265_v63 = vcombine.high %v1072_v4, %v1073_v16  ;;  %v1074_v19 = vmax.f32 %v976_v13, 0.0  ;;  %v1075_v2 = vmax.f32 %v978_v3, 0.0 }
 0x167   :  { %v1262_v38 = vcombine.high %v1254_v54, %v1254_v54  ;;  %v1263_v0 = vcombine.high %v1261_v25, %v1261_v25  ;;  %v2581_v50 = vrot.slane %v9824_v53, 2  ;;  %v9907_v34 = vrot.slane %v1254_v54, %v9732_v18 }
 0x168   :  { %v9910_v52 = vrot.slane %v1261_v25, %v9732_v18  ;;  %v1272_v42 = vrot.slane %v1264_v17, %v9732_v18  ;;  %v1279_v12 = vrot.slane %v1265_v63, %v9732_v18  ;;  %v2585_v3 = vsel %vm2556_vm10, %v1611_v22, -inf }
 0x169   :  { %v9923_v54 = vrot.slane %v1262_v38, %v9732_v18  ;;  %v9926_v25 = vrot.slane %v1263_v0, %v9732_v18  ;;  %v9930_v59 = vsel %vm2548_vm9, %v9907_v34, -inf  ;;  %v1282_v4 = vcombine.low %v1074_v19, %v1075_v2 }
 0x16a   :  { %14278 = vst [vmem:[#allocation3_spill] sm:$0xff] %v9910_v52  ;;  %v1280_v17 = vcombine.high %v1272_v42, %v1272_v42  ;;  %v1281_v63 = vcombine.high %v1279_v12, %v1279_v12  ;;  %v1283_v16 = vcombine.high %v1074_v19, %v1075_v2  ;;  %v2582_v13 = vmax.f32 %v9824_v53, %v2581_v50 }
 0x16b   :  { %14279 = vst [vmem:[#allocation4_spill] sm:$0xff] %v9923_v54  ;;  %14280 = vst [vmem:[#allocation5_spill] sm:$0xff] %v9926_v25  ;;  %v2586_v38 = vrot.slane %v2585_v3, 4  ;;  %v2592_v0 = vsel %vm2548_vm9, %v9752_v58, -inf  ;;  %v9941_v33 = vsel %vm2548_vm9, %v9910_v52, -inf  ;;  %v9944_v57 = vrot.slane %v1272_v42, %v9732_v18 }
 0x16c   :  { %v9947_v19 = vrot.slane %v1280_v17, %v9732_v18  ;;  %v9950_v53 = vrot.slane %v1279_v12, %v9732_v18  ;;  %v9958_v62 = vrot.slane %v1281_v63, %v9732_v18  ;;  %v9965_v17 = vrot.slane %v1282_v4, %v9732_v18 }
 0x16d   :  { %14281 = vst [vmem:[#allocation6_spill] sm:$0xff] %v9944_v57  ;;  %v9962_v42 = vsel %vm2548_vm9, %v9944_v57, -inf  ;;  %v9968_v12 = vrot.slane %v1283_v16, %v9732_v18  ;;  %v2583_v60 = vrot.slane %v2582_v13, 1  ;;  %v2587_v22 = vmax.f32 %v2585_v3, %v2586_v38 }
 0x16e   :  { %14282 = vst [vmem:[#allocation7_spill] sm:$0xff] %v9962_v42  ;;  %v9973_v50 = vsel %vm2548_vm9, %v9950_v53, -inf  ;;  %v2593_v63 = vrot.slane %v2592_v0, 4  ;;  %v2599_v16 = vsel %vm2556_vm10, %v1619_v24, -inf  ;;  %v2551_v2 = vmax.f32 %v9758_v6, %v2550_v41 }
 0x16f   :  { %v2588_v38 = vrot.slane %v2587_v22, 2  ;;  %v9993_v23 = vmax.f32 %v2582_v13, %v2583_v60  ;;  %v2600_v24 = vrot.slane %v2599_v16, 4  ;;  %v14284_v60 = vcombine.high %v9803_v49, %v9803_v49 }
 0x170   :  { %v2594_v56 = vmax.f32 %v2592_v0, %v2593_v63  ;;  %v2557_v0 = vsel %vm2556_vm10, %v1595_v5, -inf  ;;  %v2692_v63 = vmax.f32 %v9828_v15, %v2691_v26  ;;  %v2552_v41 = vrot.slane %v2551_v2, 2 }
 0x171   :  { %14283 = vst [vmem:[#allocation8_spill] sm:$0xff] %v9993_v23  ;;  %v2589_v58 = vmax.f32 %v2587_v22, %v2588_v38  ;;  %v2697_v13 = vsel %vm2556_vm10, %v14284_v60, -inf  ;;  %v2564_v22 = vsel %vm2548_vm9, %v9749_v20, -inf  ;;  %v2601_v6 = vmax.f32 %v2599_v16, %v2600_v24 }
 0x172   :  { %v2595_v10 = vrot.slane %v2594_v56, 2  ;;  %v2558_v47 = vrot.slane %v2557_v0, 4  ;;  %v2693_v1 = vrot.slane %v2692_v63, 2  ;;  %v2698_v4 = vrot.slane %v2697_v13, 4 }
 0x173   :  { %v2590_v38 = vrot.slane %v2589_v58, 1  ;;  %v2565_v5 = vrot.slane %v2564_v22, 4  ;;  %v2602_v15 = vrot.slane %v2601_v6, 2  ;;  %v2553_v26 = vmax.f32 %v2551_v2, %v2552_v41 }
 0x174   :  { %v2596_v3 = vmax.f32 %v2594_v56, %v2595_v10  ;;  %v2559_v42 = vmax.f32 %v2557_v0, %v2558_v47  ;;  %v2694_v49 = vmax.f32 %v2692_v63, %v2693_v1  ;;  %v2699_v25 = vmax.f32 %v2697_v13, %v2698_v4 }
 0x175   :  { %v10011_v55 = vmax.f32 %v2589_v58, %v2590_v38  ;;  %v2566_v60 = vmax.f32 %v2564_v22, %v2565_v5  ;;  %v10015_v54 = vrot.slane %v9965_v17, %v9732_v18  ;;  %v2603_v56 = vmax.f32 %v2601_v6, %v2602_v15 }
 0x176   :  { %v2597_v57 = vrot.slane %v2596_v3, 1  ;;  %v2554_v16 = vrot.slane %v2553_v26, 1  ;;  %v2560_v24 = vrot.slane %v2559_v42, 2  ;;  %v2695_v52 = vrot.slane %v2694_v49, 1 }
 0x177   :  { %14285 = vst [vmem:[#allocation9_spill] sm:$0xff] %v10011_v55  ;;  %v8332_v10 = vpack.i.bf16 %v10011_v55, %v9993_v23  ;;  %v2700_v58 = vrot.slane %v2699_v25, 2  ;;  %v2567_v38 = vrot.slane %v2566_v60, 2  ;;  %v2604_v2 = vrot.slane %v2603_v56, 1 }
 0x178   :  { %v10020_v47 = vmax.f32 %v2596_v3, %v2597_v57  ;;  %v14287_v4 = vcombine.high %v9749_v20, %v9749_v20  ;;  %v2676_v63 = vsel %vm2548_vm9, %v9815_v61, -inf  ;;  %v10028_v13 = vmax.f32 %v2553_v26, %v2554_v16 }
 0x179   :  { %8333 = vrot.lane.b32.xlu0 %v8332_v10, %s9069_s2  ;;  %v2561_v22 = vmax.f32 %v2559_v42, %v2560_v24  ;;  %v2701_v6 = vmax.f32 %v2699_v25, %v2700_v58  ;;  %v2568_v41 = vmax.f32 %v2566_v60, %v2567_v38  ;;  %v10030_v1 = vmax.f32 %v2603_v56, %v2604_v2 }
 0x17a   :  { %14286 = vst [vmem:[#allocation10_spill] sm:$0xff] %v10020_v47  ;;  %v2571_v0 = vsel %vm2556_vm10, %v14287_v4, -inf  ;;  %14288 = vst [vmem:[#allocation11_spill] sm:$0xff] %v10028_v13  ;;  %v2677_v15 = vrot.slane %v2676_v63, 4  ;;  %v14290_v57 = vcombine.high %v9815_v61, %v9815_v61  ;;  %v10036_v10 = vmax.f32 %v2694_v49, %v2695_v52 }
 0x17b   :  { %14289 = vst [vmem:[#allocation12_spill] sm:$0xff] %v10030_v1  ;;  %v2572_v5 = vrot.slane %v2571_v0, 4  ;;  %v2562_v20 = vrot.slane %v2561_v22, 1  ;;  %v2702_v4 = vrot.slane %v2701_v6, 1  ;;  %v8347_v26 = vpack.i.bf16 %v10030_v1, %v10020_v47 }
 0x17c   :  { %v2683_v3 = vsel %vm2556_vm10, %v14290_v57, -inf  ;;  %14291 = vst [vmem:[#allocation13_spill] sm:$0xff] %v10036_v10  ;;  %v2678_v25 = vmax.f32 %v2676_v63, %v2677_v15  ;;  %v14292_v60 = vrot.slane %v9789_v36, 4  ;;  %v2569_v61 = vrot.slane %v2568_v41, 1 }
 0x17d   :  { %v2684_v23 = vrot.slane %v2683_v3, 4  ;;  %v2573_v42 = vmax.f32 %v2571_v0, %v2572_v5  ;;  %v10043_v16 = vmax.f32 %v2561_v22, %v2562_v20  ;;  %v10045_v24 = vmax.f32 %v2701_v6, %v2702_v4  ;;  %8348 = vrot.lane.b32.xlu1 %v8347_v26, %s9069_s2 }
 0x17e   :  { %v2608_v56 = vmax.f32 %v9789_v36, %v14292_v60  ;;  %v2679_v49 = vrot.slane %v2678_v25, 2  ;;  %v14295_v2 = vcombine.high %v9765_v14, %v9765_v14  ;;  %v2704_v57 = vsel %vm2548_vm9, %v9818_v21, -inf }
 0x17f   :  { %14293 = vst [vmem:[#allocation14_spill] sm:$0xff] %v10043_v16  ;;  %14294 = vst [vmem:[#allocation15_spill] sm:$0xff] %v10045_v24  ;;  %v2685_v58 = vmax.f32 %v2683_v3, %v2684_v23  ;;  %v2574_v52 = vrot.slane %v2573_v42, 2  ;;  %v8337_v63 = vpack.i.bf16 %v10043_v16, %v10028_v13  ;;  %v8372_v36 = vpack.i.bf16 %v10045_v24, %v10036_v10 }
 0x180   :  { %v2609_v38 = vrot.slane %v2608_v56, 2  ;;  %v2613_v0 = vsel %vm2556_vm10, %v14295_v2, -inf  ;;  %v2680_v23 = vmax.f32 %v2678_v25, %v2679_v49  ;;  %v2705_v20 = vrot.slane %v2704_v57, 4 }
 0x181   :  { %v2686_v22 = vrot.slane %v2685_v58, 2  ;;  %v2614_v6 = vrot.slane %v2613_v0, 4  ;;  %v2575_v5 = vmax.f32 %v2573_v42, %v2574_v52  ;;  %8338 = vrot.lane.b32.xlu0 %v8337_v63, %s9069_s2  ;;  %v14296_v4 = vcombine.high %v9818_v21, %v9818_v21  ;;  %8373 = vrot.lane.b32.xlu1 %v8372_v36, %s9069_s2 }
 0x182   :  { %v2610_v15 = vmax.f32 %v2608_v56, %v2609_v38  ;;  %v2681_v2 = vrot.slane %v2680_v23, 1  ;;  %v2706_v49 = vmax.f32 %v2704_v57, %v2705_v20  ;;  %v14297_v38 = vrot.slane %v9793_v37, 4 }
 0x183   :  { %v2687_v3 = vmax.f32 %v2685_v58, %v2686_v22  ;;  %v2615_v14 = vmax.f32 %v2613_v0, %v2614_v6  ;;  %v2711_v26 = vsel %vm2556_vm10, %v14296_v4, -inf  ;;  %v2576_v60 = vrot.slane %v2575_v5, 1  ;;  %v981_v0 = vpop.f32.mrf.mxu0 }
 0x184   :  { %v2611_v42 = vrot.slane %v2610_v15, 1  ;;  %v2712_v25 = vrot.slane %v2711_v26, 4  ;;  %v2636_v58 = vmax.f32 %v9793_v37, %v14297_v38  ;;  %v10067_v63 = vmax.f32 %v2568_v41, %v2569_v61 }
 0x185   :  { %v2688_v56 = vrot.slane %v2687_v3, 1  ;;  %v2616_v52 = vrot.slane %v2615_v14, 2  ;;  %v10069_v22 = vmax.f32 %v2575_v5, %v2576_v60  ;;  %v10071_v21 = vmax.f32 %v2680_v23, %v2681_v2 }
 0x186   :  { %14298 = vst [vmem:[#allocation16_spill] sm:$0xff] %v10067_v63  ;;  %v2713_v6 = vmax.f32 %v2711_v26, %v2712_v25  ;;  %v2707_v10 = vrot.slane %v2706_v49, 2  ;;  %v2637_v24 = vrot.slane %v2636_v58, 2  ;;  %v14302_v37 = vcombine.high %v9768_v8, %v9768_v8  ;;  %v983_v26 = vpop.f32.mrf.mxu0 }
 0x187   :  { %14299 = vst [vmem:[#allocation17_spill] sm:$0xff] %v10069_v22  ;;  %14300 = vst [vmem:[#allocation18_spill] sm:$0xff] %v10071_v21  ;;  %v10073_v36 = vmax.f32 %v2687_v3, %v2688_v56  ;;  %v2617_v4 = vmax.f32 %v2615_v14, %v2616_v52  ;;  %v8342_v57 = vpack.i.bf16 %v10069_v22, %v10067_v63 }
 0x188   :  { %v2714_v20 = vrot.slane %v2713_v6, 2  ;;  %v2641_v41 = vsel %vm2556_vm10, %v14302_v37, -inf  ;;  %v982_v61 = vadd.f32 %v981_v0, %v9726_v29  ;;  %v10084_v23 = vmax.f32 %v2610_v15, %v2611_v42 }
 0x189   :  { %14301 = vst [vmem:[#allocation19_spill] sm:$0xff] %v10073_v36  ;;  %v8382_v5 = vpack.i.bf16 %v10073_v36, %v10071_v21  ;;  %v2618_v3 = vrot.slane %v2617_v4, 1  ;;  %v2708_v14 = vmax.f32 %v2706_v49, %v2707_v10  ;;  %8343 = vrot.lane.b32.xlu0 %v8342_v57, %s9069_s2  ;;  %v2642_v2 = vrot.slane %v2641_v41, 4 }
 0x18a   :  { %14303 = vst [vmem:[#allocation20_spill] sm:$0xff] %v10084_v23  ;;  %v2715_v60 = vmax.f32 %v2713_v6, %v2714_v20  ;;  %v1076_v25 = vmax.f32 %v982_v61, 0.0  ;;  %v984_v56 = vadd.f32 %v983_v26, %v9728_v32  ;;  %v2638_v38 = vmax.f32 %v2636_v58, %v2637_v24 }
 0x18b   :  { %8383 = vrot.lane.b32.xlu1 %v8382_v5, %s9069_s2  ;;  %v10089_v8 = vmax.f32 %v2617_v4, %v2618_v3  ;;  %v2709_v52 = vrot.slane %v2708_v14, 1  ;;  %v14305_v0 = vrot.slane %v9863_v48, 4  ;;  %v2643_v10 = vmax.f32 %v2641_v41, %v2642_v2 }
 0x18c   :  { %v2716_v42 = vrot.slane %v2715_v60, 1  ;;  %v1077_v49 = vmax.f32 %v984_v56, 0.0  ;;  %v14306_v6 = vcombine.high %v9831_v40, %v9831_v40  ;;  %v10100_v20 = vrot.slane %v9968_v12, %v9732_v18 }
 0x18d   :  { %14304 = vst [vmem:[#allocation21_spill] sm:$0xff] %v10089_v8  ;;  %v2720_v15 = vmax.f32 %v9863_v48, %v14305_v0  ;;  %v8352_v4 = vpack.i.bf16 %v10089_v8, %v10084_v23  ;;  %v10104_v24 = vmax.f32 %v2708_v14, %v2709_v52  ;;  %v2644_v48 = vrot.slane %v2643_v10, 2 }
 0x18e   :  { %v2725_v57 = vsel %vm2556_vm10, %v14306_v6, -inf  ;;  %v10106_v37 = vmax.f32 %v2715_v60, %v2716_v42  ;;  %v1300_v41 = vcombine.low %v1076_v25, %v1077_v49  ;;  %v1301_v61 = vcombine.high %v1076_v25, %v1077_v49 }
 0x18f   :  { %14307 = vst [vmem:[#allocation22_spill] sm:$0xff] %v10104_v24  ;;  %v2721_v58 = vrot.slane %v2720_v15, 2  ;;  %8353 = vrot.lane.b32.xlu0 %v8352_v4, %s9069_s2  ;;  %v2726_v3 = vrot.slane %v2725_v57, 4  ;;  %v2620_v26 = vsel %vm2548_vm9, %v9781_v28, -inf  ;;  %v2639_v2 = vrot.slane %v2638_v38, 1 }
 0x190   :  { %14308 = vst [vmem:[#allocation23_spill] sm:$0xff] %v10106_v37  ;;  %v8387_v14 = vpack.i.bf16 %v10106_v37, %v10104_v24  ;;  %v2645_v56 = vmax.f32 %v2643_v10, %v2644_v48  ;;  %v14309_v60 = vcombine.high %v9781_v28, %v9781_v28  ;;  %v14310_v52 = vcombine.high %v9965_v17, %v9965_v17  ;;  %v985_v10 = vpop.f32.mrf.mxu0 }
 0x191   :  { %v2722_v5 = vmax.f32 %v2720_v15, %v2721_v58  ;;  %v14311_v15 = vcombine.high %v9968_v12, %v9968_v12  ;;  %v2727_v49 = vmax.f32 %v2725_v57, %v2726_v3  ;;  %v2621_v6 = vrot.slane %v2620_v26, 4 }
 0x192   :  { %v2627_v25 = vsel %vm2556_vm10, %v14309_v60, -inf  ;;  %v10123_v0 = vrot.slane %v14310_v52, %v9732_v18  ;;  %v10133_v28 = vsel %vm2548_vm9, %v10015_v54, -inf  ;;  %8388 = vrot.lane.b32.xlu1 %v8387_v14, %s9069_s2  ;;  %v2646_v4 = vrot.slane %v2645_v56, 1 }
 0x193   :  { %v10129_v42 = vrot.slane %v14311_v15, %v9732_v18  ;;  %v1308_v17 = vrot.slane %v1300_v41, %v9732_v18  ;;  %v1315_v58 = vrot.slane %v1301_v61, %v9732_v18  ;;  %v2723_v48 = vrot.slane %v2722_v5, 1 }
 0x194   :  { %v2728_v60 = vrot.slane %v2727_v49, 2  ;;  %v2622_v52 = vmax.f32 %v2620_v26, %v2621_v6  ;;  %v2628_v12 = vrot.slane %v2627_v25, 4  ;;  %v10142_v3 = vsel %vm2548_vm9, %v10100_v20, -inf  ;;  %v987_v6 = vpop.f32.mrf.mxu0 }
 0x195   :  { %v10144_v15 = vmax.f32 %v2638_v38, %v2639_v2  ;;  %v10146_v40 = vmax.f32 %v2645_v56, %v2646_v4  ;;  %v1316_v24 = vcombine.high %v1308_v17, %v1308_v17  ;;  %v1317_v37 = vcombine.high %v1315_v58, %v1315_v58 }
 0x196   :  { %v2729_v14 = vmax.f32 %v2727_v49, %v2728_v60  ;;  %v10156_v38 = vrot.slane %v1308_v17, %v9732_v18  ;;  %v10158_v2 = vmax.f32 %v2722_v5, %v2723_v48  ;;  %v2623_v4 = vrot.slane %v2622_v52, 2 }
 0x197   :  { %14312 = vst [vmem:[#allocation24_spill] sm:$0xff] %v10144_v15  ;;  %14313 = vst [vmem:[#allocation25_spill] sm:$0xff] %v10146_v40  ;;  %v8357_v57 = vpack.i.bf16 %v10146_v40, %v10144_v15  ;;  %v2629_v41 = vmax.f32 %v2627_v25, %v2628_v12  ;;  %v986_v61 = vadd.f32 %v985_v10, %v9726_v29  ;;  %v14315_v60 = vrot.slane %v9867_v9, 4 }
 0x198   :  { %14314 = vst [vmem:[#allocation26_spill] sm:$0xff] %v10158_v2  ;;  %v2730_v56 = vrot.slane %v2729_v14, 1  ;;  %v988_v49 = vadd.f32 %v987_v6, %v9728_v32  ;;  %v14316_v15 = vcombine.high %v9839_v11, %v9839_v11  ;;  %v2624_v48 = vmax.f32 %v2622_v52, %v2623_v4 }
 0x199   :  { %8358 = vrot.lane.b32.xlu0 %v8357_v57, %s9069_s2  ;;  %v2748_v26 = vmax.f32 %v9867_v9, %v14315_v60  ;;  %v2630_v40 = vrot.slane %v2629_v41, 2  ;;  %v1078_v12 = vmax.f32 %v986_v61, 0.0  ;;  %v2648_v10 = vsel %vm2548_vm9, %v9785_v35, -inf }
 0x19a   :  { %v2753_v17 = vsel %vm2556_vm10, %v14316_v15, -inf  ;;  %v10170_v5 = vmax.f32 %v2729_v14, %v2730_v56  ;;  %v1079_v57 = vmax.f32 %v988_v49, 0.0  ;;  %v2625_v9 = vrot.slane %v2624_v48, 1 }
 0x19b   :  { %v2754_v25 = vrot.slane %v2753_v17, 4  ;;  %v2749_v23 = vrot.slane %v2748_v26, 2  ;;  %v2631_v60 = vmax.f32 %v2629_v41, %v2630_v40  ;;  %v2649_v14 = vrot.slane %v2648_v10, 4 }
 0x19c   :  { %14317 = vst [vmem:[#allocation27_spill] sm:$0xff] %v10170_v5  ;;  %v8392_v6 = vpack.i.bf16 %v10170_v5, %v10158_v2  ;;  %v1318_v11 = vcombine.low %v1078_v12, %v1079_v57  ;;  %v1319_v8 = vcombine.high %v1078_v12, %v1079_v57  ;;  %v10177_v52 = vrot.slane %v1315_v58, %v9732_v18 }
 0x19d   :  { %v2755_v21 = vmax.f32 %v2753_v17, %v2754_v25  ;;  %v2750_v15 = vmax.f32 %v2748_v26, %v2749_v23  ;;  %v2632_v61 = vrot.slane %v2631_v60, 1  ;;  %v14318_v4 = vcombine.high %v9785_v35, %v9785_v35  ;;  %v991_v35 = vpop.f32.mrf.mxu0 }
 0x19e   :  { %8393 = vrot.lane.b32.xlu1 %v8392_v6, %s9069_s2  ;;  %v10185_v2 = vrot.slane %v1316_v24, %v9732_v18  ;;  %v10188_v40 = vrot.slane %v1317_v37, %v9732_v18  ;;  %v10192_v23 = vsel %vm2548_vm9, %v10156_v38, -inf  ;;  %v2650_v58 = vmax.f32 %v2648_v10, %v2649_v14 }
 0x19f   :  { %v2756_v56 = vrot.slane %v2755_v21, 2  ;;  %v2655_v49 = vsel %vm2556_vm10, %v14318_v4, -inf  ;;  %v10194_v41 = vmax.f32 %v2624_v48, %v2625_v9  ;;  %v10196_v26 = vmax.f32 %v2631_v60, %v2632_v61 }
 0x1a0   :  { %v2751_v17 = vrot.slane %v2750_v15, 1  ;;  %v10200_v12 = vsel %vm2548_vm9, %v10177_v52, -inf  ;;  %v1326_v24 = vrot.slane %v1318_v11, %v9732_v18  ;;  %v1333_v37 = vrot.slane %v1319_v8, %v9732_v18 }
 0x1a1   :  { %14319 = vst [vmem:[#allocation28_spill] sm:$0xff] %v10194_v41  ;;  %14320 = vst [vmem:[#allocation29_spill] sm:$0xff] %v10196_v26  ;;  %v2757_v25 = vmax.f32 %v2755_v21, %v2756_v56  ;;  %v2656_v57 = vrot.slane %v2655_v49, 4  ;;  %v8362_v6 = vpack.i.bf16 %v10196_v26, %v10194_v41  ;;  %v2651_v48 = vrot.slane %v2650_v58, 2 }
 0x1a2   :  { %v992_v9 = vadd.f32 %v991_v35, %v9726_v29  ;;  %v10218_v56 = vmax.f32 %v2750_v15, %v2751_v17  ;;  %v993_v35 = vpop.f32.mrf.mxu0  ;;  %v1334_v60 = vcombine.high %v1326_v24, %v1326_v24  ;;  %v1335_v41 = vcombine.high %v1333_v37, %v1333_v37 }
 0x1a3   :  { %v2758_v10 = vrot.slane %v2757_v25, 1  ;;  %8363 = vrot.lane.b32.xlu0 %v8362_v6, %s9069_s2  ;;  %v2652_v14 = vmax.f32 %v2650_v58, %v2651_v48  ;;  %v10224_v26 = vrot.slane %v1326_v24, %v9732_v18  ;;  %v2657_v11 = vmax.f32 %v2655_v49, %v2656_v57 }
 0x1a4   :  { %14321 = vst [vmem:[#allocation30_spill] sm:$0xff] %v10218_v56  ;;  %v1080_v61 = vmax.f32 %v992_v9, 0.0  ;;  %v994_v6 = vadd.f32 %v993_v35, %v9728_v32  ;;  %v2732_v15 = vsel %vm2548_vm9, %v9850_v27, -inf  ;;  %v14323_v17 = vcombine.high %v9850_v27, %v9850_v27  ;;  %v995_v9 = vpop.f32.mrf.mxu0 }
 0x1a5   :  { %v10220_v4 = vmax.f32 %v2757_v25, %v2758_v10  ;;  %v14324_v58 = vrot.slane %v9822_v43, 4  ;;  %v10239_v10 = vrot.slane %v1333_v37, %v9732_v18  ;;  %v2658_v49 = vrot.slane %v2657_v11, 2 }
 0x1a6   :  { %v2739_v25 = vsel %vm2556_vm10, %v14323_v17, -inf  ;;  %v2733_v57 = vrot.slane %v2732_v15, 4  ;;  %v2653_v35 = vrot.slane %v2652_v14, 1  ;;  %v1081_v21 = vmax.f32 %v994_v6, 0.0  ;;  %v997_v47 = vpop.f32.mrf.mxu0 }
 0x1a7   :  { %14322 = vst [vmem:[#allocation31_spill] sm:$0xff] %v10220_v4  ;;  %v8397_v8 = vpack.i.bf16 %v10220_v4, %v10218_v56  ;;  %v2664_v24 = vmax.f32 %v9822_v43, %v14324_v58  ;;  %v2740_v48 = vrot.slane %v2739_v25, 4  ;;  %v14325_v27 = vcombine.high %v9796_v44, %v9796_v44 }
 0x1a8   :  { %v2659_v4 = vmax.f32 %v2657_v11, %v2658_v49  ;;  %v2734_v5 = vmax.f32 %v2732_v15, %v2733_v57  ;;  %v1337_v36 = vcombine.high %v1080_v61, %v1081_v21  ;;  %v10249_v1 = vrot.slane %v1334_v60, %v9732_v18 }
 0x1a9   :  { %8398 = vrot.lane.b32.xlu1 %v8397_v8, %s9069_s2  ;;  %v2665_v56 = vrot.slane %v2664_v24, 2  ;;  %v2669_v17 = vsel %vm2556_vm10, %v14325_v27, -inf  ;;  %v2741_v43 = vmax.f32 %v2739_v25, %v2740_v48  ;;  %v1336_v8 = vcombine.low %v1080_v61, %v1081_v21 }
 0x1aa   :  { %v2670_v58 = vrot.slane %v2669_v17, 4  ;;  %v2660_v22 = vrot.slane %v2659_v4, 1  ;;  %v2735_v13 = vrot.slane %v2734_v5, 2  ;;  %v10252_v44 = vrot.slane %v1335_v41, %v9732_v18 }
 0x1ab   :  { %v2666_v63 = vmax.f32 %v2664_v24, %v2665_v56  ;;  %v2742_v16 = vrot.slane %v2741_v43, 2  ;;  %v10254_v11 = vmax.f32 %v2652_v14, %v2653_v35  ;;  %v996_v15 = vadd.f32 %v995_v9, %v9726_v29 }
 0x1ac   :  { %v2671_v6 = vmax.f32 %v2669_v17, %v2670_v58  ;;  %v10257_v25 = vmax.f32 %v2659_v4, %v2660_v22  ;;  %v1344_v21 = vrot.slane %v1336_v8, %v9732_v18  ;;  %v2736_v61 = vmax.f32 %v2734_v5, %v2735_v13 }
 0x1ad   :  { %14326 = vst [vmem:[#allocation32_spill] sm:$0xff] %v10254_v11  ;;  %v2743_v56 = vmax.f32 %v2741_v43, %v2742_v16  ;;  %v1351_v49 = vrot.slane %v1337_v36, %v9732_v18  ;;  %v2667_v60 = vrot.slane %v2666_v63, 1  ;;  %v998_v57 = vadd.f32 %v997_v47, %v9728_v32 }
 0x1ae   :  { %14327 = vst [vmem:[#allocation33_spill] sm:$0xff] %v10257_v25  ;;  %v8367_v41 = vpack.i.bf16 %v10257_v25, %v10254_v11  ;;  %v2737_v14 = vrot.slane %v2736_v61, 1  ;;  %v2672_v9 = vrot.slane %v2671_v6, 2  ;;  %v10272_v16 = vsel %vm2548_vm9, %v10224_v26, -inf }
 0x1af   :  { %v2744_v48 = vrot.slane %v2743_v56, 1  ;;  %v10276_v36 = vsel %vm2548_vm9, %v10239_v10, -inf  ;;  %v1352_v47 = vcombine.high %v1344_v21, %v1344_v21  ;;  %v1082_v35 = vmax.f32 %v996_v15, 0.0 }
 0x1b0   :  { %8368 = vrot.lane.b32.xlu0 %v8367_v41, %s9069_s2  ;;  %v10279_v5 = vmax.f32 %v2736_v61, %v2737_v14  ;;  %v1353_v27 = vcombine.high %v1351_v49, %v1351_v49  ;;  %v10284_v17 = vrot.slane %v1344_v21, %v9732_v18  ;;  %v10287_v43 = vrot.slane %v1351_v49, %v9732_v18 }
 0x1b1   :  { %v10281_v4 = vmax.f32 %v2743_v56, %v2744_v48  ;;  %v10289_v58 = vmax.f32 %v2666_v63, %v2667_v60  ;;  %v2673_v13 = vmax.f32 %v2671_v6, %v2672_v9  ;;  %v1083_v41 = vmax.f32 %v998_v57, 0.0 }
 0x1b2   :  { %14328 = vst [vmem:[#allocation34_spill] sm:$0xff] %v10279_v5  ;;  %v2760_v61 = vsel %vm2548_vm9, %v9853_v30, -inf  ;;  %v14331_v15 = vcombine.high %v9853_v30, %v9853_v30  ;;  %v14332_v14 = vrot.slane %v9901_v45, 4  ;;  %v14333_v63 = vcombine.high %v9873_v51, %v9873_v51 }
 0x1b3   :  { %14329 = vst [vmem:[#allocation35_spill] sm:$0xff] %v10281_v4  ;;  %14330 = vst [vmem:[#allocation36_spill] sm:$0xff] %v10289_v58  ;;  %v8402_v8 = vpack.i.bf16 %v10281_v4, %v10279_v5  ;;  %v2761_v56 = vrot.slane %v2760_v61, 4  ;;  %v2674_v6 = vrot.slane %v2673_v13, 1  ;;  %v1354_v57 = vcombine.low %v1082_v35, %v1083_v41 }
 0x1b4   :  { %v2767_v21 = vsel %vm2556_vm10, %v14331_v15, -inf  ;;  %v2804_v49 = vmax.f32 %v9901_v45, %v14332_v14  ;;  %v2809_v60 = vsel %vm2556_vm10, %v14333_v63, -inf  ;;  %v1355_v48 = vcombine.high %v1082_v35, %v1083_v41 }
 0x1b5   :  { %8403 = vrot.lane.b32.xlu1 %v8402_v8, %s9069_s2  ;;  %v2768_v9 = vrot.slane %v2767_v21, 4  ;;  %v10308_v22 = vrot.slane %v1352_v47, %v9732_v18  ;;  %v2762_v30 = vmax.f32 %v2760_v61, %v2761_v56  ;;  %v2810_v24 = vrot.slane %v2809_v60, 4 }
 0x1b6   :  { %v2805_v15 = vrot.slane %v2804_v49, 2  ;;  %v10311_v37 = vrot.slane %v1353_v27, %v9732_v18  ;;  %v10313_v45 = vmax.f32 %v2673_v13, %v2674_v6  ;;  %v2816_v14 = vsel %vm2548_vm9, %v9893_v31, -inf }
 0x1b7   :  { %v2769_v51 = vmax.f32 %v2767_v21, %v2768_v9  ;;  %v10319_v8 = vsel %vm2548_vm9, %v10284_v17, -inf  ;;  %v10323_v47 = vsel %vm2548_vm9, %v10287_v43, -inf  ;;  %v2763_v35 = vrot.slane %v2762_v30, 2 }
 0x1b8   :  { %14334 = vst [vmem:[#allocation37_spill] sm:$0xff] %v10313_v45  ;;  %v2806_v41 = vmax.f32 %v2804_v49, %v2805_v15  ;;  %v8377_v27 = vpack.i.bf16 %v10313_v45, %v10289_v58  ;;  %v10328_v13 = vrot.slane %v1354_v57, %v9732_v18  ;;  %v10331_v61 = vrot.slane %v1355_v48, %v9732_v18 }
 0x1b9   :  { %v2811_v56 = vmax.f32 %v2809_v60, %v2810_v24  ;;  %v2764_v21 = vmax.f32 %v2762_v30, %v2763_v35  ;;  %v2770_v63 = vrot.slane %v2769_v51, 2  ;;  %v2817_v9 = vrot.slane %v2816_v14, 4 }
 0x1ba   :  { %v2807_v6 = vrot.slane %v2806_v41, 1  ;;  %8378 = vrot.lane.b32.xlu0 %v8377_v27, %s9069_s2  ;;  %v14337_v60 = vcombine.high %v9893_v31, %v9893_v31  ;;  %v14338_v30 = vrot.slane %v9897_v39, 4  ;;  %v14339_v49 = vcombine.high %v9870_v46, %v9870_v46 }
 0x1bb   :  { %v2765_v48 = vrot.slane %v2764_v21, 1  ;;  %v2771_v4 = vmax.f32 %v2769_v51, %v2770_v63  ;;  %v2812_v57 = vrot.slane %v2811_v56, 2  ;;  %v2818_v15 = vmax.f32 %v2816_v14, %v2817_v9 }
 0x1bc   :  { %v10352_v27 = vmax.f32 %v2806_v41, %v2807_v6  ;;  %v2823_v24 = vsel %vm2556_vm10, %v14337_v60, -inf  ;;  %v2776_v35 = vmax.f32 %v9897_v39, %v14338_v30  ;;  %v2781_v51 = vsel %vm2556_vm10, %v14339_v49, -inf }
 0x1bd   :  { %v10350_v5 = vmax.f32 %v2764_v21, %v2765_v48  ;;  %v2772_v58 = vrot.slane %v2771_v4, 1  ;;  %v2813_v21 = vmax.f32 %v2811_v56, %v2812_v57  ;;  %v2819_v41 = vrot.slane %v2818_v15, 2 }
 0x1be   :  { %14336 = vst [vmem:[#allocation39_spill] sm:$0xff] %v10352_v27  ;;  %v2824_v63 = vrot.slane %v2823_v24, 4  ;;  %v2782_v6 = vrot.slane %v2781_v51, 4  ;;  %v2777_v9 = vrot.slane %v2776_v35, 2  ;;  %v14341_v31 = vrot.slane %v9973_v50, 4 }
 0x1bf   :  { %14335 = vst [vmem:[#allocation38_spill] sm:$0xff] %v10350_v5  ;;  %v10365_v14 = vmax.f32 %v2771_v4, %v2772_v58  ;;  %v14342_v48 = vcombine.high %v9950_v53, %v9950_v53  ;;  %v2814_v30 = vrot.slane %v2813_v21, 1  ;;  %v2820_v46 = vmax.f32 %v2818_v15, %v2819_v41 }
 0x1c0   :  { %v2916_v60 = vmax.f32 %v9973_v50, %v14341_v31  ;;  %v2825_v11 = vmax.f32 %v2823_v24, %v2824_v63  ;;  %v2783_v49 = vmax.f32 %v2781_v51, %v2782_v6  ;;  %v2778_v57 = vmax.f32 %v2776_v35, %v2777_v9 }
 0x1c1   :  { %14340 = vst [vmem:[#allocation40_spill] sm:$0xff] %v10365_v14  ;;  %v2921_v39 = vsel %vm2556_vm10, %v14342_v48, -inf  ;;  %v8407_v56 = vpack.i.bf16 %v10365_v14, %v10350_v5  ;;  %v10376_v45 = vmax.f32 %v2813_v21, %v2814_v30  ;;  %v2821_v25 = vrot.slane %v2820_v46, 1 }
 0x1c2   :  { %v2917_v4 = vrot.slane %v2916_v60, 2  ;;  %v2922_v58 = vrot.slane %v2921_v39, 4  ;;  %v2826_v55 = vrot.slane %v2825_v11, 2  ;;  %v2784_v50 = vrot.slane %v2783_v49, 2 }
 0x1c3   :  { %14343 = vst [vmem:[#allocation41_spill] sm:$0xff] %v10376_v45  ;;  %8408 = vrot.lane.b32.xlu1 %v8407_v56, %s9069_s2  ;;  %v2779_v53 = vrot.slane %v2778_v57, 1  ;;  %v2788_v15 = vsel %vm2548_vm9, %v9881_v7, -inf  ;;  %v8412_v24 = vpack.i.bf16 %v10376_v45, %v10352_v27  ;;  %v10383_v51 = vmax.f32 %v2820_v46, %v2821_v25 }
 0x1c4   :  { %v2918_v31 = vmax.f32 %v2916_v60, %v2917_v4  ;;  %v2923_v48 = vmax.f32 %v2921_v39, %v2922_v58  ;;  %v2827_v35 = vmax.f32 %v2825_v11, %v2826_v55  ;;  %v2785_v41 = vmax.f32 %v2783_v49, %v2784_v50 }
 0x1c5   :  { %14344 = vst [vmem:[#allocation42_spill] sm:$0xff] %v10383_v51  ;;  %v10385_v21 = vmax.f32 %v2778_v57, %v2779_v53  ;;  %v2789_v9 = vrot.slane %v2788_v15, 4  ;;  %8413 = vrot.lane.b32.xlu0 %v8412_v24, %s9069_s2  ;;  %v14346_v39 = vcombine.high %v9881_v7, %v9881_v7  ;;  %v2900_v25 = vsel %vm2548_vm9, %v9947_v19, -inf }
 0x1c6   :  { %v2919_v63 = vrot.slane %v2918_v31, 1  ;;  %v2924_v6 = vrot.slane %v2923_v48, 2  ;;  %v2828_v30 = vrot.slane %v2827_v35, 1  ;;  %v2786_v60 = vrot.slane %v2785_v41, 1 }
 0x1c7   :  { %14345 = vst [vmem:[#allocation43_spill] sm:$0xff] %v10385_v21  ;;  %v2795_v56 = vsel %vm2556_vm10, %v14346_v39, -inf  ;;  %v2790_v11 = vmax.f32 %v2788_v15, %v2789_v9  ;;  %v2901_v58 = vrot.slane %v2900_v25, 4  ;;  %v14350_v50 = vcombine.high %v9947_v19, %v9947_v19 }
 0x1c8   :  { %v10394_v46 = vmax.f32 %v2918_v31, %v2919_v63  ;;  %v2925_v55 = vmax.f32 %v2923_v48, %v2924_v6  ;;  %v2796_v49 = vrot.slane %v2795_v56, 4  ;;  %v10396_v57 = vmax.f32 %v2827_v35, %v2828_v30 }
 0x1c9   :  { %v10398_v4 = vmax.f32 %v2785_v41, %v2786_v60  ;;  %v2907_v7 = vsel %vm2556_vm10, %v14350_v50, -inf  ;;  %v2791_v24 = vrot.slane %v2790_v11, 2  ;;  %v2902_v15 = vmax.f32 %v2900_v25, %v2901_v58 }
 0x1ca   :  { %14347 = vst [vmem:[#allocation44_spill] sm:$0xff] %v10394_v46  ;;  %14348 = vst [vmem:[#allocation45_spill] sm:$0xff] %v10396_v57  ;;  %v2926_v53 = vrot.slane %v2925_v55, 1  ;;  %v2797_v39 = vmax.f32 %v2795_v56, %v2796_v49  ;;  %v2908_v5 = vrot.slane %v2907_v7, 4  ;;  %v8427_v31 = vpack.i.bf16 %v10396_v57, %v10383_v51 }
 0x1cb   :  { %14349 = vst [vmem:[#allocation46_spill] sm:$0xff] %v10398_v4  ;;  %v8417_v48 = vpack.i.bf16 %v10398_v4, %v10385_v21  ;;  %v14351_v35 = vrot.slane %v9930_v59, 4  ;;  %v2792_v19 = vmax.f32 %v2790_v11, %v2791_v24  ;;  %v2903_v30 = vrot.slane %v2902_v15, 2 }
 0x1cc   :  { %v10411_v63 = vmax.f32 %v2925_v55, %v2926_v53  ;;  %v2798_v6 = vrot.slane %v2797_v39, 2  ;;  %v2909_v9 = vmax.f32 %v2907_v7, %v2908_v5  ;;  %8428 = vrot.lane.b32.xlu1 %v8427_v31, %s9069_s2  ;;  %v14353_v56 = vcombine.high %v9907_v34, %v9907_v34 }
 0x1cd   :  { %v2832_v41 = vmax.f32 %v9930_v59, %v14351_v35  ;;  %8418 = vrot.lane.b32.xlu0 %v8417_v48, %s9069_s2  ;;  %v2928_v49 = vsel %vm2548_vm9, %v9958_v62, -inf  ;;  %v2793_v55 = vrot.slane %v2792_v19, 1  ;;  %v2904_v58 = vmax.f32 %v2902_v15, %v2903_v30 }
 0x1ce   :  { %14352 = vst [vmem:[#allocation47_spill] sm:$0xff] %v10411_v63  ;;  %v2837_v25 = vsel %vm2556_vm10, %v14353_v56, -inf  ;;  %v8452_v59 = vpack.i.bf16 %v10411_v63, %v10394_v46  ;;  %v2799_v11 = vmax.f32 %v2797_v39, %v2798_v6  ;;  %v2910_v5 = vrot.slane %v2909_v9, 2 }
 0x1cf   :  { %v2833_v60 = vrot.slane %v2832_v41, 2  ;;  %v2838_v7 = vrot.slane %v2837_v25, 4  ;;  %v2929_v53 = vrot.slane %v2928_v49, 4  ;;  %v10423_v24 = vmax.f32 %v2792_v19, %v2793_v55 }
 0x1d0   :  { %v2800_v31 = vrot.slane %v2799_v11, 1  ;;  %v2911_v48 = vmax.f32 %v2909_v9, %v2910_v5  ;;  %v14355_v34 = vcombine.high %v9958_v62, %v9958_v62  ;;  %8453 = vrot.lane.b32.xlu1 %v8452_v59, %s9069_s2  ;;  %v2905_v56 = vrot.slane %v2904_v58, 1  ;;  %v1001_v9 = vpop.f32.mrf.mxu0 }
 0x1d1   :  { %v2834_v50 = vmax.f32 %v2832_v41, %v2833_v60  ;;  %14354 = vst [vmem:[#allocation48_spill] sm:$0xff] %v10423_v24  ;;  %v2839_v46 = vmax.f32 %v2837_v25, %v2838_v7  ;;  %v2930_v39 = vmax.f32 %v2928_v49, %v2929_v53  ;;  %v14357_v19 = vrot.slane %v9941_v33, 4 }
 0x1d2   :  { %v2935_v35 = vsel %vm2556_vm10, %v14355_v34, -inf  ;;  %v10430_v6 = vmax.f32 %v2799_v11, %v2800_v31  ;;  %v2912_v15 = vrot.slane %v2911_v48, 1  ;;  %v10435_v60 = vmax.f32 %v2904_v58, %v2905_v56  ;;  %v14361_v31 = vld [vmem:[#allocation3_spill] sm:$0xff] }
 0x1d3   :  { %v2835_v21 = vrot.slane %v2834_v50, 1  ;;  %v2936_v41 = vrot.slane %v2935_v35, 4  ;;  %v2860_v30 = vmax.f32 %v9941_v33, %v14357_v19  ;;  %v2840_v55 = vrot.slane %v2839_v46, 2 }
 0x1d4   :  { %14356 = vst [vmem:[#allocation49_spill] sm:$0xff] %v10430_v6  ;;  %14358 = vst [vmem:[#allocation50_spill] sm:$0xff] %v10435_v60  ;;  %v2931_v5 = vrot.slane %v2930_v39, 2  ;;  %v8422_v59 = vpack.i.bf16 %v10430_v6, %v10423_v24  ;;  %v10441_v25 = vmax.f32 %v2911_v48, %v2912_v15  ;;  %v14362_v34 = vcombine.high %v14361_v31, %v14361_v31  ;;  %v1003_v15 = vpop.f32.mrf.mxu0 }
 0x1d5   :  { %v10437_v62 = vmax.f32 %v2834_v50, %v2835_v21  ;;  %v2937_v49 = vmax.f32 %v2935_v35, %v2936_v41  ;;  %v2861_v11 = vrot.slane %v2860_v30, 2  ;;  %v2841_v7 = vmax.f32 %v2839_v46, %v2840_v55 }
 0x1d6   :  { %14360 = vst [vmem:[#allocation52_spill] sm:$0xff] %v10441_v25  ;;  %v2932_v53 = vmax.f32 %v2930_v39, %v2931_v5  ;;  %v2865_v33 = vsel %vm2556_vm10, %v14362_v34, -inf  ;;  %v1002_v58 = vadd.f32 %v1001_v9, %v9726_v29  ;;  %8423 = vrot.lane.b32.xlu0 %v8422_v59, %s9069_s2  ;;  %v8462_v21 = vpack.i.bf16 %v10441_v25, %v10435_v60 }
 0x1d7   :  { %14359 = vst [vmem:[#allocation51_spill] sm:$0xff] %v10437_v62  ;;  %v2938_v50 = vrot.slane %v2937_v49, 2  ;;  %v2862_v56 = vmax.f32 %v2860_v30, %v2861_v11  ;;  %v2866_v48 = vrot.slane %v2865_v33, 4  ;;  %v2842_v35 = vrot.slane %v2841_v7, 1 }
 0x1d8   :  { %v2933_v41 = vrot.slane %v2932_v53, 1  ;;  %v1084_v46 = vmax.f32 %v1002_v58, 0.0  ;;  %v1004_v39 = vadd.f32 %v1003_v15, %v9728_v32  ;;  %v10454_v19 = vrot.slane %v10328_v13, %v9732_v18  ;;  %8463 = vrot.lane.b32.xlu1 %v8462_v21, %s9069_s2 }
 0x1d9   :  { %v2939_v9 = vmax.f32 %v2937_v49, %v2938_v50  ;;  %v2867_v55 = vmax.f32 %v2865_v33, %v2866_v48  ;;  %v14363_v5 = vrot.slane %v10133_v28, 4  ;;  %v10460_v30 = vmax.f32 %v2841_v7, %v2842_v35 }
 0x1da   :  { %v2863_v11 = vrot.slane %v2862_v56, 1  ;;  %v1085_v31 = vmax.f32 %v1004_v39, 0.0  ;;  %v14365_v34 = vcombine.high %v10015_v54, %v10015_v54  ;;  %v10466_v15 = vmax.f32 %v2932_v53, %v2933_v41  ;;  %v14368_v39 = vld [vmem:[#allocation4_spill] sm:$0xff] }
 0x1db   :  { %v2944_v59 = vmax.f32 %v10133_v28, %v14363_v5  ;;  %14364 = vst [vmem:[#allocation3_spill] sm:$0xff] %v10460_v30  ;;  %v2940_v60 = vrot.slane %v2939_v9, 1  ;;  %v2868_v25 = vrot.slane %v2867_v55, 2  ;;  %v8432_v49 = vpack.i.bf16 %v10460_v30, %v10437_v62 }
 0x1dc   :  { %v2949_v58 = vsel %vm2556_vm10, %v14365_v34, -inf  ;;  %14366 = vst [vmem:[#allocation53_spill] sm:$0xff] %v10466_v15  ;;  %v1372_v33 = vcombine.low %v1084_v46, %v1085_v31  ;;  %v1373_v50 = vcombine.high %v1084_v46, %v1085_v31  ;;  %v2844_v54 = vsel %vm2548_vm9, %v14368_v39, -inf }
 0x1dd   :  { %v2945_v21 = vrot.slane %v2944_v59, 2  ;;  %v2950_v28 = vrot.slane %v2949_v58, 4  ;;  %v10470_v7 = vmax.f32 %v2939_v9, %v2940_v60  ;;  %v2869_v48 = vmax.f32 %v2867_v55, %v2868_v25  ;;  %8433 = vrot.lane.b32.xlu0 %v8432_v49, %s9069_s2 }
 0x1de   :  { %v1380_v53 = vrot.slane %v1372_v33, %v9732_v18  ;;  %v1387_v41 = vrot.slane %v1373_v50, %v9732_v18  ;;  %v2845_v34 = vrot.slane %v2844_v54, 4  ;;  %v10479_v62 = vrot.slane %v10331_v61, %v9732_v18 }
 0x1df   :  { %14367 = vst [vmem:[#allocation54_spill] sm:$0xff] %v10470_v7  ;;  %v2946_v35 = vmax.f32 %v2944_v59, %v2945_v21  ;;  %v2951_v5 = vmax.f32 %v2949_v58, %v2950_v28  ;;  %v8467_v60 = vpack.i.bf16 %v10470_v7, %v10466_v15  ;;  %v10483_v25 = vmax.f32 %v2862_v56, %v2863_v11 }
 0x1e0   :  { %v2870_v46 = vrot.slane %v2869_v48, 1  ;;  %v14370_v9 = vcombine.high %v10328_v13, %v10328_v13  ;;  %v14371_v59 = vcombine.high %v10331_v61, %v10331_v61  ;;  %v1388_v58 = vcombine.high %v1380_v53, %v1380_v53 }
 0x1e1   :  { %14369 = vst [vmem:[#allocation4_spill] sm:$0xff] %v10483_v25  ;;  %v1978_v21 = vrot.slane %v1380_v53, %v9732_v18  ;;  %v10500_v56 = vsel %vm2548_vm9, %v10454_v19, -inf  ;;  %8468 = vrot.lane.b32.xlu1 %v8467_v60, %s9069_s2  ;;  %v2947_v13 = vrot.slane %v2946_v35, 1  ;;  %v2952_v49 = vrot.slane %v2951_v5, 2 }
 0x1e2   :  { %v10489_v55 = vrot.slane %v14370_v9, %v9732_v18  ;;  %v10495_v31 = vrot.slane %v14371_v59, %v9732_v18  ;;  %v10503_v11 = vmax.f32 %v2869_v48, %v2870_v46  ;;  %v1389_v50 = vcombine.high %v1387_v41, %v1387_v41  ;;  %v1005_v9 = vpop.f32.mrf.mxu0 }
 0x1e3   :  { %v10508_v61 = vrot.slane %v1387_v41, %v9732_v18  ;;  %v2846_v28 = vmax.f32 %v2844_v54, %v2845_v34  ;;  %v10514_v59 = vsel %vm2548_vm9, %v10479_v62, -inf  ;;  %v2953_v60 = vmax.f32 %v2951_v5, %v2952_v49 }
 0x1e4   :  { %14372 = vst [vmem:[#allocation55_spill] sm:$0xff] %v10503_v11  ;;  %v8437_v48 = vpack.i.bf16 %v10503_v11, %v10483_v25  ;;  %v1979_v33 = vcombine.high %v1978_v21, %v1978_v21  ;;  %v1986_v15 = vrot.slane %v1388_v58, %v9732_v18  ;;  %v14374_v54 = vcombine.high %v14368_v39, %v14368_v39  ;;  %v1007_v46 = vpop.f32.mrf.mxu0 }
 0x1e5   :  { %14373 = vst [vmem:[#allocation56_spill] sm:$0xff] %v10508_v61  ;;  %v10529_v25 = vmax.f32 %v2946_v35, %v2947_v13  ;;  %v2954_v5 = vrot.slane %v2953_v60, 1  ;;  %v10535_v39 = vrot.slane %v1389_v50, %v9732_v18  ;;  %v3222_v34 = vsel %vm2548_vm9, %v1978_v21, -inf }
 0x1e6   :  { %v2851_v41 = vsel %vm2556_vm10, %v14374_v54, -inf  ;;  %8438 = vrot.lane.b32.xlu0 %v8437_v48, %s9069_s2  ;;  %v2847_v54 = vrot.slane %v2846_v28, 2  ;;  %v10540_v53 = vsel %vm2548_vm9, %v10508_v61, -inf  ;;  %v1987_v13 = vcombine.high %v1986_v15, %v1986_v15 }
 0x1e7   :  { %14375 = vst [vmem:[#allocation57_spill] sm:$0xff] %v10529_v25  ;;  %14376 = vst [vmem:[#allocation58_spill] sm:$0xff] %v10535_v39  ;;  %v10542_v48 = vmax.f32 %v2953_v60, %v2954_v5  ;;  %v2852_v35 = vrot.slane %v2851_v41, 4  ;;  %v3229_v49 = vsel %vm2556_vm10, %v1979_v33, -inf  ;;  %v1006_v58 = vadd.f32 %v1005_v9, %v9726_v29 }
 0x1e8   :  { %v2848_v11 = vmax.f32 %v2846_v28, %v2847_v54  ;;  %v1008_v30 = vadd.f32 %v1007_v46, %v9728_v32  ;;  %v14378_v21 = vrot.slane %v10142_v3, 4  ;;  %v3223_v63 = vrot.slane %v3222_v34, 4  ;;  %v14380_v28 = vld [vmem:[#allocation5_spill] sm:$0xff] }
 0x1e9   :  { %14377 = vst [vmem:[#allocation59_spill] sm:$0xff] %v10542_v48  ;;  %v8472_v50 = vpack.i.bf16 %v10542_v48, %v10529_v25  ;;  %v2853_v7 = vmax.f32 %v2851_v41, %v2852_v35  ;;  %v1086_v60 = vmax.f32 %v1006_v58, 0.0  ;;  %v14379_v5 = vcombine.high %v10100_v20, %v10100_v20 }
 0x1ea   :  { %v2972_v24 = vmax.f32 %v10142_v3, %v14378_v21  ;;  %v2872_v9 = vsel %vm2548_vm9, %v14380_v28, -inf  ;;  %v2849_v54 = vrot.slane %v2848_v11, 1  ;;  %v1087_v35 = vmax.f32 %v1008_v30, 0.0 }
 0x1eb   :  { %v2977_v33 = vsel %vm2556_vm10, %v14379_v5, -inf  ;;  %8473 = vrot.lane.b32.xlu1 %v8472_v50, %s9069_s2  ;;  %v2854_v41 = vrot.slane %v2853_v7, 2  ;;  %v3230_v3 = vrot.slane %v3229_v49, 4  ;;  %v2873_v58 = vrot.slane %v2872_v9, 4 }
 0x1ec   :  { %v2978_v46 = vrot.slane %v2977_v33, 4  ;;  %v2973_v21 = vrot.slane %v2972_v24, 2  ;;  %v3236_v48 = vsel %vm2548_vm9, %v1986_v15, -inf  ;;  %v1390_v6 = vcombine.low %v1086_v60, %v1087_v35 }
 0x1ed   :  { %v2855_v20 = vmax.f32 %v2853_v7, %v2854_v41  ;;  %v1391_v5 = vcombine.high %v1086_v60, %v1087_v35  ;;  %v10562_v4 = vmax.f32 %v3222_v34, %v3223_v63  ;;  %v2874_v57 = vmax.f32 %v2872_v9, %v2873_v58 }
 0x1ee   :  { %v2979_v50 = vmax.f32 %v2977_v33, %v2978_v46  ;;  %v10565_v27 = vmax.f32 %v2848_v11, %v2849_v54  ;;  %v1398_v45 = vrot.slane %v1390_v6, %v9732_v18  ;;  %v3237_v14 = vrot.slane %v3236_v48, 4 }
 0x1ef   :  { %v2856_v30 = vrot.slane %v2855_v20, 1  ;;  %v1405_v25 = vrot.slane %v1391_v5, %v9732_v18  ;;  %v2974_v39 = vmax.f32 %v2972_v24, %v2973_v21  ;;  %v14382_v15 = vcombine.high %v14380_v28, %v14380_v28  ;;  %v1011_v24 = vpop.f32.mrf.mxu0 }
 0x1f0   :  { %14381 = vst [vmem:[#allocation5_spill] sm:$0xff] %v10565_v27  ;;  %v2980_v61 = vrot.slane %v2979_v50, 2  ;;  %v1406_v34 = vcombine.high %v1398_v45, %v1398_v45  ;;  %v2010_v11 = vrot.slane %v1398_v45, %v9732_v18  ;;  %v10577_v33 = vsel %vm2556_vm10, %v1987_v13, -inf }
 0x1f1   :  { %v2879_v63 = vsel %vm2556_vm10, %v14382_v15, -inf  ;;  %v10573_v7 = vmax.f32 %v2855_v20, %v2856_v30  ;;  %v1407_v60 = vcombine.high %v1405_v25, %v1405_v25  ;;  %14384 = vst [vmem:[#allocation61_spill] sm:$0xff] %v10577_v33  ;;  %v2026_v6 = vrot.slane %v1405_v25, %v9732_v18 }
 0x1f2   :  { %v2981_v9 = vmax.f32 %v2979_v50, %v2980_v61  ;;  %v2875_v54 = vrot.slane %v2874_v57, 2  ;;  %v2011_v28 = vcombine.high %v2010_v11, %v2010_v11  ;;  %v2018_v35 = vrot.slane %v1406_v34, %v9732_v18 }
 0x1f3   :  { %14383 = vst [vmem:[#allocation60_spill] sm:$0xff] %v10573_v7  ;;  %v8442_v41 = vpack.i.bf16 %v10573_v7, %v10565_v27  ;;  %v2880_v46 = vrot.slane %v2879_v63, 4  ;;  %v10583_v21 = vmax.f32 %v3229_v49, %v3230_v3  ;;  %v2027_v58 = vcombine.high %v2026_v6, %v2026_v6  ;;  %v1013_v3 = vpop.f32.mrf.mxu0 }
 0x1f4   :  { %v3278_v45 = vsel %vm2548_vm9, %v2010_v11, -inf  ;;  %v2975_v20 = vrot.slane %v2974_v39, 1  ;;  %v2034_v25 = vrot.slane %v1407_v60, %v9732_v18  ;;  %v3285_v61 = vsel %vm2556_vm10, %v2011_v28, -inf }
 0x1f5   :  { %14385 = vst [vmem:[#allocation62_spill] sm:$0xff] %v10583_v21  ;;  %8443 = vrot.lane.b32.xlu0 %v8442_v41, %s9069_s2  ;;  %v1012_v5 = vadd.f32 %v1011_v24, %v9726_v29  ;;  %v3279_v50 = vrot.slane %v3278_v45, 4  ;;  %v3306_v30 = vsel %vm2548_vm9, %v2026_v6, -inf  ;;  %v2982_v15 = vrot.slane %v2981_v9, 1 }
 0x1f6   :  { %v2876_v49 = vmax.f32 %v2874_v57, %v2875_v54  ;;  %v2019_v34 = vcombine.high %v2018_v35, %v2018_v35  ;;  %v3292_v11 = vsel %vm2548_vm9, %v2018_v35, -inf  ;;  %v2881_v51 = vmax.f32 %v2879_v63, %v2880_v46 }
 0x1f7   :  { %v1014_v13 = vadd.f32 %v1013_v3, %v9728_v32  ;;  %v3286_v27 = vrot.slane %v3285_v61, 4  ;;  %v3313_v60 = vsel %vm2556_vm10, %v2027_v58, -inf  ;;  %v10596_v28 = vmax.f32 %v2974_v39, %v2975_v20 }
 0x1f8   :  { %v10598_v24 = vmax.f32 %v3236_v48, %v3237_v14  ;;  %v2035_v7 = vcombine.high %v2034_v25, %v2034_v25  ;;  %v3307_v6 = vrot.slane %v3306_v30, 4  ;;  %v1088_v33 = vmax.f32 %v1012_v5, 0.0 }
 0x1f9   :  { %14386 = vst [vmem:[#allocation63_spill] sm:$0xff] %v10596_v28  ;;  %v10600_v57 = vmax.f32 %v3278_v45, %v3279_v50  ;;  %v3293_v54 = vrot.slane %v3292_v11, 4  ;;  %v10602_v21 = vmax.f32 %v2981_v9, %v2982_v15  ;;  %v2877_v63 = vrot.slane %v2876_v49, 1 }
 0x1fa   :  { %14387 = vst [vmem:[#allocation64_spill] sm:$0xff] %v10598_v24  ;;  %v10605_v35 = vsel %vm2556_vm10, %v2019_v34, -inf  ;;  %v3314_v46 = vrot.slane %v3313_v60, 4  ;;  %v2882_v3 = vrot.slane %v2881_v51, 2  ;;  %v1089_v41 = vmax.f32 %v1014_v13, 0.0 }
 0x1fb   :  { %14388 = vst [vmem:[#allocation65_spill] sm:$0xff] %v10600_v57  ;;  %14389 = vst [vmem:[#allocation66_spill] sm:$0xff] %v10602_v21  ;;  %v10607_v58 = vmax.f32 %v3285_v61, %v3286_v27  ;;  %v8477_v14 = vpack.i.bf16 %v10602_v21, %v10596_v28  ;;  %v2956_v39 = vsel %vm2548_vm9, %v10123_v0, -inf  ;;  %v14392_v48 = vcombine.high %v10123_v0, %v10123_v0 }
 0x1fc   :  { %14390 = vst [vmem:[#allocation67_spill] sm:$0xff] %v10605_v35  ;;  %v2883_v45 = vmax.f32 %v2881_v51, %v2882_v3  ;;  %v1408_v20 = vcombine.low %v1088_v33, %v1089_v41  ;;  %v1409_v5 = vcombine.high %v1088_v33, %v1089_v41  ;;  %v2957_v50 = vrot.slane %v2956_v39, 4  ;;  %v14396_v41 = vld [vmem:[#allocation7_spill] sm:$0xff] }
 0x1fd   :  { %14391 = vst [vmem:[#allocation68_spill] sm:$0xff] %v10607_v58  ;;  %v2963_v9 = vsel %vm2556_vm10, %v14392_v48, -inf  ;;  %v10618_v13 = vmax.f32 %v3306_v30, %v3307_v6  ;;  %8478 = vrot.lane.b32.xlu1 %v8477_v14, %s9069_s2  ;;  %v10621_v27 = vmax.f32 %v2876_v49, %v2877_v63  ;;  %v10626_v3 = vmax.f32 %v3292_v11, %v3293_v54 }
 0x1fe   :  { %v2964_v61 = vrot.slane %v2963_v9, 4  ;;  %v2884_v34 = vrot.slane %v2883_v45, 1  ;;  %v1416_v28 = vrot.slane %v1408_v20, %v9732_v18  ;;  %v1423_v0 = vrot.slane %v1409_v5, %v9732_v18 }
 0x1ff   :  { %14393 = vst [vmem:[#allocation69_spill] sm:$0xff] %v10618_v13  ;;  %14394 = vst [vmem:[#allocation70_spill] sm:$0xff] %v10621_v27  ;;  %v2958_v21 = vmax.f32 %v2956_v39, %v2957_v50  ;;  %v3320_v33 = vsel %vm2548_vm9, %v2034_v25, -inf  ;;  %v14397_v30 = vrot.slane %v14396_v41, 4  ;;  %v10635_v20 = vmax.f32 %v3313_v60, %v3314_v46 }
 0x200   :  { %14395 = vst [vmem:[#allocation71_spill] sm:$0xff] %v10626_v3  ;;  %v10632_v14 = vmax.f32 %v2883_v45, %v2884_v34  ;;  %v1424_v49 = vcombine.high %v1416_v28, %v1416_v28  ;;  %v1425_v63 = vcombine.high %v1423_v0, %v1423_v0  ;;  %v2042_v48 = vrot.slane %v1416_v28, %v9732_v18  ;;  %v14401_v28 = vld [vmem:[#allocation6_spill] sm:$0xff] }
 0x201   :  { %v2888_v6 = vmax.f32 %v14396_v41, %v14397_v30  ;;  %14399 = vst [vmem:[#allocation72_spill] sm:$0xff] %v10635_v20  ;;  %v2058_v39 = vrot.slane %v1423_v0, %v9732_v18  ;;  %v2959_v5 = vrot.slane %v2958_v21, 2  ;;  %v2965_v50 = vmax.f32 %v2963_v9, %v2964_v61  ;;  %v1015_v0 = vpop.f32.mrf.mxu0 }
 0x202   :  { %14398 = vst [vmem:[#allocation7_spill] sm:$0xff] %v10632_v14  ;;  %v3321_v11 = vrot.slane %v3320_v33, 4  ;;  %v8447_v25 = vpack.i.bf16 %v10632_v14, %v10621_v27  ;;  %v2043_v54 = vcombine.high %v2042_v48, %v2042_v48  ;;  %v2050_v15 = vrot.slane %v1424_v49, %v9732_v18 }
 0x203   :  { %v10642_v45 = vsel %vm2556_vm10, %v2035_v7, -inf  ;;  %v2059_v34 = vcombine.high %v2058_v39, %v2058_v39  ;;  %v3334_v41 = vsel %vm2548_vm9, %v2042_v48, -inf  ;;  %v14402_v60 = vcombine.high %v14401_v28, %v14401_v28  ;;  %v1017_v20 = vpop.f32.mrf.mxu0 }
 0x204   :  { %14400 = vst [vmem:[#allocation73_spill] sm:$0xff] %v10642_v45  ;;  %8448 = vrot.lane.b32.xlu0 %v8447_v25, %s9069_s2  ;;  %v10651_v9 = vrot.slane %v1425_v63, %v9732_v18  ;;  %v3341_v61 = vsel %vm2556_vm10, %v2043_v54, -inf  ;;  %v2889_v30 = vrot.slane %v2888_v6, 2  ;;  %v1016_v7 = vadd.f32 %v1015_v0, %v9726_v29 }
 0x205   :  { %v2893_v46 = vsel %vm2556_vm10, %v14402_v60, -inf  ;;  %v3335_v49 = vrot.slane %v3334_v41, 4  ;;  %v3362_v51 = vsel %vm2548_vm9, %v2058_v39, -inf  ;;  %v2960_v48 = vmax.f32 %v2958_v21, %v2959_v5 }
 0x206   :  { %v2966_v27 = vrot.slane %v2965_v50, 2  ;;  %v2051_v14 = vcombine.high %v2050_v15, %v2050_v15  ;;  %v3342_v28 = vrot.slane %v3341_v61, 4  ;;  %v3348_v60 = vsel %vm2548_vm9, %v2050_v15, -inf }
 0x207   :  { %v2894_v35 = vrot.slane %v2893_v46, 4  ;;  %v10658_v3 = vmax.f32 %v3320_v33, %v3321_v11  ;;  %v10662_v54 = vsel %vm2556_vm10, %v2059_v34, -inf  ;;  %v3363_v39 = vrot.slane %v3362_v51, 4 }
 0x208   :  { %v2890_v21 = vmax.f32 %v2888_v6, %v2889_v30  ;;  %v1090_v5 = vmax.f32 %v1016_v7, 0.0  ;;  %v10666_v58 = vmax.f32 %v3334_v41, %v3335_v49  ;;  %v3349_v15 = vrot.slane %v3348_v60, 4 }
 0x209   :  { %14403 = vst [vmem:[#allocation6_spill] sm:$0xff] %v10658_v3  ;;  %v2961_v57 = vrot.slane %v2960_v48, 1  ;;  %v2967_v24 = vmax.f32 %v2965_v50, %v2966_v27  ;;  %v10668_v25 = vmax.f32 %v3341_v61, %v3342_v28  ;;  %v10671_v33 = vsel %vm2556_vm10, %v2051_v14, -inf }
 0x20a   :  { %14404 = vst [vmem:[#allocation74_spill] sm:$0xff] %v10666_v58  ;;  %v3370_v11 = vrot.slane %v10662_v54, 4  ;;  %v2895_v34 = vmax.f32 %v2893_v46, %v2894_v35  ;;  %v1018_v6 = vadd.f32 %v1017_v20, %v9728_v32  ;;  %v2984_v41 = vsel %vm2548_vm9, %v10129_v42, -inf }
 0x20b   :  { %14405 = vst [vmem:[#allocation75_spill] sm:$0xff] %v10668_v25  ;;  %v10674_v63 = vmax.f32 %v2960_v48, %v2961_v57  ;;  %v2968_v0 = vrot.slane %v2967_v24, 1  ;;  %v2891_v30 = vrot.slane %v2890_v21, 1  ;;  %v2985_v49 = vrot.slane %v2984_v41, 4 }
 0x20c   :  { %v2896_v7 = vrot.slane %v2895_v34, 2  ;;  %v14407_v27 = vcombine.high %v10129_v42, %v10129_v42  ;;  %v1091_v61 = vmax.f32 %v1018_v6, 0.0  ;;  %v14409_v57 = vrot.slane %v10200_v12, 4 }
 0x20d   :  { %14406 = vst [vmem:[#allocation76_spill] sm:$0xff] %v10674_v63  ;;  %v10683_v50 = vmax.f32 %v2967_v24, %v2968_v0  ;;  %v10689_v48 = vmax.f32 %v3362_v51, %v3363_v39  ;;  %v2986_v25 = vmax.f32 %v2984_v41, %v2985_v49  ;;  %v3376_v24 = vsel %vm2548_vm9, %v10651_v9, -inf }
 0x20e   :  { %v2991_v14 = vsel %vm2556_vm10, %v14407_v27, -inf  ;;  %v3028_v46 = vmax.f32 %v10200_v12, %v14409_v57  ;;  %v2897_v28 = vmax.f32 %v2895_v34, %v2896_v7  ;;  %v1426_v42 = vcombine.low %v1090_v5, %v1091_v61 }
 0x20f   :  { %14408 = vst [vmem:[#allocation77_spill] sm:$0xff] %v10683_v50  ;;  %v2992_v35 = vrot.slane %v2991_v14, 4  ;;  %v8482_v45 = vpack.i.bf16 %v10683_v50, %v10674_v63  ;;  %v1427_v3 = vcombine.high %v1090_v5, %v1091_v61  ;;  %v10695_v0 = vmax.f32 %v2890_v21, %v2891_v30 }
 0x210   :  { %v2898_v6 = vrot.slane %v2897_v28, 1  ;;  %v2987_v13 = vrot.slane %v2986_v25, 2  ;;  %v1434_v12 = vrot.slane %v1426_v42, %v9732_v18  ;;  %v3029_v34 = vrot.slane %v3028_v46, 2 }
 0x211   :  { %v2993_v27 = vmax.f32 %v2991_v14, %v2992_v35  ;;  %14410 = vst [vmem:[#allocation78_spill] sm:$0xff] %v10695_v0  ;;  %8483 = vrot.lane.b32.xlu1 %v8482_v45, %s9069_s2  ;;  %v1441_v51 = vrot.slane %v1427_v3, %v9732_v18  ;;  %v14412_v49 = vcombine.high %v10177_v52, %v10177_v52  ;;  %v3377_v3 = vrot.slane %v3376_v24, 4 }
 0x212   :  { %v10701_v7 = vmax.f32 %v2897_v28, %v2898_v6  ;;  %v2988_v5 = vmax.f32 %v2986_v25, %v2987_v13  ;;  %v1442_v30 = vcombine.high %v1434_v12, %v1434_v12  ;;  %v2074_v45 = vrot.slane %v1434_v12, %v9732_v18 }
 0x213   :  { %v2994_v39 = vrot.slane %v2993_v27, 2  ;;  %v3033_v21 = vsel %vm2556_vm10, %v14412_v49, -inf  ;;  %v1443_v14 = vcombine.high %v1441_v51, %v1441_v51  ;;  %v2090_v61 = vrot.slane %v1441_v51, %v9732_v18 }
 0x214   :  { %14411 = vst [vmem:[#allocation79_spill] sm:$0xff] %v10701_v7  ;;  %v10709_v35 = vmax.f32 %v3348_v60, %v3349_v15  ;;  %v8457_v57 = vpack.i.bf16 %v10701_v7, %v10695_v0  ;;  %v2075_v42 = vcombine.high %v2074_v45, %v2074_v45  ;;  %v2082_v13 = vrot.slane %v1442_v30, %v9732_v18 }
 0x215   :  { %v2995_v28 = vmax.f32 %v2993_v27, %v2994_v39  ;;  %v3030_v25 = vmax.f32 %v3028_v46, %v3029_v34  ;;  %v3034_v52 = vrot.slane %v3033_v21, 4  ;;  %v2091_v6 = vcombine.high %v2090_v61, %v2090_v61 }
 0x216   :  { %8458 = vrot.lane.b32.xlu0 %v8457_v57, %s9069_s2  ;;  %v3390_v49 = vsel %vm2548_vm9, %v2074_v45, -inf  ;;  %v2989_v12 = vrot.slane %v2988_v5, 1  ;;  %v3040_v60 = vsel %vm2548_vm9, %v10188_v40, -inf  ;;  %v10719_v15 = vmax.f32 %v10662_v54, %v3370_v11 }
 0x217   :  { %v14413_v27 = vcombine.high %v10651_v9, %v10651_v9  ;;  %v10728_v46 = vrot.slane %v1443_v14, %v9732_v18  ;;  %v10731_v39 = vsel %vm2548_vm9, %v2090_v61, -inf  ;;  %v2083_v34 = vcombine.high %v2082_v13, %v2082_v13 }
 0x218   :  { %v3391_v30 = vrot.slane %v3390_v49, 4  ;;  %v10734_v45 = vsel %vm2556_vm10, %v2075_v42, -inf  ;;  %v2996_v57 = vrot.slane %v2995_v28, 1  ;;  %v10737_v54 = vsel %vm2548_vm9, %v2082_v13, -inf }
 0x219   :  { %v10725_v51 = vsel %vm2556_vm10, %v14413_v27, -inf  ;;  %v3031_v11 = vrot.slane %v3030_v25, 1  ;;  %v3035_v9 = vmax.f32 %v3033_v21, %v3034_v52  ;;  %v3041_v41 = vrot.slane %v3040_v60, 4 }
 0x21a   :  { %14414 = vst [vmem:[#allocation80_spill] sm:$0xff] %v10725_v51  ;;  %v10740_v20 = vmax.f32 %v3376_v24, %v3377_v3  ;;  %v10743_v14 = vsel %vm2556_vm10, %v2091_v6, -inf  ;;  %v10745_v61 = vmax.f32 %v2988_v5, %v2989_v12  ;;  %v10752_v21 = vmax.f32 %v3390_v49, %v3391_v30 }
 0x21b   :  { %v10756_v24 = vsel %vm2556_vm10, %v2083_v34, -inf  ;;  %v10758_v3 = vmax.f32 %v2995_v28, %v2996_v57  ;;  %v10761_v6 = vmax.f32 %v3030_v25, %v3031_v11  ;;  %v3036_v12 = vrot.slane %v3035_v9, 2 }
 0x21c   :  { %14415 = vst [vmem:[#allocation81_spill] sm:$0xff] %v10740_v20  ;;  %14416 = vst [vmem:[#allocation82_spill] sm:$0xff] %v10745_v61  ;;  %v3042_v0 = vmax.f32 %v3040_v60, %v3041_v41  ;;  %v14419_v49 = vcombine.high %v10188_v40, %v10188_v40  ;;  %v14420_v42 = vrot.slane %v10192_v23, 4  ;;  %v14421_v28 = vcombine.high %v10156_v38, %v10156_v38 }
 0x21d   :  { %14417 = vst [vmem:[#allocation83_spill] sm:$0xff] %v10758_v3  ;;  %14418 = vst [vmem:[#allocation84_spill] sm:$0xff] %v10761_v6  ;;  %v8487_v27 = vpack.i.bf16 %v10758_v3, %v10745_v61  ;;  %v3037_v57 = vmax.f32 %v3035_v9, %v3036_v12  ;;  %v14422_v40 = vrot.slane %v10323_v47, 4  ;;  %v14423_v52 = vcombine.high %v10287_v43, %v10287_v43 }
 0x21e   :  { %v3047_v30 = vsel %vm2556_vm10, %v14419_v49, -inf  ;;  %v3000_v34 = vmax.f32 %v10192_v23, %v14420_v42  ;;  %v3005_v25 = vsel %vm2556_vm10, %v14421_v28, -inf  ;;  %v3043_v11 = vrot.slane %v3042_v0, 2 }
 0x21f   :  { %v3048_v41 = vrot.slane %v3047_v30, 4  ;;  %v3006_v60 = vrot.slane %v3005_v25, 4  ;;  %8488 = vrot.lane.b32.xlu1 %v8487_v27, %s9069_s2  ;;  %v3140_v49 = vmax.f32 %v10323_v47, %v14422_v40  ;;  %v3145_v23 = vsel %vm2556_vm10, %v14423_v52, -inf }
 0x220   :  { %v3001_v5 = vrot.slane %v3000_v34, 2  ;;  %v3012_v38 = vsel %vm2548_vm9, %v10185_v2, -inf  ;;  %v3038_v42 = vrot.slane %v3037_v57, 1  ;;  %v3044_v9 = vmax.f32 %v3042_v0, %v3043_v11 }
 0x221   :  { %v3049_v12 = vmax.f32 %v3047_v30, %v3048_v41  ;;  %v3007_v28 = vmax.f32 %v3005_v25, %v3006_v60  ;;  %v3141_v13 = vrot.slane %v3140_v49, 2  ;;  %v3146_v27 = vrot.slane %v3145_v23, 4 }
 0x222   :  { %v3002_v63 = vmax.f32 %v3000_v34, %v3001_v5  ;;  %v3013_v61 = vrot.slane %v3012_v38, 4  ;;  %v10786_v3 = vmax.f32 %v3037_v57, %v3038_v42  ;;  %v3045_v50 = vrot.slane %v3044_v9, 1 }
 0x223   :  { %v3050_v47 = vrot.slane %v3049_v12, 2  ;;  %v3008_v40 = vrot.slane %v3007_v28, 2  ;;  %v3142_v43 = vmax.f32 %v3140_v49, %v3141_v13  ;;  %v3147_v58 = vmax.f32 %v3145_v23, %v3146_v27 }
 0x224   :  { %14424 = vst [vmem:[#allocation85_spill] sm:$0xff] %v10786_v3  ;;  %v3003_v7 = vrot.slane %v3002_v63, 1  ;;  %v3014_v52 = vmax.f32 %v3012_v38, %v3013_v61  ;;  %v8492_v51 = vpack.i.bf16 %v10786_v3, %v10761_v6  ;;  %v10790_v20 = vmax.f32 %v3044_v9, %v3045_v50 }
 0x225   :  { %v3051_v0 = vmax.f32 %v3049_v12, %v3050_v47  ;;  %v3009_v30 = vmax.f32 %v3007_v28, %v3008_v40  ;;  %v3143_v34 = vrot.slane %v3142_v43, 1  ;;  %v3148_v25 = vrot.slane %v3147_v58, 2 }
 0x226   :  { %14425 = vst [vmem:[#allocation86_spill] sm:$0xff] %v10790_v20  ;;  %v10792_v5 = vmax.f32 %v3002_v63, %v3003_v7  ;;  %v3015_v57 = vrot.slane %v3014_v52, 2  ;;  %8493 = vrot.lane.b32.xlu0 %v8492_v51, %s9069_s2  ;;  %v14427_v13 = vcombine.high %v10185_v2, %v10185_v2  ;;  %v3124_v50 = vsel %vm2548_vm9, %v10308_v22, -inf }
 0x227   :  { %v3052_v11 = vrot.slane %v3051_v0, 1  ;;  %v3010_v41 = vrot.slane %v3009_v30, 1  ;;  %v10801_v60 = vmax.f32 %v3142_v43, %v3143_v34  ;;  %v3149_v49 = vmax.f32 %v3147_v58, %v3148_v25 }
 0x228   :  { %14426 = vst [vmem:[#allocation87_spill] sm:$0xff] %v10792_v5  ;;  %v3019_v61 = vsel %vm2556_vm10, %v14427_v13, -inf  ;;  %v3016_v63 = vmax.f32 %v3014_v52, %v3015_v57  ;;  %v3125_v51 = vrot.slane %v3124_v50, 4  ;;  %v14431_v42 = vcombine.high %v10308_v22, %v10308_v22 }
 0x229   :  { %14428 = vst [vmem:[#allocation88_spill] sm:$0xff] %v10801_v60  ;;  %v3020_v7 = vrot.slane %v3019_v61, 4  ;;  %v10803_v23 = vmax.f32 %v3051_v0, %v3052_v11  ;;  %v10805_v38 = vmax.f32 %v3009_v30, %v3010_v41  ;;  %v3150_v9 = vrot.slane %v3149_v49, 1 }
 0x22a   :  { %v3131_v2 = vsel %vm2556_vm10, %v14431_v42, -inf  ;;  %v3017_v12 = vrot.slane %v3016_v63, 1  ;;  %v3126_v40 = vmax.f32 %v3124_v50, %v3125_v51  ;;  %v14432_v43 = vrot.slane %v10272_v16, 4 }
 0x22b   :  { %14429 = vst [vmem:[#allocation89_spill] sm:$0xff] %v10803_v23  ;;  %14430 = vst [vmem:[#allocation90_spill] sm:$0xff] %v10805_v38  ;;  %v3021_v28 = vmax.f32 %v3019_v61, %v3020_v7  ;;  %v3132_v27 = vrot.slane %v3131_v2, 4  ;;  %v8507_v47 = vpack.i.bf16 %v10803_v23, %v10790_v20  ;;  %v8497_v58 = vpack.i.bf16 %v10805_v38, %v10792_v5 }
 0x22c   :  { %v3056_v52 = vmax.f32 %v10272_v16, %v14432_v43  ;;  %v10818_v0 = vmax.f32 %v3149_v49, %v3150_v9  ;;  %v10820_v22 = vmax.f32 %v3016_v63, %v3017_v12  ;;  %v3127_v25 = vrot.slane %v3126_v40, 2 }
 0x22d   :  { %v3022_v30 = vrot.slane %v3021_v28, 2  ;;  %v3133_v34 = vmax.f32 %v3131_v2, %v3132_v27  ;;  %8508 = vrot.lane.b32.xlu1 %v8507_v47, %s9069_s2  ;;  %8498 = vrot.lane.b32.xlu0 %v8497_v58, %s9069_s2  ;;  %v14435_v11 = vcombine.high %v10224_v26, %v10224_v26  ;;  %v3152_v16 = vsel %vm2548_vm9, %v10311_v37, -inf }
 0x22e   :  { %14433 = vst [vmem:[#allocation91_spill] sm:$0xff] %v10818_v0  ;;  %14434 = vst [vmem:[#allocation92_spill] sm:$0xff] %v10820_v22  ;;  %v3057_v57 = vrot.slane %v3056_v52, 2  ;;  %v8532_v13 = vpack.i.bf16 %v10818_v0, %v10801_v60  ;;  %v3128_v63 = vmax.f32 %v3126_v40, %v3127_v25  ;;  %v3153_v51 = vrot.slane %v3152_v16, 4 }
 0x22f   :  { %v3061_v41 = vsel %vm2556_vm10, %v14435_v11, -inf  ;;  %v3023_v61 = vmax.f32 %v3021_v28, %v3022_v30  ;;  %v3134_v50 = vrot.slane %v3133_v34, 2  ;;  %v14436_v42 = vcombine.high %v10311_v37, %v10311_v37 }
 0x230   :  { %v3062_v49 = vrot.slane %v3061_v41, 4  ;;  %v3058_v7 = vmax.f32 %v3056_v52, %v3057_v57  ;;  %v3129_v47 = vrot.slane %v3128_v63, 1  ;;  %v3154_v43 = vmax.f32 %v3152_v16, %v3153_v51  ;;  %v1021_v57 = vpop.f32.mrf.mxu0 }
 0x231   :  { %v3159_v2 = vsel %vm2556_vm10, %v14436_v42, -inf  ;;  %v3024_v26 = vrot.slane %v3023_v61, 1  ;;  %v3135_v9 = vmax.f32 %v3133_v34, %v3134_v50  ;;  %8533 = vrot.lane.b32.xlu1 %v8532_v13, %s9069_s2  ;;  %v14437_v28 = vrot.slane %v10276_v36, 4 }
 0x232   :  { %v3063_v12 = vmax.f32 %v3061_v41, %v3062_v49  ;;  %v3160_v27 = vrot.slane %v3159_v2, 4  ;;  %v3059_v58 = vrot.slane %v3058_v7, 1  ;;  %v10842_v11 = vmax.f32 %v3128_v63, %v3129_v47  ;;  %v1023_v47 = vpop.f32.mrf.mxu0 }
 0x233   :  { %v3084_v40 = vmax.f32 %v10276_v36, %v14437_v28  ;;  %v10840_v52 = vmax.f32 %v3023_v61, %v3024_v26  ;;  %v3136_v30 = vrot.slane %v3135_v9, 1  ;;  %v3155_v41 = vrot.slane %v3154_v43, 2 }
 0x234   :  { %v3064_v25 = vrot.slane %v3063_v12, 2  ;;  %v3161_v37 = vmax.f32 %v3159_v2, %v3160_v27  ;;  %14439 = vst [vmem:[#allocation94_spill] sm:$0xff] %v10842_v11  ;;  %v10844_v34 = vmax.f32 %v3058_v7, %v3059_v58  ;;  %v14442_v42 = vcombine.high %v10239_v10, %v10239_v10 }
 0x235   :  { %14438 = vst [vmem:[#allocation93_spill] sm:$0xff] %v10840_v52  ;;  %v3085_v50 = vrot.slane %v3084_v40, 2  ;;  %v8502_v13 = vpack.i.bf16 %v10840_v52, %v10820_v22  ;;  %v10848_v16 = vmax.f32 %v3135_v9, %v3136_v30  ;;  %v3156_v36 = vmax.f32 %v3154_v43, %v3155_v41 }
 0x236   :  { %14440 = vst [vmem:[#allocation95_spill] sm:$0xff] %v10844_v34  ;;  %v3065_v49 = vmax.f32 %v3063_v12, %v3064_v25  ;;  %v3162_v51 = vrot.slane %v3161_v37, 2  ;;  %v3089_v2 = vsel %vm2556_vm10, %v14442_v42, -inf  ;;  %v1022_v63 = vadd.f32 %v1021_v57, %v9726_v29 }
 0x237   :  { %14441 = vst [vmem:[#allocation96_spill] sm:$0xff] %v10848_v16  ;;  %v3086_v61 = vmax.f32 %v3084_v40, %v3085_v50  ;;  %8503 = vrot.lane.b32.xlu0 %v8502_v13, %s9069_s2  ;;  %v8542_v7 = vpack.i.bf16 %v10848_v16, %v10842_v11  ;;  %v3090_v9 = vrot.slane %v3089_v2, 4  ;;  %v14443_v12 = vrot.slane %v10734_v45, 4 }
 0x238   :  { %v3066_v26 = vrot.slane %v3065_v49, 1  ;;  %v3163_v27 = vmax.f32 %v3161_v37, %v3162_v51  ;;  %v3157_v43 = vrot.slane %v3156_v36, 1  ;;  %v1092_v10 = vmax.f32 %v1022_v63, 0.0 }
 0x239   :  { %v10861_v58 = vmax.f32 %v10734_v45, %v14443_v12  ;;  %v1024_v28 = vadd.f32 %v1023_v47, %v9728_v32  ;;  %8543 = vrot.lane.b32.xlu1 %v8542_v7, %s9069_s2  ;;  %v3091_v25 = vmax.f32 %v3089_v2, %v3090_v9  ;;  %v14445_v57 = vrot.slane %v10500_v56, 4 }
 0x23a   :  { %v10865_v40 = vmax.f32 %v3065_v49, %v3066_v26  ;;  %v3164_v30 = vrot.slane %v3163_v27, 1  ;;  %v10870_v41 = vmax.f32 %v3156_v36, %v3157_v43  ;;  %v3087_v50 = vrot.slane %v3086_v61, 1 }
 0x23b   :  { %v3168_v37 = vmax.f32 %v10500_v56, %v14445_v57  ;;  %v1093_v13 = vmax.f32 %v1024_v28, 0.0  ;;  %v14447_v45 = vcombine.high %v10454_v19, %v10454_v19  ;;  %v3092_v63 = vrot.slane %v3091_v25, 2 }
 0x23c   :  { %14444 = vst [vmem:[#allocation97_spill] sm:$0xff] %v10865_v40  ;;  %14446 = vst [vmem:[#allocation98_spill] sm:$0xff] %v10870_v41  ;;  %v8512_v42 = vpack.i.bf16 %v10865_v40, %v10844_v34  ;;  %v10878_v49 = vmax.f32 %v3163_v27, %v3164_v30  ;;  %v3068_v56 = vsel %vm2548_vm9, %v10249_v1, -inf  ;;  %v3432_v27 = vsel %vm2548_vm9, %v10728_v46, -inf }
 0x23d   :  { %v3173_v51 = vsel %vm2556_vm10, %v14447_v45, -inf  ;;  %v3169_v2 = vrot.slane %v3168_v37, 2  ;;  %v1444_v7 = vcombine.low %v1092_v10, %v1093_v13  ;;  %v1445_v26 = vcombine.high %v1092_v10, %v1093_v13 }
 0x23e   :  { %14448 = vst [vmem:[#allocation99_spill] sm:$0xff] %v10878_v49  ;;  %v3174_v9 = vrot.slane %v3173_v51, 4  ;;  %8513 = vrot.lane.b32.xlu0 %v8512_v42, %s9069_s2  ;;  %v8547_v19 = vpack.i.bf16 %v10878_v49, %v10870_v41  ;;  %v3093_v47 = vmax.f32 %v3091_v25, %v3092_v63  ;;  %v3069_v12 = vrot.slane %v3068_v56, 4 }
 0x23f   :  { %v1452_v43 = vrot.slane %v1444_v7, %v9732_v18  ;;  %v1459_v10 = vrot.slane %v1445_v26, %v9732_v18  ;;  %v10891_v30 = vmax.f32 %v3086_v61, %v3087_v50  ;;  %v3170_v13 = vmax.f32 %v3168_v37, %v3169_v2 }
 0x240   :  { %v3175_v28 = vmax.f32 %v3173_v51, %v3174_v9  ;;  %8548 = vrot.lane.b32.xlu1 %v8547_v19, %s9069_s2  ;;  %v3094_v57 = vrot.slane %v3093_v47, 1  ;;  %v3070_v45 = vmax.f32 %v3068_v56, %v3069_v12  ;;  %v14450_v7 = vrot.slane %v10731_v39, 4 }
 0x241   :  { %14449 = vst [vmem:[#allocation100_spill] sm:$0xff] %v10891_v30  ;;  %v1460_v42 = vcombine.high %v1452_v43, %v1452_v43  ;;  %v1461_v36 = vcombine.high %v1459_v10, %v1459_v10  ;;  %v2106_v25 = vrot.slane %v1452_v43, %v9732_v18  ;;  %v2122_v63 = vrot.slane %v1459_v10, %v9732_v18 }
 0x242   :  { %v10899_v26 = vmax.f32 %v10731_v39, %v14450_v7  ;;  %v10901_v51 = vmax.f32 %v3093_v47, %v3094_v57  ;;  %v3176_v61 = vrot.slane %v3175_v28, 2  ;;  %v14452_v50 = vrot.slane %v10737_v54, 4 }
 0x243   :  { %v3433_v2 = vrot.slane %v3432_v27, 4  ;;  %v2107_v9 = vcombine.high %v2106_v25, %v2106_v25  ;;  %v2114_v56 = vrot.slane %v1460_v42, %v9732_v18  ;;  %v2123_v12 = vcombine.high %v2122_v63, %v2122_v63 }
 0x244   :  { %14451 = vst [vmem:[#allocation101_spill] sm:$0xff] %v10901_v51  ;;  %v10906_v37 = vmax.f32 %v10737_v54, %v14452_v50  ;;  %v8517_v19 = vpack.i.bf16 %v10901_v51, %v10891_v30  ;;  %v3446_v43 = vsel %vm2548_vm9, %v2106_v25, -inf  ;;  %v14453_v39 = vcombine.high %v10249_v1, %v10249_v1  ;;  %v1025_v50 = vpop.f32.mrf.mxu0 }
 0x245   :  { %v14454_v10 = vcombine.high %v10728_v46, %v10728_v46  ;;  %v10923_v57 = vrot.slane %v1461_v36, %v9732_v18  ;;  %v3171_v42 = vrot.slane %v3170_v13, 1  ;;  %v3071_v7 = vrot.slane %v3070_v45, 2 }
 0x246   :  { %v3075_v47 = vsel %vm2556_vm10, %v14453_v39, -inf  ;;  %8518 = vrot.lane.b32.xlu0 %v8517_v19, %s9069_s2  ;;  %v3447_v25 = vrot.slane %v3446_v43, 4  ;;  %v3453_v41 = vsel %vm2556_vm10, %v2107_v9, -inf  ;;  %v3474_v1 = vsel %vm2548_vm9, %v2122_v63, -inf }
 0x247   :  { %v10920_v54 = vsel %vm2556_vm10, %v14454_v10, -inf  ;;  %v3177_v39 = vmax.f32 %v3175_v28, %v3176_v61  ;;  %v14455_v30 = vrot.slane %v10743_v14, 4  ;;  %v2115_v10 = vcombine.high %v2114_v56, %v2114_v56  ;;  %v1027_v61 = vpop.f32.mrf.mxu0 }
 0x248   :  { %v10934_v36 = vsel %vm2548_vm9, %v2114_v56, -inf  ;;  %v3076_v51 = vrot.slane %v3075_v47, 4  ;;  %v10937_v34 = vmax.f32 %v3432_v27, %v3433_v2  ;;  %v10941_v9 = vsel %vm2556_vm10, %v2123_v12, -inf }
 0x249   :  { %v10931_v46 = vmax.f32 %v10743_v14, %v14455_v30  ;;  %v2131_v28 = vcombine.high %v10923_v57, %v10923_v57  ;;  %v3454_v63 = vrot.slane %v3453_v41, 4  ;;  %v3475_v14 = vrot.slane %v3474_v1, 4 }
 0x24a   :  { %v10945_v30 = vmax.f32 %v3170_v13, %v3171_v42  ;;  %v10947_v56 = vmax.f32 %v3446_v43, %v3447_v25  ;;  %v3178_v49 = vrot.slane %v3177_v39, 1  ;;  %v3072_v27 = vmax.f32 %v3070_v45, %v3071_v7 }
 0x24b   :  { %v10951_v2 = vsel %vm2556_vm10, %v2115_v10, -inf  ;;  %v3077_v19 = vmax.f32 %v3075_v47, %v3076_v51  ;;  %v1026_v16 = vadd.f32 %v1025_v50, %v9726_v29  ;;  %v1028_v13 = vadd.f32 %v1027_v61, %v9728_v32 }
 0x24c   :  { %14456 = vst [vmem:[#allocation102_spill] sm:$0xff] %v10945_v30  ;;  %v10955_v40 = vmax.f32 %v3177_v39, %v3178_v49  ;;  %v3073_v5 = vrot.slane %v3072_v27, 1  ;;  %v14458_v43 = vrot.slane %v10514_v59, 4  ;;  %v14459_v45 = vcombine.high %v10479_v62, %v10479_v62 }
 0x24d   :  { %v3078_v25 = vrot.slane %v3077_v19, 2  ;;  %v1094_v11 = vmax.f32 %v1026_v16, 0.0  ;;  %v3096_v51 = vsel %vm2548_vm9, %v10252_v44, -inf  ;;  %v10967_v47 = vmax.f32 %v3453_v41, %v3454_v63 }
 0x24e   :  { %14457 = vst [vmem:[#allocation103_spill] sm:$0xff] %v10955_v40  ;;  %v3196_v42 = vmax.f32 %v10514_v59, %v14458_v43  ;;  %v3201_v7 = vsel %vm2556_vm10, %v14459_v45, -inf  ;;  %v8552_v50 = vpack.i.bf16 %v10955_v40, %v10945_v30  ;;  %v1095_v39 = vmax.f32 %v1028_v13, 0.0 }
 0x24f   :  { %v3079_v10 = vmax.f32 %v3077_v19, %v3078_v25  ;;  %v3202_v61 = vrot.slane %v3201_v7, 4  ;;  %v3097_v16 = vrot.slane %v3096_v51, 4  ;;  %v10972_v43 = vmax.f32 %v3474_v1, %v3475_v14 }
 0x250   :  { %v3197_v59 = vrot.slane %v3196_v42, 2  ;;  %8553 = vrot.lane.b32.xlu1 %v8552_v50, %s9069_s2  ;;  %v10975_v62 = vmax.f32 %v3072_v27, %v3073_v5  ;;  %v1462_v45 = vcombine.low %v1094_v11, %v1095_v39  ;;  %v1463_v12 = vcombine.high %v1094_v11, %v1095_v39 }
 0x251   :  { %v3080_v41 = vrot.slane %v3079_v10, 1  ;;  %v3203_v63 = vmax.f32 %v3201_v7, %v3202_v61  ;;  %v3098_v60 = vmax.f32 %v3096_v51, %v3097_v16  ;;  %v14461_v49 = vcombine.high %v10252_v44, %v10252_v44 }
 0x252   :  { %14460 = vst [vmem:[#allocation104_spill] sm:$0xff] %v10975_v62  ;;  %v3488_v1 = vsel %vm2548_vm9, %v10923_v57, -inf  ;;  %v1470_v14 = vrot.slane %v1462_v45, %v9732_v18  ;;  %v1477_v5 = vrot.slane %v1463_v12, %v9732_v18  ;;  %v3198_v11 = vmax.f32 %v3196_v42, %v3197_v59  ;;  %v1031_v12 = vpop.f32.mrf.mxu0 }
 0x253   :  { %v3103_v13 = vsel %vm2556_vm10, %v14461_v49, -inf  ;;  %v10986_v27 = vmax.f32 %v3079_v10, %v3080_v41  ;;  %v3204_v25 = vrot.slane %v3203_v63, 2  ;;  %v3099_v7 = vrot.slane %v3098_v60, 2 }
 0x254   :  { %v1478_v51 = vcombine.high %v1470_v14, %v1470_v14  ;;  %v2138_v50 = vrot.slane %v1470_v14, %v9732_v18  ;;  %v2154_v44 = vrot.slane %v1477_v5, %v9732_v18  ;;  %v3104_v49 = vrot.slane %v3103_v13, 4 }
 0x255   :  { %14462 = vst [vmem:[#allocation105_spill] sm:$0xff] %v10986_v27  ;;  %v10991_v39 = vsel %vm2556_vm10, %v2131_v28, -inf  ;;  %v8522_v57 = vpack.i.bf16 %v10986_v27, %v10975_v62  ;;  %v1479_v61 = vcombine.high %v1477_v5, %v1477_v5  ;;  %v3205_v16 = vmax.f32 %v3203_v63, %v3204_v25 }
 0x256   :  { %v2139_v10 = vcombine.high %v2138_v50, %v2138_v50  ;;  %v2146_v42 = vrot.slane %v1478_v51, %v9732_v18  ;;  %v2155_v59 = vcombine.high %v2154_v44, %v2154_v44  ;;  %v1032_v45 = vadd.f32 %v1031_v12, %v9726_v29 }
 0x257   :  { %v3489_v41 = vrot.slane %v3488_v1, 4  ;;  %8523 = vrot.lane.b32.xlu0 %v8522_v57, %s9069_s2  ;;  %v3502_v14 = vsel %vm2548_vm9, %v2138_v50, -inf  ;;  %v3199_v19 = vrot.slane %v3198_v11, 1  ;;  %v3100_v28 = vmax.f32 %v3098_v60, %v3099_v7  ;;  %v1033_v7 = vpop.f32.mrf.mxu0 }
 0x258   :  { %v2147_v5 = vcombine.high %v2146_v42, %v2146_v42  ;;  %v3105_v63 = vmax.f32 %v3103_v13, %v3104_v49  ;;  %v11002_v25 = vrot.slane %v1479_v61, %v9732_v18  ;;  %v3509_v51 = vsel %vm2556_vm10, %v2139_v10, -inf }
 0x259   :  { %v3530_v12 = vsel %vm2548_vm9, %v2154_v44, -inf  ;;  %v3206_v27 = vrot.slane %v3205_v16, 1  ;;  %v3503_v40 = vrot.slane %v3502_v14, 4  ;;  %v3516_v57 = vsel %vm2548_vm9, %v2146_v42, -inf }
 0x25a   :  { %v11008_v50 = vsel %vm2556_vm10, %v2155_v59, -inf  ;;  %v1096_v60 = vmax.f32 %v1032_v45, 0.0  ;;  %v14463_v62 = vrot.slane %v10934_v36, 4  ;;  %v11016_v49 = vsel %vm2556_vm10, %v2147_v5, -inf }
 0x25b   :  { %14464 = vst [vmem:[#allocation106_spill] sm:$0xff] %v11016_v49  ;;  %v11018_v61 = vmax.f32 %v3198_v11, %v3199_v19  ;;  %v3101_v44 = vrot.slane %v3100_v28, 1  ;;  %v14466_v10 = vrot.slane %v10941_v9, 4  ;;  %v11025_v59 = vmax.f32 %v3488_v1, %v3489_v41 }
 0x25c   :  { %v11013_v13 = vmax.f32 %v10934_v36, %v14463_v62  ;;  %v3510_v45 = vrot.slane %v3509_v51, 4  ;;  %v3531_v30 = vrot.slane %v3530_v12, 4  ;;  %v2163_v22 = vcombine.high %v11002_v25, %v11002_v25 }
 0x25d   :  { %14465 = vst [vmem:[#allocation107_spill] sm:$0xff] %v11018_v61  ;;  %v11023_v42 = vmax.f32 %v10941_v9, %v14466_v10  ;;  %v3517_v36 = vrot.slane %v3516_v57, 4  ;;  %v11030_v5 = vmax.f32 %v3205_v16, %v3206_v27  ;;  %v11032_v19 = vmax.f32 %v3502_v14, %v3503_v40  ;;  %v1035_v10 = vpop.f32.mrf.mxu0 }
 0x25e   :  { %v3106_v0 = vrot.slane %v3105_v63, 2  ;;  %v1034_v9 = vadd.f32 %v1033_v7, %v9728_v32  ;;  %v3180_v41 = vsel %vm2548_vm9, %v10489_v55, -inf  ;;  %v14468_v52 = vcombine.high %v10489_v55, %v10489_v55 }
 0x25f   :  { %14467 = vst [vmem:[#allocation108_spill] sm:$0xff] %v11030_v5  ;;  %v8557_v1 = vpack.i.bf16 %v11030_v5, %v11018_v61  ;;  %v14469_v40 = vrot.slane %v10319_v8, 4  ;;  %v3181_v62 = vrot.slane %v3180_v41, 4  ;;  %v11047_v38 = vmax.f32 %v3509_v51, %v3510_v45 }
 0x260   :  { %v3187_v27 = vsel %vm2556_vm10, %v14468_v52, -inf  ;;  %v3107_v14 = vmax.f32 %v3105_v63, %v3106_v0  ;;  %v1097_v11 = vmax.f32 %v1034_v9, 0.0  ;;  %v11050_v61 = vmax.f32 %v3100_v28, %v3101_v44  ;;  %v1037_v0 = vpop.f32.mrf.mxu0 }
 0x261   :  { %v3112_v16 = vmax.f32 %v10319_v8, %v14469_v40  ;;  %v3188_v7 = vrot.slane %v3187_v27, 4  ;;  %14470 = vst [vmem:[#allocation109_spill] sm:$0xff] %v11047_v38  ;;  %8558 = vrot.lane.b32.xlu1 %v8557_v1, %s9069_s2  ;;  %v14472_v55 = vcombine.high %v10284_v17, %v10284_v17  ;;  %v3182_v8 = vmax.f32 %v3180_v41, %v3181_v62 }
 0x262   :  { %14471 = vst [vmem:[#allocation110_spill] sm:$0xff] %v11050_v61  ;;  %v3108_v20 = vrot.slane %v3107_v14, 1  ;;  %v1480_v23 = vcombine.low %v1096_v60, %v1097_v11  ;;  %v1481_v6 = vcombine.high %v1096_v60, %v1097_v11  ;;  %v11056_v63 = vmax.f32 %v3530_v12, %v3531_v30 }
 0x263   :  { %v3113_v5 = vrot.slane %v3112_v16, 2  ;;  %v3117_v52 = vsel %vm2556_vm10, %v14472_v55, -inf  ;;  %v3544_v51 = vsel %vm2548_vm9, %v11002_v25, -inf  ;;  %v3189_v45 = vmax.f32 %v3187_v27, %v3188_v7 }
 0x264   :  { %14473 = vst [vmem:[#allocation111_spill] sm:$0xff] %v11056_v63  ;;  %v1036_v28 = vadd.f32 %v1035_v10, %v9726_v29  ;;  %v11061_v44 = vmax.f32 %v3107_v14, %v3108_v20  ;;  %v1488_v9 = vrot.slane %v1480_v23, %v9732_v18  ;;  %v1495_v17 = vrot.slane %v1481_v6, %v9732_v18 }
 0x265   :  { %v3183_v1 = vrot.slane %v3182_v8, 2  ;;  %v3190_v40 = vrot.slane %v3189_v45, 2  ;;  %v3114_v55 = vmax.f32 %v3112_v16, %v3113_v5  ;;  %v3118_v60 = vrot.slane %v3117_v52, 4 }
 0x266   :  { %14474 = vst [vmem:[#allocation112_spill] sm:$0xff] %v11061_v44  ;;  %v1038_v62 = vadd.f32 %v1037_v0, %v9728_v32  ;;  %v8527_v30 = vpack.i.bf16 %v11061_v44, %v11050_v61  ;;  %v1496_v12 = vcombine.high %v1488_v9, %v1488_v9  ;;  %v1497_v25 = vcombine.high %v1495_v17, %v1495_v17 }
 0x267   :  { %v2170_v11 = vrot.slane %v1488_v9, %v9732_v18  ;;  %v11070_v10 = vmax.f32 %v3516_v57, %v3517_v36  ;;  %v3545_v23 = vrot.slane %v3544_v51, 4  ;;  %v3184_v41 = vmax.f32 %v3182_v8, %v3183_v1 }
 0x268   :  { %8528 = vrot.lane.b32.xlu0 %v8527_v30, %s9069_s2  ;;  %v2178_v5 = vrot.slane %v1496_v12, %v9732_v18  ;;  %v2186_v27 = vrot.slane %v1495_v17, %v9732_v18  ;;  %v11077_v14 = vsel %vm2556_vm10, %v2163_v22, -inf  ;;  %v2194_v7 = vrot.slane %v1497_v25, %v9732_v18 }
 0x269   :  { %14475 = vst [vmem:[#allocation113_spill] sm:$0xff] %v11070_v10  ;;  %v2171_v6 = vcombine.high %v2170_v11, %v2170_v11  ;;  %v3558_v16 = vsel %vm2548_vm9, %v2170_v11, -inf  ;;  %14476 = vst [vmem:[#allocation114_spill] sm:$0xff] %v11077_v14  ;;  %v3115_v0 = vrot.slane %v3114_v55, 1  ;;  %v1098_v9 = vmax.f32 %v1036_v28, 0.0 }
 0x26a   :  { %v3559_v57 = vrot.slane %v3558_v16, 4  ;;  %v3191_v36 = vmax.f32 %v3189_v45, %v3190_v40  ;;  %v3119_v20 = vmax.f32 %v3117_v52, %v3118_v60  ;;  %v1099_v8 = vmax.f32 %v1038_v62, 0.0 }
 0x26b   :  { %v3565_v1 = vsel %vm2556_vm10, %v2171_v6, -inf  ;;  %v3572_v30 = vsel %vm2548_vm9, %v2178_v5, -inf  ;;  %v3586_v12 = vsel %vm2548_vm9, %v2186_v27, -inf  ;;  %v3185_v17 = vrot.slane %v3184_v41, 1 }
 0x26c   :  { %v14477_v22 = vrot.slane %v11008_v50, 4  ;;  %v2179_v25 = vcombine.high %v2178_v5, %v2178_v5  ;;  %v2187_v28 = vcombine.high %v2186_v27, %v2186_v27  ;;  %v11089_v44 = vmax.f32 %v3544_v51, %v3545_v23 }
 0x26d   :  { %v2195_v45 = vcombine.high %v2194_v7, %v2194_v7  ;;  %v11092_v40 = vmax.f32 %v3114_v55, %v3115_v0  ;;  %v11094_v60 = vmax.f32 %v3558_v16, %v3559_v57  ;;  %v3566_v62 = vrot.slane %v3565_v1, 4 }
 0x26e   :  { %v11087_v61 = vmax.f32 %v11008_v50, %v14477_v22  ;;  %14479 = vst [vmem:[#allocation116_spill] sm:$0xff] %v11089_v44  ;;  %v3573_v6 = vrot.slane %v3572_v30, 4  ;;  %v3587_v3 = vrot.slane %v3586_v12, 4  ;;  %v11096_v11 = vmax.f32 %v3184_v41, %v3185_v17 }
 0x26f   :  { %14480 = vst [vmem:[#allocation117_spill] sm:$0xff] %v11092_v40  ;;  %14481 = vst [vmem:[#allocation118_spill] sm:$0xff] %v11094_v60  ;;  %v3192_v49 = vrot.slane %v3191_v36, 1  ;;  %v3120_v10 = vrot.slane %v3119_v20, 2  ;;  %v1498_v50 = vcombine.low %v1098_v9, %v1099_v8  ;;  %v11099_v5 = vsel %vm2556_vm10, %v2179_v25, -inf }
 0x270   :  { %14478 = vst [vmem:[#allocation115_spill] sm:$0xff] %v11087_v61  ;;  %14482 = vst [vmem:[#allocation119_spill] sm:$0xff] %v11096_v11  ;;  %v3593_v51 = vsel %vm2556_vm10, %v2187_v28, -inf  ;;  %v3600_v23 = vsel %vm2548_vm9, %v2194_v7, -inf  ;;  %v1499_v27 = vcombine.high %v1098_v9, %v1099_v8  ;;  %v3208_v41 = vsel %vm2548_vm9, %v10495_v31, -inf }
 0x271   :  { %v11103_v55 = vmax.f32 %v3191_v36, %v3192_v49  ;;  %v3121_v16 = vmax.f32 %v3119_v20, %v3120_v10  ;;  %v1506_v0 = vrot.slane %v1498_v50, %v9732_v18  ;;  %v11110_v17 = vsel %vm2556_vm10, %v2195_v45, -inf }
 0x272   :  { %14484 = vst [vmem:[#allocation121_spill] sm:$0xff] %v11110_v17  ;;  %v1513_v22 = vrot.slane %v1499_v27, %v9732_v18  ;;  %v3209_v25 = vrot.slane %v3208_v41, 4  ;;  %v11116_v10 = vmax.f32 %v3565_v1, %v3566_v62  ;;  %v14486_v28 = vcombine.high %v10495_v31, %v10495_v31 }
 0x273   :  { %14483 = vst [vmem:[#allocation120_spill] sm:$0xff] %v11103_v55  ;;  %v8562_v7 = vpack.i.bf16 %v11103_v55, %v11096_v11  ;;  %v3122_v9 = vrot.slane %v3121_v16, 1  ;;  %v1514_v49 = vcombine.high %v1506_v0, %v1506_v0  ;;  %v2202_v20 = vrot.slane %v1506_v0, %v9732_v18 }
 0x274   :  { %14485 = vst [vmem:[#allocation122_spill] sm:$0xff] %v11116_v10  ;;  %v1515_v36 = vcombine.high %v1513_v22, %v1513_v22  ;;  %v2218_v8 = vrot.slane %v1513_v22, %v9732_v18  ;;  %v3215_v45 = vsel %vm2556_vm10, %v14486_v28, -inf  ;;  %v11128_v0 = vmax.f32 %v3586_v12, %v3587_v3  ;;  %v14495_v10 = vld [vmem:[#allocation62_spill] sm:$0xff] }
 0x275   :  { %8563 = vrot.lane.b32.xlu1 %v8562_v7, %s9069_s2  ;;  %v11124_v50 = vmax.f32 %v3121_v16, %v3122_v9  ;;  %v2203_v27 = vcombine.high %v2202_v20, %v2202_v20  ;;  %v2210_v57 = vrot.slane %v1514_v49, %v9732_v18  ;;  %v3614_v52 = vsel %vm2548_vm9, %v2202_v20, -inf }
 0x276   :  { %v3594_v1 = vrot.slane %v3593_v51, 4  ;;  %v3601_v62 = vrot.slane %v3600_v23, 4  ;;  %v14488_v22 = vrot.slane %v10540_v53, 4  ;;  %v11136_v7 = vrot.slane %v1515_v36, %v9732_v18 }
 0x277   :  { %14487 = vst [vmem:[#allocation123_spill] sm:$0xff] %v11124_v50  ;;  %v8537_v31 = vpack.i.bf16 %v11124_v50, %v11092_v40  ;;  %v3615_v16 = vrot.slane %v3614_v52, 4  ;;  %v3210_v9 = vmax.f32 %v3208_v41, %v3209_v25  ;;  %v2211_v28 = vcombine.high %v2210_v57, %v2210_v57 }
 0x278   :  { %v3252_v11 = vmax.f32 %v10540_v53, %v14488_v22  ;;  %v11139_v49 = vsel %vm2556_vm10, %v2203_v27, -inf  ;;  %v11142_v3 = vsel %vm2548_vm9, %v2210_v57, -inf  ;;  %v3216_v12 = vrot.slane %v3215_v45, 4 }
 0x279   :  { %v11144_v20 = vmax.f32 %v3572_v30, %v3573_v6  ;;  %8538 = vrot.lane.b32.xlu0 %v8537_v31, %s9069_s2  ;;  %v2219_v36 = vcombine.high %v2218_v8, %v2218_v8  ;;  %v11150_v41 = vmax.f32 %v3593_v51, %v3594_v1  ;;  %v11152_v25 = vmax.f32 %v3600_v23, %v3601_v62 }
 0x27a   :  { %v11155_v27 = vsel %vm2548_vm9, %v2218_v8, -inf  ;;  %v11159_v6 = vmax.f32 %v3614_v52, %v3615_v16  ;;  %v11164_v31 = vsel %vm2556_vm10, %v2211_v28, -inf  ;;  %v3211_v53 = vrot.slane %v3210_v9, 2  ;;  %v14490_v52 = vld [vmem:[#allocation56_spill] sm:$0xff] }
 0x27b   :  { %14489 = vst [vmem:[#allocation124_spill] sm:$0xff] %v11152_v25  ;;  %v3217_v51 = vmax.f32 %v3215_v45, %v3216_v12  ;;  %v3253_v1 = vrot.slane %v3252_v11, 2  ;;  %v11168_v8 = vsel %vm2556_vm10, %v2219_v36, -inf  ;;  %v11172_v62 = vsel %vm2548_vm9, %v11136_v7, -inf  ;;  %v14492_v45 = vld [vmem:[#allocation58_spill] sm:$0xff] }
 0x27c   :  { %v14491_v16 = vcombine.high %v14490_v52, %v14490_v52  ;;  %v3212_v30 = vmax.f32 %v3210_v9, %v3211_v53  ;;  %v3264_v12 = vsel %vm2548_vm9, %v14492_v45, -inf  ;;  %v14493_v36 = vcombine.high %v14492_v45, %v14492_v45 }
 0x27d   :  { %v3218_v28 = vrot.slane %v3217_v51, 2  ;;  %v3254_v22 = vmax.f32 %v3252_v11, %v3253_v1  ;;  %v14494_v50 = vrot.slane %v10562_v4, 2  ;;  %v3232_v52 = vrot.slane %v14495_v10, 2 }
 0x27e   :  { %v3257_v40 = vsel %vm2556_vm10, %v14491_v16, -inf  ;;  %v3271_v23 = vsel %vm2556_vm10, %v14493_v36, -inf  ;;  %v3213_v60 = vrot.slane %v3212_v30, 1  ;;  %v3265_v11 = vrot.slane %v3264_v12, 4 }
 0x27f   :  { %v3258_v57 = vrot.slane %v3257_v40, 4  ;;  %v3226_v55 = vmax.f32 %v10562_v4, %v14494_v50  ;;  %v3219_v16 = vmax.f32 %v3217_v51, %v3218_v28  ;;  %v3255_v9 = vrot.slane %v3254_v22, 1 }
 0x280   :  { %v3272_v1 = vrot.slane %v3271_v23, 4  ;;  %v3233_v44 = vmax.f32 %v14495_v10, %v3232_v52  ;;  %v11189_v61 = vmax.f32 %v3212_v30, %v3213_v60  ;;  %v3266_v17 = vmax.f32 %v3264_v12, %v3265_v11 }
 0x281   :  { %v3259_v53 = vmax.f32 %v3257_v40, %v3258_v57  ;;  %v3227_v14 = vrot.slane %v3226_v55, 1  ;;  %v3220_v45 = vrot.slane %v3219_v16, 1  ;;  %v11191_v63 = vmax.f32 %v3254_v22, %v3255_v9  ;;  %v14502_v22 = vld [vmem:[#allocation64_spill] sm:$0xff] }
 0x282   :  { %14496 = vst [vmem:[#allocation56_spill] sm:$0xff] %v11189_v61  ;;  %v3273_v25 = vmax.f32 %v3271_v23, %v3272_v1  ;;  %v3234_v50 = vrot.slane %v3233_v44, 1  ;;  %v14500_v40 = vrot.slane %v10689_v48, 2  ;;  %v3372_v10 = vrot.slane %v10719_v15, 2 }
 0x283   :  { %14497 = vst [vmem:[#allocation58_spill] sm:$0xff] %v11191_v63  ;;  %v3260_v36 = vrot.slane %v3259_v53, 2  ;;  %v11193_v4 = vmax.f32 %v3226_v55, %v3227_v14  ;;  %v11195_v38 = vmax.f32 %v3219_v16, %v3220_v45  ;;  %v3267_v60 = vrot.slane %v3266_v17, 2  ;;  %v14505_v45 = vld [vmem:[#allocation61_spill] sm:$0xff] }
 0x284   :  { %v3366_v57 = vmax.f32 %v10689_v48, %v14500_v40  ;;  %v3274_v30 = vrot.slane %v3273_v25, 2  ;;  %v11201_v28 = vmax.f32 %v3233_v44, %v3234_v50  ;;  %v3239_v52 = vrot.slane %v14502_v22, 2 }
 0x285   :  { %14498 = vst [vmem:[#allocation62_spill] sm:$0xff] %v11193_v4  ;;  %14499 = vst [vmem:[#allocation125_spill] sm:$0xff] %v11195_v38  ;;  %v3261_v51 = vmax.f32 %v3259_v53, %v3260_v36  ;;  %v8567_v14 = vpack.i.bf16 %v11195_v38, %v11189_v61  ;;  %v3373_v12 = vmax.f32 %v10719_v15, %v3372_v10  ;;  %v14506_v36 = vrot.slane %v14505_v45, 4 }
 0x286   :  { %14501 = vst [vmem:[#allocation126_spill] sm:$0xff] %v11201_v28  ;;  %v3367_v23 = vrot.slane %v3366_v57, 1  ;;  %v3268_v16 = vmax.f32 %v3266_v17, %v3267_v60  ;;  %v3275_v9 = vmax.f32 %v3273_v25, %v3274_v30  ;;  %v8577_v48 = vpack.i.bf16 %v11201_v28, %v11193_v4 }
 0x287   :  { %v3262_v55 = vrot.slane %v3261_v51, 1  ;;  %v3240_v53 = vmax.f32 %v14502_v22, %v3239_v52  ;;  %8568 = vrot.lane.b32.xlu1 %v8567_v14, %s9069_s2  ;;  %v3374_v1 = vrot.slane %v3373_v12, 1  ;;  %v3245_v50 = vmax.f32 %v14505_v45, %v14506_v36  ;;  %v14512_v45 = vld [vmem:[#allocation65_spill] sm:$0xff] }
 0x288   :  { %v11213_v11 = vmax.f32 %v3366_v57, %v3367_v23  ;;  %v3269_v40 = vrot.slane %v3268_v16, 1  ;;  %v3276_v15 = vrot.slane %v3275_v9, 1  ;;  %v3351_v25 = vrot.slane %v10709_v35, 2 }
 0x289   :  { %v11211_v44 = vmax.f32 %v3261_v51, %v3262_v55  ;;  %v3241_v17 = vrot.slane %v3240_v53, 1  ;;  %v11221_v60 = vmax.f32 %v3373_v12, %v3374_v1  ;;  %v3246_v30 = vrot.slane %v3245_v50, 2 }
 0x28a   :  { %14504 = vst [vmem:[#allocation127_spill] sm:$0xff] %v11213_v11  ;;  %v14508_v51 = vrot.slane %v10671_v33, 4  ;;  %v11226_v22 = vmax.f32 %v3268_v16, %v3269_v40  ;;  %v11228_v52 = vmax.f32 %v3275_v9, %v3276_v15  ;;  %v3352_v55 = vmax.f32 %v10709_v35, %v3351_v25  ;;  %v14514_v9 = vld [vmem:[#allocation68_spill] sm:$0xff]  ;;  %v14515_v40 = vld [vmem:[#allocation81_spill] sm:$0xff] }
 0x28b   :  { %14503 = vst [vmem:[#allocation64_spill] sm:$0xff] %v11211_v44  ;;  %v8572_v10 = vpack.i.bf16 %v11211_v44, %v11191_v63  ;;  %14507 = vst [vmem:[#allocation61_spill] sm:$0xff] %v11221_v60  ;;  %v11230_v14 = vmax.f32 %v3240_v53, %v3241_v17  ;;  %v8612_v23 = vpack.i.bf16 %v11221_v60, %v11213_v11  ;;  %v14513_v36 = vrot.slane %v14512_v45, 2  ;;  %v14519_v11 = vld [vmem:[#allocation69_spill] sm:$0xff] }
 0x28c   :  { %v3357_v57 = vmax.f32 %v10671_v33, %v14508_v51  ;;  %14509 = vst [vmem:[#allocation128_spill] sm:$0xff] %v11226_v22  ;;  %14510 = vst [vmem:[#allocation129_spill] sm:$0xff] %v11228_v52  ;;  %v3247_v12 = vmax.f32 %v3245_v50, %v3246_v30  ;;  %v8587_v33 = vpack.i.bf16 %v11228_v52, %v11226_v22  ;;  %v3353_v16 = vrot.slane %v3352_v55, 1 }
 0x28d   :  { %14511 = vst [vmem:[#allocation130_spill] sm:$0xff] %v11230_v14  ;;  %8573 = vrot.lane.b32.xlu0 %v8572_v10, %s9069_s2  ;;  %v3282_v4 = vmax.f32 %v14512_v45, %v14513_v36  ;;  %v3288_v53 = vrot.slane %v14514_v9, 2  ;;  %v3379_v15 = vrot.slane %v14515_v40, 2  ;;  %v14516_v10 = vld [vmem:[#allocation80_spill] sm:$0xff]  ;;  %v14520_v28 = vrot.slane %v14519_v11, 2 }
 0x28e   :  { %v3358_v1 = vrot.slane %v3357_v57, 2  ;;  %v3248_v35 = vrot.slane %v3247_v12, 1  ;;  %v14517_v51 = vrot.slane %v14516_v10, 4  ;;  %8588 = vrot.lane.b32.xlu1 %v8587_v33, %s9069_s2  ;;  %v11247_v30 = vmax.f32 %v3352_v55, %v3353_v16  ;;  %v14523_v16 = vld [vmem:[#allocation72_spill] sm:$0xff] }
 0x28f   :  { %v3283_v25 = vrot.slane %v3282_v4, 1  ;;  %v3289_v45 = vmax.f32 %v14514_v9, %v3288_v53  ;;  %v3380_v36 = vmax.f32 %v14515_v40, %v3379_v15  ;;  %v3310_v60 = vmax.f32 %v14519_v11, %v14520_v28  ;;  %v1041_v9 = vpop.f32.mrf.mxu0  ;;  %v8334_v11 = vpop.permute.xlu0 %8333 }
 0x290   :  { %v3359_v17 = vmax.f32 %v3357_v57, %v3358_v1  ;;  %v3385_v50 = vmax.f32 %v14516_v10, %v14517_v51  ;;  %14518 = vst [vmem:[#allocation65_spill] sm:$0xff] %v11247_v30  ;;  %v11255_v57 = vmax.f32 %v3247_v12, %v3248_v35  ;;  %v3316_v52 = vrot.slane %v14523_v16, 2 }
 0x291   :  { %8578 = vrot.lane.b32.xlu0 %v8577_v48, %s9069_s2  ;;  %v11257_v22 = vmax.f32 %v3282_v4, %v3283_v25  ;;  %v3290_v51 = vrot.slane %v3289_v45, 1  ;;  %v3381_v33 = vrot.slane %v3380_v36, 1  ;;  %v3311_v55 = vrot.slane %v3310_v60, 1 }
 0x292   :  { %14521 = vst [vmem:[#allocation68_spill] sm:$0xff] %v11255_v57  ;;  %v3360_v1 = vrot.slane %v3359_v17, 1  ;;  %v3386_v10 = vrot.slane %v3385_v50, 2  ;;  %v8582_v53 = vpack.i.bf16 %v11255_v57, %v11230_v14  ;;  %v1042_v48 = vadd.f32 %v1041_v9, %v9726_v29  ;;  %8613 = vrot.lane.b32.xlu1 %v8612_v23, %s9069_s2 }
 0x293   :  { %14522 = vst [vmem:[#allocation81_spill] sm:$0xff] %v11257_v22  ;;  %v11266_v4 = vmax.f32 %v3289_v45, %v3290_v51  ;;  %v11268_v12 = vmax.f32 %v3380_v36, %v3381_v33  ;;  %v11270_v15 = vmax.f32 %v3310_v60, %v3311_v55  ;;  %v3317_v35 = vmax.f32 %v14523_v16, %v3316_v52  ;;  %v1043_v51 = vpop.f32.mrf.mxu0 }
 0x294   :  { %v11262_v40 = vmax.f32 %v3359_v17, %v3360_v1  ;;  %v3387_v28 = vmax.f32 %v3385_v50, %v3386_v10  ;;  %v1100_v50 = vmax.f32 %v1042_v48, 0.0  ;;  %v8349_v1 = vpop.permute.xlu1 %8348  ;;  %v8336_v10 = vunpack.i.h.bf16 %v8334_v11 }
 0x295   :  { %14525 = vst [vmem:[#allocation69_spill] sm:$0xff] %v11266_v4  ;;  %14526 = vst [vmem:[#allocation72_spill] sm:$0xff] %v11268_v12  ;;  %8583 = vrot.lane.b32.xlu0 %v8582_v53, %s9069_s2  ;;  %v8592_v23 = vpack.i.bf16 %v11266_v4, %v11257_v22  ;;  %v3318_v45 = vrot.slane %v3317_v35, 1  ;;  %v8335_v36 = vunpack.i.l.bf16 %v8334_v11  ;;  %v1044_v52 = vadd.f32 %v1043_v51, %v9728_v32 }
 0x296   :  { %14524 = vst [vmem:[#allocation80_spill] sm:$0xff] %v11262_v40  ;;  %14527 = vst [vmem:[#allocation131_spill] sm:$0xff] %v11270_v15  ;;  %v8622_v17 = vpack.i.bf16 %v11262_v40, %v11247_v30  ;;  %v3388_v25 = vrot.slane %v3387_v28, 1  ;;  %v14529_v33 = vrot.slane %v10752_v21, 2  ;;  %v3400_v16 = vrot.slane %v10861_v58, 2 }
 0x297   :  { %v11287_v53 = vmax.f32 %v3317_v35, %v3318_v45  ;;  %v4473_v48 = vsel %vm4470_vm11, %v8335_v36, %v8336_v10  ;;  %v8351_v11 = vunpack.i.h.bf16 %v8349_v1  ;;  %v14532_v51 = vrot.slane %v11142_v3, 4  ;;  %v14534_v36 = vld [vmem:[#allocation8_spill] sm:$0xff] }
 0x298   :  { %v11278_v60 = vmax.f32 %v3387_v28, %v3388_v25  ;;  %v3394_v55 = vmax.f32 %v10752_v21, %v14529_v33  ;;  %8623 = vrot.lane.b32.xlu1 %v8622_v17, %s9069_s2  ;;  %v14531_v28 = vrot.slane %v11139_v49, 4  ;;  %v1101_v33 = vmax.f32 %v1044_v52, 0.0  ;;  %v14533_v17 = vld [vmem:[#allocation9_spill] sm:$0xff] }
 0x299   :  { %14530 = vst [vmem:[#allocation133_spill] sm:$0xff] %v11287_v53  ;;  %v11298_v21 = vmax.f32 %v11142_v3, %v14532_v51  ;;  %8593 = vrot.lane.b32.xlu0 %v8592_v23, %s9069_s2  ;;  %v4764_v45 = vmax.f32 %v14533_v17, %v8336_v10  ;;  %v4763_v22 = vmax.f32 %v14534_v36, %v4473_v48  ;;  %v14535_v3 = vld [vmem:[#allocation12_spill] sm:$0xff]  ;;  %v14537_v10 = vrot.slane %v11155_v27, 4 }
 0x29a   :  { %14528 = vst [vmem:[#allocation132_spill] sm:$0xff] %v11278_v60  ;;  %v11293_v25 = vmax.f32 %v11139_v49, %v14531_v28  ;;  %v3395_v9 = vrot.slane %v3394_v55, 1  ;;  %v8627_v35 = vpack.i.bf16 %v11278_v60, %v11268_v12  ;;  %v3401_v4 = vmax.f32 %v10861_v58, %v3400_v16 }
 0x29b   :  { %v8597_v49 = vpack.i.bf16 %v11287_v53, %v11270_v15  ;;  %v1516_v28 = vcombine.low %v1100_v50, %v1101_v33  ;;  %v1517_v30 = vcombine.high %v1100_v50, %v1101_v33  ;;  %v4766_v51 = vmax.f32 %v14535_v3, %v8351_v11 }
 0x29c   :  { %8628 = vrot.lane.b32.xlu1 %v8627_v35, %s9069_s2  ;;  %v11311_v52 = vmax.f32 %v3394_v55, %v3395_v9  ;;  %v3402_v12 = vrot.slane %v3401_v4, 1  ;;  %v8350_v60 = vunpack.i.l.bf16 %v8349_v1  ;;  %v11316_v48 = vmax.f32 %v11155_v27, %v14537_v10 }
 0x29d   :  { %v3650_v58 = vrot.slane %v11168_v8, 4  ;;  %8598 = vrot.lane.b32.xlu0 %v8597_v49, %s9069_s2  ;;  %v1524_v50 = vrot.slane %v1516_v28, %v9732_v18  ;;  %v1531_v16 = vrot.slane %v1517_v30, %v9732_v18  ;;  %v14538_v33 = vcombine.high %v11136_v7, %v11136_v7 }
 0x29e   :  { %14536 = vst [vmem:[#allocation9_spill] sm:$0xff] %v11311_v52  ;;  %v4956_v1 = vpack.c.bf16 %v4764_v45, %v4764_v45  ;;  %v4955_v9 = vpack.c.bf16 %v4763_v22, %v4763_v22  ;;  %v11328_v35 = vmax.f32 %v3401_v4, %v3402_v12  ;;  %v4958_v3 = vpack.c.bf16 %v4766_v51, %v4766_v51  ;;  %v14543_v12 = vld [vmem:[#allocation71_spill] sm:$0xff] }
 0x29f   :  { %v11326_v55 = vsel %vm2556_vm10, %v14538_v33, -inf  ;;  %v1532_v27 = vcombine.high %v1524_v50, %v1524_v50  ;;  %v1533_v17 = vcombine.high %v1531_v16, %v1531_v16  ;;  %v2234_v36 = vrot.slane %v1524_v50, %v9732_v18 }
 0x2a0   :  { %14539 = vst [vmem:[#allocation8_spill] sm:$0xff] %v11328_v35  ;;  %v3657_v49 = vrot.slane %v11172_v62, 4  ;;  %v2250_v28 = vrot.slane %v1531_v16, %v9732_v18  ;;  %v8632_v30 = vpack.i.bf16 %v11328_v35, %v11311_v52  ;;  %v4474_v7 = vsel %vm4470_vm11, %v8350_v60, %v8351_v11  ;;  %v1045_v52 = vpop.f32.mrf.mxu0 }
 0x2a1   :  { %v2235_v10 = vcombine.high %v2234_v36, %v2234_v36  ;;  %v2242_v45 = vrot.slane %v1532_v27, %v9732_v18  ;;  %v2258_v22 = vrot.slane %v1533_v17, %v9732_v18  ;;  %v3670_v4 = vsel %vm2548_vm9, %v2234_v36, -inf  ;;  %v14542_v27 = vld [vmem:[#allocation10_spill] sm:$0xff] }
 0x2a2   :  { %v11340_v50 = vunpack.c.l.b16 %v4956_v1  ;;  %v11342_v51 = vunpack.c.l.b16 %v4955_v9  ;;  %v3671_v33 = vrot.slane %v3670_v4, 4  ;;  %8633 = vrot.lane.b32.xlu1 %v8632_v30, %s9069_s2  ;;  %v11347_v11 = vunpack.c.l.b16 %v4958_v3 }
 0x2a3   :  { %v3677_v60 = vsel %vm2556_vm10, %v2235_v10, -inf  ;;  %v11350_v23 = vmax.f32 %v14542_v27, %v4474_v7  ;;  %v2243_v17 = vcombine.high %v2242_v45, %v2242_v45  ;;  %v3684_v36 = vsel %vm2548_vm9, %v2242_v45, -inf  ;;  %v1047_v7 = vpop.f32.mrf.mxu0 }
 0x2a4   :  { %14540 = vst [vmem:[#allocation12_spill] sm:$0xff] %v11342_v51  ;;  %14541 = vst [vmem:[#allocation134_spill] sm:$0xff] %v11347_v11  ;;  %v3698_v1 = vsel %vm2548_vm9, %v2250_v28, -inf  ;;  %v3295_v9 = vrot.slane %v14543_v12, 2  ;;  %v11356_v35 = vmax.f32 %v11168_v8, %v3650_v58  ;;  %v2251_v30 = vcombine.high %v2250_v28, %v2250_v28  ;;  %v8339_v58 = vpop.permute.xlu0 %8338 }
 0x2a5   :  { %v2259_v16 = vcombine.high %v2258_v22, %v2258_v22  ;;  %v11358_v15 = vmax.f32 %v3670_v4, %v3671_v33  ;;  %v11361_v3 = vmax.f32 %v11172_v62, %v3657_v49  ;;  %v3678_v45 = vrot.slane %v3677_v60, 4  ;;  %v14546_v62 = vld [vmem:[#allocation67_spill] sm:$0xff] }
 0x2a6   :  { %v3685_v27 = vrot.slane %v3684_v36, 4  ;;  %v3699_v53 = vrot.slane %v3698_v1, 4  ;;  %v4957_v8 = vpack.c.bf16 %v11350_v23, %v11350_v23  ;;  %v11369_v28 = vsel %vm2556_vm10, %v2243_v17, -inf }
 0x2a7   :  { %14544 = vst [vmem:[#allocation10_spill] sm:$0xff] %v11358_v15  ;;  %14545 = vst [vmem:[#allocation71_spill] sm:$0xff] %v11369_v28  ;;  %v3296_v4 = vmax.f32 %v14543_v12, %v3295_v9  ;;  %v14547_v49 = vrot.slane %v14546_v62, 4  ;;  %v1046_v10 = vadd.f32 %v1045_v52, %v9726_v29  ;;  %v11378_v40 = vsel %vm2556_vm10, %v2251_v30, -inf  ;;  %v14553_v15 = vld [vmem:[#allocation6_spill] sm:$0xff] }
 0x2a8   :  { %v11381_v23 = vsel %vm2548_vm9, %v2258_v22, -inf  ;;  %v11384_v17 = vsel %vm2556_vm10, %v2259_v16, -inf  ;;  %v11386_v57 = vmax.f32 %v3677_v60, %v3678_v45  ;;  %v8341_v63 = vunpack.i.h.bf16 %v8339_v58 }
 0x2a9   :  { %v3301_v33 = vmax.f32 %v14546_v62, %v14547_v49  ;;  %14548 = vst [vmem:[#allocation67_spill] sm:$0xff] %v11384_v17  ;;  %v3297_v12 = vrot.slane %v3296_v4, 1  ;;  %v1102_v62 = vmax.f32 %v1046_v10, 0.0  ;;  %v8340_v49 = vunpack.i.l.bf16 %v8339_v58 }
 0x2aa   :  { %14549 = vst [vmem:[#allocation135_spill] sm:$0xff] %v11386_v57  ;;  %v1048_v52 = vadd.f32 %v1047_v7, %v9728_v32  ;;  %v14550_v14 = vrot.slane %v10899_v26, 2  ;;  %v11392_v61 = vmax.f32 %v3684_v36, %v3685_v27  ;;  %v3428_v16 = vrot.slane %v10931_v46, 2 }
 0x2ab   :  { %v3302_v9 = vrot.slane %v3301_v33, 2  ;;  %v11396_v60 = vmax.f32 %v3698_v1, %v3699_v53  ;;  %v11398_v45 = vmax.f32 %v3296_v4, %v3297_v12  ;;  %v4471_v7 = vsel %vm4470_vm11, %v8340_v49, %v8341_v63  ;;  %v14555_v53 = vld [vmem:[#allocation14_spill] sm:$0xff] }
 0x2ac   :  { %v3422_v30 = vmax.f32 %v10899_v26, %v14550_v14  ;;  %14551 = vst [vmem:[#allocation136_spill] sm:$0xff] %v11392_v61  ;;  %v1103_v38 = vmax.f32 %v1048_v52, 0.0  ;;  %v3429_v57 = vmax.f32 %v10931_v46, %v3428_v16  ;;  %v3323_v26 = vrot.slane %v14553_v15, 2  ;;  %v14557_v52 = vld [vmem:[#allocation11_spill] sm:$0xff]  ;;  %v14558_v16 = vld [vmem:[#allocation73_spill] sm:$0xff] }
 0x2ad   :  { %v3303_v44 = vmax.f32 %v3301_v33, %v3302_v9  ;;  %14552 = vst [vmem:[#allocation137_spill] sm:$0xff] %v11398_v45  ;;  %v3706_v14 = vrot.slane %v11378_v40, 4  ;;  %v3713_v36 = vrot.slane %v11381_v23, 4  ;;  %v4760_v1 = vmax.f32 %v14555_v53, %v8341_v63 }
 0x2ae   :  { %v3423_v10 = vrot.slane %v3422_v30, 1  ;;  %v1534_v27 = vcombine.low %v1102_v62, %v1103_v38  ;;  %v1535_v33 = vcombine.high %v1102_v62, %v1103_v38  ;;  %v3430_v12 = vrot.slane %v3429_v57, 1 }
 0x2af   :  { %v3304_v58 = vrot.slane %v3303_v44, 1  ;;  %v4759_v22 = vmax.f32 %v14557_v52, %v4471_v7  ;;  %v14559_v28 = vrot.slane %v14558_v16, 4  ;;  %v3324_v63 = vmax.f32 %v14553_v15, %v3323_v26  ;;  %v1051_v26 = vpop.f32.mrf.mxu0 }
 0x2b0   :  { %v11408_v4 = vmax.f32 %v3422_v30, %v3423_v10  ;;  %v1542_v49 = vrot.slane %v1534_v27, %v9732_v18  ;;  %v1549_v46 = vrot.slane %v1535_v33, %v9732_v18  ;;  %v11422_v62 = vunpack.c.l.b16 %v4957_v8 }
 0x2b1   :  { %v11405_v9 = vmax.f32 %v3303_v44, %v3304_v58  ;;  %v3329_v61 = vmax.f32 %v14558_v16, %v14559_v28  ;;  %v11419_v44 = vmax.f32 %v3429_v57, %v3430_v12  ;;  %v8374_v57 = vpop.permute.xlu1 %8373  ;;  %v4952_v53 = vpack.c.bf16 %v4760_v1, %v4760_v1 }
 0x2b2   :  { %14556 = vst [vmem:[#allocation14_spill] sm:$0xff] %v11408_v4  ;;  %14561 = vst [vmem:[#allocation73_spill] sm:$0xff] %v11422_v62  ;;  %v1550_v30 = vcombine.high %v1542_v49, %v1542_v49  ;;  %v2266_v10 = vrot.slane %v1542_v49, %v9732_v18  ;;  %v2282_v58 = vrot.slane %v1549_v46, %v9732_v18  ;;  %v3325_v16 = vrot.slane %v3324_v63, 1 }
 0x2b3   :  { %14554 = vst [vmem:[#allocation6_spill] sm:$0xff] %v11405_v9  ;;  %v8602_v38 = vpack.i.bf16 %v11405_v9, %v11398_v45  ;;  %14560 = vst [vmem:[#allocation11_spill] sm:$0xff] %v11419_v44  ;;  %v1551_v28 = vcombine.high %v1549_v46, %v1549_v46  ;;  %v8637_v27 = vpack.i.bf16 %v11419_v44, %v11408_v4  ;;  %v3330_v33 = vrot.slane %v3329_v61, 2 }
 0x2b4   :  { %v4951_v12 = vpack.c.bf16 %v4759_v22, %v4759_v22  ;;  %v2267_v15 = vcombine.high %v2266_v10, %v2266_v10  ;;  %v2274_v8 = vrot.slane %v1550_v30, %v9732_v18  ;;  %v2283_v52 = vcombine.high %v2282_v58, %v2282_v58 }
 0x2b5   :  { %8603 = vrot.lane.b32.xlu0 %v8602_v38, %s9069_s2  ;;  %v3726_v49 = vsel %vm2548_vm9, %v2266_v10, -inf  ;;  %8638 = vrot.lane.b32.xlu1 %v8637_v27, %s9069_s2  ;;  %v1052_v38 = vadd.f32 %v1051_v26, %v9726_v29  ;;  %v3754_v7 = vsel %vm2548_vm9, %v2282_v58, -inf  ;;  %v8376_v4 = vunpack.i.h.bf16 %v8374_v57 }
 0x2b6   :  { %v2275_v46 = vcombine.high %v2274_v8, %v2274_v8  ;;  %v3733_v51 = vsel %vm2556_vm10, %v2267_v15, -inf  ;;  %v11437_v22 = vmax.f32 %v11378_v40, %v3706_v14  ;;  %v11440_v1 = vrot.slane %v1551_v28, %v9732_v18 }
 0x2b7   :  { %v3727_v30 = vrot.slane %v3726_v49, 4  ;;  %v3331_v44 = vmax.f32 %v3329_v61, %v3330_v33  ;;  %v11443_v10 = vmax.f32 %v11381_v23, %v3713_v36  ;;  %v3734_v26 = vrot.slane %v3733_v51, 4  ;;  %v14565_v23 = vld [vmem:[#allocation15_spill] sm:$0xff]  ;;  %v8344_v33 = vpop.permute.xlu0 %8343 }
 0x2b8   :  { %v3740_v45 = vsel %vm2548_vm9, %v2274_v8, -inf  ;;  %v11447_v15 = vunpack.c.l.b16 %v4952_v53  ;;  %v11450_v58 = vsel %vm2556_vm10, %v2275_v46, -inf  ;;  %v3755_v40 = vrot.slane %v3754_v7, 4 }
 0x2b9   :  { %14562 = vst [vmem:[#allocation138_spill] sm:$0xff] %v11443_v10  ;;  %14563 = vst [vmem:[#allocation139_spill] sm:$0xff] %v11450_v58  ;;  %v3761_v14 = vsel %vm2556_vm10, %v2283_v52, -inf  ;;  %v11453_v28 = vunpack.c.l.b16 %v4951_v12  ;;  %v11455_v9 = vmax.f32 %v3324_v63, %v3325_v16  ;;  %v1104_v61 = vmax.f32 %v1052_v38, 0.0 }
 0x2ba   :  { %v4780_v36 = vmax.f32 %v14565_v23, %v8376_v4  ;;  %v2291_v27 = vcombine.high %v11440_v1, %v11440_v1  ;;  %v11460_v8 = vmax.f32 %v3726_v49, %v3727_v30  ;;  %v3741_v53 = vrot.slane %v3740_v45, 4  ;;  %v1053_v23 = vpop.f32.mrf.mxu0 }
 0x2bb   :  { %14564 = vst [vmem:[#allocation140_spill] sm:$0xff] %v11455_v9  ;;  %v3332_v17 = vrot.slane %v3331_v44, 1  ;;  %v11462_v46 = vmax.f32 %v3733_v51, %v3734_v26  ;;  %v3762_v52 = vrot.slane %v3761_v14, 4  ;;  %v8375_v12 = vunpack.i.l.bf16 %v8374_v57 }
 0x2bc   :  { %14566 = vst [vmem:[#allocation15_spill] sm:$0xff] %v11460_v8  ;;  %v11465_v62 = vmax.f32 %v3754_v7, %v3755_v40  ;;  %v8346_v16 = vunpack.i.h.bf16 %v8344_v33  ;;  %v8345_v38 = vunpack.i.l.bf16 %v8344_v33  ;;  %v1054_v49 = vadd.f32 %v1053_v23, %v9728_v32  ;;  %v14572_v40 = vld [vmem:[#allocation17_spill] sm:$0xff] }
 0x2bd   :  { %14567 = vst [vmem:[#allocation141_spill] sm:$0xff] %v11462_v46  ;;  %v11467_v63 = vmax.f32 %v3331_v44, %v3332_v17  ;;  %v4481_v11 = vsel %vm4470_vm11, %v8375_v12, %v8376_v4  ;;  %v3407_v30 = vrot.slane %v10906_v37, 2  ;;  %v14570_v51 = vrot.slane %v10756_v24, 4  ;;  %v14571_v44 = vld [vmem:[#allocation13_spill] sm:$0xff] }
 0x2be   :  { %14568 = vst [vmem:[#allocation142_spill] sm:$0xff] %v11465_v62  ;;  %v3768_v57 = vsel %vm2548_vm9, %v11440_v1, -inf  ;;  %v4779_v7 = vmax.f32 %v14571_v44, %v4481_v11  ;;  %v4762_v33 = vmax.f32 %v14572_v40, %v8346_v16  ;;  %v4472_v4 = vsel %vm4470_vm11, %v8345_v38, %v8346_v16  ;;  %v14574_v1 = vld [vmem:[#allocation16_spill] sm:$0xff] }
 0x2bf   :  { %14569 = vst [vmem:[#allocation143_spill] sm:$0xff] %v11467_v63  ;;  %v3413_v26 = vmax.f32 %v10756_v24, %v14570_v51  ;;  %v8607_v17 = vpack.i.bf16 %v11467_v63, %v11455_v9  ;;  %v1105_v12 = vmax.f32 %v1054_v49, 0.0  ;;  %v3408_v23 = vmax.f32 %v10906_v37, %v3407_v30 }
 0x2c0   :  { %v11484_v46 = vmax.f32 %v3740_v45, %v3741_v53  ;;  %v4954_v24 = vpack.c.bf16 %v4762_v33, %v4762_v33  ;;  %v4761_v51 = vmax.f32 %v14574_v1, %v4472_v4  ;;  %v11488_v40 = vmax.f32 %v3761_v14, %v3762_v52  ;;  %v14576_v53 = vld [vmem:[#allocation74_spill] sm:$0xff] }
 0x2c1   :  { %v3414_v10 = vrot.slane %v3413_v26, 2  ;;  %8608 = vrot.lane.b32.xlu0 %v8607_v17, %s9069_s2  ;;  %v1552_v9 = vcombine.low %v1104_v61, %v1105_v12  ;;  %v1553_v63 = vcombine.high %v1104_v61, %v1105_v12  ;;  %v3409_v11 = vrot.slane %v3408_v23, 1 }
 0x2c2   :  { %14573 = vst [vmem:[#allocation13_spill] sm:$0xff] %v11484_v46  ;;  %14575 = vst [vmem:[#allocation17_spill] sm:$0xff] %v11488_v40  ;;  %v4972_v16 = vpack.c.bf16 %v4780_v36, %v4780_v36  ;;  %v4971_v38 = vpack.c.bf16 %v4779_v7, %v4779_v7  ;;  %v4953_v49 = vpack.c.bf16 %v4761_v51, %v4761_v51  ;;  %v14577_v58 = vrot.slane %v14576_v53, 2 }
 0x2c3   :  { %v3415_v44 = vmax.f32 %v3413_v26, %v3414_v10  ;;  %v1560_v37 = vrot.slane %v1552_v9, %v9732_v18  ;;  %v1567_v30 = vrot.slane %v1553_v63, %v9732_v18  ;;  %v3769_v33 = vrot.slane %v3768_v57, 4 }
 0x2c4   :  { %v3338_v17 = vmax.f32 %v14576_v53, %v14577_v58  ;;  %v5356_v4 = vunpack.c.l.b16 %v4954_v24  ;;  %v5355_v1 = vunpack.c.l.b16 %v4953_v49  ;;  %v11495_v61 = vmax.f32 %v3408_v23, %v3409_v11  ;;  %v14583_v53 = vld [vmem:[#allocation75_spill] sm:$0xff] }
 0x2c5   :  { %v3416_v45 = vrot.slane %v3415_v44, 1  ;;  %v1568_v10 = vcombine.high %v1560_v37, %v1560_v37  ;;  %v1569_v14 = vcombine.high %v1567_v30, %v1567_v30  ;;  %v2298_v36 = vrot.slane %v1560_v37, %v9732_v18 }
 0x2c6   :  { %14578 = vst [vmem:[#allocation16_spill] sm:$0xff] %v11495_v61  ;;  %v2314_v52 = vrot.slane %v1567_v30, %v9732_v18  ;;  %v11501_v63 = vsel %vm2556_vm10, %v2291_v27, -inf  ;;  %v11503_v26 = vunpack.c.l.b16 %v4972_v16  ;;  %v11507_v58 = vunpack.c.l.b16 %v4971_v38 }
 0x2c7   :  { %14579 = vst [vmem:[#allocation74_spill] sm:$0xff] %v11501_v63  ;;  %v11505_v7 = vmax.f32 %v3415_v44, %v3416_v45  ;;  %v2299_v12 = vcombine.high %v2298_v36, %v2298_v36  ;;  %v2306_v23 = vrot.slane %v1568_v10, %v9732_v18  ;;  %v3339_v24 = vrot.slane %v3338_v17, 1  ;;  %v1055_v10 = vpop.f32.mrf.mxu0 }
 0x2c8   :  { %14581 = vst [vmem:[#allocation145_spill] sm:$0xff] %v11507_v58  ;;  %v5566_v51 = vrot.slane %v5356_v4, 7  ;;  %v2315_v11 = vcombine.high %v2314_v52, %v2314_v52  ;;  %v3782_v49 = vsel %vm2548_vm9, %v2298_v36, -inf  ;;  %v11513_v30 = vmax.f32 %v3768_v57, %v3769_v33  ;;  %v8384_v36 = vpop.permute.xlu1 %8383 }
 0x2c9   :  { %14580 = vst [vmem:[#allocation144_spill] sm:$0xff] %v11505_v7  ;;  %v8642_v37 = vpack.i.bf16 %v11505_v7, %v11495_v61  ;;  %v5545_v27 = vrot.slane %v5355_v1, 7  ;;  %v11516_v44 = vrot.slane %v1569_v14, %v9732_v18  ;;  %v3783_v16 = vrot.slane %v3782_v49, 4 }
 0x2ca   :  { %14582 = vst [vmem:[#allocation146_spill] sm:$0xff] %v11513_v30  ;;  %v3789_v38 = vsel %vm2556_vm10, %v2299_v12, -inf  ;;  %v3810_v45 = vsel %vm2548_vm9, %v2314_v52, -inf  ;;  %v3344_v4 = vrot.slane %v14583_v53, 2  ;;  %v2307_v33 = vcombine.high %v2306_v23, %v2306_v23 }
 0x2cb   :  { %8643 = vrot.lane.b32.xlu1 %v8642_v37, %s9069_s2  ;;  %v3796_v1 = vsel %vm2548_vm9, %v2306_v23, -inf  ;;  %v11528_v9 = vsel %vm5546_vm12, %v5566_v51, %v11447_v15  ;;  %v3817_v52 = vsel %vm2556_vm10, %v2315_v11, -inf  ;;  %v11531_v12 = vmax.f32 %v3338_v17, %v3339_v24  ;;  %v8999_v37 = vld [vmem:[%s13986_s3 + $0x38] sm:$0xff]   ;;  %v8354_v15 = vpop.permute.xlu0 %8353  ;;  %v1057_v24 = vpop.f32.mrf.mxu0 }
 0x2cc   :  { %v11538_v57 = vsel %vm5546_vm12, %v5545_v27, %v11453_v28  ;;  %v2323_v23 = vcombine.high %v11516_v44, %v11516_v44  ;;  %v3790_v14 = vrot.slane %v3789_v38, 4  ;;  %v3811_v61 = vrot.slane %v3810_v45, 4 }
 0x2cd   :  { %14584 = vst [vmem:[#allocation75_spill] sm:$0xff] %v11531_v12  ;;  %v11542_v51 = vmax.f32 %v3782_v49, %v3783_v16  ;;  %v3797_v11 = vrot.slane %v3796_v1, 4  ;;  %v3345_v17 = vmax.f32 %v14583_v53, %v3344_v4  ;;  %v11546_v7 = vsel %vm2556_vm10, %v2307_v33, -inf  ;;  %v9000_v16 = vld [vmem:[%s13986_s3 + $0x30] sm:$0xff]  }
 0x2ce   :  { %14586 = vst [vmem:[#allocation148_spill] sm:$0xff] %v11546_v7  ;;  %v3818_v63 = vrot.slane %v3817_v52, 4  ;;  %v14201_v30 = vmov 0   ;;  %v1056_v28 = vadd.f32 %v1055_v10, %v9726_v29  ;;  %v8386_v27 = vunpack.i.h.bf16 %v8384_v36  ;;  %v14589_v10 = vld [vmem:[#allocation19_spill] sm:$0xff] }
 0x2cf   :  { %14585 = vst [vmem:[#allocation147_spill] sm:$0xff] %v11542_v51  ;;  %5981 = vmatprep.subr.bf16.mxu1 %v14201_v30  ;;  %v3346_v46 = vrot.slane %v3345_v17, 1  ;;  %v8385_v40 = vunpack.i.l.bf16 %v8384_v36  ;;  %v8356_v62 = vunpack.i.h.bf16 %v8354_v15  ;;  %v8355_v49 = vunpack.i.l.bf16 %v8354_v15 }
 0x2d0   :  { %5982 = vmatpush1.bf16.msra.mxu1 %v8999_v37  ;;  %v11553_v53 = vmax.f32 %v3789_v38, %v3790_v14  ;;  %v11555_v4 = vmax.f32 %v3810_v45, %v3811_v61  ;;  %v1106_v33 = vmax.f32 %v1056_v28, 0.0  ;;  %v1058_v8 = vadd.f32 %v1057_v24, %v9728_v32  ;;  %v14590_v38 = vld [vmem:[#allocation21_spill] sm:$0xff]  ;;  %v14591_v24 = vld [vmem:[#allocation18_spill] sm:$0xff] }
 0x2d1   :  { %5983 = vmatprep.subr.bf16.mxu1 %v14201_v30  ;;  %v11559_v29 = vmax.f32 %v3345_v17, %v3346_v46  ;;  %v4778_v37 = vmax.f32 %v14589_v10, %v8386_v27  ;;  %v4480_v36 = vsel %vm4470_vm11, %v8385_v40, %v8386_v27  ;;  %v4475_v15 = vsel %vm4470_vm11, %v8355_v49, %v8356_v62  ;;  %v14592_v17 = vld [vmem:[#allocation20_spill] sm:$0xff] }
 0x2d2   :  { %14587 = vst [vmem:[#allocation149_spill] sm:$0xff] %v11553_v53  ;;  %v3824_v58 = vsel %vm2548_vm9, %v11516_v44, -inf  ;;  %v4768_v14 = vmax.f32 %v14590_v38, %v8356_v62  ;;  %v1107_v61 = vmax.f32 %v1058_v8, 0.0  ;;  %v3435_v45 = vrot.slane %v10937_v34, 2  ;;  %v9001_v44 = vld [vmem:[%s13986_s3 + $0x28] sm:$0xff]  }
 0x2d3   :  { %14588 = vst [vmem:[#allocation150_spill] sm:$0xff] %v11559_v29  ;;  %v8617_v32 = vpack.i.bf16 %v11559_v29, %v11531_v12  ;;  %v4777_v46 = vmax.f32 %v14591_v24, %v4480_v36  ;;  %v4767_v28 = vmax.f32 %v14592_v17, %v4475_v15  ;;  %v14593_v10 = vrot.slane %v10920_v54, 4 }
 0x2d4   :  { %5984 = vmatpush1.bf16.msra.mxu1 %v9000_v16  ;;  %v11579_v8 = vmax.f32 %v3796_v1, %v3797_v11  ;;  %v1570_v49 = vcombine.low %v1106_v33, %v1107_v61  ;;  %v3825_v36 = vrot.slane %v3824_v58, 4  ;;  %v4970_v15 = vpack.c.bf16 %v4778_v37, %v4778_v37  ;;  %v9002_v37 = vld [vmem:[%s13986_s3 + $0x20] sm:$0xff]  }
 0x2d5   :  { %v3441_v40 = vmax.f32 %v10920_v54, %v14593_v10  ;;  %5985 = vmatprep.subr.bf16.mxu1 %v14201_v30  ;;  %8618 = vrot.lane.b32.xlu0 %v8617_v32, %s9069_s2  ;;  %v1571_v38 = vcombine.high %v1106_v33, %v1107_v61  ;;  %v11585_v24 = vmax.f32 %v3817_v52, %v3818_v63  ;;  %v11594_v33 = vsel %vm2556_vm10, %v2323_v23, -inf }
 0x2d6   :  { %v4960_v17 = vpack.c.bf16 %v4768_v14, %v4768_v14  ;;  %v1578_v10 = vrot.slane %v1570_v49, %v9732_v18  ;;  %v4969_v1 = vpack.c.bf16 %v4777_v46, %v4777_v46  ;;  %v4959_v11 = vpack.c.bf16 %v4767_v28, %v4767_v28  ;;  %14594 = vst [vmem:[#allocation19_spill] sm:$0xff] %v11594_v33 }
 0x2d7   :  { %v3442_v54 = vrot.slane %v3441_v40, 2  ;;  %v1585_v62 = vrot.slane %v1571_v38, %v9732_v18  ;;  %v3436_v27 = vmax.f32 %v10937_v34, %v3435_v45  ;;  %v11598_v14 = vmax.f32 %v3824_v58, %v3825_v36  ;;  %v9003_v36 = vld [vmem:[%s13986_s3 + $0x18] sm:$0xff]  }
 0x2d8   :  { %5986 = vmatpush1.bf16.msra.mxu1 %v9001_v44  ;;  %v1586_v61 = vcombine.high %v1578_v10, %v1578_v10  ;;  %v2330_v63 = vrot.slane %v1578_v10, %v9732_v18  ;;  %v11600_v32 = vunpack.c.l.b16 %v4970_v15  ;;  %v11603_v45 = vunpack.c.l.b16 %v4960_v17 }
 0x2d9   :  { %v3443_v52 = vmax.f32 %v3441_v40, %v3442_v54  ;;  %5987 = vmatprep.subr.bf16.mxu1 %v14201_v30  ;;  %14595 = vst [vmem:[#allocation21_spill] sm:$0xff] %v11598_v14  ;;  %v1587_v46 = vcombine.high %v1585_v62, %v1585_v62  ;;  %v2346_v34 = vrot.slane %v1585_v62, %v9732_v18  ;;  %v11607_v49 = vunpack.c.l.b16 %v4969_v1 }
 0x2da   :  { %v2331_v28 = vcombine.high %v2330_v63, %v2330_v63  ;;  %v2338_v44 = vrot.slane %v1586_v61, %v9732_v18  ;;  %v3838_v23 = vsel %vm2548_vm9, %v2330_v63, -inf  ;;  %v11609_v38 = vunpack.c.l.b16 %v4959_v11 }
 0x2db   :  { %v3866_v40 = vsel %vm2548_vm9, %v2346_v34, -inf  ;;  %v3437_v58 = vrot.slane %v3436_v27, 1  ;;  %v2354_v62 = vrot.slane %v1587_v46, %v9732_v18  ;;  %v3839_v15 = vrot.slane %v3838_v23, 4 }
 0x2dc   :  { %5988 = vmatpush1.bf16.msra.mxu1 %v9002_v37  ;;  %v3444_v54 = vrot.slane %v3443_v52, 1  ;;  %v14596_v17 = vrot.slane %v10972_v43, 2  ;;  %v2339_v1 = vcombine.high %v2338_v44, %v2338_v44  ;;  %v3845_v11 = vsel %vm2556_vm10, %v2331_v28, -inf  ;;  %v9004_v28 = vld [vmem:[%s13986_s3 + $0x10] sm:$0xff]  }
 0x2dd   :  { %5989 = vmatprep.subr.bf16.mxu1 %v14201_v30  ;;  %v3852_v61 = vsel %vm2548_vm9, %v2338_v44, -inf  ;;  %v3484_v37 = vrot.slane %v11023_v42, 2  ;;  %v2347_v46 = vcombine.high %v2346_v34, %v2346_v34  ;;  %v3867_v18 = vrot.slane %v3866_v40, 4  ;;  %v8389_v30 = vpop.permute.xlu1 %8388 }
 0x2de   :  { %v3478_v10 = vmax.f32 %v10972_v43, %v14596_v17  ;;  %v11628_v17 = vmax.f32 %v3436_v27, %v3437_v58  ;;  %v2355_v44 = vcombine.high %v2354_v62, %v2354_v62  ;;  %v11633_v63 = vmax.f32 %v3838_v23, %v3839_v15 }
 0x2df   :  { %v3846_v16 = vrot.slane %v3845_v11, 4  ;;  %v3853_v34 = vrot.slane %v3852_v61, 4  ;;  %v14599_v53 = vmov 0   ;;  %v11637_v12 = vsel %vm2556_vm10, %v2339_v1, -inf }
 0x2e0   :  { %14597 = vst [vmem:[#allocation18_spill] sm:$0xff] %v11628_v17  ;;  %5990 = vmatpush1.bf16.msra.mxu1 %v9003_v36  ;;  %14598 = vst [vmem:[#allocation20_spill] sm:$0xff] %v11633_v63  ;;  %v11639_v29 = vmax.f32 %v3443_v52, %v3444_v54  ;;  %v3479_v27 = vrot.slane %v3478_v10, 1  ;;  %v3485_v58 = vmax.f32 %v11023_v42, %v3484_v37  ;;  %v8359_v36 = vpop.permute.xlu0 %8358  ;;  %v11645_v51 = vsel %vm2556_vm10, %v2347_v46, -inf  ;;  %v9005_v42 = vld [vmem:[%s13986_s3 + $0x8] sm:$0xff]  }
 0x2e1   :  { %5991 = vmatprep.subr.bf16.mxu1 %v14599_v53  ;;  %14600 = vst [vmem:[#allocation151_spill] sm:$0xff] %v11637_v12  ;;  %v11642_v43 = vmax.f32 %v3866_v40, %v3867_v18  ;;  %v8391_v23 = vunpack.i.h.bf16 %v8389_v30  ;;  %v8390_v15 = vunpack.i.l.bf16 %v8389_v30  ;;  %v3880_v33 = vsel %vm2548_vm9, %v2354_v62, -inf }
 0x2e2   :  { %14601 = vst [vmem:[#allocation152_spill] sm:$0xff] %v11639_v29  ;;  %v8647_v14 = vpack.i.bf16 %v11639_v29, %v11628_v17  ;;  %v11650_v1 = vmax.f32 %v3478_v10, %v3479_v27  ;;  %v3486_v52 = vrot.slane %v3485_v58, 1  ;;  %v8361_v40 = vunpack.i.h.bf16 %v8359_v36 }
 0x2e3   :  { %14602 = vst [vmem:[#allocation153_spill] sm:$0xff] %v11642_v43  ;;  %v4482_v18 = vsel %vm4470_vm11, %v8390_v15, %v8391_v23  ;;  %v8360_v54 = vunpack.i.l.bf16 %v8359_v36  ;;  %v3491_v37 = vrot.slane %v11025_v59, 2  ;;  %v11659_v62 = vmax.f32 %v3845_v11, %v3846_v16  ;;  %v14608_v15 = vld [vmem:[#allocation23_spill] sm:$0xff] }
 0x2e4   :  { %14603 = vst [vmem:[#allocation154_spill] sm:$0xff] %v11650_v1  ;;  %5992 = vmatpush1.bf16.msra.mxu1 %v9004_v28  ;;  %8648 = vrot.lane.b32.xlu1 %v8647_v14, %s9069_s2  ;;  %v11662_v10 = vmax.f32 %v3485_v58, %v3486_v52  ;;  %v14606_v46 = vrot.slane %v10991_v39, 4  ;;  %v11667_v27 = vmax.f32 %v3852_v61, %v3853_v34  ;;  %v14609_v29 = vrot.slane %v10947_v56, 2  ;;  %v14611_v58 = vld [vmem:[#allocation22_spill] sm:$0xff] }
 0x2e5   :  { %5993 = vmatprep.subr.bf16.mxu1 %v14599_v53  ;;  %14604 = vst [vmem:[#allocation155_spill] sm:$0xff] %v11659_v62  ;;  %v4782_v36 = vmax.f32 %v14608_v15, %v8391_v23  ;;  %v3492_v17 = vmax.f32 %v11025_v59, %v3491_v37  ;;  %v11676_v14 = vsel %vm2556_vm10, %v2355_v44, -inf  ;;  %v9006_v61 = vld [vmem:[%s13986_s3] sm:$0xff]   ;;  %v4477_v34 = vsel %vm4470_vm11, %v8360_v54, %v8361_v40  ;;  %v8364_v37 = vpop.permute.xlu0 %8363 }
 0x2e6   :  { %14605 = vst [vmem:[#allocation156_spill] sm:$0xff] %v11662_v10  ;;  %v3497_v28 = vmax.f32 %v10991_v39, %v14606_v46  ;;  %14607 = vst [vmem:[#allocation157_spill] sm:$0xff] %v11667_v27  ;;  %v3450_v30 = vmax.f32 %v10947_v56, %v14609_v29  ;;  %v8652_v11 = vpack.i.bf16 %v11662_v10, %v11650_v1  ;;  %v3874_v44 = vrot.slane %v11645_v51, 4  ;;  %v14613_v1 = vld [vmem:[#allocation24_spill] sm:$0xff] }
 0x2e7   :  { %14610 = vst [vmem:[#allocation23_spill] sm:$0xff] %v11676_v14  ;;  %v4781_v39 = vmax.f32 %v14611_v58, %v4482_v18  ;;  %v3493_v56 = vrot.slane %v3492_v17, 1  ;;  %v3881_v23 = vrot.slane %v3880_v33, 4  ;;  %v8394_v18 = vpop.permute.xlu1 %8393  ;;  %v4974_v15 = vpack.c.bf16 %v4782_v36, %v4782_v36  ;;  %v14612_v58 = vld [vmem:[#allocation25_spill] sm:$0xff] }
 0x2e8   :  { %5994 = vmatpush1.bf16.msra.mxu1 %v9005_v42  ;;  %v3498_v29 = vrot.slane %v3497_v28, 2  ;;  %8653 = vrot.lane.b32.xlu0 %v8652_v11, %s9069_s2  ;;  %v3451_v52 = vrot.slane %v3450_v30, 1  ;;  %v3456_v42 = vrot.slane %v10967_v47, 2  ;;  %v4772_v16 = vmax.f32 %v14612_v58, %v8361_v40 }
 0x2e9   :  { %5995 = vmatprep.subr.bf16.mxu1 %v14599_v53  ;;  %v4973_v59 = vpack.c.bf16 %v4781_v39, %v4781_v39  ;;  %v4771_v10 = vmax.f32 %v14613_v1, %v4477_v34  ;;  %v11693_v12 = vmax.f32 %v3492_v17, %v3493_v56  ;;  %v8396_v43 = vunpack.i.h.bf16 %v8394_v18  ;;  %v14618_v39 = vld [vmem:[#allocation27_spill] sm:$0xff] }
 0x2ea   :  { %v3499_v54 = vmax.f32 %v3497_v28, %v3498_v29  ;;  %v3457_v27 = vmax.f32 %v10967_v47, %v3456_v42  ;;  %v8395_v62 = vunpack.i.l.bf16 %v8394_v18  ;;  %v8366_v63 = vunpack.i.h.bf16 %v8364_v37 }
 0x2eb   :  { %14614 = vst [vmem:[#allocation22_spill] sm:$0xff] %v11693_v12  ;;  %v11697_v7 = vmax.f32 %v3450_v30, %v3451_v52  ;;  %v8365_v46 = vunpack.i.l.bf16 %v8364_v37  ;;  %v14616_v40 = vrot.slane %v11128_v0, 2  ;;  %v4964_v1 = vpack.c.bf16 %v4772_v16, %v4772_v16  ;;  %v14621_v30 = vld [vmem:[#allocation29_spill] sm:$0xff]  ;;  %v14622_v16 = vld [vmem:[#allocation26_spill] sm:$0xff]  ;;  %v8399_v37 = vpop.permute.xlu1 %8398 }
 0x2ec   :  { %5996 = vmatpush1.bf16.msra.mxu1 %v9006_v61  ;;  %v3500_v11 = vrot.slane %v3499_v54, 1  ;;  %v3458_v36 = vrot.slane %v3457_v27, 1  ;;  %v4784_v47 = vmax.f32 %v14618_v39, %v8396_v43  ;;  %v4483_v61 = vsel %vm4470_vm11, %v8395_v62, %v8396_v43 }
 0x2ed   :  { %6011 = vmatprep.subr.bf16.mxu1 %v14599_v53  ;;  %14615 = vst [vmem:[#allocation25_spill] sm:$0xff] %v11697_v7  ;;  %v3590_v28 = vmax.f32 %v11128_v0, %v14616_v40  ;;  %v11707_v34 = vmax.f32 %v11645_v51, %v3874_v44  ;;  %v11709_v56 = vmax.f32 %v3880_v33, %v3881_v23  ;;  %v11714_v52 = vunpack.c.l.b16 %v4974_v15 }
 0x2ee   :  { %v11702_v17 = vmax.f32 %v3499_v54, %v3500_v11  ;;  %v11711_v53 = vmax.f32 %v3457_v27, %v3458_v36  ;;  %v4770_v29 = vmax.f32 %v14621_v30, %v8366_v63  ;;  %v4963_v42 = vpack.c.bf16 %v4771_v10, %v4771_v10  ;;  %v14624_v36 = vld [vmem:[#allocation28_spill] sm:$0xff] }
 0x2ef   :  { %14619 = vst [vmem:[#allocation27_spill] sm:$0xff] %v11709_v56  ;;  %v4783_v18 = vmax.f32 %v14622_v16, %v4483_v61  ;;  %v4476_v51 = vsel %vm4470_vm11, %v8365_v46, %v8366_v63  ;;  %v3591_v33 = vrot.slane %v3590_v28, 1  ;;  %v3596_v62 = vrot.slane %v11150_v41, 2 }
 0x2f0   :  { %14617 = vst [vmem:[#allocation24_spill] sm:$0xff] %v11702_v17  ;;  %14620 = vst [vmem:[#allocation158_spill] sm:$0xff] %v11711_v53  ;;  %v8667_v0 = vpack.i.bf16 %v11702_v17, %v11693_v12  ;;  %v8657_v43 = vpack.i.bf16 %v11711_v53, %v11697_v7  ;;  %v11723_v27 = vunpack.c.l.b16 %v4973_v59  ;;  %v11725_v44 = vunpack.c.l.b16 %v4964_v1 }
 0x2f1   :  { %v4976_v10 = vpack.c.bf16 %v4784_v47, %v4784_v47  ;;  %v3463_v23 = vrot.slane %v11013_v13, 2  ;;  %v4962_v15 = vpack.c.bf16 %v4770_v29, %v4770_v29  ;;  %v3597_v58 = vmax.f32 %v11150_v41, %v3596_v62 }
 0x2f2   :  { %8668 = vrot.lane.b32.xlu1 %v8667_v0, %s9069_s2  ;;  %8658 = vrot.lane.b32.xlu0 %v8657_v43, %s9069_s2  ;;  %v14623_v54 = vrot.slane %v10951_v2, 4  ;;  %v8401_v46 = vunpack.i.h.bf16 %v8399_v37  ;;  %v11735_v11 = vunpack.c.l.b16 %v4963_v42  ;;  %v4769_v40 = vmax.f32 %v14624_v36, %v4476_v51  ;;  %v14627_v51 = vld [vmem:[#allocation31_spill] sm:$0xff] }
 0x2f3   :  { %v3464_v1 = vmax.f32 %v11013_v13, %v3463_v23  ;;  %v4975_v39 = vpack.c.bf16 %v4783_v18, %v4783_v18  ;;  %v11739_v47 = vmax.f32 %v3590_v28, %v3591_v33  ;;  %v3598_v61 = vrot.slane %v3597_v58, 1  ;;  %v8369_v13 = vpop.permute.xlu0 %8368 }
 0x2f4   :  { %v3469_v63 = vmax.f32 %v10951_v2, %v14623_v54  ;;  %v11743_v0 = vunpack.c.l.b16 %v4976_v10  ;;  %v11745_v16 = vunpack.c.l.b16 %v4962_v15  ;;  %v4788_v62 = vmax.f32 %v14627_v51, %v8401_v46 }
 0x2f5   :  { %14625 = vst [vmem:[#allocation29_spill] sm:$0xff] %v11739_v47  ;;  %v3465_v2 = vrot.slane %v3464_v1, 1  ;;  %v11747_v42 = vmax.f32 %v3597_v58, %v3598_v61  ;;  %v4961_v18 = vpack.c.bf16 %v4769_v40, %v4769_v40  ;;  %v8400_v33 = vunpack.i.l.bf16 %v8399_v37 }
 0x2f6   :  { %v3470_v30 = vrot.slane %v3469_v63, 2  ;;  %v3575_v23 = vrot.slane %v11144_v20, 2  ;;  %v11752_v54 = vunpack.c.l.b16 %v4975_v39  ;;  %v4980_v51 = vpack.c.bf16 %v4788_v62, %v4788_v62 }
 0x2f7   :  { %14626 = vst [vmem:[#allocation26_spill] sm:$0xff] %v11747_v42  ;;  %v8692_v10 = vpack.i.bf16 %v11747_v42, %v11739_v47  ;;  %v11756_v36 = vmax.f32 %v3464_v1, %v3465_v2  ;;  %v8370_v28 = vunpack.i.l.bf16 %v8369_v13  ;;  %v8404_v1 = vpop.permute.xlu1 %8403  ;;  %v4485_v2 = vsel %vm4470_vm11, %v8400_v33, %v8401_v46  ;;  %v8379_v62 = vpop.permute.xlu0 %8378 }
 0x2f8   :  { %v3471_v43 = vmax.f32 %v3469_v63, %v3470_v30  ;;  %v8371_v63 = vunpack.i.h.bf16 %v8369_v13  ;;  %v3576_v61 = vmax.f32 %v11144_v20, %v3575_v23  ;;  %v14629_v30 = vrot.slane %v11099_v5, 4  ;;  %v14633_v13 = vld [vmem:[#allocation33_spill] sm:$0xff] }
 0x2f9   :  { %14628 = vst [vmem:[#allocation28_spill] sm:$0xff] %v11756_v36  ;;  %8693 = vrot.lane.b32.xlu1 %v8692_v10, %s9069_s2  ;;  %v14631_v58 = vrot.slane %v11032_v19, 2  ;;  %v8406_v33 = vunpack.i.h.bf16 %v8404_v1  ;;  %v11779_v59 = vunpack.c.l.b16 %v4980_v51  ;;  %v8405_v23 = vunpack.i.l.bf16 %v8404_v1 }
 0x2fa   :  { %v3472_v15 = vrot.slane %v3471_v43, 1  ;;  %v3581_v40 = vmax.f32 %v11099_v5, %v14629_v30  ;;  %v3577_v41 = vrot.slane %v3576_v61, 1  ;;  %v11772_v5 = vunpack.c.l.b16 %v4961_v18 }
 0x2fb   :  { %v3506_v20 = vmax.f32 %v11032_v19, %v14631_v58  ;;  %v4774_v30 = vmax.f32 %v14633_v13, %v8371_v63  ;;  %v14634_v19 = vld [vmem:[#allocation30_spill] sm:$0xff]  ;;  %v4478_v47 = vsel %vm4470_vm11, %v8370_v28, %v8371_v63  ;;  %v8381_v7 = vunpack.i.h.bf16 %v8379_v62  ;;  %v14637_v13 = vld [vmem:[#allocation124_spill] sm:$0xff]  ;;  %v14641_v63 = vld [vmem:[#allocation121_spill] sm:$0xff] }
 0x2fc   :  { %v11765_v39 = vmax.f32 %v3471_v43, %v3472_v15  ;;  %v3582_v29 = vrot.slane %v3581_v40, 2  ;;  %v14632_v43 = vld [vmem:[#allocation109_spill] sm:$0xff]  ;;  %v4787_v58 = vmax.f32 %v14634_v19, %v4485_v2  ;;  %v3603_v42 = vrot.slane %v14637_v13, 2 }
 0x2fd   :  { %v3512_v15 = vrot.slane %v14632_v43, 2  ;;  %v3507_v46 = vrot.slane %v3506_v20, 1  ;;  %v4484_v2 = vsel %vm4470_vm11, %v8405_v23, %v8406_v33  ;;  %v14639_v19 = vld [vmem:[#allocation37_spill] sm:$0xff]  ;;  %vm6278_vm9 = vcmask 588800  }
 0x2fe   :  { %14630 = vst [vmem:[#allocation31_spill] sm:$0xff] %v11765_v39  ;;  %v8662_v10 = vpack.i.bf16 %v11765_v39, %v11756_v36  ;;  %v3583_v37 = vmax.f32 %v3581_v40, %v3582_v29  ;;  %v11784_v36 = vmax.f32 %v3576_v61, %v3577_v41  ;;  %v8380_v40 = vunpack.i.l.bf16 %v8379_v62  ;;  %v14643_v62 = vld [vmem:[#allocation32_spill] sm:$0xff] }
 0x2ff   :  { %v3513_v18 = vmax.f32 %v14632_v43, %v3512_v15  ;;  %v11786_v53 = vmax.f32 %v3506_v20, %v3507_v46  ;;  %v4776_v43 = vmax.f32 %v14639_v19, %v8381_v7  ;;  %v3604_v28 = vmax.f32 %v14637_v13, %v3603_v42  ;;  %v14646_v13 = vld [vmem:[#allocation36_spill] sm:$0xff]  ;;  %v14647_v19 = vld [vmem:[#allocation111_spill] sm:$0xff] }
 0x300   :  { %8663 = vrot.lane.b32.xlu0 %v8662_v10, %s9069_s2  ;;  %14635 = vst [vmem:[#allocation109_spill] sm:$0xff] %v11784_v36  ;;  %v3584_v39 = vrot.slane %v3583_v37, 1  ;;  %v4966_v10 = vpack.c.bf16 %v4774_v30, %v4774_v30  ;;  %v4479_v41 = vsel %vm4470_vm11, %v8380_v40, %v8381_v7  ;;  %v14642_v61 = vrot.slane %v14641_v63, 4  ;;  %v8414_v40 = vpop.permute.xlu0 %8413 }
 0x301   :  { %14636 = vst [vmem:[#allocation33_spill] sm:$0xff] %v11786_v53  ;;  %v3514_v29 = vrot.slane %v3513_v18, 1  ;;  %v4979_v15 = vpack.c.bf16 %v4787_v58, %v4787_v58  ;;  %v11801_v46 = vmax.f32 %v14643_v62, %v4478_v47  ;;  %v4968_v58 = vpack.c.bf16 %v4776_v43, %v4776_v43  ;;  %v14659_v43 = vld [vmem:[#allocation39_spill] sm:$0xff] }
 0x302   :  { %v11789_v51 = vmax.f32 %v3583_v37, %v3584_v39  ;;  %v3609_v20 = vmax.f32 %v14641_v63, %v14642_v61  ;;  %v14644_v39 = vld [vmem:[#allocation35_spill] sm:$0xff]  ;;  %v4775_v47 = vmax.f32 %v14646_v13, %v4479_v41  ;;  %v14648_v63 = vrot.slane %v14647_v19, 2 }
 0x303   :  { %v11793_v1 = vmax.f32 %v3513_v18, %v3514_v29  ;;  %v4786_v23 = vmax.f32 %v14644_v39, %v8406_v33  ;;  %v14645_v18 = vld [vmem:[#allocation34_spill] sm:$0xff]  ;;  %v3605_v29 = vrot.slane %v3604_v28, 1  ;;  %v11816_v62 = vunpack.c.l.b16 %v4966_v10  ;;  %v14649_v39 = vld [vmem:[#allocation115_spill] sm:$0xff] }
 0x304   :  { %14638 = vst [vmem:[#allocation30_spill] sm:$0xff] %v11789_v51  ;;  %v8702_v37 = vpack.i.bf16 %v11789_v51, %v11784_v36  ;;  %v4785_v7 = vmax.f32 %v14645_v18, %v4484_v2  ;;  %v3610_v42 = vrot.slane %v3609_v20, 2  ;;  %v3534_v61 = vmax.f32 %v14647_v19, %v14648_v63 }
 0x305   :  { %14640 = vst [vmem:[#allocation124_spill] sm:$0xff] %v11793_v1  ;;  %v8672_v30 = vpack.i.bf16 %v11793_v1, %v11786_v53  ;;  %v3540_v18 = vrot.slane %v14649_v39, 2  ;;  %v8409_v53 = vpop.permute.xlu1 %8408  ;;  %v11820_v1 = vunpack.c.l.b16 %v4979_v15  ;;  %v4978_v41 = vpack.c.bf16 %v4786_v23, %v4786_v23 }
 0x306   :  { %8703 = vrot.lane.b32.xlu1 %v8702_v37, %s9069_s2  ;;  %v3611_v2 = vmax.f32 %v3609_v20, %v3610_v42  ;;  %v3535_v37 = vrot.slane %v3534_v61, 1  ;;  %v4977_v13 = vpack.c.bf16 %v4785_v7, %v4785_v7  ;;  %v11824_v19 = vmax.f32 %v3604_v28, %v3605_v29 }
 0x307   :  { %8673 = vrot.lane.b32.xlu0 %v8672_v30, %s9069_s2  ;;  %v3541_v10 = vmax.f32 %v14649_v39, %v3540_v18  ;;  %v5370_v33 = vunpack.c.l.b16 %v4968_v58  ;;  %v4967_v30 = vpack.c.bf16 %v4775_v47, %v4775_v47  ;;  %v8411_v20 = vunpack.i.h.bf16 %v8409_v53  ;;  %v14656_v18 = vld [vmem:[#allocation40_spill] sm:$0xff] }
 0x308   :  { %14650 = vst [vmem:[#allocation37_spill] sm:$0xff] %v11824_v19  ;;  %v3612_v63 = vrot.slane %v3611_v2, 1  ;;  %v8416_v42 = vunpack.i.h.bf16 %v8414_v40  ;;  %v11829_v51 = vmax.f32 %v3534_v61, %v3535_v37  ;;  %v8415_v12 = vunpack.i.l.bf16 %v8414_v40 }
 0x309   :  { %v3542_v15 = vrot.slane %v3541_v10, 1  ;;  %v8410_v23 = vunpack.i.l.bf16 %v8409_v53  ;;  %v14653_v28 = vrot.slane %v11159_v6, 2  ;;  %v11835_v29 = vunpack.c.l.b16 %v4978_v41 }
 0x30a   :  { %v11827_v36 = vmax.f32 %v3611_v2, %v3612_v63  ;;  %14652 = vst [vmem:[#allocation32_spill] sm:$0xff] %v11829_v51  ;;  %v4489_v61 = vsel %vm4470_vm11, %v8415_v12, %v8416_v42  ;;  %v11842_v2 = vunpack.c.l.b16 %v4977_v13  ;;  %v14655_v40 = vrot.slane %v11600_v32, 7  ;;  %v8429_v63 = vpop.permute.xlu1 %8428 }
 0x30b   :  { %v3618_v7 = vmax.f32 %v11159_v6, %v14653_v28  ;;  %v11839_v47 = vmax.f32 %v3541_v10, %v3542_v15  ;;  %v5369_v53 = vunpack.c.l.b16 %v4967_v30  ;;  %v4790_v37 = vmax.f32 %v14656_v18, %v8411_v20  ;;  %v14657_v15 = vld [vmem:[#allocation113_spill] sm:$0xff]  ;;  %v14660_v30 = vld [vmem:[#allocation106_spill] sm:$0xff] }
 0x30c   :  { %14651 = vst [vmem:[#allocation121_spill] sm:$0xff] %v11827_v36  ;;  %v8707_v58 = vpack.i.bf16 %v11827_v36, %v11824_v19  ;;  %v5595_v39 = vsel %vm5546_vm12, %v14655_v40, %v5370_v33  ;;  %v3624_v10 = vrot.slane %v11293_v25, 2  ;;  %v3519_v12 = vrot.slane %v14657_v15, 2  ;;  %v14658_v28 = vld [vmem:[#allocation41_spill] sm:$0xff] }
 0x30d   :  { %14654 = vst [vmem:[#allocation35_spill] sm:$0xff] %v11839_v47  ;;  %v8677_v6 = vpack.i.bf16 %v11839_v47, %v11829_v51  ;;  %v3619_v41 = vrot.slane %v3618_v7, 1  ;;  %v4486_v13 = vsel %vm4470_vm11, %v8410_v23, %v8411_v20  ;;  %v4796_v32 = vmax.f32 %v14658_v28, %v8416_v42  ;;  %v8419_v28 = vpop.permute.xlu0 %8418 }
 0x30e   :  { %8708 = vrot.lane.b32.xlu1 %v8707_v58, %s9069_s2  ;;  %v4795_v33 = vmax.f32 %v14659_v43, %v4489_v61  ;;  %v14661_v40 = vrot.slane %v14660_v30, 4  ;;  %v3625_v58 = vmax.f32 %v11293_v25, %v3624_v10  ;;  %v3520_v51 = vmax.f32 %v14657_v15, %v3519_v12  ;;  %v14662_v43 = vld [vmem:[#allocation38_spill] sm:$0xff] }
 0x30f   :  { %8678 = vrot.lane.b32.xlu0 %v8677_v6, %s9069_s2  ;;  %v8431_v47 = vunpack.i.h.bf16 %v8429_v63  ;;  %v8430_v19 = vunpack.i.l.bf16 %v8429_v63  ;;  %v4982_v23 = vpack.c.bf16 %v4790_v37, %v4790_v37  ;;  %v11865_v61 = vmax.f32 %v14662_v43, %v4486_v13 }
 0x310   :  { %v3525_v18 = vmax.f32 %v14660_v30, %v14661_v40  ;;  %v11867_v17 = vmax.f32 %v3618_v7, %v3619_v41  ;;  %v3626_v30 = vrot.slane %v3625_v58, 1  ;;  %v3521_v6 = vrot.slane %v3520_v51, 1 }
 0x311   :  { %v14664_v25 = vrot.slane %v11503_v26, 6  ;;  %v4988_v63 = vpack.c.bf16 %v4796_v32, %v4796_v32  ;;  %v4987_v15 = vpack.c.bf16 %v4795_v33, %v4795_v33  ;;  %v14665_v40 = vrot.slane %v11607_v49, 7  ;;  %v14668_v26 = vld [vmem:[#allocation45_spill] sm:$0xff] }
 0x312   :  { %v3526_v42 = vrot.slane %v3525_v18, 2  ;;  %14663 = vst [vmem:[#allocation34_spill] sm:$0xff] %v11867_v17  ;;  %v11879_v20 = vmax.f32 %v3625_v58, %v3626_v30  ;;  %v4490_v7 = vsel %vm4470_vm11, %v8430_v19, %v8431_v47  ;;  %v8421_v41 = vunpack.i.h.bf16 %v8419_v28  ;;  %v8454_v30 = vpop.permute.xlu1 %8453 }
 0x313   :  { %v11872_v10 = vsel %vm5549_vm13, %v14664_v25, %v5595_v39  ;;  %v11877_v37 = vsel %vm5546_vm12, %v14665_v40, %v5369_v53  ;;  %v11882_v13 = vmax.f32 %v3520_v51, %v3521_v6  ;;  %v4798_v36 = vmax.f32 %v14668_v26, %v8431_v47  ;;  %v14672_v47 = vld [vmem:[#allocation42_spill] sm:$0xff]  ;;  %v14673_v25 = vld [vmem:[#allocation116_spill] sm:$0xff]  ;;  %v8424_v26 = vpop.permute.xlu0 %8423 }
 0x314   :  { %v3527_v12 = vmax.f32 %v3525_v18, %v3526_v42  ;;  %14666 = vst [vmem:[#allocation36_spill] sm:$0xff] %v11879_v20  ;;  %v14669_v39 = vrot.slane %v11316_v48, 2  ;;  %v11888_v33 = vunpack.c.l.b16 %v4982_v23  ;;  %v8712_v53 = vpack.i.bf16 %v11879_v20, %v11867_v17 }
 0x315   :  { %14667 = vst [vmem:[#allocation111_spill] sm:$0xff] %v11882_v13  ;;  %v3652_v19 = vrot.slane %v11356_v35, 2  ;;  %v11895_v18 = vunpack.c.l.b16 %v4988_v63  ;;  %v11897_v51 = vunpack.c.l.b16 %v4987_v15  ;;  %v4797_v42 = vmax.f32 %v14672_v47, %v4490_v7  ;;  %v14674_v15 = vld [vmem:[#allocation46_spill] sm:$0xff] }
 0x316   :  { %v3528_v43 = vrot.slane %v3527_v12, 1  ;;  %v3646_v32 = vmax.f32 %v11316_v48, %v14669_v39  ;;  %8713 = vrot.lane.b32.xlu1 %v8712_v53, %s9069_s2  ;;  %v8420_v48 = vunpack.i.l.bf16 %v8419_v28  ;;  %v3547_v40 = vrot.slane %v14673_v25, 2 }
 0x317   :  { %14670 = vst [vmem:[#allocation115_spill] sm:$0xff] %v11897_v51  ;;  %v3653_v6 = vmax.f32 %v11356_v35, %v3652_v19  ;;  %v4990_v39 = vpack.c.bf16 %v4798_v36, %v4798_v36  ;;  %v4792_v49 = vmax.f32 %v14674_v15, %v8421_v41  ;;  %v8456_v17 = vunpack.i.h.bf16 %v8454_v30 }
 0x318   :  { %v11899_v58 = vmax.f32 %v3527_v12, %v3528_v43  ;;  %v3647_v23 = vrot.slane %v3646_v32, 1  ;;  %v14675_v12 = vld [vmem:[#allocation114_spill] sm:$0xff]  ;;  %v3548_v28 = vmax.f32 %v14673_v25, %v3547_v40  ;;  %v4989_v35 = vpack.c.bf16 %v4797_v42, %v4797_v42 }
 0x319   :  { %v14676_v43 = vrot.slane %v14675_v12, 4  ;;  %v3654_v53 = vrot.slane %v3653_v6, 1  ;;  %v8455_v20 = vunpack.i.l.bf16 %v8454_v30  ;;  %v8426_v14 = vunpack.i.h.bf16 %v8424_v26  ;;  %v14681_v30 = vld [vmem:[#allocation47_spill] sm:$0xff] }
 0x31a   :  { %14671 = vst [vmem:[#allocation40_spill] sm:$0xff] %v11899_v58  ;;  %v8682_v63 = vpack.i.bf16 %v11899_v58, %v11882_v13  ;;  %v11911_v47 = vmax.f32 %v3646_v32, %v3647_v23  ;;  %v4487_v36 = vsel %vm4470_vm11, %v8420_v48, %v8421_v41  ;;  %v3549_v15 = vrot.slane %v3548_v28, 1  ;;  %v14679_v23 = vld [vmem:[#allocation49_spill] sm:$0xff] }
 0x31b   :  { %v3553_v7 = vmax.f32 %v14675_v12, %v14676_v43  ;;  %v11916_v13 = vmax.f32 %v3653_v6, %v3654_v53  ;;  %v8425_v58 = vunpack.i.l.bf16 %v8424_v26  ;;  %v4497_v32 = vsel %vm4470_vm11, %v8455_v20, %v8456_v17  ;;  %v14682_v43 = vld [vmem:[#allocation44_spill] sm:$0xff] }
 0x31c   :  { %14677 = vst [vmem:[#allocation113_spill] sm:$0xff] %v11911_v47  ;;  %8683 = vrot.lane.b32.xlu0 %v8682_v63, %s9069_s2  ;;  %v4794_v12 = vmax.f32 %v14679_v23, %v8426_v14  ;;  %v3631_v25 = vrot.slane %v11298_v21, 2  ;;  %v11923_v42 = vmax.f32 %v3548_v28, %v3549_v15  ;;  %v4812_v63 = vmax.f32 %v14681_v30, %v8456_v17  ;;  %v14684_v17 = vld [vmem:[#allocation43_spill] sm:$0xff] }
 0x31d   :  { %v3554_v19 = vrot.slane %v3553_v7, 2  ;;  %14678 = vst [vmem:[#allocation41_spill] sm:$0xff] %v11916_v13  ;;  %v8717_v40 = vpack.i.bf16 %v11916_v13, %v11911_v47  ;;  %v4811_v41 = vmax.f32 %v14682_v43, %v4497_v32  ;;  %v4488_v26 = vsel %vm4470_vm11, %v8425_v58, %v8426_v14  ;;  %v14686_v14 = vld [vmem:[#allocation118_spill] sm:$0xff]  ;;  %v8434_v13 = vpop.permute.xlu0 %8433 }
 0x31e   :  { %14680 = vst [vmem:[#allocation39_spill] sm:$0xff] %v11923_v42  ;;  %v4986_v6 = vpack.c.bf16 %v4794_v12, %v4794_v12  ;;  %v14683_v28 = vrot.slane %v11164_v31, 4  ;;  %v4791_v23 = vmax.f32 %v14684_v17, %v4487_v36  ;;  %v14685_v12 = vld [vmem:[#allocation48_spill] sm:$0xff]  ;;  %v14687_v58 = vrot.slane %v14686_v14, 2 }
 0x31f   :  { %v3555_v56 = vmax.f32 %v3553_v7, %v3554_v19  ;;  %v3632_v7 = vmax.f32 %v11298_v21, %v3631_v25  ;;  %v4984_v19 = vpack.c.bf16 %v4792_v49, %v4792_v49  ;;  %8718 = vrot.lane.b32.xlu1 %v8717_v40, %s9069_s2  ;;  %v4793_v30 = vmax.f32 %v14685_v12, %v4488_v26  ;;  %v9007_v49 = vld [vmem:[%s13986_s3 + $0x40] sm:$0x1f]   ;;  %s9071_s3 = smov 16  }
 0x320   :  { %v3637_v15 = vmax.f32 %v11164_v31, %v14683_v28  ;;  %v3562_v21 = vmax.f32 %v14686_v14, %v14687_v58  ;;  %v11945_v25 = vunpack.c.l.b16 %v4990_v39  ;;  %v5004_v40 = vpack.c.bf16 %v4812_v63, %v4812_v63  ;;  %v8464_v31 = vpop.permute.xlu1 %8463  ;;  %v14688_v14 = vld [vmem:[#allocation122_spill] sm:$0xff] }
 0x321   :  { %v3556_v48 = vrot.slane %v3555_v56, 1  ;;  %v3633_v43 = vrot.slane %v3632_v7, 1  ;;  %v11947_v28 = vunpack.c.l.b16 %v4989_v35  ;;  %v5003_v36 = vpack.c.bf16 %v4811_v41, %v4811_v41 }
 0x322   :  { %v3638_v53 = vrot.slane %v3637_v15, 2  ;;  %v5386_v26 = vunpack.c.l.b16 %v4984_v19  ;;  %v3563_v12 = vrot.slane %v3562_v21, 1  ;;  %v3568_v58 = vrot.slane %v14688_v14, 2 }
 0x323   :  { %v11936_v32 = vmax.f32 %v3555_v56, %v3556_v48  ;;  %v5388_v48 = vunpack.c.l.b16 %v4986_v6  ;;  %v4983_v20 = vpack.c.bf16 %v4791_v23, %v4791_v23  ;;  %v4985_v39 = vpack.c.bf16 %v4793_v30, %v4793_v30 }
 0x324   :  { %v3639_v17 = vmax.f32 %v3637_v15, %v3638_v53  ;;  %v5979_v63 = vsel %vm364_vm1, %v9007_v49, 0  ;;  %v8466_v47 = vunpack.i.h.bf16 %v8464_v31  ;;  %v11954_v35 = vunpack.c.l.b16 %v5004_v40 }
 0x325   :  { %v8687_v56 = vpack.i.bf16 %v11936_v32, %v11923_v42  ;;  %v11956_v51 = vmax.f32 %v3632_v7, %v3633_v43  ;;  %v3569_v41 = vmax.f32 %v14688_v14, %v3568_v58  ;;  %6012 = vmatpush2.bf16.msra.mxu1 %v5979_v63  ;;  %v5626_v6 = vrot.slane %v11945_v25, 5  ;;  %v14690_v63 = vld [vmem:[#allocation52_spill] sm:$0xff] }
 0x326   :  { %v3640_v42 = vrot.slane %v3639_v17, 1  ;;  %v11960_v53 = vunpack.c.l.b16 %v5003_v36  ;;  %v5622_v19 = vrot.slane %v5388_v48, 7  ;;  %v8465_v15 = vunpack.i.l.bf16 %v8464_v31 }
 0x327   :  { %8688 = vrot.lane.b32.xlu0 %v8687_v56, %s9069_s2  ;;  %v11964_v30 = vmax.f32 %v3562_v21, %v3563_v12  ;;  %v3570_v49 = vrot.slane %v3569_v41, 1  ;;  %v8436_v56 = vunpack.i.h.bf16 %v8434_v13  ;;  %v11967_v7 = vunpack.c.l.b16 %v4983_v20 }
 0x328   :  { %v11962_v23 = vmax.f32 %v3639_v17, %v3640_v42  ;;  %v11969_v43 = vunpack.c.l.b16 %v4985_v39  ;;  %v4496_v14 = vsel %vm4470_vm11, %v8465_v15, %v8466_v47  ;;  %v8435_v42 = vunpack.i.l.bf16 %v8434_v13 }
 0x329   :  { %v11975_v31 = vmax.f32 %v3569_v41, %v3570_v49  ;;  %v5623_v48 = vsel %vm5546_vm12, %v5622_v19, %v5386_v26  ;;  %v3659_v17 = vrot.slane %v11361_v3, 2  ;;  %v14689_v20 = vrot.slane %v11326_v55, 4  ;;  %v14691_v41 = vld [vmem:[#allocation50_spill] sm:$0xff]  ;;  %v14692_v49 = vld [vmem:[#allocation3_spill] sm:$0xff] }
 0x32a   :  { %v8722_v36 = vpack.i.bf16 %v11962_v23, %v11956_v51  ;;  %v11987_v15 = vmax.f32 %v14690_v63, %v8466_v47  ;;  %v11990_v13 = vmax.f32 %v14691_v41, %v4496_v14  ;;  %v11993_v21 = vmax.f32 %v14692_v49, %v8436_v56 }
 0x32b   :  { %v3665_v12 = vmax.f32 %v11326_v55, %v14689_v20  ;;  %v8697_v39 = vpack.i.bf16 %v11975_v31, %v11964_v30  ;;  %v5608_v26 = vrot.slane %v11969_v43, 7  ;;  %v3660_v19 = vmax.f32 %v11361_v3, %v3659_v17 }
 0x32c   :  { %8723 = vrot.lane.b32.xlu1 %v8722_v36, %s9069_s2  ;;  %v14693_v55 = vrot.slane %v11396_v60, 2  ;;  %v14694_v20 = vrot.slane %v11895_v18, 6  ;;  %v4491_v14 = vsel %vm4470_vm11, %v8435_v42, %v8436_v56  ;;  %v3708_v63 = vrot.slane %v11437_v22, 2 }
 0x32d   :  { %v3666_v40 = vrot.slane %v3665_v12, 2  ;;  %8698 = vrot.lane.b32.xlu0 %v8697_v39, %s9069_s2  ;;  %v3661_v43 = vrot.slane %v3660_v19, 1  ;;  %v5002_v41 = vpack.c.bf16 %v11987_v15, %v11987_v15  ;;  %v4992_v18 = vpack.c.bf16 %v11993_v21, %v11993_v21  ;;  %v14695_v39 = vld [vmem:[#allocation51_spill] sm:$0xff] }
 0x32e   :  { %v3702_v36 = vmax.f32 %v11396_v60, %v14693_v55  ;;  %v12003_v47 = vsel %vm5549_vm13, %v14694_v20, %v5623_v48  ;;  %v5001_v60 = vpack.c.bf16 %v11990_v13, %v11990_v13  ;;  %v3709_v48 = vmax.f32 %v11437_v22, %v3708_v63 }
 0x32f   :  { %v3667_v3 = vmax.f32 %v3665_v12, %v3666_v40  ;;  %v4799_v49 = vmax.f32 %v14695_v39, %v4491_v14  ;;  %v12016_v56 = vmax.f32 %v3660_v19, %v3661_v43  ;;  %v14697_v15 = vrot.slane %v11340_v50, 6 }
 0x330   :  { %v3703_v17 = vrot.slane %v3702_v36, 1  ;;  %v3710_v40 = vrot.slane %v3709_v48, 1  ;;  %v5578_v22 = vrot.slane %v11816_v62, 1  ;;  %v14698_v13 = vrot.slane %v11714_v52, 5 }
 0x331   :  { %v3668_v42 = vrot.slane %v3667_v3, 1  ;;  %v5569_v21 = vsel %vm5549_vm13, %v14697_v15, %v11528_v9  ;;  %v14701_v43 = vrot.slane %v11743_v0, 4  ;;  %v5606_v50 = vrot.slane %v11888_v33, 1 }
 0x332   :  { %v12018_v55 = vmax.f32 %v3702_v36, %v3703_v17  ;;  %v5599_v19 = vsel %vm5552_vm14, %v14698_v13, %v11872_v10  ;;  %v12031_v20 = vmax.f32 %v3709_v48, %v3710_v40  ;;  %v14699_v36 = vld [vmem:[#allocation134_spill] sm:$0xff]  ;;  %v14702_v62 = vrot.slane %v11603_v45, 4 }
 0x333   :  { %v12020_v12 = vmax.f32 %v3667_v3, %v3668_v42  ;;  %v14700_v14 = vrot.slane %v14699_v36, 5  ;;  %v5601_v3 = vsel %vm5555_vm15, %v14701_v43, %v5599_v19  ;;  %v14703_v10 = vrot.slane %v11835_v29, 3 }
 0x334   :  { %14696 = vst [vmem:[#allocation106_spill] sm:$0xff] %v12018_v55  ;;  %v8732_v48 = vpack.i.bf16 %v12031_v20, %v12018_v55  ;;  %v14704_v0 = vrot.slane %v11745_v16, 3  ;;  %v14705_v33 = vrot.slane %v11779_v59, 2  ;;  %v14706_v45 = vpack.c.bf16 %v11801_v46, %v11801_v46  ;;  %v14709_v59 = vld [vmem:[#allocation12_spill] sm:$0xff] }
 0x335   :  { %v5571_v63 = vsel %vm5552_vm14, %v14700_v14, %v5569_v21  ;;  %v8727_v9 = vpack.i.bf16 %v12020_v12, %v12016_v56  ;;  %v5603_v17 = vsel %vm5558_vm4, %v14703_v10, %v5601_v3  ;;  %v14707_v29 = vrot.slane %v11725_v44, 2  ;;  %v14711_v14 = vld [vmem:[#allocation73_spill] sm:$0xff] }
 0x336   :  { %v5573_v52 = vsel %vm5555_vm15, %v14702_v62, %v5571_v63  ;;  %v5605_v42 = vsel %vm5561_vm5, %v14705_v33, %v5603_v17  ;;  %v5367_v40 = vunpack.c.l.b16 %v14706_v45  ;;  %v14708_v16 = vpack.c.bf16 %v11865_v61, %v11865_v61  ;;  %8733 = vrot.lane.b32.xlu0 %v8732_v48, %s9069_s2  ;;  %v14713_v3 = vld [vmem:[#allocation145_spill] sm:$0xff]  ;;  %v8439_v48 = vpop.permute.xlu0 %8438 }
 0x337   :  { %v5575_v39 = vsel %vm5558_vm4, %v14704_v0, %v5573_v52  ;;  %8728 = vrot.lane.b32.xlu1 %v8727_v9, %s9069_s2  ;;  %v5607_v21 = vsel %vm5564_vm7, %v5606_v50, %v5605_v42  ;;  %v14710_v19 = vrot.slane %v14709_v59, 6  ;;  %v14712_v63 = vrot.slane %v14711_v14, 5  ;;  %v8469_v9 = vpop.permute.xlu1 %8468 }
 0x338   :  { %v5577_v15 = vsel %vm5561_vm5, %v14707_v29, %v5575_v39  ;;  %v5383_v13 = vunpack.c.l.b16 %v14708_v16  ;;  %v5563_v43 = vrot.slane %v5367_v40, 1  ;;  %v14714_v50 = vrot.slane %v14713_v3, 6 }
 0x339   :  { %v5550_v36 = vsel %vm5549_vm13, %v14710_v19, %v11538_v57  ;;  %v5579_v46 = vsel %vm5564_vm7, %v5578_v22, %v5577_v15  ;;  %v14715_v52 = vrot.slane %v11609_v38, 4  ;;  %v14716_v10 = vrot.slane %v11723_v27, 5 }
 0x33a   :  { %v5553_v44 = vsel %vm5552_vm14, %v14712_v63, %v5550_v36  ;;  %v5583_v61 = vsel %vm5549_vm13, %v14714_v50, %v11877_v37  ;;  %v5889_v62 = vpack.c.b16 %v5607_v21, %v5579_v46  ;;  %v5592_v17 = vrot.slane %v5383_v13, 1  ;;  %v14723_v46 = vld [vmem:[#allocation54_spill] sm:$0xff]  ;;  %v14724_v63 = vld [vmem:[#allocation67_spill] sm:$0xff] }
 0x33b   :  { %v5556_v57 = vsel %vm5555_vm15, %v14715_v52, %v5553_v44  ;;  %v5585_v22 = vsel %vm5552_vm14, %v14716_v10, %v5583_v61  ;;  %v12088_v0 = vsel %vm5546_vm12, %v5608_v26, %v11967_v7  ;;  %v4991_v39 = vpack.c.bf16 %v4799_v49, %v4799_v49 }
 0x33c   :  { %v14717_v33 = vrot.slane %v11772_v5, 3  ;;  %v14718_v42 = vrot.slane %v11752_v54, 4  ;;  %v12096_v45 = vunpack.c.l.b16 %v5002_v41  ;;  %7841 = vmatprep.mubr.msk.bf16.mxu1 %vm5959_vm8, %v5889_v62  ;;  %v14719_v27 = vrot.slane %v11842_v2, 3 }
 0x33d   :  { %v8471_v29 = vunpack.i.h.bf16 %v8469_v9  ;;  %v8470_v7 = vunpack.i.l.bf16 %v8469_v9  ;;  %v14720_v26 = vrot.slane %v11735_v11, 2  ;;  %v14721_v49 = vrot.slane %v11820_v1, 2  ;;  %v14722_v1 = vld [vmem:[#allocation138_spill] sm:$0xff] }
 0x33e   :  { %v5559_v37 = vsel %vm5558_vm4, %v14717_v33, %v5556_v57  ;;  %v5587_v38 = vsel %vm5555_vm15, %v14718_v42, %v5585_v22  ;;  %v8441_v15 = vunpack.i.h.bf16 %v8439_v48  ;;  %v8440_v21 = vunpack.i.l.bf16 %v8439_v48  ;;  %v8474_v22 = vpop.permute.xlu1 %8473  ;;  %v14729_v48 = vld [vmem:[#allocation53_spill] sm:$0xff]  ;;  %v8444_v42 = vpop.permute.xlu0 %8443 }
 0x33f   :  { %v5589_v40 = vsel %vm5558_vm4, %v14719_v27, %v5587_v38  ;;  %v5562_v5 = vsel %vm5561_vm5, %v14720_v26, %v5559_v37  ;;  %v12108_v41 = vunpack.c.l.b16 %v5001_v60  ;;  %v5394_v16 = vunpack.c.l.b16 %v4992_v18  ;;  %v14730_v27 = vld [vmem:[#allocation55_spill] sm:$0xff] }
 0x340   :  { %v5591_v54 = vsel %vm5561_vm5, %v14721_v49, %v5589_v40  ;;  %v5565_v13 = vsel %vm5564_vm7, %v5563_v43, %v5562_v5  ;;  %v12112_v59 = vunpack.c.l.b16 %v4991_v39  ;;  %v5627_v11 = vsel %vm5552_vm14, %v5626_v6, %v12003_v47  ;;  %v14726_v43 = vld [vmem:[#allocation10_spill] sm:$0xff]  ;;  %v14728_v47 = vld [vmem:[#allocation135_spill] sm:$0xff] }
 0x341   :  { %v5593_v2 = vsel %vm5564_vm7, %v5592_v17, %v5591_v54  ;;  %v3715_v36 = vrot.slane %v14722_v1, 2  ;;  %v4814_v14 = vmax.f32 %v14723_v46, %v8471_v29  ;;  %v4498_v60 = vsel %vm4470_vm11, %v8470_v7, %v8471_v29  ;;  %v14731_v29 = vld [vmem:[#allocation4_spill] sm:$0xff] }
 0x342   :  { %v5888_v19 = vpack.c.b16 %v5593_v2, %v5565_v13  ;;  %v14725_v18 = vrot.slane %v14724_v63, 4  ;;  %v14727_v3 = vrot.slane %v14726_v43, 2  ;;  %v4493_v25 = vsel %vm4470_vm11, %v8440_v21, %v8441_v15 }
 0x343   :  { %v3716_v6 = vmax.f32 %v14722_v1, %v3715_v36  ;;  %v3680_v9 = vrot.slane %v14728_v47, 2  ;;  %v5628_v52 = vrot.slane %v5394_v16, 4  ;;  %v4813_v39 = vmax.f32 %v14729_v48, %v4498_v60 }
 0x344   :  { %v3721_v44 = vmax.f32 %v14724_v63, %v14725_v18  ;;  %v3674_v50 = vmax.f32 %v14726_v43, %v14727_v3  ;;  %6014 = vmatmul.mubr.bf16.vlgmr.msra.gmra.mxu1 %v5888_v19  ;;  %v5006_v38 = vpack.c.bf16 %v4814_v14, %v4814_v14  ;;  %v4804_v40 = vmax.f32 %v14730_v27, %v8441_v15  ;;  %v14736_v18 = vld [vmem:[#allocation59_spill] sm:$0xff] }
 0x345   :  { %v3717_v33 = vrot.slane %v3716_v6, 1  ;;  %v3681_v37 = vmax.f32 %v14728_v47, %v3680_v9  ;;  %v4803_v7 = vmax.f32 %v14731_v29, %v4493_v25  ;;  %v8476_v21 = vunpack.i.h.bf16 %v8474_v22  ;;  %v14737_v25 = vld [vmem:[#allocation57_spill] sm:$0xff]  ;;  %v14738_v47 = vld [vmem:[#allocation60_spill] sm:$0xff]  ;;  %v14741_v29 = vld [vmem:[#allocation71_spill] sm:$0xff] }
 0x346   :  { %v3722_v57 = vrot.slane %v3721_v44, 2  ;;  %v3675_v10 = vrot.slane %v3674_v50, 1  ;;  %v8475_v13 = vunpack.i.l.bf16 %v8474_v22  ;;  %v8446_v2 = vunpack.i.h.bf16 %v8444_v42 }
 0x347   :  { %v12137_v5 = vmax.f32 %v3716_v6, %v3717_v33  ;;  %v3682_v54 = vrot.slane %v3681_v37, 1  ;;  %v8445_v19 = vunpack.i.l.bf16 %v8444_v42  ;;  %v5005_v1 = vpack.c.bf16 %v4813_v39, %v4813_v39  ;;  %v14739_v39 = vld [vmem:[#allocation136_spill] sm:$0xff] }
 0x348   :  { %v3723_v26 = vmax.f32 %v3721_v44, %v3722_v57  ;;  %v12139_v49 = vmax.f32 %v3674_v50, %v3675_v10  ;;  %v14735_v46 = vrot.slane %v11555_v4, 2  ;;  %v3820_v14 = vrot.slane %v11585_v24, 2 }
 0x349   :  { %14732 = vst [vmem:[#allocation38_spill] sm:$0xff] %v12137_v5  ;;  %v12141_v36 = vmax.f32 %v3681_v37, %v3682_v54  ;;  %v12148_v60 = vsel %vm5555_vm15, %v5628_v52, %v5627_v11  ;;  %v4816_v44 = vmax.f32 %v14736_v18, %v8476_v21  ;;  %v4499_v43 = vsel %vm4470_vm11, %v8475_v13, %v8476_v21  ;;  %v8479_v37 = vpop.permute.xlu1 %8478  ;;  %v14743_v21 = vld [vmem:[#allocation5_spill] sm:$0xff] }
 0x34a   :  { %14733 = vst [vmem:[#allocation45_spill] sm:$0xff] %v12139_v49  ;;  %v3724_v16 = vrot.slane %v3723_v26, 1  ;;  %v3814_v15 = vmax.f32 %v11555_v4, %v14735_v46  ;;  %v4996_v3 = vpack.c.bf16 %v4804_v40, %v4804_v40  ;;  %v4815_v6 = vmax.f32 %v14737_v25, %v4499_v43 }
 0x34b   :  { %14734 = vst [vmem:[#allocation42_spill] sm:$0xff] %v12141_v36  ;;  %v8737_v50 = vpack.i.bf16 %v12141_v36, %v12139_v49  ;;  %v4802_v9 = vmax.f32 %v14738_v47, %v8446_v2  ;;  %v4492_v11 = vsel %vm4470_vm11, %v8445_v19, %v8446_v2  ;;  %v3821_v57 = vmax.f32 %v11585_v24, %v3820_v14  ;;  %v14809_v36 = vld [vmem:[#allocation88_spill] sm:$0xff] }
 0x34c   :  { %v12150_v63 = vmax.f32 %v3723_v26, %v3724_v16  ;;  %v3815_v52 = vrot.slane %v3814_v15, 1  ;;  %v12162_v10 = vunpack.c.l.b16 %v5006_v38  ;;  %v12164_v22 = vunpack.c.l.b16 %v5005_v1 }
 0x34d   :  { %v4995_v48 = vpack.c.bf16 %v4803_v7, %v4803_v7  ;;  %8738 = vrot.lane.b32.xlu0 %v8737_v50, %s9069_s2  ;;  %v3687_v33 = vrot.slane %v14739_v39, 2  ;;  %v5008_v42 = vpack.c.bf16 %v4816_v44, %v4816_v44  ;;  %v3822_v40 = vrot.slane %v3821_v57, 1 }
 0x34e   :  { %v8747_v4 = vpack.i.bf16 %v12150_v63, %v12137_v5  ;;  %v12169_v27 = vmax.f32 %v3814_v15, %v3815_v52  ;;  %v14742_v26 = vrot.slane %v14741_v29, 4  ;;  %v5007_v38 = vpack.c.bf16 %v4815_v6, %v4815_v6 }
 0x34f   :  { %v4994_v54 = vpack.c.bf16 %v4802_v9, %v4802_v9  ;;  %v4801_v16 = vmax.f32 %v14743_v21, %v4492_v11  ;;  %v3688_v7 = vmax.f32 %v14739_v39, %v3687_v33  ;;  %v12176_v13 = vunpack.c.l.b16 %v4996_v3  ;;  %v8449_v3 = vpop.permute.xlu0 %8448  ;;  %v14750_v21 = vld [vmem:[#allocation15_spill] sm:$0xff] }
 0x350   :  { %8748 = vrot.lane.b32.xlu1 %v8747_v4, %s9069_s2  ;;  %14740 = vst [vmem:[#allocation116_spill] sm:$0xff] %v12169_v27  ;;  %v3693_v24 = vmax.f32 %v14741_v29, %v14742_v26  ;;  %v12178_v2 = vmax.f32 %v3821_v57, %v3822_v40  ;;  %v8481_v1 = vunpack.i.h.bf16 %v8479_v37  ;;  %v12181_v15 = vunpack.c.l.b16 %v4995_v48  ;;  %v14745_v4 = vld [vmem:[#allocation66_spill] sm:$0xff]  ;;  %v14747_v40 = vld [vmem:[#allocation148_spill] sm:$0xff] }
 0x351   :  { %v3689_v14 = vrot.slane %v3688_v7, 1  ;;  %v8480_v18 = vunpack.i.l.bf16 %v8479_v37  ;;  %v12184_v43 = vunpack.c.l.b16 %v5008_v42  ;;  %v12188_v6 = vunpack.c.l.b16 %v5007_v38 }
 0x352   :  { %14744 = vst [vmem:[#allocation46_spill] sm:$0xff] %v12178_v2  ;;  %v3694_v19 = vrot.slane %v3693_v24, 2  ;;  %v8767_v50 = vpack.i.bf16 %v12178_v2, %v12169_v27  ;;  %v5396_v47 = vunpack.c.l.b16 %v4994_v54  ;;  %v4993_v9 = vpack.c.bf16 %v4801_v16, %v4801_v16 }
 0x353   :  { %v4820_v11 = vmax.f32 %v14745_v4, %v8481_v1  ;;  %v12192_v52 = vmax.f32 %v3688_v7, %v3689_v14  ;;  %v4501_v48 = vsel %vm4470_vm11, %v8480_v18, %v8481_v1  ;;  %v3799_v39 = vrot.slane %v11579_v8, 2  ;;  %v14752_v1 = vld [vmem:[#allocation63_spill] sm:$0xff] }
 0x354   :  { %v3695_v25 = vmax.f32 %v3693_v24, %v3694_v19  ;;  %8768 = vrot.lane.b32.xlu1 %v8767_v50, %s9069_s2  ;;  %v8451_v37 = vunpack.i.h.bf16 %v8449_v3  ;;  %v8450_v42 = vunpack.i.l.bf16 %v8449_v3  ;;  %v14748_v29 = vrot.slane %v14747_v40, 4  ;;  %v8484_v3 = vpop.permute.xlu1 %8483  ;;  %v14753_v24 = vld [vmem:[#allocation7_spill] sm:$0xff] }
 0x355   :  { %14746 = vst [vmem:[#allocation114_spill] sm:$0xff] %v12192_v52  ;;  %v14751_v16 = vrot.slane %v14750_v21, 2  ;;  %v12207_v19 = vunpack.c.l.b16 %v4993_v9  ;;  %v4819_v14 = vmax.f32 %v14752_v1, %v4501_v48  ;;  %v3800_v18 = vmax.f32 %v11579_v8, %v3799_v39  ;;  %v14754_v8 = vld [vmem:[#allocation141_spill] sm:$0xff] }
 0x356   :  { %v3696_v57 = vrot.slane %v3695_v25, 1  ;;  %v3805_v26 = vmax.f32 %v14747_v40, %v14748_v29  ;;  %v5630_v40 = vrot.slane %v5396_v47, 3  ;;  %v4806_v44 = vmax.f32 %v14753_v24, %v8451_v37  ;;  %v14756_v24 = vld [vmem:[#allocation70_spill] sm:$0xff] }
 0x357   :  { %v3730_v7 = vmax.f32 %v14750_v21, %v14751_v16  ;;  %v4494_v21 = vsel %vm4470_vm11, %v8450_v42, %v8451_v37  ;;  %v3801_v9 = vrot.slane %v3800_v18, 1  ;;  %v3736_v39 = vrot.slane %v14754_v8, 2 }
 0x358   :  { %v12202_v54 = vmax.f32 %v3695_v25, %v3696_v57  ;;  %v3806_v50 = vrot.slane %v3805_v26, 2  ;;  %v5012_v25 = vpack.c.bf16 %v4820_v11, %v4820_v11  ;;  %v8459_v57 = vpop.permute.xlu0 %8458  ;;  %v8486_v1 = vunpack.i.h.bf16 %v8484_v3  ;;  %v14761_v11 = vld [vmem:[#allocation19_spill] sm:$0xff] }
 0x359   :  { %v3731_v48 = vrot.slane %v3730_v7, 1  ;;  %v8485_v17 = vunpack.i.l.bf16 %v8484_v3  ;;  %v5011_v4 = vpack.c.bf16 %v4819_v14, %v4819_v14  ;;  %v12218_v47 = vmax.f32 %v3800_v18, %v3801_v9  ;;  %v14759_v3 = vld [vmem:[#allocation21_spill] sm:$0xff] }
 0x35a   :  { %14749 = vst [vmem:[#allocation49_spill] sm:$0xff] %v12202_v54  ;;  %v8742_v29 = vpack.i.bf16 %v12202_v54, %v12192_v52  ;;  %v3807_v16 = vmax.f32 %v3805_v26, %v3806_v50  ;;  %v8461_v38 = vunpack.i.h.bf16 %v8459_v57  ;;  %v12221_v62 = vunpack.c.l.b16 %v5012_v25  ;;  %v14758_v50 = vld [vmem:[#allocation79_spill] sm:$0xff] }
 0x35b   :  { %14755 = vst [vmem:[#allocation47_spill] sm:$0xff] %v12218_v47  ;;  %v12224_v37 = vmax.f32 %v14756_v24, %v4494_v21  ;;  %v3737_v42 = vmax.f32 %v14754_v8, %v3736_v39  ;;  %v8460_v46 = vunpack.i.l.bf16 %v8459_v57  ;;  %v3827_v14 = vrot.slane %v14759_v3, 2  ;;  %v14764_v8 = vld [vmem:[#allocation77_spill] sm:$0xff] }
 0x35c   :  { %8743 = vrot.lane.b32.xlu0 %v8742_v29, %s9069_s2  ;;  %v3808_v33 = vrot.slane %v3807_v16, 1  ;;  %v4808_v29 = vmax.f32 %v14758_v50, %v8461_v38  ;;  %v12231_v18 = vmax.f32 %v3730_v7, %v3731_v48  ;;  %v4500_v58 = vsel %vm4470_vm11, %v8485_v17, %v8486_v1  ;;  %v14766_v50 = vld [vmem:[#allocation142_spill] sm:$0xff] }
 0x35d   :  { %v3738_v9 = vrot.slane %v3737_v42, 1  ;;  %v14762_v25 = vrot.slane %v14761_v11, 4  ;;  %v12237_v21 = vunpack.c.l.b16 %v5011_v4  ;;  %v4998_v24 = vpack.c.bf16 %v4806_v44, %v4806_v44  ;;  %v14765_v4 = vld [vmem:[#allocation76_spill] sm:$0xff] }
 0x35e   :  { %v12227_v26 = vmax.f32 %v3807_v16, %v3808_v33  ;;  %14760 = vst [vmem:[#allocation43_spill] sm:$0xff] %v12231_v18  ;;  %v5000_v16 = vpack.c.bf16 %v4808_v29, %v4808_v29  ;;  %v12243_v57 = vsel %vm5558_vm4, %v5630_v40, %v12148_v60  ;;  %v3828_v48 = vmax.f32 %v14759_v3, %v3827_v14  ;;  %v8489_v3 = vpop.permute.xlu1 %8488 }
 0x35f   :  { %v3833_v61 = vmax.f32 %v14761_v11, %v14762_v25  ;;  %v12245_v7 = vmax.f32 %v3737_v42, %v3738_v9  ;;  %v4818_v39 = vmax.f32 %v14764_v8, %v8486_v1  ;;  %v4817_v11 = vmax.f32 %v14765_v4, %v4500_v58 }
 0x360   :  { %14757 = vst [vmem:[#allocation44_spill] sm:$0xff] %v12227_v26  ;;  %v8782_v33 = vpack.i.bf16 %v12227_v26, %v12218_v47  ;;  %v4495_v44 = vsel %vm4470_vm11, %v8460_v46, %v8461_v38  ;;  %v14767_v25 = vrot.slane %v14766_v50, 2  ;;  %v5402_v40 = vunpack.c.l.b16 %v5000_v16  ;;  %v8494_v46 = vpop.permute.xlu0 %8493  ;;  %v14769_v16 = vld [vmem:[#allocation17_spill] sm:$0xff] }
 0x361   :  { %14763 = vst [vmem:[#allocation48_spill] sm:$0xff] %v12245_v7  ;;  %v3834_v17 = vrot.slane %v3833_v61, 2  ;;  %v8752_v60 = vpack.i.bf16 %v12245_v7, %v12231_v18  ;;  %v3829_v42 = vrot.slane %v3828_v48, 1  ;;  %v12259_v1 = vunpack.c.l.b16 %v4998_v24  ;;  %v14773_v7 = vld [vmem:[#allocation20_spill] sm:$0xff] }
 0x362   :  { %8783 = vrot.lane.b32.xlu1 %v8782_v33, %s9069_s2  ;;  %v3758_v29 = vmax.f32 %v14766_v50, %v14767_v25  ;;  %v3764_v50 = vrot.slane %v14769_v16, 2  ;;  %v14770_v25 = vld [vmem:[#allocation78_spill] sm:$0xff]  ;;  %v8491_v18 = vunpack.i.h.bf16 %v8489_v3  ;;  %v14771_v24 = vrot.slane %v12096_v45, 7 }
 0x363   :  { %v3835_v9 = vmax.f32 %v3833_v61, %v3834_v17  ;;  %8753 = vrot.lane.b32.xlu0 %v8752_v60, %s9069_s2  ;;  %v12264_v38 = vmax.f32 %v3828_v48, %v3829_v42  ;;  %v5010_v61 = vpack.c.bf16 %v4818_v39, %v4818_v39  ;;  %v5009_v17 = vpack.c.bf16 %v4817_v11, %v4817_v11  ;;  %v14775_v39 = vld [vmem:[#allocation155_spill] sm:$0xff] }
 0x364   :  { %v3759_v4 = vrot.slane %v3758_v29, 1  ;;  %v4807_v14 = vmax.f32 %v14770_v25, %v4495_v44  ;;  %v5651_v33 = vsel %vm5546_vm12, %v14771_v24, %v5402_v40  ;;  %v3765_v58 = vmax.f32 %v14769_v16, %v3764_v50  ;;  %v14777_v40 = vld [vmem:[#allocation83_spill] sm:$0xff]  ;;  %v14778_v16 = vld [vmem:[#allocation85_spill] sm:$0xff] }
 0x365   :  { %14768 = vst [vmem:[#allocation118_spill] sm:$0xff] %v12264_v38  ;;  %v3836_v8 = vrot.slane %v3835_v9, 1  ;;  %v8496_v60 = vunpack.i.h.bf16 %v8494_v46  ;;  %v8490_v48 = vunpack.i.l.bf16 %v8489_v3  ;;  %v8495_v42 = vunpack.i.l.bf16 %v8494_v46 }
 0x366   :  { %v14774_v26 = vrot.slane %v14773_v7, 2  ;;  %v3848_v11 = vrot.slane %v14775_v39, 2  ;;  %v12280_v25 = vmax.f32 %v3758_v29, %v3759_v4  ;;  %v3766_v45 = vrot.slane %v3765_v58, 1 }
 0x367   :  { %v12271_v47 = vmax.f32 %v3835_v9, %v3836_v8  ;;  %v4822_v9 = vmax.f32 %v14777_v40, %v8491_v18  ;;  %v12283_v8 = vunpack.c.l.b16 %v5010_v61  ;;  %v4828_v50 = vmax.f32 %v14778_v16, %v8496_v60 }
 0x368   :  { %v3842_v52 = vmax.f32 %v14773_v7, %v14774_v26  ;;  %14776 = vst [vmem:[#allocation52_spill] sm:$0xff] %v12280_v25  ;;  %v4505_v3 = vsel %vm4470_vm11, %v8495_v42, %v8496_v60  ;;  %v4999_v24 = vpack.c.bf16 %v4807_v14, %v4807_v14  ;;  %v12288_v26 = vmax.f32 %v3765_v58, %v3766_v45  ;;  %v14780_v7 = vld [vmem:[#allocation84_spill] sm:$0xff]  ;;  %v8509_v42 = vpop.permute.xlu1 %8508 }
 0x369   :  { %14772 = vst [vmem:[#allocation122_spill] sm:$0xff] %v12271_v47  ;;  %v8787_v44 = vpack.i.bf16 %v12271_v47, %v12264_v38  ;;  %v4827_v27 = vmax.f32 %v14780_v7, %v4505_v3  ;;  %v3849_v29 = vmax.f32 %v14775_v39, %v3848_v11  ;;  %v12292_v4 = vunpack.c.l.b16 %v5009_v17  ;;  %v14782_v38 = vld [vmem:[#allocation13_spill] sm:$0xff]  ;;  %v14784_v11 = vld [vmem:[#allocation139_spill] sm:$0xff] }
 0x36a   :  { %v3843_v46 = vrot.slane %v3842_v52, 1  ;;  %14779 = vst [vmem:[#allocation50_spill] sm:$0xff] %v12288_v26  ;;  %v14781_v40 = vrot.slane %v11954_v35, 6  ;;  %v4502_v16 = vsel %vm4470_vm11, %v8490_v48, %v8491_v18  ;;  %v3743_v60 = vrot.slane %v14782_v38, 2 }
 0x36b   :  { %8788 = vrot.lane.b32.xlu1 %v8787_v44, %s9069_s2  ;;  %v8757_v14 = vpack.i.bf16 %v12288_v26, %v12280_v25  ;;  %v5014_v58 = vpack.c.bf16 %v4822_v9, %v4822_v9  ;;  %v3850_v45 = vrot.slane %v3849_v29, 1  ;;  %v5020_v3 = vpack.c.bf16 %v4828_v50, %v4828_v50  ;;  %v14787_v9 = vld [vmem:[#allocation82_spill] sm:$0xff] }
 0x36c   :  { %v5653_v61 = vsel %vm5549_vm13, %v14781_v40, %v5651_v33  ;;  %v12301_v44 = vmax.f32 %v3842_v52, %v3843_v46  ;;  %v5019_v39 = vpack.c.bf16 %v4827_v27, %v4827_v27  ;;  %v3744_v17 = vmax.f32 %v14782_v38, %v3743_v60 }
 0x36d   :  { %v14785_v35 = vrot.slane %v14784_v11, 4  ;;  %v5401_v48 = vunpack.c.l.b16 %v4999_v24  ;;  %8758 = vrot.lane.b32.xlu0 %v8757_v14, %s9069_s2  ;;  %v12309_v7 = vmax.f32 %v3849_v29, %v3850_v45  ;;  %v8511_v40 = vunpack.i.h.bf16 %v8509_v42  ;;  %v8499_v14 = vpop.permute.xlu0 %8498 }
 0x36e   :  { %14783 = vst [vmem:[#allocation3_spill] sm:$0xff] %v12301_v44  ;;  %v12313_v46 = vmax.f32 %v14787_v9, %v4502_v16  ;;  %v3745_v27 = vrot.slane %v3744_v17, 1  ;;  %v14788_v60 = vrot.slane %v12162_v10, 5  ;;  %v8510_v29 = vunpack.i.l.bf16 %v8509_v42  ;;  %v14790_v10 = vld [vmem:[#allocation89_spill] sm:$0xff] }
 0x36f   :  { %v3749_v33 = vmax.f32 %v14784_v11, %v14785_v35  ;;  %14786 = vst [vmem:[#allocation51_spill] sm:$0xff] %v12309_v7  ;;  %v8792_v24 = vpack.i.bf16 %v12309_v7, %v12301_v44  ;;  %v12323_v45 = vunpack.c.l.b16 %v5014_v58  ;;  %v12325_v35 = vunpack.c.l.b16 %v5020_v3  ;;  %v14800_v7 = vld [vmem:[#allocation90_spill] sm:$0xff] }
 0x370   :  { %v12319_v11 = vsel %vm5552_vm14, %v14788_v60, %v5653_v61  ;;  %v12327_v16 = vunpack.c.l.b16 %v5019_v39  ;;  %v14789_v18 = vrot.slane %v12108_v41, 7  ;;  %v12336_v61 = vmax.f32 %v14790_v10, %v8511_v40  ;;  %v14791_v60 = vld [vmem:[#allocation153_spill] sm:$0xff]  ;;  %v14794_v10 = vld [vmem:[#allocation147_spill] sm:$0xff] }
 0x371   :  { %v3750_v50 = vrot.slane %v3749_v33, 2  ;;  %8793 = vrot.lane.b32.xlu1 %v8792_v24, %s9069_s2  ;;  %v14792_v42 = vrot.slane %v14791_v60, 2  ;;  %v3876_v3 = vrot.slane %v11707_v34, 2  ;;  %v14795_v52 = vrot.slane %v14794_v10, 2 }
 0x372   :  { %v12332_v38 = vsel %vm5546_vm12, %v14789_v18, %v5401_v48  ;;  %v4506_v18 = vsel %vm4470_vm11, %v8510_v29, %v8511_v40  ;;  %v8500_v40 = vunpack.i.l.bf16 %v8499_v14  ;;  %vm6287_vm10 = vcmask 130048  }
 0x373   :  { %v3751_v9 = vmax.f32 %v3749_v33, %v3750_v50  ;;  %v3870_v58 = vmax.f32 %v14791_v60, %v14792_v42  ;;  %v12344_v33 = vmax.f32 %v3744_v17, %v3745_v27  ;;  %v8501_v50 = vunpack.i.h.bf16 %v8499_v14  ;;  %v8534_v17 = vpop.permute.xlu1 %8533  ;;  %v14799_v42 = vld [vmem:[#allocation149_spill] sm:$0xff] }
 0x374   :  { %v3877_v24 = vmax.f32 %v11707_v34, %v3876_v3  ;;  %v3786_v44 = vmax.f32 %v14794_v10, %v14795_v52  ;;  %v5022_v27 = vpack.c.bf16 %v12336_v61, %v12336_v61  ;;  %v8504_v3 = vpop.permute.xlu0 %8503  ;;  %v14798_v10 = vld [vmem:[#allocation86_spill] sm:$0xff]  ;;  %v3792_v26 = vrot.slane %v14799_v42, 2 }
 0x375   :  { %14793 = vst [vmem:[#allocation134_spill] sm:$0xff] %v12344_v33  ;;  %v3752_v41 = vrot.slane %v3751_v9, 1  ;;  %v3871_v48 = vrot.slane %v3870_v58, 1  ;;  %v4829_v60 = vmax.f32 %v14798_v10, %v4506_v18  ;;  %v8536_v47 = vunpack.i.h.bf16 %v8534_v17 }
 0x376   :  { %v3878_v34 = vrot.slane %v3877_v24, 1  ;;  %v3787_v25 = vrot.slane %v3786_v44, 1  ;;  %v8535_v54 = vunpack.i.l.bf16 %v8534_v17  ;;  %v3793_v14 = vmax.f32 %v14799_v42, %v3792_v26 }
 0x377   :  { %v12354_v39 = vmax.f32 %v3751_v9, %v3752_v41  ;;  %v12358_v29 = vmax.f32 %v3870_v58, %v3871_v48  ;;  %v4824_v9 = vmax.f32 %v14800_v7, %v8501_v50  ;;  %v8506_v61 = vunpack.i.h.bf16 %v8504_v3  ;;  %v14802_v48 = vld [vmem:[#allocation157_spill] sm:$0xff]  ;;  %v14803_v7 = vld [vmem:[#allocation151_spill] sm:$0xff] }
 0x378   :  { %v12365_v41 = vmax.f32 %v3877_v24, %v3878_v34  ;;  %v8505_v58 = vunpack.i.l.bf16 %v8504_v3  ;;  %v3855_v2 = vrot.slane %v14802_v48, 2  ;;  %v4513_v10 = vsel %vm4470_vm11, %v8535_v54, %v8536_v47  ;;  %v14807_v3 = vld [vmem:[#allocation91_spill] sm:$0xff] }
 0x379   :  { %14796 = vst [vmem:[#allocation12_spill] sm:$0xff] %v12354_v39  ;;  %14797 = vst [vmem:[#allocation73_spill] sm:$0xff] %v12358_v29  ;;  %v8762_v52 = vpack.i.bf16 %v12354_v39, %v12344_v33  ;;  %v4503_v33 = vsel %vm4470_vm11, %v8500_v40, %v8501_v50  ;;  %v14804_v24 = vrot.slane %v14803_v7, 4  ;;  %v12377_v17 = vmax.f32 %v3786_v44, %v3787_v25  ;;  %v14806_v39 = vld [vmem:[#allocation93_spill] sm:$0xff]  ;;  %v14808_v40 = vld [vmem:[#allocation92_spill] sm:$0xff] }
 0x37a   :  { %14801 = vst [vmem:[#allocation145_spill] sm:$0xff] %v12365_v41  ;;  %v8797_v18 = vpack.i.bf16 %v12365_v41, %v12358_v29  ;;  %v4826_v26 = vmax.f32 %v14806_v39, %v8506_v61  ;;  %v4504_v42 = vsel %vm4470_vm11, %v8505_v58, %v8506_v61  ;;  %v4844_v50 = vmax.f32 %v14807_v3, %v8536_v47  ;;  %v14810_v44 = vld [vmem:[#allocation146_spill] sm:$0xff]  ;;  %v14811_v58 = vld [vmem:[#allocation87_spill] sm:$0xff] }
 0x37b   :  { %8763 = vrot.lane.b32.xlu0 %v8762_v52, %s9069_s2  ;;  %v3861_v34 = vmax.f32 %v14803_v7, %v14804_v24  ;;  %14805 = vst [vmem:[#allocation138_spill] sm:$0xff] %v12377_v17  ;;  %v3794_v52 = vrot.slane %v3793_v14, 1  ;;  %v4825_v49 = vmax.f32 %v14808_v40, %v4504_v42  ;;  %v3856_v29 = vmax.f32 %v14802_v48, %v3855_v2  ;;  %v8544_v48 = vpop.permute.xlu1 %8543 }
 0x37c   :  { %8798 = vrot.lane.b32.xlu1 %v8797_v18, %s9069_s2  ;;  %v4843_v7 = vmax.f32 %v14809_v36, %v4513_v10  ;;  %v5018_v25 = vpack.c.bf16 %v4826_v26, %v4826_v26  ;;  %v3771_v24 = vrot.slane %v14810_v44, 2  ;;  %v5021_v5 = vpack.c.bf16 %v4829_v60, %v4829_v60  ;;  %v8514_v10 = vpop.permute.xlu0 %8513  ;;  %v14813_v26 = vld [vmem:[#allocation74_spill] sm:$0xff] }
 0x37d   :  { %v3862_v54 = vrot.slane %v3861_v34, 2  ;;  %v12385_v41 = vmax.f32 %v3793_v14, %v3794_v52  ;;  %v5017_v39 = vpack.c.bf16 %v4825_v49, %v4825_v49  ;;  %v3857_v55 = vrot.slane %v3856_v29, 1 }
 0x37e   :  { %v4823_v18 = vmax.f32 %v14811_v58, %v4503_v33  ;;  %v5420_v42 = vunpack.c.l.b16 %v5018_v25  ;;  %v3772_v2 = vmax.f32 %v14810_v44, %v3771_v24  ;;  %v5016_v14 = vpack.c.bf16 %v4824_v9, %v4824_v9 }
 0x37f   :  { %v3863_v61 = vmax.f32 %v3861_v34, %v3862_v54  ;;  %v8772_v47 = vpack.i.bf16 %v12385_v41, %v12377_v17  ;;  %v5036_v52 = vpack.c.bf16 %v4844_v50, %v4844_v50  ;;  %v12393_v3 = vmax.f32 %v3856_v29, %v3857_v55  ;;  %v14818_v17 = vld [vmem:[#allocation94_spill] sm:$0xff] }
 0x380   :  { %v5035_v49 = vpack.c.bf16 %v4843_v7, %v4843_v7  ;;  %v5678_v60 = vrot.slane %v5420_v42, 7  ;;  %v5419_v34 = vunpack.c.l.b16 %v5017_v39  ;;  %v14814_v33 = vrot.slane %v14813_v26, 4 }
 0x381   :  { %14812 = vst [vmem:[#allocation54_spill] sm:$0xff] %v12393_v3  ;;  %v3864_v36 = vrot.slane %v3863_v61, 1  ;;  %8773 = vrot.lane.b32.xlu0 %v8772_v47, %s9069_s2  ;;  %v3773_v25 = vrot.slane %v3772_v2, 1  ;;  %v8546_v44 = vunpack.i.h.bf16 %v8544_v48  ;;  %v8545_v24 = vunpack.i.l.bf16 %v8544_v48 }
 0x382   :  { %v3777_v40 = vmax.f32 %v14813_v26, %v14814_v33  ;;  %v12401_v9 = vunpack.c.l.b16 %v5022_v27  ;;  %v12403_v55 = vunpack.c.l.b16 %v5021_v5  ;;  %v8516_v50 = vunpack.i.h.bf16 %v8514_v10  ;;  %v14815_v26 = vld [vmem:[#allocation97_spill] sm:$0xff] }
 0x383   :  { %v12399_v54 = vmax.f32 %v3863_v61, %v3864_v36  ;;  %v5418_v58 = vunpack.c.l.b16 %v5016_v14  ;;  %v5015_v47 = vpack.c.bf16 %v4823_v18, %v4823_v18  ;;  %v12405_v7 = vunpack.c.l.b16 %v5036_v52  ;;  %v14817_v18 = vld [vmem:[#allocation96_spill] sm:$0xff] }
 0x384   :  { %v3778_v29 = vrot.slane %v3777_v40, 2  ;;  %v12409_v42 = vunpack.c.l.b16 %v5035_v49  ;;  %v4512_v36 = vsel %vm4470_vm11, %v8545_v24, %v8546_v44  ;;  %v4832_v48 = vmax.f32 %v14815_v26, %v8516_v50  ;;  %v14819_v49 = vld [vmem:[#allocation27_spill] sm:$0xff] }
 0x385   :  { %v8802_v39 = vpack.i.bf16 %v12399_v54, %v12393_v3  ;;  %v5664_v27 = vrot.slane %v5419_v34, 7  ;;  %v5679_v5 = vsel %vm5546_vm12, %v5678_v60, %v5418_v58  ;;  %v12415_v33 = vmax.f32 %v3772_v2, %v3773_v25 }
 0x386   :  { %v3779_v61 = vmax.f32 %v3777_v40, %v3778_v29  ;;  %v12418_v14 = vmax.f32 %v14817_v18, %v8546_v44  ;;  %v12421_v3 = vmax.f32 %v14818_v17, %v4512_v36  ;;  %v3883_v40 = vrot.slane %v14819_v49, 2  ;;  %v14820_v29 = vld [vmem:[#allocation23_spill] sm:$0xff] }
 0x387   :  { %8803 = vrot.lane.b32.xlu1 %v8802_v39, %s9069_s2  ;;  %14816 = vst [vmem:[#allocation67_spill] sm:$0xff] %v12415_v33  ;;  %v14821_v24 = vrot.slane %v14820_v29, 4  ;;  %v5682_v34 = vrot.slane %v12401_v9, 5  ;;  %v5417_v58 = vunpack.c.l.b16 %v5015_v47  ;;  %v8515_v2 = vunpack.i.l.bf16 %v8514_v10  ;;  %v8549_v47 = vpop.permute.xlu1 %8548 }
 0x388   :  { %v3780_v52 = vrot.slane %v3779_v61, 1  ;;  %v5708_v25 = vrot.slane %v12405_v7, 6  ;;  %v5024_v39 = vpack.c.bf16 %v4832_v48, %v4832_v48  ;;  %v3884_v17 = vmax.f32 %v14819_v49, %v3883_v40 }
 0x389   :  { %v3889_v26 = vmax.f32 %v14820_v29, %v14821_v24  ;;  %v5694_v36 = vrot.slane %v12409_v42, 6  ;;  %v12435_v18 = vsel %vm5546_vm12, %v5664_v27, %v5417_v58  ;;  %v14822_v29 = vrot.slane %v12325_v35, 6 }
 0x38a   :  { %v12430_v44 = vmax.f32 %v3779_v61, %v3780_v52  ;;  %v5034_v61 = vpack.c.bf16 %v12418_v14, %v12418_v14  ;;  %v5033_v48 = vpack.c.bf16 %v12421_v3, %v12421_v3  ;;  %v3885_v52 = vrot.slane %v3884_v17, 1 }
 0x38b   :  { %v12440_v24 = vsel %vm5549_vm13, %v14822_v29, %v5679_v5  ;;  %v3890_v60 = vrot.slane %v3889_v26, 2  ;;  %v4507_v27 = vsel %vm4470_vm11, %v8515_v2, %v8516_v50  ;;  %v14823_v35 = vrot.slane %v12184_v43, 4 }
 0x38c   :  { %v8777_v10 = vpack.i.bf16 %v12430_v44, %v12415_v33  ;;  %v14824_v40 = vpack.c.bf16 %v12224_v37, %v12224_v37  ;;  %v12457_v29 = vunpack.c.l.b16 %v5024_v39  ;;  %v12459_v14 = vmax.f32 %v3884_v17, %v3885_v52 }
 0x38d   :  { %v3891_v49 = vmax.f32 %v3889_v26, %v3890_v60  ;;  %v5657_v5 = vsel %vm5555_vm15, %v14823_v35, %v12319_v11  ;;  %v14826_v3 = vrot.slane %v12176_v13, 2  ;;  %v14827_v26 = vrot.slane %v12283_v8, 3  ;;  %v8519_v11 = vpop.permute.xlu0 %8518 }
 0x38e   :  { %v5399_v58 = vunpack.c.l.b16 %v14824_v40  ;;  %8778 = vrot.lane.b32.xlu0 %v8777_v10, %s9069_s2  ;;  %14825 = vst [vmem:[#allocation10_spill] sm:$0xff] %v12459_v14  ;;  %v14828_v37 = vrot.slane %v12221_v62, 2  ;;  %v14829_v39 = vpack.c.bf16 %v12313_v46, %v12313_v46  ;;  %v14830_v10 = vld [vmem:[#allocation115_spill] sm:$0xff]  ;;  %v14833_v35 = vrot.slane %v12323_v45, 1  ;;  %v8554_v45 = vpop.permute.xlu1 %8553 }
 0x38f   :  { %v5633_v50 = vsel %vm5561_vm5, %v14826_v3, %v12243_v57  ;;  %v5659_v43 = vsel %vm5558_vm4, %v14827_v26, %v5657_v5  ;;  %v3892_v60 = vrot.slane %v3891_v49, 1  ;;  %v14831_v52 = vrot.slane %v14830_v10, 6 }
 0x390   :  { %v5661_v2 = vsel %vm5561_vm5, %v14828_v37, %v5659_v43  ;;  %v5415_v17 = vunpack.c.l.b16 %v14829_v39  ;;  %v14832_v57 = vrot.slane %v12259_v1, 1  ;;  %v14834_v62 = vrot.slane %v11947_v28, 5  ;;  %v14840_v39 = vld [vmem:[#allocation95_spill] sm:$0xff] }
 0x391   :  { %v5611_v13 = vsel %vm5549_vm13, %v14831_v52, %v12088_v0  ;;  %v5663_v5 = vsel %vm5564_vm7, %v14833_v35, %v5661_v2  ;;  %v5620_v3 = vrot.slane %v5399_v58, 1  ;;  %v12487_v46 = vmax.f32 %v3891_v49, %v3892_v60  ;;  %v8524_v35 = vpop.permute.xlu0 %8523 }
 0x392   :  { %v5635_v8 = vsel %vm5564_vm7, %v14832_v57, %v5633_v50  ;;  %v5613_v40 = vsel %vm5552_vm14, %v14834_v62, %v5611_v13  ;;  %v14836_v43 = vrot.slane %v12112_v59, 4  ;;  %v14837_v1 = vrot.slane %v11960_v53, 6  ;;  %v14844_v57 = vld [vmem:[#allocation99_spill] sm:$0xff] }
 0x393   :  { %14835 = vst [vmem:[#allocation135_spill] sm:$0xff] %v12487_v46  ;;  %v5891_v26 = vpack.c.b16 %v5663_v5, %v5635_v8  ;;  %v14838_v37 = vrot.slane %v12207_v19, 3  ;;  %v14839_v2 = vrot.slane %v12164_v22, 5  ;;  %v5648_v58 = vrot.slane %v5415_v17, 1 }
 0x394   :  { %v5615_v0 = vsel %vm5555_vm15, %v14836_v43, %v5613_v40  ;;  %v5639_v50 = vsel %vm5549_vm13, %v14837_v1, %v12332_v38  ;;  %v8551_v60 = vunpack.i.h.bf16 %v8549_v47  ;;  %v4831_v59 = vmax.f32 %v14840_v39, %v4507_v27 }
 0x395   :  { %v5617_v28 = vsel %vm5558_vm4, %v14838_v37, %v5615_v0  ;;  %v5641_v49 = vsel %vm5552_vm14, %v14839_v2, %v5639_v50  ;;  %v8807_v10 = vpack.i.bf16 %v12487_v46, %v12459_v14  ;;  %7842 = vmatprep.mubr.msk.bf16.mxu1 %vm5959_vm8, %v5891_v26  ;;  %v14841_v53 = vrot.slane %v12188_v6, 4  ;;  %v14846_v26 = vld [vmem:[#allocation98_spill] sm:$0xff]  ;;  %v14847_v0 = vld [vmem:[#allocation101_spill] sm:$0xff] }
 0x396   :  { %v8550_v19 = vunpack.i.l.bf16 %v8549_v47  ;;  %v14842_v52 = vrot.slane %v12181_v15, 2  ;;  %v14843_v13 = vrot.slane %v12292_v4, 3  ;;  %v4846_v27 = vmax.f32 %v14844_v57, %v8551_v60  ;;  %v14851_v57 = vld [vmem:[#allocation105_spill] sm:$0xff] }
 0x397   :  { %v5643_v38 = vsel %vm5555_vm15, %v14841_v53, %v5641_v49  ;;  %v8521_v8 = vunpack.i.h.bf16 %v8519_v11  ;;  %8808 = vrot.lane.b32.xlu1 %v8807_v10, %s9069_s2  ;;  %v14845_v5 = vrot.slane %v12237_v21, 2  ;;  %v8520_v62 = vunpack.i.l.bf16 %v8519_v11  ;;  %v8559_v49 = vpop.permute.xlu1 %8558  ;;  %v14849_v10 = vld [vmem:[#allocation100_spill] sm:$0xff]  ;;  %s9073_s2 = smov 88  }
 0x398   :  { %v5619_v22 = vsel %vm5561_vm5, %v14842_v52, %v5617_v28  ;;  %v5645_v17 = vsel %vm5558_vm4, %v14843_v13, %v5643_v38  ;;  %v4514_v47 = vsel %vm4470_vm11, %v8550_v19, %v8551_v60  ;;  %v8556_v15 = vunpack.i.h.bf16 %v8554_v45  ;;  %v14848_v28 = vld [vmem:[#allocation103_spill] sm:$0xff]  ;;  %v8529_v13 = vpop.permute.xlu0 %8528 }
 0x399   :  { %v5647_v6 = vsel %vm5561_vm5, %v14845_v5, %v5645_v17  ;;  %v5621_v40 = vsel %vm5564_vm7, %v5620_v3, %v5619_v22  ;;  %v4845_v43 = vmax.f32 %v14846_v26, %v4514_v47  ;;  %v4836_v1 = vmax.f32 %v14847_v0, %v8521_v8  ;;  %v14852_v47 = vld [vmem:[#allocation102_spill] sm:$0xff]  ;;  %v14853_v26 = vld [vmem:[#allocation104_spill] sm:$0xff] }
 0x39a   :  { %v5649_v4 = vsel %vm5564_vm7, %v5648_v58, %v5647_v6  ;;  %v4509_v37 = vsel %vm4470_vm11, %v8520_v62, %v8521_v8  ;;  %v4848_v2 = vmax.f32 %v14848_v28, %v8556_v15  ;;  %v8555_v21 = vunpack.i.l.bf16 %v8554_v45 }
 0x39b   :  { %v5890_v50 = vpack.c.b16 %v5649_v4, %v5621_v40  ;;  %v12527_v39 = vunpack.c.l.b16 %v5034_v61  ;;  %v12529_v60 = vunpack.c.l.b16 %v5033_v48  ;;  %v5023_v11 = vpack.c.bf16 %v4831_v59, %v4831_v59  ;;  %v8564_v40 = vpop.permute.xlu1 %8563 }
 0x39c   :  { %v4835_v3 = vmax.f32 %v14849_v10, %v4509_v37  ;;  %v5038_v58 = vpack.c.bf16 %v4846_v27, %v4846_v27  ;;  %v5037_v53 = vpack.c.bf16 %v4845_v43, %v4845_v43  ;;  %v8526_v38 = vunpack.i.h.bf16 %v8524_v35  ;;  %v8539_v10 = vpop.permute.xlu0 %8538 }
 0x39d   :  { %6022 = vmatmul.mubr.bf16.gmra.mxu1 %v5890_v50  ;;  %v8525_v19 = vunpack.i.l.bf16 %v8524_v35  ;;  %v14850_v52 = vrot.slane %v12327_v16, 6  ;;  %v5684_v45 = vrot.slane %v12457_v29, 4  ;;  %v5028_v61 = vpack.c.bf16 %v4836_v1, %v4836_v1 }
 0x39e   :  { %v4515_v48 = vsel %vm4470_vm11, %v8555_v21, %v8556_v15  ;;  %v5027_v59 = vpack.c.bf16 %v4835_v3, %v4835_v3  ;;  %v5040_v17 = vpack.c.bf16 %v4848_v2, %v4848_v2  ;;  %v4834_v8 = vmax.f32 %v14851_v57, %v8526_v38  ;;  %v14857_v57 = vld [vmem:[#allocation120_spill] sm:$0xff] }
 0x39f   :  { %v12536_v22 = vsel %vm5549_vm13, %v14850_v52, %v12435_v18  ;;  %v4508_v27 = vsel %vm4470_vm11, %v8525_v19, %v8526_v38  ;;  %v5706_v35 = vrot.slane %v12527_v39, 7  ;;  %v5692_v5 = vrot.slane %v12529_v60, 7  ;;  %v14856_v38 = vld [vmem:[#allocation112_spill] sm:$0xff] }
 0x3a0   :  { %v12544_v16 = vunpack.c.l.b16 %v5023_v11  ;;  %v5683_v18 = vsel %vm5552_vm14, %v5682_v34, %v12440_v24  ;;  %v12550_v29 = vunpack.c.l.b16 %v5038_v58  ;;  %v12552_v6 = vunpack.c.l.b16 %v5037_v53  ;;  %v14854_v24 = vld [vmem:[#allocation108_spill] sm:$0xff]  ;;  %v8574_v3 = vpop.permute.xlu0 %8573 }
 0x3a1   :  { %v4847_v62 = vmax.f32 %v14852_v47, %v4515_v48  ;;  %v8561_v15 = vunpack.i.h.bf16 %v8559_v49  ;;  %v5026_v4 = vpack.c.bf16 %v4834_v8, %v4834_v8  ;;  %v4833_v43 = vmax.f32 %v14853_v26, %v4508_v27  ;;  %v8569_v27 = vpop.permute.xlu1 %8568 }
 0x3a2   :  { %v8560_v0 = vunpack.i.l.bf16 %v8559_v49  ;;  %v8531_v1 = vunpack.i.h.bf16 %v8529_v13  ;;  %v5685_v50 = vsel %vm5555_vm15, %v5684_v45, %v5683_v18  ;;  %v12557_v37 = vunpack.c.l.b16 %v5028_v61  ;;  %v14855_v49 = vld [vmem:[#allocation107_spill] sm:$0xff] }
 0x3a3   :  { %v12559_v9 = vunpack.c.l.b16 %v5027_v59  ;;  %v12561_v34 = vunpack.c.l.b16 %v5040_v17  ;;  %v4852_v28 = vmax.f32 %v14854_v24, %v8561_v15  ;;  %v8530_v21 = vunpack.i.l.bf16 %v8529_v13  ;;  %v14860_v59 = vld [vmem:[#allocation119_spill] sm:$0xff] }
 0x3a4   :  { %v4517_v2 = vsel %vm4470_vm11, %v8560_v0, %v8561_v15  ;;  %v8566_v11 = vunpack.i.h.bf16 %v8564_v40  ;;  %v5039_v58 = vpack.c.bf16 %v4847_v62, %v4847_v62  ;;  %v4838_v19 = vmax.f32 %v14856_v38, %v8531_v1  ;;  %v14858_v38 = vld [vmem:[#allocation123_spill] sm:$0xff] }
 0x3a5   :  { %v4851_v53 = vmax.f32 %v14855_v49, %v4517_v2  ;;  %v5710_v52 = vrot.slane %v12550_v29, 5  ;;  %v5428_v61 = vunpack.c.l.b16 %v5026_v4  ;;  %v5025_v48 = vpack.c.bf16 %v4833_v43, %v4833_v43 }
 0x3a6   :  { %v4850_v8 = vmax.f32 %v14857_v57, %v8566_v11  ;;  %v5044_v18 = vpack.c.bf16 %v4852_v28, %v4852_v28  ;;  %v4510_v47 = vsel %vm4470_vm11, %v8530_v21, %v8531_v1  ;;  %v8565_v62 = vunpack.i.l.bf16 %v8564_v40  ;;  %v14859_v57 = vld [vmem:[#allocation110_spill] sm:$0xff] }
 0x3a7   :  { %v8541_v15 = vunpack.i.h.bf16 %v8539_v10  ;;  %v12575_v26 = vunpack.c.l.b16 %v5039_v58  ;;  %v5043_v0 = vpack.c.bf16 %v4851_v53, %v4851_v53  ;;  %v5030_v24 = vpack.c.bf16 %v4838_v19, %v4838_v19  ;;  %v14861_v53 = vld [vmem:[#allocation117_spill] sm:$0xff] }
 0x3a8   :  { %v8540_v4 = vunpack.i.l.bf16 %v8539_v10  ;;  %v5686_v43 = vrot.slane %v5428_v61, 3  ;;  %v12577_v2 = vunpack.c.l.b16 %v5025_v48  ;;  %v4516_v49 = vsel %vm4470_vm11, %v8565_v62, %v8566_v11 }
 0x3a9   :  { %v4840_v17 = vmax.f32 %v14858_v38, %v8541_v15  ;;  %v4837_v45 = vmax.f32 %v14859_v57, %v4510_v47  ;;  %v5042_v28 = vpack.c.bf16 %v4850_v8, %v4850_v8  ;;  %v4849_v1 = vmax.f32 %v14860_v59, %v4516_v49  ;;  %v8589_v38 = vpop.permute.xlu1 %8588  ;;  %v14862_v8 = vld [vmem:[#allocation125_spill] sm:$0xff] }
 0x3aa   :  { %v4511_v40 = vsel %vm4470_vm11, %v8540_v4, %v8541_v15  ;;  %v12584_v21 = vunpack.c.l.b16 %v5044_v18  ;;  %v8571_v19 = vunpack.i.h.bf16 %v8569_v27  ;;  %v12587_v61 = vunpack.c.l.b16 %v5043_v0 }
 0x3ab   :  { %v5032_v58 = vpack.c.bf16 %v4840_v17, %v4840_v17  ;;  %v4839_v10 = vmax.f32 %v14861_v53, %v4511_v40  ;;  %v12589_v48 = vunpack.c.l.b16 %v5030_v24  ;;  %v8570_v11 = vunpack.i.l.bf16 %v8569_v27  ;;  %v14863_v27 = vld [vmem:[#allocation64_spill] sm:$0xff] }
 0x3ac   :  { %v8576_v62 = vunpack.i.h.bf16 %v8574_v3  ;;  %v4854_v57 = vmax.f32 %v14862_v8, %v8571_v19  ;;  %v8575_v59 = vunpack.i.l.bf16 %v8574_v3  ;;  %v5029_v49 = vpack.c.bf16 %v4837_v45, %v4837_v45 }
 0x3ad   :  { %v5434_v13 = vunpack.c.l.b16 %v5032_v58  ;;  %v5031_v47 = vpack.c.bf16 %v4839_v10, %v4839_v10  ;;  %v12592_v15 = vunpack.c.l.b16 %v5042_v28  ;;  %v5041_v18 = vpack.c.bf16 %v4849_v1, %v4849_v1  ;;  %v8579_v58 = vpop.permute.xlu0 %8578  ;;  %v8614_v39 = vpop.permute.xlu1 %8613 }
 0x3ae   :  { %v4518_v17 = vsel %vm4470_vm11, %v8570_v11, %v8571_v19  ;;  %v12598_v24 = vsel %vm5558_vm4, %v5686_v43, %v5685_v50  ;;  %v4860_v40 = vmax.f32 %v14863_v27, %v8576_v62  ;;  %v8591_v28 = vunpack.i.h.bf16 %v8589_v38  ;;  %v14864_v19 = vld [vmem:[#allocation56_spill] sm:$0xff] }
 0x3af   :  { %v5707_v3 = vsel %vm5546_vm12, %v5706_v35, %v5434_v13  ;;  %v5433_v45 = vunpack.c.l.b16 %v5031_v47  ;;  %v5046_v10 = vpack.c.bf16 %v4854_v57, %v4854_v57  ;;  %v4853_v11 = vmax.f32 %v14864_v19, %v4518_v17 }
 0x3b0   :  { %v4521_v8 = vsel %vm4470_vm11, %v8575_v59, %v8576_v62  ;;  %v12609_v43 = vunpack.c.l.b16 %v5029_v49  ;;  %v12612_v0 = vunpack.c.l.b16 %v5041_v18  ;;  %v5709_v35 = vsel %vm5549_vm13, %v5708_v25, %v5707_v3  ;;  %v14865_v59 = vld [vmem:[#allocation58_spill] sm:$0xff]  ;;  %v14866_v49 = vld [vmem:[#allocation129_spill] sm:$0xff]  ;;  %v14872_v25 = vld [vmem:[#allocation127_spill] sm:$0xff] }
 0x3b1   :  { %v5052_v13 = vpack.c.bf16 %v4860_v40, %v4860_v40  ;;  %v8590_v47 = vunpack.i.l.bf16 %v8589_v38  ;;  %v8581_v57 = vunpack.i.h.bf16 %v8579_v58  ;;  %v5693_v62 = vsel %vm5546_vm12, %v5692_v5, %v5433_v45  ;;  %v8584_v1 = vpop.permute.xlu0 %8583  ;;  %v14867_v5 = vld [vmem:[#allocation128_spill] sm:$0xff]  ;;  %v14868_v45 = vld [vmem:[#allocation61_spill] sm:$0xff]  ;;  %v8624_v29 = vpop.permute.xlu1 %8623 }
 0x3b2   :  { %v4859_v17 = vmax.f32 %v14865_v59, %v4521_v8  ;;  %v4862_v19 = vmax.f32 %v14866_v49, %v8591_v28  ;;  %v8580_v50 = vunpack.i.l.bf16 %v8579_v58  ;;  %v12622_v4 = vunpack.c.l.b16 %v5046_v10  ;;  %v14870_v49 = vld [vmem:[#allocation62_spill] sm:$0xff] }
 0x3b3   :  { %v5045_v18 = vpack.c.bf16 %v4853_v11, %v4853_v11  ;;  %v4522_v53 = vsel %vm4470_vm11, %v8590_v47, %v8591_v28  ;;  %v8616_v7 = vunpack.i.h.bf16 %v8614_v39  ;;  %v5711_v60 = vsel %vm5552_vm14, %v5710_v52, %v5709_v35 }
 0x3b4   :  { %v4861_v40 = vmax.f32 %v14867_v5, %v4522_v53  ;;  %v12634_v58 = vsel %vm5549_vm13, %v5694_v36, %v5693_v62  ;;  %v4519_v3 = vsel %vm4470_vm11, %v8580_v50, %v8581_v57  ;;  %v8615_v10 = vunpack.i.l.bf16 %v8614_v39  ;;  %v14869_v53 = vld [vmem:[#allocation126_spill] sm:$0xff]  ;;  %v14871_v5 = vld [vmem:[#allocation68_spill] sm:$0xff] }
 0x3b5   :  { %v4876_v28 = vmax.f32 %v14868_v45, %v8616_v7  ;;  %v12638_v11 = vunpack.c.l.b16 %v5052_v13  ;;  %v5051_v8 = vpack.c.bf16 %v4859_v17, %v4859_v17  ;;  %v5054_v47 = vpack.c.bf16 %v4862_v19, %v4862_v19  ;;  %v8594_v27 = vpop.permute.xlu0 %8593  ;;  %v8629_v46 = vpop.permute.xlu1 %8628 }
 0x3b6   :  { %v8586_v59 = vunpack.i.h.bf16 %v8584_v1  ;;  %v5718_v52 = vrot.slane %v12622_v4, 1  ;;  %v12641_v35 = vunpack.c.l.b16 %v5045_v18  ;;  %v4856_v42 = vmax.f32 %v14869_v53, %v8581_v57 }
 0x3b7   :  { %v4529_v36 = vsel %vm4470_vm11, %v8615_v10, %v8616_v7  ;;  %v5053_v62 = vpack.c.bf16 %v4861_v40, %v4861_v40  ;;  %v4855_v50 = vmax.f32 %v14870_v49, %v4519_v3  ;;  %v8585_v39 = vunpack.i.l.bf16 %v8584_v1  ;;  %v14873_v40 = vld [vmem:[#allocation130_spill] sm:$0xff]  ;;  %v14874_v3 = vld [vmem:[#allocation80_spill] sm:$0xff] }
 0x3b8   :  { %v4858_v45 = vmax.f32 %v14871_v5, %v8586_v59  ;;  %v5068_v13 = vpack.c.bf16 %v4876_v28, %v4876_v28  ;;  %v4875_v17 = vmax.f32 %v14872_v25, %v4529_v36  ;;  %v8626_v19 = vunpack.i.h.bf16 %v8624_v29  ;;  %v14875_v25 = vld [vmem:[#allocation65_spill] sm:$0xff] }
 0x3b9   :  { %v8625_v38 = vunpack.i.l.bf16 %v8624_v29  ;;  %v12648_v14 = vunpack.c.l.b16 %v5051_v8  ;;  %v12650_v4 = vunpack.c.l.b16 %v5054_v47  ;;  %v4520_v57 = vsel %vm4470_vm11, %v8585_v39, %v8586_v59 }
 0x3ba   :  { %v5050_v18 = vpack.c.bf16 %v4858_v45, %v4858_v45  ;;  %v5048_v7 = vpack.c.bf16 %v4856_v42, %v4856_v42  ;;  %v4857_v10 = vmax.f32 %v14873_v40, %v4520_v57  ;;  %v4874_v53 = vmax.f32 %v14874_v3, %v8626_v19  ;;  %v14876_v57 = vld [vmem:[#allocation69_spill] sm:$0xff] }
 0x3bb   :  { %v4528_v1 = vsel %vm4470_vm11, %v8625_v38, %v8626_v19  ;;  %v5047_v28 = vpack.c.bf16 %v4855_v50, %v4855_v50  ;;  %v8596_v29 = vunpack.i.h.bf16 %v8594_v27  ;;  %v12657_v5 = vunpack.c.l.b16 %v5053_v62 }
 0x3bc   :  { %v5452_v49 = vunpack.c.l.b16 %v5050_v18  ;;  %v4873_v36 = vmax.f32 %v14875_v25, %v4528_v1  ;;  %v12659_v8 = vunpack.c.l.b16 %v5068_v13  ;;  %v5067_v47 = vpack.c.bf16 %v4875_v17, %v4875_v17  ;;  %v8599_v1 = vpop.permute.xlu0 %8598 }
 0x3bd   :  { %v8595_v45 = vunpack.i.l.bf16 %v8594_v27  ;;  %v5736_v59 = vrot.slane %v12638_v11, 6  ;;  %v5049_v42 = vpack.c.bf16 %v4857_v10, %v4857_v10  ;;  %v5066_v39 = vpack.c.bf16 %v4874_v53, %v4874_v53 }
 0x3be   :  { %v4864_v40 = vmax.f32 %v14876_v57, %v8596_v29  ;;  %v5704_v38 = vrot.slane %v12641_v35, 1  ;;  %v5722_v50 = vrot.slane %v12648_v14, 6  ;;  %v5738_v19 = vrot.slane %v12650_v4, 5 }
 0x3bf   :  { %v5450_v18 = vunpack.c.l.b16 %v5048_v7  ;;  %v5449_v62 = vunpack.c.l.b16 %v5047_v28  ;;  %v5734_v3 = vrot.slane %v5452_v49, 7  ;;  %v5065_v13 = vpack.c.bf16 %v4873_v36, %v4873_v36  ;;  %v14879_v36 = vld [vmem:[#allocation81_spill] sm:$0xff] }
 0x3c0   :  { %v4523_v17 = vsel %vm4470_vm11, %v8595_v45, %v8596_v29  ;;  %v5764_v11 = vrot.slane %v12659_v8, 6  ;;  %v12669_v10 = vunpack.c.l.b16 %v5067_v47  ;;  %v14877_v53 = vrot.slane %v12561_v34, 4 }
 0x3c1   :  { %v5451_v25 = vunpack.c.l.b16 %v5049_v42  ;;  %v12674_v57 = vunpack.c.l.b16 %v5066_v39  ;;  %v5056_v7 = vpack.c.bf16 %v4864_v40, %v4864_v40  ;;  %v14878_v28 = vrot.slane %v12557_v37, 2  ;;  %v8634_v40 = vpop.permute.xlu1 %8633 }
 0x3c2   :  { %v5713_v35 = vsel %vm5555_vm15, %v14877_v53, %v5711_v60  ;;  %v4863_v29 = vmax.f32 %v14879_v36, %v4523_v17  ;;  %v14880_v45 = vrot.slane %v12592_v15, 3  ;;  %v14881_v34 = vrot.slane %v12403_v55, 5 }
 0x3c3   :  { %v5689_v49 = vsel %vm5561_vm5, %v14878_v28, %v12598_v24  ;;  %v14882_v42 = vrot.slane %v12552_v6, 5  ;;  %v5735_v37 = vsel %vm5546_vm12, %v5734_v3, %v5450_v18  ;;  %v12693_v24 = vunpack.c.l.b16 %v5065_v13 }
 0x3c4   :  { %v5715_v47 = vsel %vm5558_vm4, %v14880_v45, %v5713_v35  ;;  %v5669_v60 = vsel %vm5552_vm14, %v14881_v34, %v12536_v22  ;;  %v14883_v17 = vrot.slane %v12589_v48, 1  ;;  %v14884_v53 = vrot.slane %v12584_v21, 2  ;;  %v8604_v34 = vpop.permute.xlu0 %8603 }
 0x3c5   :  { %v5697_v39 = vsel %vm5552_vm14, %v14882_v42, %v12634_v58  ;;  %v14885_v35 = vrot.slane %v12544_v16, 4  ;;  %v14886_v58 = vrot.slane %v12575_v26, 4  ;;  %v8631_v3 = vunpack.i.h.bf16 %v8629_v46 }
 0x3c6   :  { %v5691_v15 = vsel %vm5564_vm7, %v14883_v17, %v5689_v49  ;;  %v5717_v55 = vsel %vm5561_vm5, %v14884_v53, %v5715_v47  ;;  %v5720_v13 = vrot.slane %v5451_v25, 7  ;;  %v5458_v28 = vunpack.c.l.b16 %v5056_v7 }
 0x3c7   :  { %v5719_v22 = vsel %vm5564_vm7, %v5718_v52, %v5717_v55  ;;  %v5671_v6 = vsel %vm5555_vm15, %v14885_v35, %v5669_v60  ;;  %v5699_v18 = vsel %vm5555_vm15, %v14886_v58, %v5697_v39  ;;  %v14887_v49 = vrot.slane %v12577_v2, 3  ;;  %v14891_v2 = vld [vmem:[#allocation132_spill] sm:$0xff] }
 0x3c8   :  { %v5893_v48 = vpack.c.b16 %v5719_v22, %v5691_v15  ;;  %v5055_v36 = vpack.c.bf16 %v4863_v29, %v4863_v29  ;;  %v14888_v45 = vrot.slane %v12559_v9, 2  ;;  %v14889_v16 = vrot.slane %v12612_v0, 3  ;;  %v8639_v15 = vpop.permute.xlu1 %8638  ;;  %v14893_v55 = vld [vmem:[#allocation72_spill] sm:$0xff] }
 0x3c9   :  { %v5673_v21 = vsel %vm5558_vm4, %v14887_v49, %v5671_v6  ;;  %v8630_v26 = vunpack.i.l.bf16 %v8629_v46  ;;  %v14890_v25 = vrot.slane %v12587_v61, 2  ;;  %v4878_v60 = vmax.f32 %v14891_v2, %v8631_v3  ;;  %v14894_v61 = vld [vmem:[#allocation133_spill] sm:$0xff]  ;;  %v14898_v2 = vld [vmem:[#allocation6_spill] sm:$0xff] }
 0x3ca   :  { %v5675_v52 = vsel %vm5561_vm5, %v14888_v45, %v5673_v21  ;;  %v5701_v47 = vsel %vm5558_vm4, %v14889_v16, %v5699_v18  ;;  %7843 = vmatprep.mubr.msk.bf16.mxu1 %vm5959_vm8, %v5893_v48  ;;  %v8601_v42 = vunpack.i.h.bf16 %v8599_v1  ;;  %v8600_v29 = vunpack.i.l.bf16 %v8599_v1  ;;  %v14895_v1 = vld [vmem:[#allocation131_spill] sm:$0xff] }
 0x3cb   :  { %v5703_v7 = vsel %vm5561_vm5, %v14890_v25, %v5701_v47  ;;  %v14892_v9 = vrot.slane %v12609_v43, 1  ;;  %v4530_v17 = vsel %vm4470_vm11, %v8630_v26, %v8631_v3  ;;  %v8636_v46 = vunpack.i.h.bf16 %v8634_v40  ;;  %v14896_v43 = vld [vmem:[#allocation8_spill] sm:$0xff]  ;;  %v8609_v25 = vpop.permute.xlu0 %8608 }
 0x3cc   :  { %v5705_v0 = vsel %vm5564_vm7, %v5704_v38, %v5703_v7  ;;  %v4877_v22 = vmax.f32 %v14893_v55, %v4530_v17  ;;  %v4868_v35 = vmax.f32 %v14894_v61, %v8601_v42  ;;  %v4525_v6 = vsel %vm4470_vm11, %v8600_v29, %v8601_v42  ;;  %v14897_v7 = vld [vmem:[#allocation9_spill] sm:$0xff]  ;;  %v8644_v42 = vpop.permute.xlu1 %8643 }
 0x3cd   :  { %v5677_v39 = vsel %vm5564_vm7, %v14892_v9, %v5675_v52  ;;  %v5737_v58 = vsel %vm5549_vm13, %v5736_v59, %v5735_v37  ;;  %v4867_v18 = vmax.f32 %v14895_v1, %v4525_v6  ;;  %v4880_v48 = vmax.f32 %v14896_v43, %v8636_v46 }
 0x3ce   :  { %v5892_v53 = vpack.c.b16 %v5705_v0, %v5677_v39  ;;  %v8635_v49 = vunpack.i.l.bf16 %v8634_v40  ;;  %v5721_v38 = vsel %vm5546_vm12, %v5720_v13, %v5449_v62  ;;  %v5740_v21 = vrot.slane %v5458_v28, 4 }
 0x3cf   :  { %v12734_v3 = vunpack.c.l.b16 %v5055_v36  ;;  %v8606_v45 = vunpack.i.h.bf16 %v8604_v34  ;;  %v5070_v52 = vpack.c.bf16 %v4878_v60, %v4878_v60  ;;  %v5069_v16 = vpack.c.bf16 %v4877_v22, %v4877_v22  ;;  %v8619_v6 = vpop.permute.xlu0 %8618 }
 0x3d0   :  { %6030 = vmatmul.mubr.bf16.gmra.mxu1 %v5892_v53  ;;  %v4531_v47 = vsel %vm4470_vm11, %v8635_v49, %v8636_v46  ;;  %v8605_v26 = vunpack.i.l.bf16 %v8604_v34  ;;  %v5739_v37 = vsel %vm5552_vm14, %v5738_v19, %v5737_v58  ;;  %v5060_v40 = vpack.c.bf16 %v4868_v35, %v4868_v35  ;;  %v14899_v58 = vld [vmem:[#allocation137_spill] sm:$0xff]  ;;  %v14901_v49 = vld [vmem:[#allocation143_spill] sm:$0xff] }
 0x3d1   :  { %v4879_v62 = vmax.f32 %v14897_v7, %v4531_v47  ;;  %v5762_v13 = vrot.slane %v12674_v57, 7  ;;  %v5059_v28 = vpack.c.bf16 %v4867_v18, %v4867_v18  ;;  %v5072_v36 = vpack.c.bf16 %v4880_v48, %v4880_v48  ;;  %v14900_v18 = vld [vmem:[#allocation11_spill] sm:$0xff] }
 0x3d2   :  { %v4866_v60 = vmax.f32 %v14898_v2, %v8606_v45  ;;  %v12747_v34 = vsel %vm5549_vm13, %v5722_v50, %v5721_v38  ;;  %v5748_v29 = vrot.slane %v12693_v24, 7  ;;  %v8641_v19 = vunpack.i.h.bf16 %v8639_v15 }
 0x3d3   :  { %v12752_v9 = vsel %vm5555_vm15, %v5740_v21, %v5739_v37  ;;  %v12754_v39 = vunpack.c.l.b16 %v5070_v52  ;;  %v12756_v0 = vunpack.c.l.b16 %v5069_v16  ;;  %v4524_v17 = vsel %vm4470_vm11, %v8605_v26, %v8606_v45  ;;  %v8649_v16 = vpop.permute.xlu1 %8648 }
 0x3d4   :  { %v12759_v46 = vunpack.c.l.b16 %v5060_v40  ;;  %v5071_v14 = vpack.c.bf16 %v4879_v62, %v4879_v62  ;;  %v8640_v53 = vunpack.i.l.bf16 %v8639_v15  ;;  %v8611_v50 = vunpack.i.h.bf16 %v8609_v25  ;;  %v14903_v40 = vld [vmem:[#allocation140_spill] sm:$0xff] }
 0x3d5   :  { %v12761_v55 = vunpack.c.l.b16 %v5059_v28  ;;  %v12763_v22 = vunpack.c.l.b16 %v5072_v36  ;;  %v5058_v61 = vpack.c.bf16 %v4866_v60, %v4866_v60  ;;  %v8610_v35 = vunpack.i.l.bf16 %v8609_v25  ;;  %v14902_v25 = vld [vmem:[#allocation14_spill] sm:$0xff] }
 0x3d6   :  { %v4865_v1 = vmax.f32 %v14899_v58, %v4524_v17  ;;  %v4884_v43 = vmax.f32 %v14900_v18, %v8641_v19  ;;  %v4533_v48 = vsel %vm4470_vm11, %v8640_v53, %v8641_v19  ;;  %v4870_v38 = vmax.f32 %v14901_v49, %v8611_v50  ;;  %v8654_v49 = vpop.permute.xlu0 %8653 }
 0x3d7   :  { %v5766_v21 = vrot.slane %v12754_v39, 5  ;;  %v4526_v45 = vsel %vm4470_vm11, %v8610_v35, %v8611_v50  ;;  %v8646_v52 = vunpack.i.h.bf16 %v8644_v42  ;;  %v12773_v26 = vunpack.c.l.b16 %v5071_v14  ;;  %v14904_v50 = vld [vmem:[#allocation144_spill] sm:$0xff]  ;;  %v8669_v4 = vpop.permute.xlu1 %8668  ;;  %v14915_v39 = vld [vmem:[#allocation158_spill] sm:$0xff] }
 0x3d8   :  { %v4883_v37 = vmax.f32 %v14902_v25, %v4533_v48  ;;  %v4869_v7 = vmax.f32 %v14903_v40, %v4526_v45  ;;  %v5460_v36 = vunpack.c.l.b16 %v5058_v61  ;;  %v8645_v2 = vunpack.i.l.bf16 %v8644_v42  ;;  %v14905_v40 = vld [vmem:[#allocation16_spill] sm:$0xff]  ;;  %v14906_v61 = vld [vmem:[#allocation150_spill] sm:$0xff] }
 0x3d9   :  { %v5057_v60 = vpack.c.bf16 %v4865_v1, %v4865_v1  ;;  %v5076_v19 = vpack.c.bf16 %v4884_v43, %v4884_v43  ;;  %v5062_v17 = vpack.c.bf16 %v4870_v38, %v4870_v38  ;;  %v8621_v53 = vunpack.i.h.bf16 %v8619_v6  ;;  %v14907_v43 = vld [vmem:[#allocation152_spill] sm:$0xff] }
 0x3da   :  { %v4882_v35 = vmax.f32 %v14904_v50, %v8646_v52  ;;  %v4532_v58 = vsel %vm4470_vm11, %v8645_v2, %v8646_v52  ;;  %v8620_v14 = vunpack.i.l.bf16 %v8619_v6  ;;  %v8651_v18 = vunpack.i.h.bf16 %v8649_v16  ;;  %v14908_v2 = vld [vmem:[#allocation75_spill] sm:$0xff]  ;;  %v8659_v47 = vpop.permute.xlu0 %8658 }
 0x3db   :  { %v5075_v45 = vpack.c.bf16 %v4883_v37, %v4883_v37  ;;  %v5061_v25 = vpack.c.bf16 %v4869_v7, %v4869_v7  ;;  %v4881_v62 = vmax.f32 %v14905_v40, %v4532_v58  ;;  %v5742_v15 = vrot.slane %v5460_v36, 3 }
 0x3dc   :  { %v4872_v42 = vmax.f32 %v14906_v61, %v8621_v53  ;;  %v4527_v1 = vsel %vm4470_vm11, %v8620_v14, %v8621_v53  ;;  %v4886_v38 = vmax.f32 %v14907_v43, %v8651_v18  ;;  %v12786_v50 = vunpack.c.l.b16 %v5057_v60 }
 0x3dd   :  { %v12788_v52 = vunpack.c.l.b16 %v5076_v19  ;;  %v12790_v6 = vunpack.c.l.b16 %v5062_v17  ;;  %v4871_v48 = vmax.f32 %v14908_v2, %v4527_v1  ;;  %v5074_v37 = vpack.c.bf16 %v4882_v35, %v4882_v35  ;;  %v14912_v17 = vld [vmem:[#allocation24_spill] sm:$0xff] }
 0x3de   :  { %v5064_v7 = vpack.c.bf16 %v4872_v42, %v4872_v42  ;;  %v8650_v27 = vunpack.i.l.bf16 %v8649_v16  ;;  %v8656_v58 = vunpack.i.h.bf16 %v8654_v49  ;;  %v12793_v36 = vunpack.c.l.b16 %v5075_v45  ;;  %v14909_v16 = vld [vmem:[#allocation156_spill] sm:$0xff] }
 0x3df   :  { %v12795_v40 = vunpack.c.l.b16 %v5061_v25  ;;  %v5073_v53 = vpack.c.bf16 %v4881_v62, %v4881_v62  ;;  %v8655_v14 = vunpack.i.l.bf16 %v8654_v49  ;;  %v5063_v43 = vpack.c.bf16 %v4871_v48, %v4871_v48  ;;  %v14917_v25 = vld [vmem:[#allocation29_spill] sm:$0xff] }
 0x3e0   :  { %v5466_v61 = vunpack.c.l.b16 %v5064_v7  ;;  %v5078_v60 = vpack.c.bf16 %v4886_v38, %v4886_v38  ;;  %v4534_v19 = vsel %vm4470_vm11, %v8650_v27, %v8651_v18  ;;  %v12801_v35 = vsel %vm5558_vm4, %v5742_v15, %v12752_v9  ;;  %v8694_v18 = vpop.permute.xlu1 %8693  ;;  %v14910_v9 = vld [vmem:[#allocation18_spill] sm:$0xff] }
 0x3e1   :  { %v4892_v42 = vmax.f32 %v14909_v16, %v8656_v58  ;;  %v4537_v45 = vsel %vm4470_vm11, %v8655_v14, %v8656_v58  ;;  %v12806_v62 = vunpack.c.l.b16 %v5074_v37  ;;  %v8671_v27 = vunpack.i.h.bf16 %v8669_v4  ;;  %v14911_v38 = vld [vmem:[#allocation154_spill] sm:$0xff] }
 0x3e2   :  { %v5763_v49 = vsel %vm5546_vm12, %v5762_v13, %v5466_v61  ;;  %v12812_v1 = vunpack.c.l.b16 %v5073_v53  ;;  %v4885_v15 = vmax.f32 %v14910_v9, %v4534_v19  ;;  %v4891_v2 = vmax.f32 %v14911_v38, %v4537_v45  ;;  %v8664_v38 = vpop.permute.xlu0 %8663  ;;  %v14918_v53 = vld [vmem:[#allocation31_spill] sm:$0xff] }
 0x3e3   :  { %v5465_v37 = vunpack.c.l.b16 %v5063_v43  ;;  %v12818_v14 = vunpack.c.l.b16 %v5078_v60  ;;  %v5765_v57 = vsel %vm5549_vm13, %v5764_v11, %v5763_v49  ;;  %v5084_v13 = vpack.c.bf16 %v4892_v42, %v4892_v42 }
 0x3e4   :  { %v8670_v61 = vunpack.i.l.bf16 %v8669_v4  ;;  %v8661_v16 = vunpack.i.h.bf16 %v8659_v47  ;;  %v4894_v19 = vmax.f32 %v14912_v17, %v8671_v27  ;;  %v8660_v9 = vunpack.i.l.bf16 %v8659_v47  ;;  %v14913_v17 = vld [vmem:[#allocation22_spill] sm:$0xff]  ;;  %v8704_v42 = vpop.permute.xlu1 %8703 }
 0x3e5   :  { %v8696_v45 = vunpack.i.h.bf16 %v8694_v18  ;;  %v5077_v58 = vpack.c.bf16 %v4885_v15, %v4885_v15  ;;  %v5083_v43 = vpack.c.bf16 %v4891_v2, %v4891_v2  ;;  %v5767_v8 = vsel %vm5552_vm14, %v5766_v21, %v5765_v57  ;;  %v14914_v2 = vld [vmem:[#allocation26_spill] sm:$0xff] }
 0x3e6   :  { %v4538_v60 = vsel %vm4470_vm11, %v8670_v61, %v8671_v27  ;;  %v5749_v11 = vsel %vm5546_vm12, %v5748_v29, %v5465_v37  ;;  %v12835_v49 = vunpack.c.l.b16 %v5084_v13  ;;  %v4535_v15 = vsel %vm4470_vm11, %v8660_v9, %v8661_v16  ;;  %v14916_v13 = vld [vmem:[#allocation25_spill] sm:$0xff] }
 0x3e7   :  { %v4893_v47 = vmax.f32 %v14913_v17, %v4538_v60  ;;  %v4908_v7 = vmax.f32 %v14914_v2, %v8696_v45  ;;  %v8695_v27 = vunpack.i.l.bf16 %v8694_v18  ;;  %v5086_v61 = vpack.c.bf16 %v4894_v19, %v4894_v19  ;;  %v8674_v18 = vpop.permute.xlu0 %8673 }
 0x3e8   :  { %v4888_v48 = vmax.f32 %v14915_v39, %v8661_v16  ;;  %v8666_v21 = vunpack.i.h.bf16 %v8664_v38  ;;  %v8665_v57 = vunpack.i.l.bf16 %v8664_v38  ;;  %v12840_v24 = vunpack.c.l.b16 %v5077_v58  ;;  %v14919_v39 = vld [vmem:[#allocation30_spill] sm:$0xff] }
 0x3e9   :  { %v12842_v29 = vunpack.c.l.b16 %v5083_v43  ;;  %v4545_v37 = vsel %vm4470_vm11, %v8695_v27, %v8696_v45  ;;  %v8706_v60 = vunpack.i.h.bf16 %v8704_v42  ;;  %v5085_v17 = vpack.c.bf16 %v4893_v47, %v4893_v47  ;;  %v14920_v27 = vld [vmem:[#allocation28_spill] sm:$0xff] }
 0x3ea   :  { %v4887_v4 = vmax.f32 %v14916_v13, %v4535_v15  ;;  %v4907_v9 = vmax.f32 %v14917_v25, %v4545_v37  ;;  %v4890_v2 = vmax.f32 %v14918_v53, %v8666_v21  ;;  %v5100_v19 = vpack.c.bf16 %v4908_v7, %v4908_v7  ;;  %v14922_v13 = vld [vmem:[#allocation109_spill] sm:$0xff] }
 0x3eb   :  { %v4536_v16 = vsel %vm4470_vm11, %v8665_v57, %v8666_v21  ;;  %v4906_v38 = vmax.f32 %v14919_v39, %v8706_v60  ;;  %v8705_v58 = vunpack.i.l.bf16 %v8704_v42  ;;  %v12850_v28 = vunpack.c.l.b16 %v5086_v61 }
 0x3ec   :  { %v5080_v43 = vpack.c.bf16 %v4888_v48, %v4888_v48  ;;  %v5099_v59 = vpack.c.bf16 %v4907_v9, %v4907_v9  ;;  %v5082_v45 = vpack.c.bf16 %v4890_v2, %v4890_v2  ;;  %v4889_v47 = vmax.f32 %v14920_v27, %v4536_v16  ;;  %v8709_v2 = vpop.permute.xlu1 %8708  ;;  %v8679_v27 = vpop.permute.xlu0 %8678 }
 0x3ed   :  { %v5098_v33 = vpack.c.bf16 %v4906_v38, %v4906_v38  ;;  %v4544_v15 = vsel %vm4470_vm11, %v8705_v58, %v8706_v60  ;;  %v8676_v25 = vunpack.i.h.bf16 %v8674_v18  ;;  %v14921_v53 = vrot.slane %v12669_v10, 6 }
 0x3ee   :  { %v12857_v37 = vunpack.c.l.b16 %v5085_v17  ;;  %v5079_v21 = vpack.c.bf16 %v4887_v4, %v4887_v4  ;;  %v8675_v57 = vunpack.i.l.bf16 %v8674_v18  ;;  %v5792_v42 = vrot.slane %v12835_v49, 6  ;;  %v14923_v18 = vld [vmem:[#allocation124_spill] sm:$0xff] }
 0x3ef   :  { %v5751_v7 = vsel %vm5549_vm13, %v14921_v53, %v5749_v11  ;;  %v12860_v61 = vunpack.c.l.b16 %v5100_v19  ;;  %v5484_v48 = vunpack.c.l.b16 %v5082_v45  ;;  %v4905_v9 = vmax.f32 %v14922_v13, %v4544_v15 }
 0x3f0   :  { %v5760_v16 = vrot.slane %v12840_v24, 1  ;;  %v5778_v60 = vrot.slane %v12842_v29, 6  ;;  %v12865_v39 = vunpack.c.l.b16 %v5099_v59  ;;  %v5081_v10 = vpack.c.bf16 %v4889_v47, %v4889_v47 }
 0x3f1   :  { %v5794_v11 = vrot.slane %v12850_v28, 5  ;;  %v5482_v17 = vunpack.c.l.b16 %v5080_v43  ;;  %v12868_v4 = vunpack.c.l.b16 %v5098_v33  ;;  %v4896_v49 = vmax.f32 %v14923_v18, %v8676_v25 }
 0x3f2   :  { %v5780_v19 = vrot.slane %v12857_v37, 5  ;;  %v5481_v38 = vunpack.c.l.b16 %v5079_v21  ;;  %v4539_v58 = vsel %vm4470_vm11, %v8675_v57, %v8676_v25  ;;  %v14924_v45 = vrot.slane %v12763_v22, 4 }
 0x3f3   :  { %v5820_v59 = vrot.slane %v12860_v61, 6  ;;  %v5790_v47 = vrot.slane %v5484_v48, 7  ;;  %v5097_v15 = vpack.c.bf16 %v4905_v9, %v4905_v9  ;;  %v14925_v33 = vrot.slane %v12759_v46, 2  ;;  %v14928_v9 = vld [vmem:[#allocation33_spill] sm:$0xff] }
 0x3f4   :  { %v5769_v24 = vsel %vm5555_vm15, %v14924_v45, %v5767_v8  ;;  %v5806_v53 = vrot.slane %v12865_v39, 6  ;;  %v5483_v13 = vunpack.c.l.b16 %v5081_v10  ;;  %v14926_v21 = vrot.slane %v12806_v62, 3  ;;  %v8714_v45 = vpop.permute.xlu1 %8713  ;;  %v14955_v39 = vld [vmem:[#allocation46_spill] sm:$0xff] }
 0x3f5   :  { %v5745_v43 = vsel %vm5561_vm5, %v14925_v33, %v12801_v35  ;;  %v14927_v22 = vrot.slane %v12657_v5, 5  ;;  %v5818_v57 = vrot.slane %v12868_v4, 7  ;;  %v5088_v48 = vpack.c.bf16 %v4896_v49, %v4896_v49 }
 0x3f6   :  { %v5771_v25 = vsel %vm5558_vm4, %v14926_v21, %v5769_v24  ;;  %v4895_v18 = vmax.f32 %v14928_v9, %v4539_v58  ;;  %v14929_v46 = vrot.slane %v12788_v52, 2  ;;  %v14930_v10 = vrot.slane %v12790_v6, 1 }
 0x3f7   :  { %v5725_v8 = vsel %vm5552_vm14, %v14927_v22, %v12747_v34  ;;  %v14931_v24 = vrot.slane %v12818_v14, 1  ;;  %v14932_v34 = vrot.slane %v12734_v3, 4  ;;  %v14933_v49 = vrot.slane %v12756_v0, 5 }
 0x3f8   :  { %v5773_v35 = vsel %vm5561_vm5, %v14929_v46, %v5771_v25  ;;  %v5747_v62 = vsel %vm5564_vm7, %v14930_v10, %v5745_v43  ;;  %v5791_v52 = vsel %vm5546_vm12, %v5790_v47, %v5482_v17  ;;  %v12907_v21 = vunpack.c.l.b16 %v5097_v15  ;;  %v8684_v46 = vpop.permute.xlu0 %8683 }
 0x3f9   :  { %v5775_v5 = vsel %vm5564_vm7, %v14931_v24, %v5773_v35  ;;  %v5727_v33 = vsel %vm5555_vm15, %v14932_v34, %v5725_v8  ;;  %v5753_v58 = vsel %vm5552_vm14, %v14933_v49, %v5751_v7  ;;  %v14934_v6 = vrot.slane %v12786_v50, 3  ;;  %v14939_v35 = vld [vmem:[#allocation121_spill] sm:$0xff] }
 0x3fa   :  { %v5895_v25 = vpack.c.b16 %v5775_v5, %v5747_v62  ;;  %v5776_v14 = vrot.slane %v5483_v13, 7  ;;  %v14935_v22 = vrot.slane %v12773_v26, 4  ;;  %v8711_v9 = vunpack.i.h.bf16 %v8709_v2  ;;  %v14941_v49 = vld [vmem:[#allocation37_spill] sm:$0xff] }
 0x3fb   :  { %v5729_v43 = vsel %vm5558_vm4, %v14934_v6, %v5727_v33  ;;  %v8710_v8 = vunpack.i.l.bf16 %v8709_v2  ;;  %v14936_v0 = vrot.slane %v12761_v55, 2  ;;  %v14937_v17 = vrot.slane %v12812_v1, 3 }
 0x3fc   :  { %v5755_v3 = vsel %vm5555_vm15, %v14935_v22, %v5753_v58  ;;  %7844 = vmatprep.mubr.msk.bf16.mxu1 %vm5959_vm8, %v5895_v25  ;;  %v8681_v47 = vunpack.i.h.bf16 %v8679_v27  ;;  %v8680_v15 = vunpack.i.l.bf16 %v8679_v27  ;;  %v14938_v13 = vrot.slane %v12793_v36, 2  ;;  %v8719_v27 = vpop.permute.xlu1 %8718  ;;  %v14942_v25 = vld [vmem:[#allocation35_spill] sm:$0xff]  ;;  %v14943_v22 = vld [vmem:[#allocation32_spill] sm:$0xff] }
 0x3fd   :  { %v5731_v7 = vsel %vm5561_vm5, %v14936_v0, %v5729_v43  ;;  %v5757_v50 = vsel %vm5558_vm4, %v14937_v17, %v5755_v3  ;;  %v4910_v10 = vmax.f32 %v14939_v35, %v8711_v9  ;;  %v4546_v2 = vsel %vm4470_vm11, %v8710_v8, %v8711_v9  ;;  %v14944_v8 = vld [vmem:[#allocation36_spill] sm:$0xff] }
 0x3fe   :  { %v5759_v26 = vsel %vm5561_vm5, %v14938_v13, %v5757_v50  ;;  %v8716_v62 = vunpack.i.h.bf16 %v8714_v45  ;;  %v5793_v24 = vsel %vm5549_vm13, %v5792_v42, %v5791_v52  ;;  %v14940_v55 = vrot.slane %v12795_v40, 1  ;;  %v14945_v50 = vld [vmem:[#allocation40_spill] sm:$0xff] }
 0x3ff   :  { %v5761_v1 = vsel %vm5564_vm7, %v5760_v16, %v5759_v26  ;;  %v4541_v34 = vsel %vm4470_vm11, %v8680_v15, %v8681_v47  ;;  %v5087_v33 = vpack.c.bf16 %v4895_v18, %v4895_v18  ;;  %v4909_v58 = vmax.f32 %v14941_v49, %v4546_v2 }
 0x400   :  { %v5733_v5 = vsel %vm5564_vm7, %v14940_v55, %v5731_v7  ;;  %v4900_v6 = vmax.f32 %v14942_v25, %v8681_v47  ;;  %v5490_v43 = vunpack.c.l.b16 %v5088_v48  ;;  %v4899_v3 = vmax.f32 %v14943_v22, %v4541_v34  ;;  %v8689_v7 = vpop.permute.xlu0 %8688  ;;  %v14947_v55 = vld [vmem:[#allocation111_spill] sm:$0xff] }
 0x401   :  { %v5894_v36 = vpack.c.b16 %v5761_v1, %v5733_v5  ;;  %v8715_v9 = vunpack.i.l.bf16 %v8714_v45  ;;  %v8686_v42 = vunpack.i.h.bf16 %v8684_v46  ;;  %v5777_v40 = vsel %vm5546_vm12, %v5776_v14, %v5481_v38  ;;  %v14946_v14 = vld [vmem:[#allocation34_spill] sm:$0xff] }
 0x402   :  { %v5102_v52 = vpack.c.bf16 %v4910_v10, %v4910_v10  ;;  %v4912_v16 = vmax.f32 %v14944_v8, %v8716_v62  ;;  %v8685_v0 = vunpack.i.l.bf16 %v8684_v46  ;;  %v5804_v18 = vrot.slane %v12907_v21, 7 }
 0x403   :  { %6038 = vmatmul.mubr.bf16.gmra.mxu1 %v5894_v36  ;;  %v5795_v17 = vsel %vm5552_vm14, %v5794_v11, %v5793_v24  ;;  %v4547_v48 = vsel %vm4470_vm11, %v8715_v9, %v8716_v62  ;;  %v4898_v47 = vmax.f32 %v14945_v50, %v8686_v42  ;;  %v12944_v45 = vunpack.c.l.b16 %v5087_v33  ;;  %v8724_v11 = vpop.permute.xlu1 %8723 }
 0x404   :  { %v5101_v15 = vpack.c.bf16 %v4909_v58, %v4909_v58  ;;  %v5092_v38 = vpack.c.bf16 %v4900_v6, %v4900_v6  ;;  %v4911_v13 = vmax.f32 %v14946_v14, %v4547_v48  ;;  %v12950_v46 = vsel %vm5549_vm13, %v5778_v60, %v5777_v40  ;;  %v8699_v58 = vpop.permute.xlu0 %8698  ;;  %v12961_v25 = vpop.f32.mrf.mxu1 }
 0x405   :  { %v5796_v26 = vrot.slane %v5490_v43, 4  ;;  %v5091_v35 = vpack.c.bf16 %v4899_v3, %v4899_v3  ;;  %v4540_v28 = vsel %vm4470_vm11, %v8685_v0, %v8686_v42  ;;  %v12953_v10 = vunpack.c.l.b16 %v5102_v52  ;;  %v14948_v42 = vld [vmem:[#allocation41_spill] sm:$0xff] }
 0x406   :  { %v5104_v2 = vpack.c.bf16 %v4912_v16, %v4912_v16  ;;  %v5103_v62 = vpack.c.bf16 %v4911_v13, %v4911_v13  ;;  %v5090_v24 = vpack.c.bf16 %v4898_v47, %v4898_v47  ;;  %v4897_v5 = vmax.f32 %v14947_v55, %v4540_v28  ;;  %v6017_v8 = vpop.f32.mrf.mxu1 }
 0x407   :  { %v8721_v1 = vunpack.i.h.bf16 %v8719_v27  ;;  %v8720_v34 = vunpack.i.l.bf16 %v8719_v27  ;;  %v8691_v33 = vunpack.i.h.bf16 %v8689_v7  ;;  %v5782_v29 = vrot.slane %v12944_v45, 4  ;;  %v8729_v48 = vpop.permute.xlu1 %8728 }
 0x408   :  { %v12957_v36 = vunpack.c.l.b16 %v5101_v15  ;;  %v12959_v60 = vunpack.c.l.b16 %v5092_v38  ;;  %v8690_v49 = vunpack.i.l.bf16 %v8689_v7  ;;  %v5797_v6 = vsel %vm5555_vm15, %v5796_v26, %v5795_v17  ;;  %v14949_v15 = vld [vmem:[#allocation113_spill] sm:$0xff]  ;;  %v12978_v13 = vpop.f32.mrf.mxu1 }
 0x409   :  { %v12964_v43 = vunpack.c.l.b16 %v5091_v35  ;;  %v4549_v22 = vsel %vm4470_vm11, %v8720_v34, %v8721_v1  ;;  %v8726_v3 = vunpack.i.h.bf16 %v8724_v11  ;;  %v5822_v27 = vrot.slane %v12953_v10, 5  ;;  %v14950_v35 = vld [vmem:[#allocation39_spill] sm:$0xff] }
 0x40a   :  { %v12968_v9 = vunpack.c.l.b16 %v5104_v2  ;;  %v4916_v40 = vmax.f32 %v14948_v42, %v8721_v1  ;;  %v4542_v52 = vsel %vm4470_vm11, %v8690_v49, %v8691_v33  ;;  %v12972_v16 = vunpack.c.l.b16 %v5103_v62  ;;  %v8734_v1 = vpop.permute.xlu0 %8733  ;;  %v6020_v34 = vpop.f32.mrf.mxu1 }
 0x40b   :  { %v5492_v0 = vunpack.c.l.b16 %v5090_v24  ;;  %v5089_v7 = vpack.c.bf16 %v4897_v5, %v4897_v5  ;;  %v4902_v17 = vmax.f32 %v11936_v32, %v8691_v33  ;;  %v5800_v47 = vrot.slane %v12959_v60, 2 }
 0x40c   :  { %v4915_v38 = vmax.f32 %v14949_v15, %v4549_v22  ;;  %v8725_v14 = vunpack.i.l.bf16 %v8724_v11  ;;  %v4901_v28 = vmax.f32 %v14950_v35, %v4542_v52  ;;  %v4914_v2 = vmax.f32 %v11962_v23, %v8726_v3 }
 0x40d   :  { %v8701_v62 = vunpack.i.h.bf16 %v8699_v58  ;;  %v5824_v24 = vrot.slane %v12968_v9, 4  ;;  %v5108_v32 = vpack.c.bf16 %v4916_v40, %v4916_v40  ;;  %v8700_v5 = vunpack.i.l.bf16 %v8699_v58 }
 0x40e   :  { %v4548_v55 = vsel %vm4470_vm11, %v8725_v14, %v8726_v3  ;;  %v5798_v11 = vrot.slane %v5492_v0, 3  ;;  %v12986_v49 = vunpack.c.l.b16 %v5089_v7  ;;  %v5094_v22 = vpack.c.bf16 %v4902_v17, %v4902_v17  ;;  %v8749_v14 = vpop.permute.xlu1 %8748 }
 0x40f   :  { %v5107_v42 = vpack.c.bf16 %v4915_v38, %v4915_v38  ;;  %v4913_v52 = vmax.f32 %v11956_v51, %v4548_v55  ;;  %v4904_v23 = vmax.f32 %v11975_v31, %v8701_v62  ;;  %v4543_v8 = vsel %vm4470_vm11, %v8700_v5, %v8701_v62  ;;  %v8739_v55 = vpop.permute.xlu0 %8738 }
 0x410   :  { %v5093_v15 = vpack.c.bf16 %v4901_v28, %v4901_v28  ;;  %v5106_v40 = vpack.c.bf16 %v4914_v2, %v4914_v2  ;;  %v4903_v3 = vmax.f32 %v11964_v30, %v4543_v8  ;;  %v8731_v58 = vunpack.i.h.bf16 %v8729_v48 }
 0x411   :  { %v12992_v35 = vunpack.c.l.b16 %v5108_v32  ;;  %v5096_v34 = vpack.c.bf16 %v4904_v23, %v4904_v23  ;;  %v8730_v0 = vunpack.i.l.bf16 %v8729_v48  ;;  %v8736_v7 = vunpack.i.h.bf16 %v8734_v1 }
 0x412   :  { %v12994_v33 = vunpack.c.l.b16 %v5094_v22  ;;  %v5095_v17 = vpack.c.bf16 %v4903_v3, %v4903_v3  ;;  %v4918_v51 = vmax.f32 %v12020_v12, %v8731_v58  ;;  %v8735_v38 = vunpack.i.l.bf16 %v8734_v1 }
 0x413   :  { %v12997_v31 = vunpack.c.l.b16 %v5107_v42  ;;  %v5105_v62 = vpack.c.bf16 %v4913_v52, %v4913_v52  ;;  %v5498_v28 = vunpack.c.l.b16 %v5096_v34  ;;  %v8751_v2 = vunpack.i.h.bf16 %v8749_v14 }
 0x414   :  { %v13000_v30 = vsel %vm5558_vm4, %v5798_v11, %v5797_v6  ;;  %v13002_v32 = vunpack.c.l.b16 %v5093_v15  ;;  %v13004_v5 = vunpack.c.l.b16 %v5106_v40  ;;  %v4550_v48 = vsel %vm4470_vm11, %v8730_v0, %v8731_v58  ;;  %v8769_v58 = vpop.permute.xlu1 %8768  ;;  %v14951_v0 = vld [vmem:[#allocation106_spill] sm:$0xff] }
 0x415   :  { %v5828_v12 = vrot.slane %v12992_v35, 2  ;;  %v4924_v1 = vmax.f32 %v12031_v20, %v8736_v7  ;;  %v4553_v42 = vsel %vm4470_vm11, %v8735_v38, %v8736_v7  ;;  %v5802_v52 = vrot.slane %v12994_v33, 1 }
 0x416   :  { %v5819_v6 = vsel %vm5546_vm12, %v5818_v57, %v5498_v28  ;;  %v5497_v11 = vunpack.c.l.b16 %v5095_v17  ;;  %v5110_v23 = vpack.c.bf16 %v4918_v51, %v4918_v51  ;;  %v13016_v15 = vunpack.c.l.b16 %v5105_v62  ;;  %v8744_v62 = vpop.permute.xlu0 %8743 }
 0x417   :  { %v4917_v40 = vmax.f32 %v12016_v56, %v4550_v48  ;;  %v4926_v3 = vmax.f32 %v12150_v63, %v8751_v2  ;;  %v5826_v34 = vrot.slane %v13004_v5, 3  ;;  %v4923_v7 = vmax.f32 %v14951_v0, %v4553_v42 }
 0x418   :  { %v8750_v4 = vunpack.i.l.bf16 %v8749_v14  ;;  %v5821_v57 = vsel %vm5549_vm13, %v5820_v59, %v5819_v6  ;;  %v5116_v17 = vpack.c.bf16 %v4924_v1, %v4924_v1  ;;  %v8741_v51 = vunpack.i.h.bf16 %v8739_v55  ;;  %v14952_v1 = vld [vmem:[#allocation38_spill] sm:$0xff] }
 0x419   :  { %v8740_v38 = vunpack.i.l.bf16 %v8739_v55  ;;  %v5805_v56 = vsel %vm5546_vm12, %v5804_v18, %v5497_v11  ;;  %v13029_v63 = vunpack.c.l.b16 %v5110_v23  ;;  %v8771_v48 = vunpack.i.h.bf16 %v8769_v58  ;;  %v14953_v11 = vld [vmem:[#allocation42_spill] sm:$0xff] }
 0x41a   :  { %v4554_v28 = vsel %vm4470_vm11, %v8750_v4, %v8751_v2  ;;  %v5109_v14 = vpack.c.bf16 %v4917_v40, %v4917_v40  ;;  %v5118_v0 = vpack.c.bf16 %v4926_v3, %v4926_v3  ;;  %v5823_v59 = vsel %vm5552_vm14, %v5822_v27, %v5821_v57  ;;  %v8784_v3 = vpop.permute.xlu1 %8783 }
 0x41b   :  { %v4551_v61 = vsel %vm4470_vm11, %v8740_v38, %v8741_v51  ;;  %v5115_v55 = vpack.c.bf16 %v4923_v7, %v4923_v7  ;;  %v4925_v21 = vmax.f32 %v14952_v1, %v4554_v28  ;;  %v8770_v6 = vunpack.i.l.bf16 %v8769_v58  ;;  %v14954_v38 = vld [vmem:[#allocation45_spill] sm:$0xff] }
 0x41c   :  { %v13041_v18 = vsel %vm5549_vm13, %v5806_v53, %v5805_v56  ;;  %v5518_v2 = vunpack.c.l.b16 %v5116_v17  ;;  %v4920_v23 = vmax.f32 %v14953_v11, %v8741_v51  ;;  %v8746_v40 = vunpack.i.h.bf16 %v8744_v62  ;;  %v14956_v53 = vld [vmem:[#allocation49_spill] sm:$0xff]  ;;  %v8754_v17 = vpop.permute.xlu0 %8753 }
 0x41d   :  { %v5830_v4 = vrot.slane %v13029_v63, 1  ;;  %v4919_v10 = vmax.f32 %v14954_v38, %v4551_v61  ;;  %v4561_v27 = vsel %vm4470_vm11, %v8770_v6, %v8771_v48  ;;  %v8745_v7 = vunpack.i.l.bf16 %v8744_v62  ;;  %v14957_v61 = vld [vmem:[#allocation116_spill] sm:$0xff]  ;;  %v14958_v62 = vld [vmem:[#allocation114_spill] sm:$0xff] }
 0x41e   :  { %v13047_v57 = vunpack.c.l.b16 %v5109_v14  ;;  %v13049_v58 = vunpack.c.l.b16 %v5118_v0  ;;  %v4940_v28 = vmax.f32 %v14955_v39, %v8771_v48  ;;  %v4922_v56 = vmax.f32 %v14956_v53, %v8746_v40  ;;  %v14959_v0 = vld [vmem:[#allocation44_spill] sm:$0xff] }
 0x41f   :  { %v13053_v1 = vunpack.c.l.b16 %v5115_v55  ;;  %v5117_v51 = vpack.c.bf16 %v4925_v21, %v4925_v21  ;;  %v4552_v11 = vsel %vm4470_vm11, %v8745_v7, %v8746_v40  ;;  %v8786_v63 = vunpack.i.h.bf16 %v8784_v3 }
 0x420   :  { %v5112_v8 = vpack.c.bf16 %v4920_v23, %v4920_v23  ;;  %v4939_v38 = vmax.f32 %v14957_v61, %v4561_v27  ;;  %v5114_v6 = vpack.c.bf16 %v4922_v56, %v4922_v56  ;;  %v4921_v14 = vmax.f32 %v14958_v62, %v4552_v11  ;;  %v14960_v23 = vld [vmem:[#allocation48_spill] sm:$0xff]  ;;  %v8789_v61 = vpop.permute.xlu1 %8788 }
 0x421   :  { %v5111_v42 = vpack.c.bf16 %v4919_v10, %v4919_v10  ;;  %v4938_v20 = vmax.f32 %v14959_v0, %v8786_v63  ;;  %v8785_v26 = vunpack.i.l.bf16 %v8784_v3  ;;  %v8756_v48 = vunpack.i.h.bf16 %v8754_v17  ;;  %v14962_v0 = vld [vmem:[#allocation43_spill] sm:$0xff] }
 0x422   :  { %v5132_v39 = vpack.c.bf16 %v4940_v28, %v4940_v28  ;;  %v5516_v53 = vunpack.c.l.b16 %v5114_v6  ;;  %v5113_v50 = vpack.c.bf16 %v4921_v14, %v4921_v14  ;;  %v8755_v55 = vunpack.i.l.bf16 %v8754_v17 }
 0x423   :  { %v5848_v22 = vrot.slane %v5518_v2, 6  ;;  %v13059_v21 = vunpack.c.l.b16 %v5117_v51  ;;  %v4560_v40 = vsel %vm4470_vm11, %v8785_v26, %v8786_v63  ;;  %v4928_v7 = vmax.f32 %v14960_v23, %v8756_v48  ;;  %v14961_v26 = vld [vmem:[#allocation47_spill] sm:$0xff] }
 0x424   :  { %v5816_v27 = vrot.slane %v13047_v57, 1  ;;  %v5131_v56 = vpack.c.bf16 %v4939_v38, %v4939_v38  ;;  %v5846_v11 = vrot.slane %v5516_v53, 7  ;;  %v5130_v10 = vpack.c.bf16 %v4938_v20, %v4938_v20 }
 0x425   :  { %v5850_v3 = vrot.slane %v13049_v58, 5  ;;  %v5514_v62 = vunpack.c.l.b16 %v5112_v8  ;;  %v5515_v28 = vunpack.c.l.b16 %v5113_v50  ;;  %v4555_v6 = vsel %vm4470_vm11, %v8755_v55, %v8756_v48 }
 0x426   :  { %v5834_v2 = vrot.slane %v13053_v1, 6  ;;  %v5513_v17 = vunpack.c.l.b16 %v5111_v42  ;;  %v13067_v51 = vunpack.c.l.b16 %v5132_v39  ;;  %v4937_v63 = vmax.f32 %v14961_v26, %v4560_v40  ;;  %v14976_v1 = vld [vmem:[#allocation12_spill] sm:$0xff] }
 0x427   :  { %v5836_v14 = vrot.slane %v13059_v21, 5  ;;  %v5847_v57 = vsel %vm5546_vm12, %v5846_v11, %v5514_v62  ;;  %v5120_v38 = vpack.c.bf16 %v4928_v7, %v4928_v7  ;;  %v5825_v20 = vsel %vm5555_vm15, %v5824_v24, %v5823_v59  ;;  %v8759_v59 = vpop.permute.xlu0 %8758 }
 0x428   :  { %v13075_v8 = vunpack.c.l.b16 %v5131_v56  ;;  %v13077_v50 = vunpack.c.l.b16 %v5130_v10  ;;  %v4927_v48 = vmax.f32 %v14962_v0, %v4555_v6  ;;  %v5801_v42 = vsel %vm5561_vm5, %v5800_v47, %v13000_v30  ;;  %v8794_v30 = vpop.permute.xlu1 %8793 }
 0x429   :  { %v5832_v39 = vrot.slane %v5515_v28, 7  ;;  %v5803_v53 = vsel %vm5564_vm7, %v5802_v52, %v5801_v42  ;;  %v5827_v9 = vsel %vm5558_vm4, %v5826_v34, %v5825_v20  ;;  %v5781_v24 = vsel %vm5552_vm14, %v5780_v19, %v12950_v46 }
 0x42a   :  { %v5849_v55 = vsel %vm5549_vm13, %v5848_v22, %v5847_v57  ;;  %v5129_v60 = vpack.c.bf16 %v4937_v63, %v4937_v63  ;;  %v5829_v47 = vsel %vm5561_vm5, %v5828_v12, %v5827_v9  ;;  %v5783_v33 = vsel %vm5555_vm15, %v5782_v29, %v5781_v24  ;;  %v14971_v57 = vld [vmem:[#allocation118_spill] sm:$0xff]  ;;  %v14973_v24 = vld [vmem:[#allocation52_spill] sm:$0xff] }
 0x42b   :  { %v5522_v5 = vunpack.c.l.b16 %v5120_v38  ;;  %v5831_v52 = vsel %vm5564_vm7, %v5830_v4, %v5829_v47  ;;  %v14963_v37 = vrot.slane %v12986_v49, 3  ;;  %v14964_v46 = vrot.slane %v12957_v36, 5  ;;  %v8764_v26 = vpop.permute.xlu0 %8763  ;;  %v14972_v38 = vld [vmem:[#allocation50_spill] sm:$0xff]  ;;  %v14974_v47 = vld [vmem:[#allocation51_spill] sm:$0xff] }
 0x42c   :  { %v5119_v35 = vpack.c.bf16 %v4927_v48, %v4927_v48  ;;  %v5897_v34 = vpack.c.b16 %v5831_v52, %v5803_v53  ;;  %v14965_v12 = vrot.slane %v12964_v43, 2  ;;  %v14966_v29 = vrot.slane %v12972_v16, 4  ;;  %v8799_v0 = vpop.permute.xlu1 %8798 }
 0x42d   :  { %v5785_v19 = vsel %vm5558_vm4, %v14963_v37, %v5783_v33  ;;  %v5809_v22 = vsel %vm5552_vm14, %v14964_v46, %v13041_v18  ;;  %v14967_v4 = vrot.slane %v13002_v32, 1  ;;  %v14968_v23 = vrot.slane %v13016_v15, 3  ;;  %v14970_v32 = vld [vmem:[#allocation122_spill] sm:$0xff] }
 0x42e   :  { %v5787_v45 = vsel %vm5561_vm5, %v14965_v12, %v5785_v19  ;;  %v5811_v40 = vsel %vm5555_vm15, %v14966_v29, %v5809_v22  ;;  %v8791_v7 = vunpack.i.h.bf16 %v8789_v61  ;;  %v8790_v18 = vunpack.i.l.bf16 %v8789_v61  ;;  %7845 = vmatprep.mubr.msk.bf16.mxu1 %vm5959_vm8, %v5897_v34 }
 0x42f   :  { %v5789_v49 = vsel %vm5564_vm7, %v14967_v4, %v5787_v45  ;;  %v5813_v36 = vsel %vm5558_vm4, %v14968_v23, %v5811_v40  ;;  %v14969_v43 = vrot.slane %v12997_v31, 2  ;;  %v8761_v11 = vunpack.i.h.bf16 %v8759_v59  ;;  %v14977_v23 = vld [vmem:[#allocation134_spill] sm:$0xff] }
 0x430   :  { %v8760_v16 = vunpack.i.l.bf16 %v8759_v59  ;;  %v8796_v10 = vunpack.i.h.bf16 %v8794_v30  ;;  %v4942_v28 = vmax.f32 %v14970_v32, %v8791_v7  ;;  %v4562_v6 = vsel %vm4470_vm11, %v8790_v18, %v8791_v7  ;;  %v8804_v40 = vpop.permute.xlu1 %8803 }
 0x431   :  { %v5815_v56 = vsel %vm5561_vm5, %v14969_v43, %v5813_v36  ;;  %v8795_v15 = vunpack.i.l.bf16 %v8794_v30  ;;  %v4941_v61 = vmax.f32 %v14971_v57, %v4562_v6  ;;  %v4932_v20 = vmax.f32 %v14972_v38, %v8761_v11 }
 0x432   :  { %v5817_v62 = vsel %vm5564_vm7, %v5816_v27, %v5815_v56  ;;  %v4557_v31 = vsel %vm4470_vm11, %v8760_v16, %v8761_v11  ;;  %v5833_v48 = vsel %vm5546_vm12, %v5832_v39, %v5513_v17  ;;  %v13132_v42 = vunpack.c.l.b16 %v5129_v60 }
 0x433   :  { %v5896_v63 = vpack.c.b16 %v5817_v62, %v5789_v49  ;;  %v5134_v53 = vpack.c.bf16 %v4942_v28, %v4942_v28  ;;  %v4563_v27 = vsel %vm4470_vm11, %v8795_v15, %v8796_v10  ;;  %v5852_v9 = vrot.slane %v5522_v5, 4  ;;  %v14975_v5 = vld [vmem:[#allocation3_spill] sm:$0xff] }
 0x434   :  { %v4931_v59 = vmax.f32 %v14973_v24, %v4557_v31  ;;  %v4944_v33 = vmax.f32 %v14974_v47, %v8796_v10  ;;  %v8766_v30 = vunpack.i.h.bf16 %v8764_v26  ;;  %v13137_v52 = vunpack.c.l.b16 %v5119_v35 }
 0x435   :  { %6046 = vmatmul.mubr.bf16.gmra.mxu1 %v5896_v63  ;;  %v5851_v37 = vsel %vm5552_vm14, %v5850_v3, %v5849_v55  ;;  %v5133_v19 = vpack.c.bf16 %v4941_v61, %v4941_v61  ;;  %v8765_v17 = vunpack.i.l.bf16 %v8764_v26  ;;  %v5876_v39 = vrot.slane %v13067_v51, 6  ;;  %v8774_v55 = vpop.permute.xlu0 %8773 }
 0x436   :  { %v13143_v60 = vunpack.c.l.b16 %v5134_v53  ;;  %v5124_v46 = vpack.c.bf16 %v4932_v20, %v4932_v20  ;;  %v4943_v22 = vmax.f32 %v14975_v5, %v4563_v27  ;;  %v5862_v34 = vrot.slane %v13075_v8, 6  ;;  %v14978_v20 = vld [vmem:[#allocation138_spill] sm:$0xff]  ;;  %v14979_v53 = vld [vmem:[#allocation145_spill] sm:$0xff] }
 0x437   :  { %v13150_v35 = vsel %vm5549_vm13, %v5834_v2, %v5833_v48  ;;  %v5874_v58 = vrot.slane %v13077_v50, 7  ;;  %v4556_v3 = vsel %vm4470_vm11, %v8765_v17, %v8766_v30  ;;  %v5860_v12 = vrot.slane %v13132_v42, 7 }
 0x438   :  { %v13156_v51 = vsel %vm5555_vm15, %v5852_v9, %v5851_v37  ;;  %v5123_v45 = vpack.c.bf16 %v4931_v59, %v4931_v59  ;;  %v5136_v29 = vpack.c.bf16 %v4944_v33, %v4944_v33  ;;  %v5838_v4 = vrot.slane %v13137_v52, 4  ;;  %v14980_v33 = vld [vmem:[#allocation54_spill] sm:$0xff] }
 0x439   :  { %v13159_v49 = vunpack.c.l.b16 %v5133_v19  ;;  %v4930_v2 = vmax.f32 %v14976_v1, %v8766_v30  ;;  %v4929_v36 = vmax.f32 %v14977_v23, %v4556_v3  ;;  %v5878_v50 = vrot.slane %v13143_v60, 5  ;;  %v8779_v48 = vpop.permute.xlu0 %8778 }
 0x43a   :  { %v13164_v7 = vunpack.c.l.b16 %v5124_v46  ;;  %v5135_v18 = vpack.c.bf16 %v4943_v22, %v4943_v22  ;;  %v8776_v43 = vunpack.i.h.bf16 %v8774_v55  ;;  %v8801_v56 = vunpack.i.h.bf16 %v8799_v0  ;;  %v14981_v46 = vld [vmem:[#allocation73_spill] sm:$0xff] }
 0x43b   :  { %v8800_v11 = vunpack.i.l.bf16 %v8799_v0  ;;  %v8775_v16 = vunpack.i.l.bf16 %v8774_v55  ;;  %v8806_v10 = vunpack.i.h.bf16 %v8804_v40  ;;  %v13166_v62 = vunpack.c.l.b16 %v5123_v45 }
 0x43c   :  { %v5538_v32 = vunpack.c.l.b16 %v5136_v29  ;;  %v4936_v28 = vmax.f32 %v12385_v41, %v8776_v43  ;;  %v8805_v6 = vunpack.i.l.bf16 %v8804_v40  ;;  %v5864_v15 = vrot.slane %v13159_v49, 5  ;;  %v8809_v49 = vpop.permute.xlu1 %8808 }
 0x43d   :  { %v5122_v26 = vpack.c.bf16 %v4930_v2, %v4930_v2  ;;  %v5121_v63 = vpack.c.bf16 %v4929_v36, %v4929_v36  ;;  %v4559_v57 = vsel %vm4470_vm11, %v8775_v16, %v8776_v43  ;;  %v5856_v61 = vrot.slane %v13164_v7, 2 }
 0x43e   :  { %v5128_v38 = vpack.c.bf16 %v4936_v28, %v4936_v28  ;;  %v4935_v31 = vmax.f32 %v14978_v20, %v4559_v57  ;;  %v4946_v0 = vmax.f32 %v12399_v54, %v8806_v10  ;;  %v5537_v42 = vunpack.c.l.b16 %v5135_v18  ;;  %v14983_v57 = vld [vmem:[#allocation135_spill] sm:$0xff] }
 0x43f   :  { %v4948_v27 = vmax.f32 %v14979_v53, %v8801_v56  ;;  %v4565_v41 = vsel %vm4470_vm11, %v8800_v11, %v8801_v56  ;;  %v4564_v9 = vsel %vm4470_vm11, %v8805_v6, %v8806_v10  ;;  %v5524_v37 = vunpack.c.l.b16 %v5122_v26  ;;  %v14982_v11 = vld [vmem:[#allocation67_spill] sm:$0xff] }
 0x440   :  { %v5530_v24 = vunpack.c.l.b16 %v5128_v38  ;;  %v5127_v59 = vpack.c.bf16 %v4935_v31, %v4935_v31  ;;  %v5138_v47 = vpack.c.bf16 %v4946_v0, %v4946_v0  ;;  %v4945_v30 = vmax.f32 %v14980_v33, %v4564_v9  ;;  %v14984_v0 = vld [vmem:[#allocation10_spill] sm:$0xff] }
 0x441   :  { %v5523_v19 = vunpack.c.l.b16 %v5121_v63  ;;  %v8781_v17 = vunpack.i.h.bf16 %v8779_v48  ;;  %v8780_v60 = vunpack.i.l.bf16 %v8779_v48  ;;  %v4947_v5 = vmax.f32 %v14981_v46, %v4565_v41 }
 0x442   :  { %v5875_v54 = vsel %vm5546_vm12, %v5874_v58, %v5530_v24  ;;  %v5529_v22 = vunpack.c.l.b16 %v5127_v59  ;;  %v5137_v3 = vpack.c.bf16 %v4945_v30, %v4945_v30  ;;  %v5140_v55 = vpack.c.bf16 %v4948_v27, %v4948_v27 }
 0x443   :  { %v5540_v45 = vunpack.c.l.b16 %v5138_v47  ;;  %v4934_v29 = vmax.f32 %v12430_v44, %v8781_v17  ;;  %v4558_v40 = vsel %vm4470_vm11, %v8780_v60, %v8781_v17  ;;  %v5880_v1 = vrot.slane %v5538_v32, 4 }
 0x444   :  { %v5877_v2 = vsel %vm5549_vm13, %v5876_v39, %v5875_v54  ;;  %v5861_v23 = vsel %vm5546_vm12, %v5860_v12, %v5529_v22  ;;  %v5539_v36 = vunpack.c.l.b16 %v5137_v3  ;;  %v5854_v18 = vrot.slane %v5524_v37, 3 }
 0x445   :  { %v5840_v43 = vrot.slane %v5523_v19, 3  ;;  %v5126_v56 = vpack.c.bf16 %v4934_v29, %v4934_v29  ;;  %v4933_v58 = vmax.f32 %v14982_v11, %v4558_v40  ;;  %v5139_v16 = vpack.c.bf16 %v4947_v5, %v4947_v5 }
 0x446   :  { %v5863_v10 = vsel %vm5549_vm13, %v5862_v34, %v5861_v23  ;;  %v8811_v44 = vunpack.i.h.bf16 %v8809_v49  ;;  %v8810_v28 = vunpack.i.l.bf16 %v8809_v49  ;;  %v5542_v6 = vunpack.c.l.b16 %v5140_v55 }
 0x447   :  { %v5879_v32 = vsel %vm5552_vm14, %v5878_v50, %v5877_v2  ;;  %v5882_v26 = vrot.slane %v5540_v45, 3  ;;  %v5125_v39 = vpack.c.bf16 %v4933_v58, %v4933_v58  ;;  %v5868_v63 = vrot.slane %v5539_v36, 3 }
 0x448   :  { %v5528_v12 = vunpack.c.l.b16 %v5126_v56  ;;  %v4950_v38 = vmax.f32 %v14983_v57, %v8811_v44  ;;  %v4566_v20 = vsel %vm4470_vm11, %v8810_v28, %v8811_v44  ;;  %v5837_v8 = vsel %vm5552_vm14, %v5836_v14, %v13150_v35 }
 0x449   :  { %v5527_v31 = vunpack.c.l.b16 %v5125_v39  ;;  %v4949_v48 = vmax.f32 %v14984_v0, %v4566_v20  ;;  %v5865_v34 = vsel %vm5552_vm14, %v5864_v15, %v5863_v10  ;;  %v5866_v53 = vrot.slane %v5537_v42, 4 }
 0x44a   :  { %v5541_v50 = vunpack.c.l.b16 %v5139_v16  ;;  %v5881_v27 = vsel %vm5555_vm15, %v5880_v1, %v5879_v32  ;;  %v5142_v41 = vpack.c.bf16 %v4950_v38, %v4950_v38  ;;  %v5855_v9 = vsel %vm5558_vm4, %v5854_v18, %v13156_v51 }
 0x44b   :  { %v5884_v24 = vrot.slane %v5542_v6, 2  ;;  %v5883_v59 = vsel %vm5558_vm4, %v5882_v26, %v5881_v27  ;;  %v5141_v47 = vpack.c.bf16 %v4949_v48, %v4949_v48  ;;  %v5858_v33 = vrot.slane %v5528_v12, 1  ;;  %v9011_v27 = vld [vmem:[%s13987_s4 + $0x30] sm:$0xff]  }
 0x44c   :  { %v5544_v30 = vunpack.c.l.b16 %v5142_v41  ;;  %v5839_v21 = vsel %vm5555_vm15, %v5838_v4, %v5837_v8  ;;  %v5867_v14 = vsel %vm5555_vm15, %v5866_v53, %v5865_v34  ;;  %v5844_v35 = vrot.slane %v5527_v31, 1  ;;  %v9008_v34 = vld [vmem:[%s13987_s4 + $0x78] sm:$0xff]   ;;  %v9012_v41 = vld [vmem:[%s13987_s4 + $0x68] sm:$0xff]  }
 0x44d   :  { %v5543_v15 = vunpack.c.l.b16 %v5141_v47  ;;  %v5841_v42 = vsel %vm5558_vm4, %v5840_v43, %v5839_v21  ;;  %v5869_v37 = vsel %vm5558_vm4, %v5868_v63, %v5867_v14  ;;  %v5842_v51 = vrot.slane %v13166_v62, 2  ;;  %v9009_v53 = vld [vmem:[%s13987_s4 + $0x38] sm:$0xff]   ;;  %7914 = vmatprep.subr.bf16.mxu1 %v9008_v34 }
 0x44e   :  { %v5870_v19 = vrot.slane %v5541_v50, 2  ;;  %v5886_v17 = vrot.slane %v5544_v30, 1  ;;  %v5857_v46 = vsel %vm5561_vm5, %v5856_v61, %v5855_v9  ;;  %v5885_v52 = vsel %vm5561_vm5, %v5884_v24, %v5883_v59  ;;  %v9010_v50 = vld [vmem:[%s13987_s4 + $0x70] sm:$0xff]   ;;  %7915 = vmatpush3.bf16.msra.mxu1 %v9009_v53  ;;  %v9013_v9 = vld [vmem:[%s13987_s4 + $0x28] sm:$0xff]   ;;  %v9014_v24 = vld [vmem:[%s13987_s4 + $0x60] sm:$0xff]  }
 0x44f   :  { %v5872_v60 = vrot.slane %v5543_v15, 1  ;;  %v5859_v4 = vsel %vm5564_vm7, %v5858_v33, %v5857_v46  ;;  %v5843_v54 = vsel %vm5561_vm5, %v5842_v51, %v5841_v42  ;;  %v6074_v7 = vcombine.high %v12961_v25, %v12961_v25  ;;  %7916 = vmatprep.subr.bf16.mxu1 %v9010_v50  ;;  %v9015_v59 = vld [vmem:[%s13987_s4 + $0x20] sm:$0xff]   ;;  %v9016_v47 = vld [vmem:[%s13987_s4 + $0x58] sm:$0xff]   ;;  %v9018_v30 = vld [vmem:[%s13987_s4 + $0x50] sm:$0xff]  }
 0x450   :  { %v5887_v5 = vsel %vm5564_vm7, %v5886_v17, %v5885_v52  ;;  %v5871_v22 = vsel %vm5561_vm5, %v5870_v19, %v5869_v37  ;;  %v5845_v62 = vsel %vm5564_vm7, %v5844_v35, %v5843_v54  ;;  %v6075_v29 = vcombine.high %v12978_v13, %v12978_v13  ;;  %v9017_v33 = vld [vmem:[%s13987_s4 + $0x18] sm:$0xff]   ;;  %v9019_v35 = vld [vmem:[%s13987_s4 + $0x10] sm:$0xff]   ;;  %v9020_v19 = vld [vmem:[%s13987_s4 + $0x48] sm:$0xff]  }
 0x451   :  { %v5899_v3 = vpack.c.b16 %v5887_v5, %v5859_v4  ;;  %v5873_v55 = vsel %vm5564_vm7, %v5872_v60, %v5871_v22  ;;  %v13222_v61 = vcombine.low %v12961_v25, %v6074_v7  ;;  %v6103_v36 = vrot.slane %v12978_v13, 1  ;;  %v9021_v22 = vld [vmem:[%s13987_s4 + $0x8] sm:$0xff]  }
 0x452   :  { %v5898_v45 = vpack.c.b16 %v5873_v55, %v5845_v62  ;;  %v6151_v18 = vrot.slane %v12978_v13, 2  ;;  %v6246_v11 = vcombine.low %v6074_v7, %v12978_v13  ;;  %v6199_v26 = vrot.slane %v12978_v13, 3  ;;  %7917 = vmatpush3.bf16.msra.mxu1 %v9011_v27  ;;  %v9022_v7 = vld [vmem:[%s13987_s4 + $0x40] sm:$0xff]  }
 0x453   :  { %7846 = vmatprep.mubr.msk.bf16.mxu1 %vm5959_vm8, %v5899_v3  ;;  %v6102_v2 = vrot.slane %v13222_v61, 1  ;;  %v6150_v23 = vrot.slane %v13222_v61, 2  ;;  %v6198_v32 = vrot.slane %v13222_v61, 3  ;;  %7918 = vmatprep.subr.bf16.mxu1 %v9012_v41  ;;  %vm6296_vm11 = vcmask 719872  }
 0x454   :  { %6054 = vmatmul.mubr.bf16.gmra.mxu1 %v5898_v45  ;;  %vm6843_vm8 = vcmask 779264  }
 0x455   :  { %v6152_v12 = vsel %vm235_vm2, %v6150_v23, %v6151_v18  ;;  %v6104_v38 = vsel %vm106_vm0, %v6102_v2, %v6103_v36  ;;  %v6200_v13 = vsel %vm364_vm1, %v6198_v32, %v6199_v26 }
 0x456   :  { %7919 = vmatpush3.bf16.msra.mxu1 %v9013_v9 }
 0x457   :  { %7920 = vmatprep.subr.bf16.mxu1 %v9014_v24 }
 0x45a   :  { %7921 = vmatpush3.bf16.msra.mxu1 %v9015_v59 }
 0x45b   :  { %7922 = vmatprep.subr.bf16.mxu1 %v9016_v47 }
 0x45d   :  { %v6023_v40 = vpop.f32.mrf.mxu1 }
 0x45e   :  { %v6076_v49 = vcombine.high %v6023_v40, %v6023_v40  ;;  %v13226_v1 = vcombine.low %v6075_v29, %v6023_v40  ;;  %7923 = vmatpush3.bf16.msra.mxu1 %v9017_v33 }
 0x45f   :  { %v6025_v43 = vpop.f32.mrf.mxu1  ;;  %7924 = vmatprep.subr.bf16.mxu1 %v9018_v30 }
 0x460   :  { %v6105_v56 = vrot.slane %v13226_v1, 1  ;;  %v6153_v25 = vrot.slane %v13226_v1, 2  ;;  %v6247_v58 = vcombine.low %v6023_v40, %v6076_v49  ;;  %v6201_v16 = vrot.slane %v13226_v1, 3 }
 0x461   :  { %v6106_v10 = vrot.slane %v6076_v49, 1  ;;  %v6154_v44 = vrot.slane %v6076_v49, 2  ;;  %v6202_v28 = vrot.slane %v6076_v49, 3  ;;  %v6026_v6 = vpop.f32.mrf.mxu1 }
 0x462   :  { %v13238_v39 = vpack.i.bf16 %v6247_v58, %v6246_v11  ;;  %v6077_v21 = vcombine.high %v6026_v6, %v6026_v6  ;;  %7925 = vmatpush3.bf16.msra.mxu1 %v9019_v35  ;;  %v9023_v11 = vld [vmem:[%s13987_s4] sm:$0xff]  }
 0x463   :  { %v6028_v63 = vpop.f32.mrf.mxu1  ;;  %v6155_v57 = vsel %vm235_vm2, %v6153_v25, %v6154_v44  ;;  %v6107_v20 = vsel %vm106_vm0, %v6105_v56, %v6106_v10  ;;  %v6203_v48 = vsel %vm364_vm1, %v6201_v16, %v6202_v28  ;;  %7926 = vmatprep.subr.bf16.mxu1 %v9020_v19 }
 0x464   :  { %v8817_v31 = vpack.i.bf16 %v6155_v57, %v6152_v12  ;;  %v8812_v0 = vpack.i.bf16 %v6107_v20, %v6104_v38  ;;  %v8822_v8 = vpack.i.bf16 %v6203_v48, %v6200_v13  ;;  %v13285_v15 = vcombine.low %v6026_v6, %v6077_v21 }
 0x466   :  { %8818 = vrot.lane.b32.xlu1 %v8817_v31, %s9071_s3  ;;  %8813 = vrot.lane.b32.xlu0 %v8812_v0, %s9072_s15  ;;  %v6108_v52 = vrot.slane %v13285_v15, 1  ;;  %v6156_v3 = vrot.slane %v13285_v15, 2  ;;  %v6204_v10 = vrot.slane %v13285_v15, 3 }
 0x467   :  { %7927 = vmatpush3.bf16.msra.mxu1 %v9021_v22 }
 0x468   :  { %7928 = vmatprep.subr.bf16.mxu1 %v9022_v7 }
 0x46a   :  { %8823 = vrot.lane.b32.xlu0 %v8822_v8, %s9073_s2 }
 0x46b   :  { %7929 = vmatpush3.bf16.msra.mxu1 %v9023_v11 }
 0x490   :  { %v6031_v14 = vpop.f32.mrf.mxu1 }
 0x491   :  { %v6248_v37 = vcombine.low %v6077_v21, %v6031_v14  ;;  %v6078_v51 = vcombine.high %v6031_v14, %v6031_v14  ;;  %v6109_v4 = vrot.slane %v6031_v14, 1  ;;  %v6157_v5 = vrot.slane %v6031_v14, 2 }
 0x492   :  { %v6033_v42 = vpop.f32.mrf.mxu1  ;;  %v6205_v23 = vrot.slane %v6031_v14, 3 }
 0x493   :  { %v6158_v18 = vsel %vm235_vm2, %v6156_v3, %v6157_v5  ;;  %v6110_v56 = vsel %vm106_vm0, %v6108_v52, %v6109_v4 }
 0x494   :  { %v6034_v17 = vpop.f32.mrf.mxu1  ;;  %v6206_v28 = vsel %vm364_vm1, %v6204_v10, %v6205_v23 }
 0x495   :  { %v6079_v60 = vcombine.high %v6034_v17, %v6034_v17  ;;  %v13290_v46 = vcombine.low %v6078_v51, %v6034_v17 }
 0x496   :  { %v6036_v54 = vpop.f32.mrf.mxu1 }
 0x497   :  { %v6111_v62 = vrot.slane %v13290_v46, 1  ;;  %v6159_v55 = vrot.slane %v13290_v46, 2  ;;  %v6249_v45 = vcombine.low %v6034_v17, %v6079_v60  ;;  %v6207_v29 = vrot.slane %v13290_v46, 3 }
 0x498   :  { %v6112_v40 = vrot.slane %v6079_v60, 1  ;;  %v6160_v49 = vrot.slane %v6079_v60, 2  ;;  %v6208_v2 = vrot.slane %v6079_v60, 3 }
 0x499   :  { %v13303_v36 = vpack.i.bf16 %v6249_v45, %v6248_v37 }
 0x49a   :  { %v6161_v43 = vsel %vm235_vm2, %v6159_v55, %v6160_v49  ;;  %v6113_v25 = vsel %vm106_vm0, %v6111_v62, %v6112_v40  ;;  %v6209_v44 = vsel %vm364_vm1, %v6207_v29, %v6208_v2  ;;  %v9024_v49 = vld [vmem:[%s13987_s4 + $0xb0] ss:$0 sps:$4 sm:$0xff]  }
 0x49b   :  { %v8832_v58 = vpack.i.bf16 %v6161_v43, %v6158_v18  ;;  %v8827_v16 = vpack.i.bf16 %v6113_v25, %v6110_v56  ;;  %v8837_v6 = vpack.i.bf16 %v6209_v44, %v6206_v28  ;;  %v9025_v18 = vld [vmem:[%s13987_s4 + $0xa8] sm:$0xff]   ;;  %8075 = vmatprep.subr.msk.bf16.mxu1 %vm493_vm3, %v9024_v49  ;;  %v6527_v56 = vsel %vm493_vm3, %v9024_v49, 0 }
 0x49d   :  { %8833 = vrot.lane.b32.xlu0 %v8832_v58, %s9071_s3  ;;  %8828 = vrot.lane.b32.xlu1 %v8827_v16, %s9072_s15  ;;  %v9026_v58 = vld [vmem:[%s13987_s4 + $0xa0] sm:$0xff]   ;;  %v9027_v16 = vld [vmem:[%s13987_s4 + $0x98] sm:$0xff]  }
 0x4a1   :  { %8838 = vrot.lane.b32.xlu1 %v8837_v6, %s9073_s2 }
 0x4c3   :  { %v6039_v32 = vpop.f32.mrf.mxu1 }
 0x4c5   :  { %v6041_v26 = vpop.f32.mrf.mxu1 }
 0x4c7   :  { %v13318_v63 = vpop.f32.mrf.mxu1 }
 0x4c8   :  { %v6115_v37 = vrot.slane %v13318_v63, 1  ;;  %v6163_v51 = vrot.slane %v13318_v63, 2  ;;  %v6211_v62 = vrot.slane %v13318_v63, 3 }
 0x4c9   :  { %v6044_v12 = vpop.f32.mrf.mxu1 }
 0x4d8   :  { %v8819_v57 = vpop.permute.xlu1 %8818  ;;  %v8814_v38 = vpop.permute.xlu0 %8813 }
 0x4d9   :  { %v8821_v20 = vunpack.i.h.bf16 %v8819_v57  ;;  %v8820_v31 = vunpack.i.l.bf16 %v8819_v57  ;;  %v8816_v0 = vunpack.i.h.bf16 %v8814_v38  ;;  %v8815_v48 = vunpack.i.l.bf16 %v8814_v38 }
 0x4db   :  { %v6280_v53 = vsel %vm6278_vm9, %v13226_v1, %v8816_v0  ;;  %v6289_v50 = vsel %vm6287_vm10, %v8816_v0, %v8821_v20  ;;  %v6279_v27 = vsel %vm6278_vm9, %v13222_v61, %v8815_v48  ;;  %v6288_v41 = vsel %vm6287_vm10, %v8815_v48, %v8820_v31 }
 0x4dc   :  { %v13320_v13 = vpop.permute.xlu0 %8823  ;;  %v6314_v47 = vpack.c.bf16 %v6280_v53, %v6279_v27  ;;  %v13336_v1 = vcombine.high %v6039_v32, %v6039_v32  ;;  %v6081_v61 = vcombine.high %v13318_v63, %v13318_v63 }
 0x4dd   :  { %v8826_v8 = vunpack.i.h.bf16 %v13320_v13  ;;  %v8825_v34 = vunpack.i.l.bf16 %v13320_v13 }
 0x4de   :  { %v13339_v33 = vcombine.low %v6039_v32, %v13336_v1 }
 0x4df   :  { %v6297_v9 = vsel %vm6296_vm11, %v6288_v41, %v8825_v34  ;;  %v6298_v24 = vsel %vm6296_vm11, %v6289_v50, %v8826_v8 }
 0x4e0   :  { %v6315_v59 = vpack.c.bf16 %v6298_v24, %v6297_v9  ;;  %v6114_v35 = vrot.slane %v13339_v33, 1  ;;  %v6162_v42 = vrot.slane %v13339_v33, 2  ;;  %v6210_v3 = vrot.slane %v13339_v33, 3 }
 0x4e2   :  { %6561 = vmatprep.mubr.bf16.mxu1 %v6315_v59  ;;  %v6164_v45 = vsel %vm235_vm2, %v6162_v42, %v6163_v51  ;;  %v6116_v29 = vsel %vm106_vm0, %v6114_v35, %v6115_v37  ;;  %v6212_v25 = vsel %vm364_vm1, %v6210_v3, %v6211_v62 }
 0x4e3   :  { %6562 = vmatmul.mubr.bf16.vlgmr.msra.gmra.mxu1 %v6314_v47 }
 0x4e4   :  { %8008 = vmatpush3.bf16.msra.mxu1 %v6527_v56 }
 0x4e5   :  { %8009 = vmatprep.subr.bf16.mxu1 %v9025_v18 }
 0x4e8   :  { %8010 = vmatpush3.bf16.msra.mxu1 %v9025_v18 }
 0x4e9   :  { %8011 = vmatprep.subr.bf16.mxu1 %v9026_v58 }
 0x4ec   :  { %8012 = vmatpush3.bf16.msra.mxu1 %v9026_v58  ;;  %v6250_v58 = vcombine.low %v13336_v1, %v13318_v63 }
 0x4ed   :  { %8013 = vmatprep.subr.bf16.mxu1 %v9027_v16 }
 0x4f0   :  { %8014 = vmatpush3.bf16.msra.mxu1 %v9027_v16 }
 0x4f5   :  { %v13343_v30 = vpop.f32.mrf.mxu1 }
 0x4f6   :  { %v13347_v21 = vcombine.high %v13343_v30, %v13343_v30  ;;  %v13350_v14 = vcombine.low %v6081_v61, %v13343_v30 }
 0x4f7   :  { %v6049_v19 = vpop.f32.mrf.mxu1 }
 0x4f8   :  { %v6117_v17 = vrot.slane %v13350_v14, 1  ;;  %v6165_v60 = vrot.slane %v13350_v14, 2  ;;  %v6213_v52 = vrot.slane %v13350_v14, 3  ;;  %v6118_v4 = vrot.slane %v13347_v21, 1 }
 0x4f9   :  { %v6166_v5 = vrot.slane %v13347_v21, 2  ;;  %v6214_v54 = vrot.slane %v13347_v21, 3  ;;  %v6050_v22 = vpop.f32.mrf.mxu1  ;;  %v6251_v56 = vcombine.low %v13343_v30, %v13347_v21 }
 0x4fa   :  { %v6119_v40 = vsel %vm106_vm0, %v6117_v17, %v6118_v4  ;;  %v13389_v57 = vcombine.high %v6050_v22, %v6050_v22  ;;  %v9028_v4 = vld [vmem:[%s13987_s4 + $0x90] sm:$0xff]  }
 0x4fb   :  { %v6052_v55 = vpop.f32.mrf.mxu1  ;;  %v6167_v7 = vsel %vm235_vm2, %v6165_v60, %v6166_v5  ;;  %v8842_v23 = vpack.i.bf16 %v6119_v40, %v6116_v29  ;;  %v6215_v43 = vsel %vm364_vm1, %v6213_v52, %v6214_v54  ;;  %8015 = vmatprep.subr.bf16.mxu1 %v9028_v4  ;;  %v8882_v16 = vpack.i.bf16 %v6251_v56, %v6250_v58 }
 0x4fc   :  { %v8847_v2 = vpack.i.bf16 %v6167_v7, %v6164_v45  ;;  %v8852_v11 = vpack.i.bf16 %v6215_v43, %v6212_v25  ;;  %v13406_v24 = vcombine.low %v6050_v22, %v13389_v57  ;;  %8016 = vmatpush3.bf16.msra.mxu1 %v9028_v4 }
 0x4fd   :  { %8843 = vrot.lane.b32.xlu0 %v8842_v23, %s9072_s15 }
 0x4fe   :  { %8848 = vrot.lane.b32.xlu1 %v8847_v2, %s9071_s3  ;;  %v6120_v19 = vrot.slane %v13406_v24, 1  ;;  %v6168_v17 = vrot.slane %v13406_v24, 2  ;;  %v9029_v2 = vld [vmem:[%s13987_s4 + $0x88] sm:$0xff]   ;;  %v6216_v23 = vrot.slane %v13406_v24, 3 }
 0x4ff   :  { %8017 = vmatprep.subr.bf16.mxu1 %v9029_v2 }
 0x500   :  { %8018 = vmatpush3.bf16.msra.mxu1 %v9029_v2 }
 0x501   :  { %8853 = vrot.lane.b32.xlu0 %v8852_v11, %s9073_s2  ;;  %v9030_v11 = vld [vmem:[%s13987_s4 + $0x80] sm:$0xff]  }
 0x502   :  { %8019 = vmatprep.subr.bf16.mxu1 %v9030_v11 }
 0x504   :  { %8020 = vmatpush3.bf16.msra.mxu1 %v9030_v11 }
 0x50f   :  { %v8834_v10 = vpop.permute.xlu0 %8833  ;;  %v8829_v44 = vpop.permute.xlu1 %8828 }
 0x510   :  { %v8836_v28 = vunpack.i.h.bf16 %v8834_v10  ;;  %v8835_v6 = vunpack.i.l.bf16 %v8834_v10  ;;  %v8831_v32 = vunpack.i.h.bf16 %v8829_v44  ;;  %v8830_v26 = vunpack.i.l.bf16 %v8829_v44 }
 0x512   :  { %v6291_v0 = vsel %vm6287_vm10, %v8831_v32, %v8836_v28  ;;  %v6290_v48 = vsel %vm6287_vm10, %v8830_v26, %v8835_v6  ;;  %v6281_v53 = vsel %vm6278_vm9, %v13285_v15, %v8830_v26  ;;  %v6282_v50 = vsel %vm6278_vm9, %v13290_v46, %v8831_v32 }
 0x513   :  { %v13387_v12 = vpop.permute.xlu1 %8838  ;;  %v6317_v35 = vpack.c.bf16 %v6282_v50, %v6281_v53 }
 0x514   :  { %v8841_v38 = vunpack.i.h.bf16 %v13387_v12  ;;  %v8840_v20 = vunpack.i.l.bf16 %v13387_v12  ;;  %v6055_v31 = vpop.f32.mrf.mxu1 }
 0x515   :  { %v6084_v59 = vcombine.high %v6055_v31, %v6055_v31  ;;  %v6121_v46 = vrot.slane %v6055_v31, 1  ;;  %v6169_v37 = vrot.slane %v6055_v31, 2  ;;  %v6217_v62 = vrot.slane %v6055_v31, 3 }
 0x516   :  { %v6057_v27 = vpop.f32.mrf.mxu1  ;;  %v6299_v41 = vsel %vm6296_vm11, %v6290_v48, %v8840_v20  ;;  %v6300_v9 = vsel %vm6296_vm11, %v6291_v0, %v8841_v38  ;;  %v6252_v30 = vcombine.low %v13389_v57, %v6055_v31 }
 0x517   :  { %v6318_v47 = vpack.c.bf16 %v6300_v9, %v6299_v41  ;;  %v6170_v55 = vsel %vm235_vm2, %v6168_v17, %v6169_v37  ;;  %v6122_v7 = vsel %vm106_vm0, %v6120_v19, %v6121_v46  ;;  %v6218_v43 = vsel %vm364_vm1, %v6216_v23, %v6217_v62 }
 0x518   :  { %v6058_v61 = vpop.f32.mrf.mxu1 }
 0x519   :  { %v6085_v15 = vcombine.high %v6058_v61, %v6058_v61  ;;  %v13408_v42 = vcombine.low %v6084_v59, %v6058_v61  ;;  %6569 = vmatprep.mubr.bf16.mxu1 %v6318_v47 }
 0x51a   :  { %v6060_v51 = vpop.f32.mrf.mxu1  ;;  %6570 = vmatmul.mubr.bf16.gmra.mxu1 %v6317_v35 }
 0x51b   :  { %v6123_v60 = vrot.slane %v13408_v42, 1  ;;  %v6171_v52 = vrot.slane %v13408_v42, 2  ;;  %v6219_v5 = vrot.slane %v13408_v42, 3  ;;  %v6124_v54 = vrot.slane %v6085_v15, 1 }
 0x51c   :  { %v6172_v22 = vrot.slane %v6085_v15, 2  ;;  %v6220_v3 = vrot.slane %v6085_v15, 3  ;;  %v6253_v10 = vcombine.low %v6058_v61, %v6085_v15 }
 0x51d   :  { %v6125_v29 = vsel %vm106_vm0, %v6123_v60, %v6124_v54  ;;  %vm6305_vm0 = vcmask 261120  }
 0x51e   :  { %v6173_v45 = vsel %vm235_vm2, %v6171_v52, %v6172_v22  ;;  %v8857_v49 = vpack.i.bf16 %v6125_v29, %v6122_v7  ;;  %v6221_v18 = vsel %vm364_vm1, %v6219_v5, %v6220_v3  ;;  %v8887_v21 = vpack.i.bf16 %v6253_v10, %v6252_v30 }
 0x51f   :  { %v8862_v40 = vpack.i.bf16 %v6173_v45, %v6170_v55  ;;  %v8867_v25 = vpack.i.bf16 %v6221_v18, %v6218_v43  ;;  %vm6513_vm1 = vcmask 850944  }
 0x520   :  { %8858 = vrot.lane.b32.xlu1 %v8857_v49, %s9072_s15 }
 0x521   :  { %8863 = vrot.lane.b32.xlu0 %v8862_v40, %s9071_s3 }
 0x524   :  { %8868 = vrot.lane.b32.xlu1 %v8867_v25, %s9073_s2 }
 0x525   :  { %8873 = vrot.lane.b32.xlu0 %v13238_v39, %s9074_s29 }
 0x528   :  { %8878 = vrot.lane.b32.xlu1 %v13303_v36, %s9074_s29 }
 0x529   :  { %8883 = vrot.lane.b32.xlu0 %v8882_v16, %s9074_s29 }
 0x52c   :  { %8888 = vrot.lane.b32.xlu1 %v8887_v21, %s9074_s29  ;;  %s9079_s29 = smov 124  }
 0x56f   :  { %v8844_v28 = vpop.permute.xlu0 %8843 }
 0x570   :  { %v8849_v44 = vpop.permute.xlu1 %8848  ;;  %v8846_v1 = vunpack.i.h.bf16 %v8844_v28  ;;  %v8845_v32 = vunpack.i.l.bf16 %v8844_v28 }
 0x571   :  { %v8851_v6 = vunpack.i.h.bf16 %v8849_v44  ;;  %v8850_v63 = vunpack.i.l.bf16 %v8849_v44 }
 0x572   :  { %v6283_v57 = vsel %vm6278_vm9, %v13339_v33, %v8845_v32  ;;  %v6284_v36 = vsel %vm6278_vm9, %v13350_v14, %v8846_v1 }
 0x573   :  { %v8854_v39 = vpop.permute.xlu0 %8853  ;;  %v6293_v48 = vsel %vm6287_vm10, %v8846_v1, %v8851_v6  ;;  %v6292_v53 = vsel %vm6287_vm10, %v8845_v32, %v8850_v63  ;;  %v6320_v41 = vpack.c.bf16 %v6284_v36, %v6283_v57  ;;  %v13480_v36 = vld [vmem:[%s13988_s5] ss:$0 sm:$0xff]  ;;  %s9075_s5 = smov 116  }
 0x574   :  { %v8856_v26 = vunpack.i.h.bf16 %v8854_v39  ;;  %v8855_v0 = vunpack.i.l.bf16 %v8854_v39 }
 0x576   :  { %v6301_v31 = vsel %vm6296_vm11, %v6292_v53, %v8855_v0  ;;  %v6302_v50 = vsel %vm6296_vm11, %v6293_v48, %v8856_v26 }
 0x577   :  { %v6321_v27 = vpack.c.bf16 %v6302_v50, %v6301_v31 }
 0x579   :  { %6577 = vmatprep.mubr.bf16.mxu1 %v6321_v27 }
 0x57a   :  { %6578 = vmatmul.mubr.bf16.gmra.mxu1 %v6320_v41 }
 0x592   :  { %v8859_v59 = vpop.permute.xlu1 %8858 }
 0x593   :  { %v8864_v9 = vpop.permute.xlu0 %8863  ;;  %v8861_v35 = vunpack.i.h.bf16 %v8859_v59  ;;  %v8860_v15 = vunpack.i.l.bf16 %v8859_v59 }
 0x594   :  { %v8866_v47 = vunpack.i.h.bf16 %v8864_v9  ;;  %v8865_v61 = vunpack.i.l.bf16 %v8864_v9 }
 0x595   :  { %v6285_v52 = vsel %vm6278_vm9, %v13406_v24, %v8860_v15  ;;  %v6286_v4 = vsel %vm6278_vm9, %v13408_v42, %v8861_v35  ;;  %vm9078_vm9 = vmmov 0  }
 0x596   :  { %v8869_v33 = vpop.permute.xlu1 %8868  ;;  %v6295_v17 = vsel %vm6287_vm10, %v8861_v35, %v8866_v47  ;;  %v6294_v60 = vsel %vm6287_vm10, %v8860_v15, %v8865_v61  ;;  %v6323_v7 = vpack.c.bf16 %v6286_v4, %v6285_v52  ;;  %v14985_v15 = vld [vmem:[#allocation2_spill] sm:$0xff] }
 0x597   :  { %v8874_v46 = vpop.permute.xlu0 %8873  ;;  %v8871_v14 = vunpack.i.h.bf16 %v8869_v33  ;;  %v8870_v19 = vunpack.i.l.bf16 %v8869_v33 }
 0x598   :  { %v8876_v37 = vunpack.i.h.bf16 %v8874_v46  ;;  %v8875_v51 = vunpack.i.l.bf16 %v8874_v46 }
 0x599   :  { %v6303_v22 = vsel %vm6296_vm11, %v6294_v60, %v8870_v19  ;;  %v6304_v3 = vsel %vm6296_vm11, %v6295_v17, %v8871_v14 }
 0x59a   :  { %v6307_v5 = vsel %vm6305_vm0, %v8826_v8, %v8876_v37  ;;  %v6306_v54 = vsel %vm6305_vm0, %v8825_v34, %v8875_v51  ;;  %v8879_v55 = vpop.permute.xlu1 %8878  ;;  %v6324_v45 = vpack.c.bf16 %v6304_v3, %v6303_v22 }
 0x59b   :  { %v8884_v62 = vpop.permute.xlu0 %8883  ;;  %v6316_v24 = vpack.c.bf16 %v6307_v5, %v6306_v54  ;;  %v8881_v29 = vunpack.i.h.bf16 %v8879_v55  ;;  %v8880_v42 = vunpack.i.l.bf16 %v8879_v55 }
 0x59c   :  { %6585 = vmatprep.mubr.bf16.mxu1 %v6324_v45  ;;  %v8886_v40 = vunpack.i.h.bf16 %v8884_v62  ;;  %v8885_v49 = vunpack.i.l.bf16 %v8884_v62 }
 0x59d   :  { %6586 = vmatmul.mubr.bf16.gmra.mxu1 %v6323_v7  ;;  %v6309_v13 = vsel %vm6305_vm0, %v8841_v38, %v8881_v29  ;;  %v6308_v8 = vsel %vm6305_vm0, %v8840_v20, %v8880_v42 }
 0x59e   :  { %8021 = vmatprep.mubr.msk.bf16.mxu1 %vm6513_vm1, %v6316_v24  ;;  %v6311_v34 = vsel %vm6305_vm0, %v8856_v26, %v8886_v40  ;;  %v6310_v2 = vsel %vm6305_vm0, %v8855_v0, %v8885_v49  ;;  %v8889_v23 = vpop.permute.xlu1 %8888  ;;  %v6319_v18 = vpack.c.bf16 %v6309_v13, %v6308_v8 }
 0x59f   :  { %v6322_v43 = vpack.c.bf16 %v6311_v34, %v6310_v2  ;;  %v8891_v56 = vunpack.i.h.bf16 %v8889_v23  ;;  %v8890_v25 = vunpack.i.l.bf16 %v8889_v23 }
 0x5a1   :  { %v6312_v11 = vsel %vm6305_vm0, %v8870_v19, %v8890_v25  ;;  %v6313_v38 = vsel %vm6305_vm0, %v8871_v14, %v8891_v56 }
 0x5a2   :  { %v6325_v12 = vpack.c.bf16 %v6313_v38, %v6312_v11 }
 0x5a3   :  { %v7930_v20 = vpop.f32.mrf.mxu1 }
 0x5a5   :  { %8022 = vmatmul.mubr.msk.bf16.vlgmr.msra.gmra.mxu1 %vm6513_vm1, %v6319_v18  ;;  %v7931_v58 = vpop.f32.mrf.mxu1 }
 0x5a6   :  { %8025 = vmatprep.mubr.msk.bf16.mxu1 %vm6513_vm1, %v6322_v43  ;;  %v7932_v53 = vadd.f32 %v7931_v58, %v7930_v20 }
 0x5a7   :  { %v7933_v16 = vpop.f32.mrf.mxu1 }
 0x5a8   :  { %v6564_v41 = vadd.f32 %v7932_v53, %v13480_v36 }
 0x5a9   :  { %v7934_v10 = vpop.f32.mrf.mxu1 }
 0x5aa   :  { %v7935_v14 = vadd.f32 %v7934_v10, %v7933_v16 }
 0x5ac   :  { %v6567_v45 = vadd.f32 %v7935_v14, %v13480_v36 }
 0x5ad   :  { %8026 = vmatmul.mubr.msk.bf16.gmra.mxu1 %vm6513_vm1, %v6325_v12 }
 0x5da   :  { %v7936_v30 = vpop.f32.mrf.mxu1 }
 0x5dc   :  { %v7937_v21 = vpop.f32.mrf.mxu1 }
 0x5dd   :  { %v7938_v0 = vadd.f32 %v7937_v21, %v7936_v30 }
 0x5de   :  { %v7939_v44 = vpop.f32.mrf.mxu1 }
 0x5df   :  { %v6572_v31 = vadd.f32 %v7938_v0, %v13480_v36 }
 0x5e0   :  { %v7940_v28 = vpop.f32.mrf.mxu1 }
 0x5e1   :  { %v7941_v61 = vadd.f32 %v7940_v28, %v7939_v44 }
 0x5e3   :  { %v6575_v17 = vadd.f32 %v7941_v61, %v13480_v36 }
 0x63a   :  { %v7942_v6 = vpop.f32.mrf.mxu1 }
 0x63c   :  { %v7943_v63 = vpop.f32.mrf.mxu1 }
 0x63d   :  { %v7944_v3 = vadd.f32 %v7943_v63, %v7942_v6 }
 0x63e   :  { %v7945_v1 = vpop.f32.mrf.mxu1 }
 0x63f   :  { %v13496_v18 = vadd.f32 %v7944_v3, %v13480_v36 }
 0x640   :  { %v7946_v32 = vpop.f32.mrf.mxu1 }
 0x641   :  { %v7947_v62 = vadd.f32 %v7946_v32, %v7945_v1 }
 0x643   :  { %v13500_v11 = vadd.f32 %v7947_v62, %v13480_v36 }
 0x65d   :  { %v7948_v39 = vpop.f32.mrf.mxu1 }
 0x65f   :  { %v7949_v26 = vpop.f32.mrf.mxu1 }
 0x660   :  { %v7950_v43 = vadd.f32 %v7949_v26, %v7948_v39 }
 0x661   :  { %v7951_v48 = vpop.f32.mrf.mxu1 }
 0x663   :  { %v7952_v57 = vpop.f32.mrf.mxu1 }
 0x664   :  { %v7953_v16 = vadd.f32 %v7952_v57, %v7951_v48  ;;  %v6588_v48 = vadd.f32 %v7950_v43, %v13480_v36 }
 0x665   :  { %v8023_v50 = vpop.f32.mrf.mxu1 }
 0x666   :  { %v6637_v27 = vadd.f32 %v8023_v50, %v6572_v31 }
 0x667   :  { %v6628_v9 = vpop.f32.mrf.mxu1 }
 0x668   :  { %v6661_v59 = vmax.f32 %v6637_v27, 0.0  ;;  %v6629_v47 = vadd.f32 %v6628_v9, %v6564_v41 }
 0x669   :  { %v8024_v51 = vpop.f32.mrf.mxu1 }
 0x66a   :  { %v6709_v35 = vcombine.high %v6661_v59, %v6661_v59  ;;  %v6716_v46 = vrot.slane %v6661_v59, %v14985_v15  ;;  %v6659_v33 = vmax.f32 %v6629_v47, 0.0  ;;  %v6640_v5 = vadd.f32 %v8024_v51, %v6575_v17 }
 0x66b   :  { %v6631_v22 = vpop.f32.mrf.mxu1 }
 0x66c   :  { %v6675_v37 = vcombine.high %v6659_v33, %v6659_v33  ;;  %v6682_v19 = vrot.slane %v6659_v33, %v14985_v15  ;;  %v6723_v60 = vrot.slane %v6709_v35, %v14985_v15  ;;  %v6724_v52 = vcombine.high %v6716_v46, %v6716_v46 }
 0x66d   :  { %v6900_v4 = vsel %vm6843_vm8, %v6716_v46, -inf  ;;  %v6662_v40 = vmax.f32 %v6640_v5, 0.0  ;;  %v6632_v49 = vadd.f32 %v6631_v22, %v6567_v45  ;;  %v8027_v57 = vpop.f32.mrf.mxu1  ;;  %v6591_v35 = vadd.f32 %v7953_v16, %v13480_v36 }
 0x66e   :  { %v6689_v54 = vrot.slane %v6675_v37, %v14985_v15  ;;  %v6690_v55 = vcombine.high %v6682_v19, %v6682_v19  ;;  %v6725_v7 = vcombine.high %v6723_v60, %v6723_v60  ;;  %v6901_v24 = vrot.slane %v6900_v4, 4 }
 0x66f   :  { %v6907_v29 = vsel %vm6843_vm8, %v6724_v52, -inf  ;;  %v6914_v42 = vsel %vm6843_vm8, %v6723_v60, -inf  ;;  %v6726_v12 = vcombine.high %v6662_v40, %v6662_v40  ;;  %v6733_v20 = vrot.slane %v6662_v40, %v14985_v15  ;;  %v6644_v52 = vpop.f32.mrf.mxu1 }
 0x670   :  { %v6691_v13 = vcombine.high %v6689_v54, %v6689_v54  ;;  %v6858_v8 = vsel %vm6843_vm8, %v6689_v54, -inf  ;;  %v6908_v34 = vrot.slane %v6907_v29, 4  ;;  %v6915_v2 = vrot.slane %v6914_v42, 4 }
 0x671   :  { %v6851_v23 = vsel %vm6843_vm8, %v6690_v55, -inf  ;;  %v6902_v56 = vmax.f32 %v6900_v4, %v6901_v24  ;;  %v6921_v25 = vsel %vm6843_vm8, %v6725_v7, -inf  ;;  %v6859_v38 = vrot.slane %v6858_v8, 4 }
 0x672   :  { %v6660_v58 = vmax.f32 %v6632_v49, 0.0  ;;  %v6844_v10 = vsel %vm6843_vm8, %v6682_v19, -inf  ;;  %v6852_v30 = vrot.slane %v6851_v23, 4  ;;  %v6865_v21 = vsel %vm6843_vm8, %v6691_v13, -inf }
 0x673   :  { %v6909_v44 = vmax.f32 %v6907_v29, %v6908_v34  ;;  %v6916_v28 = vmax.f32 %v6914_v42, %v6915_v2  ;;  %v6740_v6 = vrot.slane %v6726_v12, %v14985_v15  ;;  %v6741_v63 = vcombine.high %v6733_v20, %v6733_v20 }
 0x674   :  { %v6903_v1 = vrot.slane %v6902_v56, 2  ;;  %v6922_v32 = vrot.slane %v6921_v25, 4  ;;  %v6928_v39 = vsel %vm6843_vm8, %v6733_v20, -inf  ;;  %v6692_v26 = vcombine.high %v6660_v58, %v6660_v58 }
 0x675   :  { %v6845_v0 = vrot.slane %v6844_v10, 4  ;;  %v6860_v53 = vmax.f32 %v6858_v8, %v6859_v38  ;;  %v6866_v31 = vrot.slane %v6865_v21, 4  ;;  %v6853_v50 = vmax.f32 %v6851_v23, %v6852_v30  ;;  %v8028_v8 = vpop.f32.mrf.mxu1 }
 0x676   :  { %v6935_v27 = vsel %vm6843_vm8, %v6741_v63, -inf  ;;  %v6942_v41 = vsel %vm6843_vm8, %v6740_v6, -inf  ;;  %v6699_v9 = vrot.slane %v6660_v58, %v14985_v15  ;;  %v6910_v59 = vrot.slane %v6909_v44, 2 }
 0x677   :  { %v6917_v47 = vrot.slane %v6916_v28, 2  ;;  %v6929_v61 = vrot.slane %v6928_v39, 4  ;;  %v13512_v46 = vmax.f32 %v6902_v56, %v6903_v1  ;;  %v13514_v33 = vmax.f32 %v6921_v25, %v6922_v32 }
 0x678   :  { %v6742_v37 = vcombine.high %v6740_v6, %v6740_v6  ;;  %v6706_v51 = vrot.slane %v6692_v26, %v14985_v15  ;;  %v13517_v14 = vmax.f32 %v6844_v10, %v6845_v0  ;;  %v6861_v19 = vrot.slane %v6860_v53, 2  ;;  %v6647_v6 = vpop.f32.mrf.mxu1 }
 0x679   :  { %v6936_v17 = vrot.slane %v6935_v27, 4  ;;  %v6943_v60 = vrot.slane %v6942_v41, 4  ;;  %v6854_v4 = vrot.slane %v6853_v50, 2  ;;  %v13519_v5 = vmax.f32 %v6865_v21, %v6866_v31 }
 0x67a   :  { %v6872_v54 = vsel %vm6843_vm8, %v6699_v9, -inf  ;;  %v6653_v22 = vadd.f32 %v8027_v57, %v6588_v48  ;;  %v13522_v36 = vmax.f32 %v6909_v44, %v6910_v59  ;;  %v13524_v3 = vmax.f32 %v6916_v28, %v6917_v47 }
 0x67b   :  { %v13526_v62 = vmax.f32 %v6928_v39, %v6929_v61  ;;  %v6707_v55 = vcombine.high %v6699_v9, %v6699_v9  ;;  %v6924_v45 = vrot.slane %v13514_v33, 2  ;;  %v6949_v7 = vsel %vm6843_vm8, %v6742_v37, -inf }
 0x67c   :  { %v6708_v24 = vcombine.high %v6706_v51, %v6706_v51  ;;  %v6886_v29 = vsel %vm6843_vm8, %v6706_v51, -inf  ;;  %v13531_v42 = vmax.f32 %v6860_v53, %v6861_v19  ;;  %v6937_v40 = vmax.f32 %v6935_v27, %v6936_v17 }
 0x67d   :  { %v6944_v49 = vmax.f32 %v6942_v41, %v6943_v60  ;;  %v6873_v13 = vrot.slane %v6872_v54, 4  ;;  %v13533_v34 = vmax.f32 %v6853_v50, %v6854_v4  ;;  %v6868_v2 = vrot.slane %v13519_v5, 2 }
 0x67e   :  { %v6665_v23 = vmax.f32 %v6653_v22, 0.0  ;;  %v6645_v43 = vadd.f32 %v6644_v52, %v13496_v18  ;;  %v6931_v56 = vrot.slane %v13526_v62, 2  ;;  %v6950_v25 = vrot.slane %v6949_v7, 4 }
 0x67f   :  { %v6879_v38 = vsel %vm6843_vm8, %v6707_v55, -inf  ;;  %v6887_v12 = vrot.slane %v6886_v29, 4  ;;  %v6893_v20 = vsel %vm6843_vm8, %v6708_v24, -inf  ;;  %v6938_v30 = vrot.slane %v6937_v40, 2 }
 0x680   :  { %v6777_v58 = vcombine.high %v6665_v23, %v6665_v23  ;;  %v6784_v16 = vrot.slane %v6665_v23, %v14985_v15  ;;  %v6663_v10 = vmax.f32 %v6645_v43, 0.0  ;;  %v6945_v21 = vrot.slane %v6944_v49, 2 }
 0x681   :  { %v6874_v44 = vmax.f32 %v6872_v54, %v6873_v13  ;;  %v6656_v28 = vadd.f32 %v8028_v8, %v6591_v35  ;;  %v6880_v63 = vrot.slane %v6879_v38, 4  ;;  %v13542_v39 = vmax.f32 %v6949_v7, %v6950_v25 }
 0x682   :  { %v6791_v18 = vrot.slane %v6777_v58, %v14985_v15  ;;  %v6792_v1 = vcombine.high %v6784_v16, %v6784_v16  ;;  %v6743_v32 = vcombine.high %v6663_v10, %v6663_v10  ;;  %v6888_v26 = vmax.f32 %v6886_v29, %v6887_v12 }
 0x683   :  { %v6894_v0 = vrot.slane %v6893_v20, 4  ;;  %v6750_v53 = vrot.slane %v6663_v10, %v14985_v15  ;;  %v6648_v50 = vadd.f32 %v6647_v6, %v13500_v11  ;;  %v6875_v27 = vrot.slane %v6874_v44, 2 }
 0x684   :  { %v7019_v31 = vsel %vm6843_vm8, %v6792_v1, -inf  ;;  %v7026_v48 = vsel %vm6843_vm8, %v6791_v18, -inf  ;;  %v6757_v57 = vrot.slane %v6743_v32, %v14985_v15  ;;  %v6793_v41 = vcombine.high %v6791_v18, %v6791_v18 }
 0x685   :  { %v6758_v9 = vcombine.high %v6750_v53, %v6750_v53  ;;  %v6666_v59 = vmax.f32 %v6656_v28, 0.0  ;;  %v6881_v47 = vmax.f32 %v6879_v38, %v6880_v63  ;;  %v7020_v61 = vrot.slane %v7019_v31, 4 }
 0x686   :  { %v6759_v35 = vcombine.high %v6757_v57, %v6757_v57  ;;  %v6970_v37 = vsel %vm6843_vm8, %v6757_v57, -inf  ;;  %v13550_v51 = vmax.f32 %v6937_v40, %v6938_v30  ;;  %v6889_v19 = vrot.slane %v6888_v26, 2 }
 0x687   :  { %v13552_v17 = vmax.f32 %v6893_v20, %v6894_v0  ;;  %v7027_v60 = vrot.slane %v7026_v48, 4  ;;  %v13554_v52 = vmax.f32 %v6944_v49, %v6945_v21  ;;  %v6952_v4 = vrot.slane %v13542_v39, 2 }
 0x688   :  { %v6971_v11 = vrot.slane %v6970_v37, 4  ;;  %v6664_v54 = vmax.f32 %v6648_v50, 0.0  ;;  %v7033_v22 = vsel %vm6843_vm8, %v6793_v41, -inf  ;;  %v6963_v55 = vsel %vm6843_vm8, %v6758_v9, -inf }
 0x689   :  { %v6794_v7 = vcombine.high %v6666_v59, %v6666_v59  ;;  %v6801_v24 = vrot.slane %v6666_v59, %v14985_v15  ;;  %v13560_v29 = vmax.f32 %v6874_v44, %v6875_v27  ;;  %v6882_v40 = vrot.slane %v6881_v47, 2 }
 0x68a   :  { %v7021_v13 = vmax.f32 %v7019_v31, %v7020_v61  ;;  %v6977_v8 = vsel %vm6843_vm8, %v6759_v35, -inf  ;;  %v13563_v23 = vmax.f32 %v6888_v26, %v6889_v19  ;;  %v6896_v49 = vrot.slane %v13552_v17, 2 }
 0x68b   :  { %v7028_v43 = vmax.f32 %v7026_v48, %v7027_v60  ;;  %v6956_v25 = vsel %vm6843_vm8, %v6750_v53, -inf  ;;  %v13568_v38 = vsel %vm6843_vm8, %v6784_v16, -inf  ;;  %v7034_v12 = vrot.slane %v7033_v22, 4 }
 0x68c   :  { %v6964_v20 = vrot.slane %v6963_v55, 4  ;;  %v6972_v58 = vmax.f32 %v6970_v37, %v6971_v11  ;;  %v6978_v10 = vrot.slane %v6977_v8, 4  ;;  %v6808_v30 = vrot.slane %v6794_v7, %v14985_v15 }
 0x68d   :  { %v6809_v21 = vcombine.high %v6801_v24, %v6801_v24  ;;  %v6760_v44 = vcombine.high %v6664_v54, %v6664_v54  ;;  %v13571_v28 = vmax.f32 %v6881_v47, %v6882_v40  ;;  %v7022_v6 = vrot.slane %v7021_v13, 2 }
 0x68e   :  { %v6957_v63 = vrot.slane %v6956_v25, 4  ;;  %v6856_v18 = vrot.slane %v13533_v34, 1  ;;  %v7013_v1 = vrot.slane %v13568_v38, 4  ;;  %v7029_v32 = vrot.slane %v7028_v43, 2 }
 0x68f   :  { %v6810_v26 = vcombine.high %v6808_v30, %v6808_v30  ;;  %v7047_v16 = vsel %vm6843_vm8, %v6809_v21, -inf  ;;  %v13576_v0 = vmax.f32 %v7033_v22, %v7034_v12  ;;  %v6965_v53 = vmax.f32 %v6963_v55, %v6964_v20 }
 0x690   :  { %v6973_v31 = vrot.slane %v6972_v58, 2  ;;  %v7048_v48 = vrot.slane %v7047_v16, 4  ;;  %v13578_v57 = vmax.f32 %v6977_v8, %v6978_v10  ;;  %v6767_v27 = vrot.slane %v6664_v54, %v14985_v15 }
 0x691   :  { %v7061_v50 = vsel %vm6843_vm8, %v6810_v26, -inf  ;;  %v6774_v41 = vrot.slane %v6760_v44, %v14985_v15  ;;  %v13583_v9 = vmax.f32 %v7021_v13, %v7022_v6  ;;  %v13585_v59 = vmax.f32 %v6956_v25, %v6957_v63 }
 0x692   :  { %v13588_v47 = vsel %vm6843_vm8, %v6801_v24, -inf  ;;  %v7049_v61 = vmax.f32 %v7047_v16, %v7048_v48  ;;  %v7054_v35 = vsel %vm6843_vm8, %v6808_v30, -inf  ;;  %v7062_v37 = vrot.slane %v7061_v50, 4 }
 0x693   :  { %v6775_v19 = vcombine.high %v6767_v27, %v6767_v27  ;;  %v6776_v60 = vcombine.high %v6774_v41, %v6774_v41  ;;  %v13591_v11 = vmax.f32 %v7028_v43, %v7029_v32  ;;  %v7036_v22 = vrot.slane %v13576_v0, 2 }
 0x694   :  { %v6966_v54 = vrot.slane %v6965_v53, 2  ;;  %v13594_v55 = vmax.f32 %v6972_v58, %v6973_v31  ;;  %v6980_v15 = vrot.slane %v13578_v57, 2  ;;  %v6998_v24 = vsel %vm6843_vm8, %v6774_v41, -inf }
 0x695   :  { %v6991_v7 = vsel %vm6843_vm8, %v6775_v19, -inf  ;;  %v7005_v40 = vsel %vm6843_vm8, %v6776_v60, -inf  ;;  %v7041_v13 = vrot.slane %v13588_v47, 4  ;;  %v7050_v8 = vrot.slane %v7049_v61, 2 }
 0x696   :  { %v7055_v25 = vrot.slane %v7054_v35, 4  ;;  %v13602_v43 = vmax.f32 %v13533_v34, %v6856_v18  ;;  %v13604_v12 = vmax.f32 %v7061_v50, %v7062_v37  ;;  %v6992_v20 = vrot.slane %v6991_v7, 4 }
 0x697   :  { %v6999_v58 = vrot.slane %v6998_v24, 4  ;;  %v7006_v10 = vrot.slane %v7005_v40, 4  ;;  %v6984_v30 = vsel %vm6843_vm8, %v6767_v27, -inf  ;;  %v6919_v21 = vrot.slane %v13524_v3, 1 }
 0x698   :  { %v6863_v44 = vrot.slane %v13531_v42, 1  ;;  %v6925_v6 = vmax.f32 %v13514_v33, %v6924_v45  ;;  %v6967_v63 = vmax.f32 %v6965_v53, %v6966_v54  ;;  %v6993_v32 = vmax.f32 %v6991_v7, %v6992_v20 }
 0x699   :  { %v7000_v26 = vmax.f32 %v6998_v24, %v6999_v58  ;;  %v6940_v34 = vrot.slane %v13550_v51, 1  ;;  %v13613_v18 = vmax.f32 %v7054_v35, %v7055_v25  ;;  %v13616_v16 = vmax.f32 %v13524_v3, %v6919_v21 }
 0x69a   :  { %v13619_v31 = vmax.f32 %v13531_v42, %v6863_v44  ;;  %v6926_v48 = vrot.slane %v6925_v6, 1  ;;  %v13621_v50 = vmax.f32 %v7049_v61, %v7050_v8  ;;  %v7064_v27 = vrot.slane %v13604_v12, 2 }
 0x69b   :  { %v6985_v41 = vrot.slane %v6984_v30, 4  ;;  %v7007_v33 = vmax.f32 %v7005_v40, %v7006_v10  ;;  %v8892_v45 = vpack.i.bf16 %v13602_v43, %v13616_v16  ;;  %v13629_v35 = vmax.f32 %v13550_v51, %v6940_v34 }
 0x69c   :  { %v13626_v53 = vmax.f32 %v6925_v6, %v6926_v48  ;;  %v6947_v3 = vrot.slane %v13554_v52, 1  ;;  %v6994_v37 = vrot.slane %v6993_v32, 2  ;;  %v7001_v42 = vrot.slane %v7000_v26, 2 }
 0x69d   :  { %v6869_v61 = vmax.f32 %v13519_v5, %v6868_v2  ;;  %v6953_v19 = vmax.f32 %v13542_v39, %v6952_v4  ;;  %8893 = vrot.lane.b32.xlu0 %v8892_v45, %s9075_s5  ;;  %v6884_v54 = vrot.slane %v13571_v28, 1  ;;  %v6891_v7 = vrot.slane %v13563_v23, 1 }
 0x69e   :  { %v8897_v60 = vpack.i.bf16 %v13626_v53, %v13619_v31  ;;  %v13642_v51 = vmax.f32 %v13554_v52, %v6947_v3  ;;  %v7008_v24 = vrot.slane %v7007_v33, 2  ;;  %v6897_v2 = vmax.f32 %v13552_v17, %v6896_v49 }
 0x69f   :  { %v6870_v40 = vrot.slane %v6869_v61, 1  ;;  %v6954_v5 = vrot.slane %v6953_v19, 1  ;;  %v13653_v4 = vmax.f32 %v13571_v28, %v6884_v54  ;;  %v13656_v52 = vmax.f32 %v13563_v23, %v6891_v7 }
 0x6a0   :  { %8898 = vrot.lane.b32.xlu1 %v8897_v60, %s9075_s5  ;;  %v8902_v39 = vpack.i.bf16 %v13642_v51, %v13629_v35  ;;  %v6968_v8 = vrot.slane %v6967_v63, 1  ;;  %v6898_v58 = vrot.slane %v6897_v2, 1  ;;  %v6912_v10 = vrot.slane %v13522_v36, 1 }
 0x6a1   :  { %v13658_v25 = vmax.f32 %v6869_v61, %v6870_v40  ;;  %v13660_v20 = vmax.f32 %v6953_v19, %v6954_v5  ;;  %v6986_v17 = vmax.f32 %v6984_v30, %v6985_v41  ;;  %v6995_v49 = vmax.f32 %v6993_v32, %v6994_v37 }
 0x6a2   :  { %v7002_v21 = vmax.f32 %v7000_v26, %v7001_v42  ;;  %8903 = vrot.lane.b32.xlu0 %v8902_v39, %s9075_s5  ;;  %v6975_v44 = vrot.slane %v13594_v55, 1  ;;  %v13667_v23 = vmax.f32 %v6897_v2, %v6898_v58  ;;  %v7024_v6 = vrot.slane %v13583_v9, 1 }
 0x6a3   :  { %v8912_v28 = vpack.i.bf16 %v13660_v20, %v13658_v25  ;;  %v7031_v34 = vrot.slane %v13591_v11, 1  ;;  %v8907_v48 = vpack.i.bf16 %v13656_v52, %v13653_v4  ;;  %v13673_v45 = vmax.f32 %v6967_v63, %v6968_v8 }
 0x6a4   :  { %v13676_v30 = vmax.f32 %v13594_v55, %v6975_v44  ;;  %v7009_v32 = vmax.f32 %v7007_v33, %v7008_v24  ;;  %v7042_v26 = vmax.f32 %v13588_v47, %v7041_v13  ;;  %v7057_v41 = vrot.slane %v13613_v18, 2 }
 0x6a5   :  { %8913 = vrot.lane.b32.xlu1 %v8912_v28, %s9075_s5  ;;  %v13684_v3 = vmax.f32 %v13522_v36, %v6912_v10  ;;  %v6981_v63 = vmax.f32 %v13578_v57, %v6980_v15  ;;  %v6987_v37 = vrot.slane %v6986_v17, 2  ;;  %v7003_v55 = vrot.slane %v7002_v21, 1 }
 0x6a6   :  { %8908 = vrot.lane.b32.xlu0 %v8907_v48, %s9075_s5  ;;  %v7010_v33 = vrot.slane %v7009_v32, 1  ;;  %v7037_v47 = vmax.f32 %v13576_v0, %v7036_v22  ;;  %v13696_v42 = vmax.f32 %v13583_v9, %v7024_v6  ;;  %v13699_v36 = vmax.f32 %v13591_v11, %v7031_v34 }
 0x6a7   :  { %v8917_v13 = vpack.i.bf16 %v13684_v3, %v13667_v23  ;;  %v6996_v61 = vrot.slane %v6995_v49, 1  ;;  %v8927_v57 = vpack.i.bf16 %v13676_v30, %v13673_v45  ;;  %v7052_v19 = vrot.slane %v13621_v50, 1 }
 0x6a8   :  { %v13703_v15 = vmax.f32 %v7009_v32, %v7010_v33  ;;  %v7065_v60 = vmax.f32 %v13604_v12, %v7064_v27  ;;  %v6847_v0 = vrot.slane %v13517_v14, 2  ;;  %v7014_v9 = vmax.f32 %v13568_v38, %v7013_v1 }
 0x6a9   :  { %v7058_v22 = vmax.f32 %v13613_v18, %v7057_v41  ;;  %8918 = vrot.lane.b32.xlu1 %v8917_v13, %s9075_s5  ;;  %v6982_v11 = vrot.slane %v6981_v63, 1  ;;  %v6932_v54 = vmax.f32 %v13526_v62, %v6931_v56  ;;  %v6959_v7 = vrot.slane %v13585_v59, 2 }
 0x6aa   :  { %8928 = vrot.lane.b32.xlu0 %v8927_v57, %s9075_s5  ;;  %v13718_v12 = vmax.f32 %v7002_v21, %v7003_v55  ;;  %v7038_v27 = vrot.slane %v7037_v47, 1  ;;  %v7043_v24 = vrot.slane %v7042_v26, 2  ;;  %v8922_v38 = vpack.i.bf16 %v13699_v36, %v13696_v42 }
 0x6ab   :  { %v13722_v1 = vmax.f32 %v6995_v49, %v6996_v61  ;;  %v7066_v18 = vrot.slane %v7065_v60, 1  ;;  %v6877_v40 = vrot.slane %v13560_v29, 1  ;;  %v6988_v5 = vmax.f32 %v6986_v17, %v6987_v37 }
 0x6ac   :  { %v8937_v62 = vpack.i.bf16 %v13703_v15, %v13718_v12  ;;  %v13728_v56 = vmax.f32 %v13621_v50, %v7052_v19  ;;  %v6848_v2 = vmax.f32 %v13517_v14, %v6847_v0  ;;  %v7015_v39 = vrot.slane %v7014_v9, 2 }
 0x6ad   :  { %8923 = vrot.lane.b32.xlu1 %v8922_v38, %s9075_s5  ;;  %v13732_v8 = vmax.f32 %v6981_v63, %v6982_v11  ;;  %v7059_v58 = vrot.slane %v7058_v22, 1  ;;  %v6905_v10 = vrot.slane %v13512_v46, 1  ;;  %v6960_v49 = vmax.f32 %v13585_v59, %v6959_v7  ;;  %v9033_v11 = vld [vmem:[%s13989_s6 + $0x70] sm:$0xff]   ;;  %v9037_v38 = vld [vmem:[%s13989_s6 + $0x60] sm:$0xff]  }
 0x6ae   :  { %8938 = vrot.lane.b32.xlu0 %v8937_v62, %s9075_s5  ;;  %v13737_v17 = vmax.f32 %v7037_v47, %v7038_v27  ;;  %v6933_v21 = vrot.slane %v6932_v54, 1  ;;  %v7044_v44 = vmax.f32 %v7042_v26, %v7043_v24  ;;  %v13741_v14 = vmax.f32 %v7065_v60, %v7066_v18  ;;  %v9031_v60 = vld [vmem:[%s13989_s6 + $0x78] sm:$0xff]   ;;  %v9034_v7 = vld [vmem:[%s13989_s6 + $0x30] sm:$0xff]   ;;  %v9035_v27 = vld [vmem:[%s13989_s6 + $0x68] sm:$0xff]  }
 0x6af   :  { %v8932_v50 = vpack.i.bf16 %v13722_v1, %v13732_v8  ;;  %v6989_v28 = vrot.slane %v6988_v5, 1  ;;  %v13746_v34 = vmax.f32 %v13560_v29, %v6877_v40  ;;  %v6849_v48 = vrot.slane %v6848_v2, 1  ;;  %7965 = vmatprep.subr.bf16.mxu0 %v9031_v60  ;;  %v9036_v24 = vld [vmem:[%s13989_s6 + $0x28] sm:$0xff]   ;;  %v9038_v18 = vld [vmem:[%s13989_s6 + $0x20] sm:$0xff]   ;;  %v9039_v40 = vld [vmem:[%s13989_s6 + $0x58] sm:$0xff]  }
 0x6b0   :  { %v8942_v6 = vpack.i.bf16 %v13728_v56, %v13737_v17  ;;  %v7016_v59 = vmax.f32 %v7014_v9, %v7015_v39  ;;  %v13749_v32 = vmax.f32 %v7058_v22, %v7059_v58  ;;  %v6961_v41 = vrot.slane %v6960_v49, 1  ;;  %v9032_v22 = vld [vmem:[%s13989_s6 + $0x38] sm:$0xff]   ;;  %v9045_v62 = vld [vmem:[%s13989_s6 + $0xa0] sm:$0xff]   ;;  %v9042_v58 = vld [vmem:[%s13989_s6 + $0x10] sm:$0xff]  }
 0x6b1   :  { %8933 = vrot.lane.b32.xlu1 %v8932_v50, %s9075_s5  ;;  %v13753_v26 = vmax.f32 %v13512_v46, %v6905_v10  ;;  %v7045_v63 = vrot.slane %v7044_v44, 1  ;;  %v13757_v55 = vmax.f32 %v6932_v54, %v6933_v21  ;;  %v13761_v33 = vmax.f32 %v6988_v5, %v6989_v28  ;;  %7966 = vmatpush3.bf16.msra.mxu0 %v9032_v22  ;;  %v9040_v5 = vld [vmem:[%s13989_s6 + $0x18] sm:$0xff]   ;;  %v9043_v10 = vld [vmem:[%s13989_s6 + $0x48] sm:$0xff]   ;;  %v9049_v28 = vld [vmem:[%s13989_s6] sm:$0xff]  }
 0x6b2   :  { %8943 = vrot.lane.b32.xlu0 %v8942_v6, %s9075_s5  ;;  %v8947_v37 = vpack.i.bf16 %v13741_v14, %v13749_v32  ;;  %v7017_v47 = vrot.slane %v7016_v59, 1  ;;  %v13764_v13 = vmax.f32 %v6848_v2, %v6849_v48  ;;  %v13767_v46 = vmax.f32 %v6960_v49, %v6961_v41  ;;  %7967 = vmatprep.subr.bf16.mxu0 %v9033_v11  ;;  %v9041_v2 = vld [vmem:[%s13989_s6 + $0x50] sm:$0xff]   ;;  %v9046_v39 = vld [vmem:[%s13989_s6 + $0x98] sm:$0xff]   ;;  %v9044_v21 = vld [vmem:[%s13989_s6 + $0x8] sm:$0xff]  }
 0x6b3   :  { %v8952_v29 = vpack.i.bf16 %v13753_v26, %v13746_v34  ;;  %v13771_v57 = vmax.f32 %v7044_v44, %v7045_v63  ;;  %v9076_v0 = vmov 0.0   ;;  %v9048_v49 = vld [vmem:[%s13989_s6 + $0x90] sm:$0xff]   ;;  %v9047_v44 = vld [vmem:[%s13989_s6 + $0x40] sm:$0xff]   ;;  %v9050_v50 = vld [vmem:[%s13989_s6 + $0x88] sm:$0xff]  }
 0x6b4   :  { %v8957_v61 = vpack.i.bf16 %v13757_v55, %v13764_v13  ;;  %v8962_v19 = vpack.i.bf16 %v13761_v33, %v13767_v46  ;;  %8029 = vmatprep.subr.bf16.mxu1 %v9076_v0  ;;  %v13780_v9 = vmax.f32 %v7016_v59, %v7017_v47  ;;  %8039 = vmatprep.mubr.msk.bf16.mxu1 %vm9078_vm9, %v9076_v0 }
 0x6b5   :  { %8948 = vrot.lane.b32.xlu1 %v8947_v37, %s9075_s5  ;;  %7968 = vmatpush3.bf16.msra.mxu0 %v9034_v7 }
 0x6b6   :  { %8953 = vrot.lane.b32.xlu0 %v8952_v29, %s9075_s5  ;;  %v8967_v54 = vpack.i.bf16 %v13771_v57, %v13780_v9  ;;  %7969 = vmatprep.subr.bf16.mxu0 %v9035_v27 }
 0x6b7   :  { %8030 = vmatpush3.bf16.msra.mxu1 %v9045_v62 }
 0x6b8   :  { %8031 = vmatprep.subr.bf16.mxu1 %v9076_v0 }
 0x6b9   :  { %8958 = vrot.lane.b32.xlu1 %v8957_v61, %s9075_s5  ;;  %7970 = vmatpush3.bf16.msra.mxu0 %v9036_v24 }
 0x6ba   :  { %8963 = vrot.lane.b32.xlu0 %v8962_v19, %s9075_s5  ;;  %7971 = vmatprep.subr.bf16.mxu0 %v9037_v38 }
 0x6bb   :  { %8032 = vmatpush3.bf16.msra.mxu1 %v9046_v39 }
 0x6bc   :  { %8033 = vmatprep.subr.bf16.mxu1 %v9076_v0 }
 0x6bd   :  { %8968 = vrot.lane.b32.xlu1 %v8967_v54, %s9075_s5  ;;  %7972 = vmatpush3.bf16.msra.mxu0 %v9038_v18 }
 0x6be   :  { %7973 = vmatprep.subr.bf16.mxu0 %v9039_v40 }
 0x6bf   :  { %8034 = vmatpush3.bf16.msra.mxu1 %v9048_v49 }
 0x6c0   :  { %8035 = vmatprep.subr.bf16.mxu1 %v9076_v0 }
 0x6c1   :  { %7974 = vmatpush3.bf16.msra.mxu0 %v9040_v5 }
 0x6c2   :  { %7975 = vmatprep.subr.bf16.mxu0 %v9041_v2 }
 0x6c3   :  { %8036 = vmatpush3.bf16.msra.mxu1 %v9050_v50 }
 0x6c4   :  { %8037 = vmatprep.subr.bf16.mxu1 %v9076_v0 }
 0x6c5   :  { %7976 = vmatpush3.bf16.msra.mxu0 %v9042_v58 }
 0x6c6   :  { %7977 = vmatprep.subr.bf16.mxu0 %v9043_v10 }
 0x6c9   :  { %7978 = vmatpush3.bf16.msra.mxu0 %v9044_v21 }
 0x6ca   :  { %7979 = vmatprep.subr.bf16.mxu0 %v9047_v44 }
 0x6cd   :  { %7980 = vmatpush3.bf16.msra.mxu0 %v9049_v28 }
 0x6ce   :  { %8043 = vmatprep.subr.bf16.mxu0 %v9076_v0 }
 0x70f   :  { %v8894_v6 = vpop.permute.xlu0 %8893 }
 0x710   :  { %v8895_v37 = vunpack.i.l.bf16 %v8894_v6  ;;  %v8896_v38 = vunpack.i.h.bf16 %v8894_v6 }
 0x712   :  { %v8899_v48 = vpop.permute.xlu1 %8898  ;;  %v7206_v18 = vmax.f32 %v13616_v16, %v8895_v37  ;;  %v7197_v16 = vmax.f32 %v13602_v43, %v8896_v38 }
 0x713   :  { %v8901_v61 = vunpack.i.h.bf16 %v8899_v48  ;;  %v8900_v19 = vunpack.i.l.bf16 %v8899_v48 }
 0x714   :  { %v8904_v59 = vpop.permute.xlu0 %8903 }
 0x715   :  { %v8906_v60 = vunpack.i.h.bf16 %v8904_v59  ;;  %v8905_v22 = vunpack.i.l.bf16 %v8904_v59  ;;  %v13852_v62 = vmax.f32 %v13626_v53, %v8901_v61  ;;  %v7198_v2 = vmax.f32 %v13619_v31, %v8900_v19 }
 0x716   :  { %v7286_v31 = vrot.slane %v7206_v18, 6 }
 0x717   :  { %v8914_v41 = vpop.permute.xlu1 %8913  ;;  %v7210_v39 = vmax.f32 %v13642_v51, %v8906_v60  ;;  %v7311_v51 = vrot.slane %v13852_v62, 6 }
 0x718   :  { %v8909_v63 = vpop.permute.xlu0 %8908  ;;  %v8916_v10 = vunpack.i.h.bf16 %v8914_v41  ;;  %v8915_v49 = vunpack.i.l.bf16 %v8914_v41 }
 0x719   :  { %v8911_v29 = vunpack.i.h.bf16 %v8909_v63  ;;  %v8910_v47 = vunpack.i.l.bf16 %v8909_v63  ;;  %v7288_v48 = vrot.slane %v7210_v39, 5 }
 0x71a   :  { %v7211_v41 = vmax.f32 %v13660_v20, %v8916_v10 }
 0x71b   :  { %v7202_v11 = vmax.f32 %v13656_v52, %v8911_v29  ;;  %v8919_v54 = vpop.permute.xlu1 %8918  ;;  %v7201_v7 = vmax.f32 %v13653_v4, %v8910_v47  ;;  %v7209_v52 = vmax.f32 %v13629_v35, %v8905_v22 }
 0x71c   :  { %v8921_v27 = vunpack.i.h.bf16 %v8919_v54  ;;  %v8929_v24 = vpop.permute.xlu0 %8928  ;;  %v8920_v5 = vunpack.i.l.bf16 %v8919_v54 }
 0x71d   :  { %v7284_v40 = vrot.slane %v7202_v11, 7  ;;  %v8931_v58 = vunpack.i.h.bf16 %v8929_v24  ;;  %v7259_v44 = vrot.slane %v7201_v7, 7  ;;  %v8930_v6 = vunpack.i.l.bf16 %v8929_v24 }
 0x71e   :  { %v7205_v4 = vmax.f32 %v13684_v3, %v8921_v27  ;;  %v7203_v53 = vmax.f32 %v13667_v23, %v8920_v5  ;;  %v7263_v59 = vrot.slane %v7209_v52, 5  ;;  %v7199_v3 = vmax.f32 %v13658_v25, %v8915_v49 }
 0x71f   :  { %v8924_v21 = vpop.permute.xlu1 %8923  ;;  %v7285_v28 = vsel %vm5546_vm12, %v7284_v40, %v7198_v2  ;;  %v7214_v35 = vmax.f32 %v13676_v30, %v8931_v58  ;;  %v7260_v43 = vsel %vm5546_vm12, %v7259_v44, %v7197_v16  ;;  %v7213_v60 = vmax.f32 %v13673_v45, %v8930_v6  ;;  %v9051_v40 = vld [vmem:[%s13989_s6 + $0x80] sm:$0xff]   ;;  %s9077_s6 = smov 40  }
 0x720   :  { %v8939_v50 = vpop.permute.xlu0 %8938  ;;  %v7261_v63 = vrot.slane %v7205_v4, 6  ;;  %v7287_v29 = vsel %vm5549_vm13, %v7286_v31, %v7285_v28  ;;  %v8926_v47 = vunpack.i.h.bf16 %v8924_v21  ;;  %v7309_v19 = vrot.slane %v7203_v53, 7  ;;  %8038 = vmatpush3.bf16.msra.mxu1 %v9051_v40 }
 0x721   :  { %v8940_v23 = vunpack.i.l.bf16 %v8939_v50  ;;  %v7290_v30 = vrot.slane %v7214_v35, 4  ;;  %v8925_v54 = vunpack.i.l.bf16 %v8924_v21  ;;  %v7289_v27 = vsel %vm5552_vm14, %v7288_v48, %v7287_v29  ;;  %8063 = vmatprep.subr.bf16.mxu1 %v9076_v0 }
 0x722   :  { %v7262_v25 = vsel %vm5549_vm13, %v7261_v63, %v7260_v43  ;;  %v8941_v24 = vunpack.i.h.bf16 %v8939_v50  ;;  %v7222_v45 = vmax.f32 %v13699_v36, %v8926_v47  ;;  %v7265_v39 = vrot.slane %v7213_v60, 4 }
 0x723   :  { %v8934_v37 = vpop.permute.xlu1 %8933  ;;  %v7218_v20 = vmax.f32 %v13718_v12, %v8940_v23  ;;  %v7310_v12 = vsel %vm5546_vm12, %v7309_v19, %v7199_v3  ;;  %v7264_v10 = vsel %vm5552_vm14, %v7263_v59, %v7262_v25  ;;  %v7221_v49 = vmax.f32 %v13696_v42, %v8925_v54 }
 0x724   :  { %v8944_v61 = vpop.permute.xlu0 %8943  ;;  %v8936_v22 = vunpack.i.h.bf16 %v8934_v37  ;;  %v8935_v11 = vunpack.i.l.bf16 %v8934_v37  ;;  %v7219_v36 = vmax.f32 %v13703_v15, %v8941_v24  ;;  %v7312_v50 = vsel %vm5549_vm13, %v7311_v51, %v7310_v12 }
 0x725   :  { %v8946_v7 = vunpack.i.h.bf16 %v8944_v61  ;;  %v7292_v5 = vrot.slane %v7218_v20, 3  ;;  %v8945_v2 = vunpack.i.l.bf16 %v8944_v61  ;;  %v7294_v16 = vrot.slane %v7222_v45, 2 }
 0x726   :  { %v7217_v38 = vmax.f32 %v13722_v1, %v8936_v22  ;;  %v7215_v62 = vmax.f32 %v13732_v8, %v8935_v11  ;;  %v7291_v1 = vsel %vm5555_vm15, %v7290_v30, %v7289_v27  ;;  %v7313_v6 = vrot.slane %v7211_v41, 5 }
 0x727   :  { %v8949_v18 = vpop.permute.xlu1 %8948  ;;  %v7225_v4 = vmax.f32 %v13728_v56, %v8946_v7  ;;  %v7293_v44 = vsel %vm5558_vm4, %v7292_v5, %v7291_v1  ;;  %v7223_v53 = vmax.f32 %v13737_v17, %v8945_v2  ;;  %v7266_v56 = vsel %vm5555_vm15, %v7265_v39, %v7264_v10 }
 0x728   :  { %v8951_v58 = vunpack.i.h.bf16 %v8949_v18  ;;  %v8950_v52 = vunpack.i.l.bf16 %v8949_v18  ;;  %v7267_v8 = vrot.slane %v7217_v38, 3  ;;  %v7315_v28 = vrot.slane %v7215_v62, 4  ;;  %v8954_v23 = vpop.permute.xlu0 %8953 }
 0x729   :  { %v7269_v48 = vrot.slane %v7221_v49, 2  ;;  %v7271_v35 = vrot.slane %v7225_v4, 1  ;;  %v7295_v15 = vsel %vm5561_vm5, %v7294_v16, %v7293_v44  ;;  %v7317_v59 = vrot.slane %v7219_v36, 3 }
 0x72a   :  { %v7226_v21 = vmax.f32 %v13749_v32, %v8950_v52  ;;  %v7227_v42 = vmax.f32 %v13741_v14, %v8951_v58  ;;  %v7314_v32 = vsel %vm5552_vm14, %v7313_v6, %v7312_v50  ;;  %v7268_v51 = vsel %vm5558_vm4, %v7267_v8, %v7266_v56  ;;  %v9055_v56 = vld [vmem:[%s13990_s8 + $0x20] sm:$0xff]  }
 0x72b   :  { %v7316_v63 = vsel %vm5555_vm15, %v7315_v28, %v7314_v32  ;;  %v7319_v17 = vrot.slane %v7223_v53, 2  ;;  %v7270_v41 = vsel %vm5561_vm5, %v7269_v48, %v7268_v51  ;;  %v8955_v61 = vunpack.i.l.bf16 %v8954_v23  ;;  %v8959_v60 = vpop.permute.xlu1 %8958  ;;  %v9056_v48 = vld [vmem:[%s13990_s8 + $0x18] sm:$0xff]   ;;  %v9059_v32 = vld [vmem:[%s13990_s8] sm:$0xff]   ;;  %v9061_v51 = vld [vmem:[%s13991_s10 + $0x10] sm:$0xff]  }
 0x72c   :  { %v7296_v31 = vrot.slane %v7226_v21, 1  ;;  %v7321_v14 = vrot.slane %v7227_v42, 1  ;;  %v7272_v37 = vsel %vm5564_vm7, %v7271_v35, %v7270_v41  ;;  %v7318_v43 = vsel %vm5558_vm4, %v7317_v59, %v7316_v63  ;;  %v8964_v30 = vpop.permute.xlu0 %8963  ;;  %v9052_v21 = vld [vmem:[%s13990_s8 + $0x38] ss:$0 sps:$4 sm:$0xff]   ;;  %v9053_v42 = vld [vmem:[%s13990_s8 + $0x30] sm:$0xff]  }
 0x72d   :  { %7273 = vrot.lane.b32.xlu0 %v7272_v37, %s9065_s16  ;;  %v7320_v29 = vsel %vm5561_vm5, %v7319_v17, %v7318_v43  ;;  %v8956_v19 = vunpack.i.h.bf16 %v8954_v23  ;;  %v7200_v22 = vmax.f32 %v13746_v34, %v8955_v61  ;;  %v8960_v11 = vunpack.i.l.bf16 %v8959_v60  ;;  %v9057_v35 = vld [vmem:[%s13990_s8 + $0x10] sm:$0xff]   ;;  %v9060_v59 = vld [vmem:[%s13991_s10 + $0x18] sm:$0x3f]   ;;  %v7875_v41 = vld [vmem:[%s13992_s7] ss:$0 sm:$0xff] }
 0x72e   :  { %v7297_v3 = vsel %vm5564_vm7, %v7296_v31, %v7295_v15  ;;  %v7322_v47 = vsel %vm5564_vm7, %v7321_v14, %v7320_v29  ;;  %v8961_v7 = vunpack.i.h.bf16 %v8959_v60  ;;  %v8965_v25 = vunpack.i.l.bf16 %v8964_v30  ;;  %v9054_v31 = vld [vmem:[%s13990_s8 + $0x28] sm:$0xff]  }
 0x72f   :  { %7298 = vrot.lane.b32.xlu1 %v7297_v3, %s9077_s6  ;;  %v7204_v54 = vmax.f32 %v13753_v26, %v8956_v19  ;;  %v7236_v20 = vrot.slane %v7200_v22, 7  ;;  %v7196_v27 = vmax.f32 %v13764_v13, %v8960_v11  ;;  %v8966_v40 = vunpack.i.h.bf16 %v8964_v30  ;;  %v8969_v5 = vpop.permute.xlu1 %8968  ;;  %v9058_v15 = vld [vmem:[%s13990_s8 + $0x8] sm:$0xff]  }
 0x730   :  { %v7208_v38 = vmax.f32 %v13757_v55, %v8961_v7  ;;  %v7212_v45 = vmax.f32 %v13767_v46, %v8965_v25  ;;  %v8970_v12 = vunpack.i.l.bf16 %v8969_v5  ;;  %v8971_v13 = vunpack.i.h.bf16 %v8969_v5  ;;  %v9062_v30 = vld [vmem:[%s13991_s10 + $0x8] sm:$0xff]  }
 0x731   :  { %7323 = vrot.lane.b32.xlu0 %v7322_v47, %s9079_s29  ;;  %v7238_v24 = vrot.slane %v7204_v54, 6  ;;  %v7237_v18 = vsel %vm5546_vm12, %v7236_v20, %v7196_v27  ;;  %v7216_v2 = vmax.f32 %v13761_v33, %v8966_v40  ;;  %vm7327_vm12 = vcmask 326656   ;;  %v9063_v54 = vld [vmem:[%s13991_s10] sm:$0xff]  }
 0x732   :  { %v7240_v62 = vrot.slane %v7208_v38, 5  ;;  %v7242_v26 = vrot.slane %v7212_v45, 4  ;;  %v7220_v55 = vmax.f32 %v13780_v9, %v8970_v12  ;;  %v7224_v10 = vmax.f32 %v13771_v57, %v8971_v13  ;;  %v7898_v20 = vld [vmem:[%s13993_s9] ss:$0 sm:$0xff] }
 0x733   :  { %v7239_v34 = vsel %vm5549_vm13, %v7238_v24, %v7237_v18  ;;  %v7244_v58 = vrot.slane %v7216_v2, 3  ;;  %vm7329_vm13 = vcmask 1014784   ;;  %v7667_v6 = vsel %vm493_vm3, %v9052_v21, 0  ;;  %v7908_v45 = vld [vmem:[%s13994_s11] ss:$0 sm:$0xff] }
 0x734   :  { %v7241_v39 = vsel %vm5552_vm14, %v7240_v62, %v7239_v34  ;;  %v7246_v1 = vrot.slane %v7220_v55, 2  ;;  %v7248_v36 = vrot.slane %v7224_v10, 1  ;;  %vm7509_vm14 = vcmask 654336  }
 0x735   :  { %v7243_v52 = vsel %vm5555_vm15, %v7242_v26, %v7241_v39  ;;  %v7754_v3 = vsel %vm235_vm2, %v9060_v59, 0  ;;  %vm7662_vm2 = vcmask 982016   ;;  %vm7749_vm3 = vcmask 490496  }
 0x736   :  { %v7245_v46 = vsel %vm5558_vm4, %v7244_v58, %v7243_v52 }
 0x737   :  { %v7247_v49 = vsel %vm5561_vm5, %v7246_v1, %v7245_v46 }
 0x738   :  { %v7249_v8 = vsel %vm5564_vm7, %v7248_v36, %v7247_v49 }
 0x79f   :  { %v7274_v4 = vpop.permute.xlu0 %7273 }
 0x7a0   :  { %v7326_v9 = vsel %vm672_vm6, %v7249_v8, %v7274_v4 }
 0x7a1   :  { %v7299_v33 = vpop.permute.xlu1 %7298  ;;  %v7331_v53 = vpack.c.bf16 %v7326_v9, %v7326_v9 }
 0x7a2   :  { %v7328_v44 = vsel %vm7327_vm12, %v7274_v4, %v7299_v33 }
 0x7a3   :  { %v7324_v57 = vpop.permute.xlu0 %7323 }
 0x7a4   :  { %v7330_v50 = vsel %vm7329_vm13, %v7328_v44, %v7324_v57  ;;  %v7333_v16 = vpack.c.bf16 %v7324_v57, %v7324_v57 }
 0x7a5   :  { %v7332_v28 = vpack.c.bf16 %v7330_v50, %v7330_v50 }
 0x7a6   :  { %8040 = vmatmul.mubr.msk.bf16.vlgmr.msra.gmra.mxu1 %vm7509_vm14, %v7333_v16 }
 0x7a7   :  { %7545 = vmatprep.mubr.bf16.mxu0 %v7332_v28  ;;  %8071 = vmatprep.mubr.msk.bf16.mxu1 %vm9078_vm9, %v9076_v0 }
 0x7a8   :  { %7546 = vmatmul.mubr.bf16.vlgmr.msra.gmra.mxu0 %v7331_v53  ;;  %8064 = vmatpush3.bf16.msra.mxu1 %v7754_v3 }
 0x7a9   :  { %8044 = vmatpush3.bf16.msra.mxu0 %v7667_v6  ;;  %8059 = vmatprep.mubr.msk.bf16.mxu0 %vm9078_vm9, %v9076_v0 }
 0x7aa   :  { %8045 = vmatprep.subr.bf16.mxu0 %v9076_v0  ;;  %8065 = vmatprep.subr.bf16.mxu1 %v9076_v0 }
 0x7ac   :  { %8066 = vmatpush3.bf16.msra.mxu1 %v9061_v51 }
 0x7ad   :  { %8046 = vmatpush3.bf16.msra.mxu0 %v9053_v42  ;;  %8067 = vmatprep.subr.bf16.mxu1 %v9076_v0 }
 0x7ae   :  { %8047 = vmatprep.subr.bf16.mxu0 %v9076_v0 }
 0x7b0   :  { %8068 = vmatpush3.bf16.msra.mxu1 %v9062_v30 }
 0x7b1   :  { %8048 = vmatpush3.bf16.msra.mxu0 %v9054_v31  ;;  %8069 = vmatprep.subr.bf16.mxu1 %v9076_v0 }
 0x7b2   :  { %8049 = vmatprep.subr.bf16.mxu0 %v9076_v0 }
 0x7b4   :  { %8070 = vmatpush3.bf16.msra.mxu1 %v9063_v54 }
 0x7b5   :  { %8050 = vmatpush3.bf16.msra.mxu0 %v9055_v56 }
 0x7b6   :  { %8051 = vmatprep.subr.bf16.mxu0 %v9076_v0 }
 0x7b9   :  { %8052 = vmatpush3.bf16.msra.mxu0 %v9056_v48 }
 0x7ba   :  { %8053 = vmatprep.subr.bf16.mxu0 %v9076_v0 }
 0x7bd   :  { %8054 = vmatpush3.bf16.msra.mxu0 %v9057_v35 }
 0x7be   :  { %8055 = vmatprep.subr.bf16.mxu0 %v9076_v0 }
 0x7c1   :  { %8056 = vmatpush3.bf16.msra.mxu0 %v9058_v15 }
 0x7c2   :  { %8057 = vmatprep.subr.bf16.mxu0 %v9076_v0 }
 0x7c5   :  { %8058 = vmatpush3.bf16.msra.mxu0 %v9059_v32 }
 0x866   :  { %v7587_v63 = vpop.f32.mrf.mxu1 }
 0x868   :  { %v7981_v17 = vpop.f32.mrf.mxu0  ;;  %v8041_v14 = vpop.f32.mrf.mxu1 }
 0x86a   :  { %v7982_v37 = vpop.f32.mrf.mxu0  ;;  %v7590_v43 = vpop.f32.mrf.mxu1 }
 0x86b   :  { %v7983_v29 = vadd.f32 %v7982_v37, %v7981_v17 }
 0x86c   :  { %v7984_v47 = vpop.f32.mrf.mxu0  ;;  %v8042_v23 = vpop.f32.mrf.mxu1 }
 0x86d   :  { %v7548_v61 = vadd.f32 %v7983_v29, %v7875_v41 }
 0x86e   :  { %v7985_v19 = vpop.f32.mrf.mxu0 }
 0x86f   :  { %v7588_v60 = vadd.f32 %v7587_v63, %v7548_v61 }
 0x871   :  { %v7593_v22 = vmax.f32 %v7588_v60, 0.0 }
 0x873   :  { %v7594_v11 = vpack.c.bf16 %v7593_v22, %v7593_v22 }
 0x875   :  { %8060 = vmatmul.mubr.msk.bf16.vlgmr.msra.gmra.mxu0 %vm7662_vm2, %v7594_v11 }
 0x935   :  { %v7703_v7 = vpop.f32.mrf.mxu0 }
 0x936   :  { %v7704_v25 = vadd.f32 %v7898_v20, %v7703_v7 }
 0x937   :  { %v8061_v27 = vpop.f32.mrf.mxu0 }
 0x938   :  { %v7709_v24 = vmax.f32 %v7704_v25, 0.0 }
 0x939   :  { %v7706_v38 = vpop.f32.mrf.mxu0 }
 0x93a   :  { %v7710_v18 = vpack.c.bf16 %v7709_v24, %v7709_v24 }
 0x93b   :  { %v8062_v40 = vpop.f32.mrf.mxu0 }
 0x93c   :  { %8072 = vmatmul.mubr.msk.bf16.vlgmr.msra.gmra.mxu1 %vm7749_vm3, %v7710_v18 }
 0x9fc   :  { %v7790_v5 = vpop.f32.mrf.mxu1 }
 0x9fd   :  { %v7791_v0 = vadd.f32 %v7908_v45, %v7790_v5 }
 0x9fe   :  { %v8073_v34 = vpop.f32.mrf.mxu1 }
 0x9ff   :  { %7796 = vst [vmem:[%s13995_s12] sm:$0xff] %v7791_v0 }
 0xa00   :  { %v7793_v62 = vpop.f32.mrf.mxu1 }
 0xa02   :  { %v8074_v2 = vpop.f32.mrf.mxu1 }

</bundles_post_ra>
